<compile_context>
chip_gen: v6e
topology: v6e:2x2x1
jax: 0.10.0
libtpu: 0.0.40
codegen_flags: <defaults>
</compile_context>

<pallas_src>
import functools

import jax
import jax.numpy as jnp
from jax import lax
from jax.experimental import pallas as pl
from jax.experimental.pallas import tpu as pltpu

KSIZE = 5
STRIDE = 2
BN_EPS = 1e-5
LANE = 128


def _round_up(x: int, m: int) -> int:
    return ((x + m - 1) // m) * m


def _cdiv(a: int, b: int) -> int:
    return (a + b - 1) // b


def _conv_out(s: int) -> int:
    return (s - (KSIZE - 1) - 1) // STRIDE + 1


# -----------------------------------------------------------------------------
# Generic fused GEMM kernel:  y = act(x @ W + b)   (bf16 operands, f32 accum)
# Used for conv1 (conv-as-GEMM with wrapper patch build) and for the head.
# -----------------------------------------------------------------------------
def _gemm_bias_act_kernel(x_ref, w_ref, b_ref, o_ref, *, apply_relu):
    # x / w arrive bf16 (cast once in the wrapper — no in-kernel VPU cast).
    acc = jnp.dot(x_ref[...], w_ref[...], preferred_element_type=jnp.float32)
    acc = acc + b_ref[...]                       # bias in f32
    if apply_relu:
        acc = jnp.maximum(acc, 0.0)
    o_ref[...] = acc.astype(o_ref.dtype)


def _choose_tile_m(m: int) -> int:
    """Row tile: 8-aligned, >=2 (even) grid programs whenever M allows it
    (v7x megacore), scaled up for training-size row counts."""
    if m < 16:
        return m                                   # single full-dim block
    target = 512 if m >= 4096 else 256
    progs = max(2, _cdiv(m, target))
    if progs % 2:
        progs += 1                                 # balanced 2-TensorCore split
    return min(m, _round_up(_cdiv(m, progs), 8))


def fused_linear(x_bf16, w_bf16, b_f32, *, apply_relu, out_dtype):
    """act(x @ w + b); row grid, resident bf16 weights, lane-dense output.
    No explicit row padding: the partial boundary block is masked by Pallas."""
    M, K = x_bf16.shape
    Kw, N = w_bf16.shape
    assert K == Kw and N % LANE == 0
    tm = _choose_tile_m(M)
    grid = (_cdiv(M, tm),)

    out_isz = jnp.dtype(out_dtype).itemsize
    cost = pl.CostEstimate(
        flops=2 * M * K * N, transcendentals=0,
        bytes_accessed=M * K * 2 + K * N * 2 + N * 4 + M * N * out_isz)

    return pl.pallas_call(
        functools.partial(_gemm_bias_act_kernel, apply_relu=apply_relu),
        out_shape=jax.ShapeDtypeStruct((M, N), out_dtype),
        grid_spec=pltpu.PrefetchScalarGridSpec(
            num_scalar_prefetch=0,
            grid=grid,
            in_specs=[
                pl.BlockSpec((tm, K), lambda i: (i, 0)),   # streamed x tile
                pl.BlockSpec((K, N), lambda i: (0, 0)),    # resident weights
                pl.BlockSpec((1, N), lambda i: (0, 0)),    # resident bias
            ],
            out_specs=pl.BlockSpec((tm, N), lambda i: (i, 0)),
        ),
        compiler_params=pltpu.CompilerParams(
            dimension_semantics=("parallel",)),
        cost_estimate=cost,
    )(x_bf16, w_bf16, b_f32)


# -----------------------------------------------------------------------------
# Conv2d(k=5, s=2) + folded BN + ReLU with IN-KERNEL patch formation.
# Input is the previous layer's padded 128-channel bf16 activation, presented
# in a phase-split layout so all in-kernel slices are unit-stride and static.
# -----------------------------------------------------------------------------
def _conv_patch_kernel(x_ref, w_ref, b_ref, o_ref, *, oh, ow):
    """One image per program.  x_ref block: (1, 4, Hp, Wp, C) phase-split input
    (phase p = 2*(h%2) + (w%2)).  Forms the 25 shifted patches from the
    in-VMEM block (lane-aligned concat), then conv-as-GEMM per output row."""
    xv = x_ref[0]                                   # (4, Hp, Wp, C) bf16
    pieces = []
    for kh in range(KSIZE):
        for kw in range(KSIZE):
            p = 2 * (kh % 2) + (kw % 2)
            pieces.append(xv[p,
                             kh // 2: kh // 2 + oh,
                             kw // 2: kw // 2 + ow, :])
    patches = jnp.concatenate(pieces, axis=-1)      # (oh, ow, 25*C) bf16
    w = w_ref[...]                                  # (25*C, 128) bf16, resident
    b = b_ref[...]                                  # (1, 128) f32, resident
    for r in range(oh):                             # static unroll over rows
        acc = jnp.dot(patches[r], w, preferred_element_type=jnp.float32)
        acc = jnp.maximum(acc + b, 0.0)
        o_ref[0, r] = acc.astype(o_ref.dtype)       # (ow, 128) bf16 store


def _phase_split(x_nhwc):
    """(B,H,W,C) -> (B, 4, ceil(H/2), ceil(W/2), C).  Pure one-pass layout op
    (no duplication); phase index p = 2*(h%2) + (w%2)."""
    B, H, W, C = x_nhwc.shape
    Hp, Wp = _cdiv(H, 2), _cdiv(W, 2)
    x = jnp.pad(x_nhwc, ((0, 0), (0, 2 * Hp - H), (0, 2 * Wp - W), (0, 0)))
    x = x.reshape(B, Hp, 2, Wp, 2, C).transpose(0, 2, 4, 1, 3, 5)
    return x.reshape(B, 4, Hp, Wp, C)


def conv5x5s2_bn_relu(x_nhwc, w_mat_bf16, b_f32):
    """x: (B, H, W, C) bf16 (C = stored/padded channels).  Returns the fused
    conv+BN+ReLU activation as (B, OH, OW, 128) bf16 (zero pad lanes)."""
    B, H, W, C = x_nhwc.shape
    OH, OW = _conv_out(H), _conv_out(W)
    K, N = w_mat_bf16.shape
    assert K == KSIZE * KSIZE * C and N == LANE

    xp = _phase_split(x_nhwc)                       # (B, 4, Hp, Wp, C) bf16
    Hp, Wp = xp.shape[2], xp.shape[3]

    cost = pl.CostEstimate(
        flops=2 * B * OH * OW * K * N, transcendentals=0,
        bytes_accessed=int(xp.size) * 2 + K * N * 2 + N * 4
        + B * OH * OW * N * 2)

    return pl.pallas_call(
        functools.partial(_conv_patch_kernel, oh=OH, ow=OW),
        out_shape=jax.ShapeDtypeStruct((B, OH, OW, N), jnp.bfloat16),
        grid_spec=pltpu.PrefetchScalarGridSpec(
            num_scalar_prefetch=0,
            grid=(B,),                              # one image per program
            in_specs=[
                pl.BlockSpec((1, 4, Hp, Wp, C), lambda b: (b, 0, 0, 0, 0)),
                pl.BlockSpec((K, N), lambda b: (0, 0)),   # resident weights
                pl.BlockSpec((1, N), lambda b: (0, 0)),   # resident bias
            ],
            out_specs=pl.BlockSpec((1, OH, OW, N), lambda b: (b, 0, 0, 0)),
        ),
        compiler_params=pltpu.CompilerParams(
            dimension_semantics=("parallel",)),
        cost_estimate=cost,
    )(xp, w_mat_bf16, b_f32)


# -----------------------------------------------------------------------------
# Layer-1 wrapper patch build (3-channel input; tiny, built directly in bf16,
# K zero-pad folded into the same concatenate — no extra pad/copy passes)
# -----------------------------------------------------------------------------
def _im2col_layer1(x_bf16, k_pad):
    B, H, W, C = x_bf16.shape
    OH, OW = _conv_out(H), _conv_out(W)
    cols = [x_bf16[:, kh:kh + STRIDE * OH:STRIDE,
                   kw:kw + STRIDE * OW:STRIDE, :]
            for kh in range(KSIZE) for kw in range(KSIZE)]
    k = KSIZE * KSIZE * C
    if k_pad > k:
        cols.append(jnp.zeros((B, OH, OW, k_pad - k), x_bf16.dtype))
    patches = jnp.concatenate(cols, axis=-1)        # (B, OH, OW, k_pad)
    return patches.reshape(B * OH * OW, k_pad), OH, OW


# -----------------------------------------------------------------------------
# Parameters: synthetic PyTorch-style init + eval-mode BN folding + kernel layout
# -----------------------------------------------------------------------------
def init_params(key, observation_size, action_size):
    """f32 reference params: 3x (HWIO conv weight, bias) with eval-mode BN
    folded, plus head (linear_input_size, action) weight/bias."""
    w_in, h_in = observation_size
    convw = _conv_out(_conv_out(_conv_out(w_in)))
    convh = _conv_out(_conv_out(_conv_out(h_in)))
    linear_input_size = convw * convh * 32

    keys = iter(jax.random.split(key, 32))

    def conv_bn(cin, cout):
        fan_in = cin * KSIZE * KSIZE
        bound = 1.0 / float(fan_in) ** 0.5
        w = jax.random.uniform(next(keys), (KSIZE, KSIZE, cin, cout),
                               jnp.float32, -bound, bound)       # HWIO
        b = jax.random.uniform(next(keys), (cout,), jnp.float32, -bound, bound)
        gamma = jax.random.uniform(next(keys), (cout,), jnp.float32, 0.8, 1.2)
        beta = jax.random.uniform(next(keys), (cout,), jnp.float32, -0.1, 0.1)
        mean = 0.1 * jax.random.normal(next(keys), (cout,), jnp.float32)
        var = jax.random.uniform(next(keys), (cout,), jnp.float32, 0.5, 1.5)
        s = gamma / jnp.sqrt(var + BN_EPS)          # fold eval-mode BatchNorm
        return w * s, (b - mean) * s + beta

    conv_layers = [conv_bn(3, 16), conv_bn(16, 32), conv_bn(32, 32)]

    bound_h = 1.0 / float(linear_input_size) ** 0.5
    w_head = jax.random.uniform(next(keys), (linear_input_size, action_size),
                                jnp.float32, -bound_h, bound_h)
    b_head = jax.random.uniform(next(keys), (action_size,), jnp.float32,
                                -bound_h, bound_h)
    return conv_layers, (w_head, b_head), (convh, convw)


def prepare_kernel_params(conv_layers, head, final_hw):
    """Kernel-layout params: bf16 weights / f32 biases; output channels padded
    to 128 lanes; conv2/conv3/head input channels padded (zero rows) to match
    the padded 128-channel bf16 activations of the previous layer."""
    (w1, b1), (w2, b2), (w3, b3) = conv_layers

    def pad_cols(mat, n_pad):
        k, n = mat.shape
        return jnp.zeros((k, n_pad), jnp.float32).at[:, :n].set(mat)

    def bias_row(b):
        return jnp.zeros((1, LANE), jnp.float32).at[0, :b.shape[0]].set(b)

    # conv1: wrapper im2col in (kh, kw, cin) order, K padded 75 -> 128.
    k1 = KSIZE * KSIZE * 3
    k1_pad = _round_up(k1, LANE)
    w1_mat = jnp.zeros((k1_pad, LANE), jnp.float32)
    w1_mat = w1_mat.at[:k1, :w1.shape[-1]].set(w1.reshape(k1, -1))
    p1 = (w1_mat.astype(jnp.bfloat16), bias_row(b1), k1_pad)

    # conv2 / conv3: in-kernel patches over the 128-padded activation.
    def conv_inner(w, b):
        kh, kw, cin, cout = w.shape
        w_p = jnp.zeros((kh, kw, LANE, cout), jnp.float32)
        w_p = w_p.at[:, :, :cin, :].set(w)
        w_mat = pad_cols(w_p.reshape(kh * kw * LANE, cout), LANE)
        return w_mat.astype(jnp.bfloat16), bias_row(b)

    p2 = conv_inner(w2, b2)
    p3 = conv_inner(w3, b3)

    # head: rows ordered (h, w, c) over the 128-padded channels of conv3's
    # output (zero rows for pad channels), columns padded to 128 lanes.
    w_h, b_h = head
    oh3, ow3 = final_hw
    cin = w_h.shape[0] // (oh3 * ow3)               # 32
    action_size = w_h.shape[1]
    n_pad = _round_up(action_size, LANE)
    w_h4 = w_h.reshape(oh3, ow3, cin, action_size)
    w_hp = jnp.zeros((oh3, ow3, LANE, action_size), jnp.float32)
    w_hp = w_hp.at[:, :, :cin, :].set(w_h4).reshape(oh3 * ow3 * LANE,
                                                    action_size)
    w_hp = pad_cols(w_hp, n_pad).astype(jnp.bfloat16)
    b_hp = jnp.zeros((1, n_pad), jnp.float32).at[0, :action_size].set(b_h)
    return p1, p2, p3, (w_hp, b_hp, action_size)


# -----------------------------------------------------------------------------
# Forward pass (Conv_Qnet.forward semantics, eval mode)
# -----------------------------------------------------------------------------
def conv_qnet_forward(x_nhwc, kparams):
    p1, p2, p3, (w_h, b_h, action_size) = kparams
    B = x_nhwc.shape[0]

    # Layer 1: conv-as-GEMM, wrapper-side bf16 patch build (3-channel input).
    w1, b1, k1_pad = p1
    patches, oh1, ow1 = _im2col_layer1(x_nhwc.astype(jnp.bfloat16), k1_pad)
    y = fused_linear(patches, w1, b1, apply_relu=True, out_dtype=jnp.bfloat16)
    y = y.reshape(B, oh1, ow1, LANE)        # padded 128-channel bf16 activation

    # Layers 2-3: in-kernel patch formation on the padded bf16 activation
    # (one HBM read per activation, no im2col matrix, no channel slicing).
    y = conv5x5s2_bn_relu(y, *p2)
    y = conv5x5s2_bn_relu(y, *p3)

    # Head: plain GEMM on the (h, w, c_pad) flatten; f32 Q-values.
    flat = y.reshape(B, -1)
    q = fused_linear(flat, w_h, b_h, apply_relu=False, out_dtype=jnp.float32)
    return q[:, :action_size]


# -----------------------------------------------------------------------------
# Pure-JAX f32 reference (same folded params)
# -----------------------------------------------------------------------------
def conv_qnet_reference(x_nhwc, conv_layers, head):
    y = x_nhwc
    for w, b in conv_layers:
        y = lax.conv_general_dilated(
            y, w, window_strides=(STRIDE, STRIDE), padding="VALID",
            dimension_numbers=("NHWC", "HWIO", "NHWC"))
        y = jnp.maximum(y + b, 0.0)
    flat = y.reshape(y.shape[0], -1)
    w_h, b_h = head
    return flat @ w_h + b_h


if __name__ == "__main__":
    batch = 2
    observation_size = (40, 40)   # 3x (k=5, s=2) convs need >= 29 per side
    action_size = 4

    key = jax.random.PRNGKey(0)
    k_x, k_p = jax.random.split(key)
    # NHWC input (PyTorch equivalent is NCHW (2, 3, 40, 40))
    x = jax.random.normal(
        k_x, (batch, observation_size[1], observation_size[0], 3), jnp.float32)

    conv_layers, head, final_hw = init_params(k_p, observation_size,
                                              action_size)
    kparams = prepare_kernel_params(conv_layers, head, final_hw)

    fwd = jax.jit(lambda inp: conv_qnet_forward(inp, kparams))
    out = jax.block_until_ready(fwd(x))

    ref = conv_qnet_reference(x, conv_layers, head)
    assert out.shape == (batch, action_size)
    max_err = float(jnp.max(jnp.abs(out - ref)))
    # bf16 matmul operands + bf16 intermediate activations, f32 accumulation.
    assert jnp.allclose(out, ref, atol=5e-2, rtol=5e-2), f"max_err={max_err}"

    print("KERNEL_OK")
</pallas_src>

<mosaic_0001>
module attributes {stable_mosaic.version = 11 : i64} {
  func.func @_gemm_bias_act_kernel(%arg0: i32, %arg1: memref<168x128xbf16, #tpu.memory_space<vmem>>, %arg2: memref<128x128xbf16, #tpu.memory_space<vmem>>, %arg3: memref<1x128xf32, #tpu.memory_space<vmem>>, %arg4: memref<168x128xbf16, #tpu.memory_space<vmem>>) attributes {dimension_semantics = [#tpu.dimension_semantics<parallel>], iteration_bounds = array<i64: 4>, scalar_prefetch = 0 : i64, scratch_operands = 0 : i64, tpu.core_type = #tpu.core_type<tc>, window_params = [{transform_indices = @transform_0, window_bounds = array<i64: 168, 128>}, {pipeline_mode = #tpu.pipeline_mode<synchronous>, transform_indices = @transform_1, window_bounds = array<i64: 128, 128>}, {pipeline_mode = #tpu.pipeline_mode<synchronous>, transform_indices = @transform_2, window_bounds = array<i64: 1, 128>}, {transform_indices = @transform_3, window_bounds = array<i64: 168, 128>}]} {
    %c0 = arith.constant 0 : index
    %c0_0 = arith.constant 0 : index
    %0 = vector.load %arg1[%c0, %c0_0] : memref<168x128xbf16, #tpu.memory_space<vmem>>, vector<168x128xbf16>
    %c0_1 = arith.constant 0 : index
    %c0_2 = arith.constant 0 : index
    %1 = vector.load %arg2[%c0_1, %c0_2] : memref<128x128xbf16, #tpu.memory_space<vmem>>, vector<128x128xbf16>
    %cst = arith.constant dense<0.000000e+00> : vector<168x128xf32>
    %2 = tpu.matmul %0, %1, %cst {dimension_numbers = #tpu.dot_dimension_numbers<[1], [0], [0], [1], [0, 0, 1, 1], [], []>} : vector<168x128xbf16>, vector<128x128xbf16>, vector<168x128xf32> -> vector<168x128xf32>
    %c0_3 = arith.constant 0 : index
    %c0_4 = arith.constant 0 : index
    %3 = vector.load %arg3[%c0_3, %c0_4] : memref<1x128xf32, #tpu.memory_space<vmem>>, vector<1x128xf32>
    %4 = vector.broadcast %3 : vector<1x128xf32> to vector<168x128xf32>
    %5 = arith.addf %2, %4 : vector<168x128xf32>
    %cst_5 = arith.constant 0.000000e+00 : f32
    %6 = vector.broadcast %cst_5 : f32 to vector<168x128xf32>
    %7 = arith.maximumf %5, %6 : vector<168x128xf32>
    %8 = arith.truncf %7 : vector<168x128xf32> to vector<168x128xbf16>
    %c0_6 = arith.constant 0 : index
    %c0_7 = arith.constant 0 : index
    %9 = vector.load %arg4[%c0_6, %c0_7] : memref<168x128xbf16, #tpu.memory_space<vmem>>, vector<168x128xbf16>
    tpu.vector_store %arg4[%c0_6, %c0_7], %8 {strides = array<i32>} : memref<168x128xbf16, #tpu.memory_space<vmem>>, vector<168x128xbf16>,
    return
  }
  func.func @transform_0(%arg0: i32) -> (i32, i32) {
    %c0_i32 = arith.constant 0 : i32
    %c0_i32_0 = arith.constant 0 : i32
    return %arg0, %c0_i32 : i32, i32
  }
  func.func @transform_1(%arg0: i32) -> (i32, i32) {
    %c0_i32 = arith.constant 0 : i32
    %c0_i32_0 = arith.constant 0 : i32
    %c0_i32_1 = arith.constant 0 : i32
    return %c0_i32, %c0_i32_0 : i32, i32
  }
  func.func @transform_2(%arg0: i32) -> (i32, i32) {
    %c0_i32 = arith.constant 0 : i32
    %c0_i32_0 = arith.constant 0 : i32
    %c0_i32_1 = arith.constant 0 : i32
    return %c0_i32, %c0_i32_0 : i32, i32
  }
  func.func @transform_3(%arg0: i32) -> (i32, i32) {
    %c0_i32 = arith.constant 0 : i32
    %c0_i32_0 = arith.constant 0 : i32
    return %arg0, %c0_i32 : i32, i32
  }
}

module attributes {stable_mosaic.version = 11 : i64} {
  func.func @_conv_patch_kernel(%arg0: i32, %arg1: memref<1x4x9x9x128xbf16, #tpu.memory_space<vmem>>, %arg2: memref<3200x128xbf16, #tpu.memory_space<vmem>>, %arg3: memref<1x128xf32, #tpu.memory_space<vmem>>, %arg4: memref<1x7x7x128xbf16, #tpu.memory_space<vmem>>) attributes {dimension_semantics = [#tpu.dimension_semantics<parallel>], iteration_bounds = array<i64: 2>, scalar_prefetch = 0 : i64, scratch_operands = 0 : i64, tpu.core_type = #tpu.core_type<tc>, window_params = [{transform_indices = @transform_0, window_bounds = array<i64: 1, 4, 9, 9, 128>}, {pipeline_mode = #tpu.pipeline_mode<synchronous>, transform_indices = @transform_1, window_bounds = array<i64: 3200, 128>}, {pipeline_mode = #tpu.pipeline_mode<synchronous>, transform_indices = @transform_2, window_bounds = array<i64: 1, 128>}, {transform_indices = @transform_3, window_bounds = array<i64: 1, 7, 7, 128>}]} {
    %c0 = arith.constant 0 : index
    %c0_0 = arith.constant 0 : index
    %c0_1 = arith.constant 0 : index
    %c0_2 = arith.constant 0 : index
    %c0_3 = arith.constant 0 : index
    %0 = vector.load %arg1[%c0, %c0_0, %c0_1, %c0_2, %c0_3] : memref<1x4x9x9x128xbf16, #tpu.memory_space<vmem>>, vector<1x4x9x9x128xbf16>
    %1 = vector.shape_cast %0 : vector<1x4x9x9x128xbf16> to vector<4x9x9x128xbf16>
    %2 = vector.extract_strided_slice %1 {offsets = [0, 0, 0, 0], sizes = [1, 7, 7, 128], strides = [1, 1, 1, 1]} : vector<4x9x9x128xbf16> to vector<1x7x7x128xbf16>
    %3 = vector.shape_cast %2 : vector<1x7x7x128xbf16> to vector<7x7x128xbf16>
    %4 = vector.extract_strided_slice %1 {offsets = [1, 0, 0, 0], sizes = [1, 7, 7, 128], strides = [1, 1, 1, 1]} : vector<4x9x9x128xbf16> to vector<1x7x7x128xbf16>
    %5 = vector.shape_cast %4 : vector<1x7x7x128xbf16> to vector<7x7x128xbf16>
    %6 = vector.extract_strided_slice %1 {offsets = [0, 0, 1, 0], sizes = [1, 7, 7, 128], strides = [1, 1, 1, 1]} : vector<4x9x9x128xbf16> to vector<1x7x7x128xbf16>
    %7 = vector.shape_cast %6 : vector<1x7x7x128xbf16> to vector<7x7x128xbf16>
    %8 = vector.extract_strided_slice %1 {offsets = [1, 0, 1, 0], sizes = [1, 7, 7, 128], strides = [1, 1, 1, 1]} : vector<4x9x9x128xbf16> to vector<1x7x7x128xbf16>
    %9 = vector.shape_cast %8 : vector<1x7x7x128xbf16> to vector<7x7x128xbf16>
    %10 = vector.extract_strided_slice %1 {offsets = [0, 0, 2, 0], sizes = [1, 7, 7, 128], strides = [1, 1, 1, 1]} : vector<4x9x9x128xbf16> to vector<1x7x7x128xbf16>
    %11 = vector.shape_cast %10 : vector<1x7x7x128xbf16> to vector<7x7x128xbf16>
    %12 = vector.extract_strided_slice %1 {offsets = [2, 0, 0, 0], sizes = [1, 7, 7, 128], strides = [1, 1, 1, 1]} : vector<4x9x9x128xbf16> to vector<1x7x7x128xbf16>
    %13 = vector.shape_cast %12 : vector<1x7x7x128xbf16> to vector<7x7x128xbf16>
    %14 = vector.extract_strided_slice %1 {offsets = [3, 0, 0, 0], sizes = [1, 7, 7, 128], strides = [1, 1, 1, 1]} : vector<4x9x9x128xbf16> to vector<1x7x7x128xbf16>
    %15 = vector.shape_cast %14 : vector<1x7x7x128xbf16> to vector<7x7x128xbf16>
    %16 = vector.extract_strided_slice %1 {offsets = [2, 0, 1, 0], sizes = [1, 7, 7, 128], strides = [1, 1, 1, 1]} : vector<4x9x9x128xbf16> to vector<1x7x7x128xbf16>
    %17 = vector.shape_cast %16 : vector<1x7x7x128xbf16> to vector<7x7x128xbf16>
    %18 = vector.extract_strided_slice %1 {offsets = [3, 0, 1, 0], sizes = [1, 7, 7, 128], strides = [1, 1, 1, 1]} : vector<4x9x9x128xbf16> to vector<1x7x7x128xbf16>
    %19 = vector.shape_cast %18 : vector<1x7x7x128xbf16> to vector<7x7x128xbf16>
    %20 = vector.extract_strided_slice %1 {offsets = [2, 0, 2, 0], sizes = [1, 7, 7, 128], strides = [1, 1, 1, 1]} : vector<4x9x9x128xbf16> to vector<1x7x7x128xbf16>
    %21 = vector.shape_cast %20 : vector<1x7x7x128xbf16> to vector<7x7x128xbf16>
    %22 = vector.extract_strided_slice %1 {offsets = [0, 1, 0, 0], sizes = [1, 7, 7, 128], strides = [1, 1, 1, 1]} : vector<4x9x9x128xbf16> to vector<1x7x7x128xbf16>
    %23 = vector.shape_cast %22 : vector<1x7x7x128xbf16> to vector<7x7x128xbf16>
    %24 = vector.extract_strided_slice %1 {offsets = [1, 1, 0, 0], sizes = [1, 7, 7, 128], strides = [1, 1, 1, 1]} : vector<4x9x9x128xbf16> to vector<1x7x7x128xbf16>
    %25 = vector.shape_cast %24 : vector<1x7x7x128xbf16> to vector<7x7x128xbf16>
    %26 = vector.extract_strided_slice %1 {offsets = [0, 1, 1, 0], sizes = [1, 7, 7, 128], strides = [1, 1, 1, 1]} : vector<4x9x9x128xbf16> to vector<1x7x7x128xbf16>
    %27 = vector.shape_cast %26 : vector<1x7x7x128xbf16> to vector<7x7x128xbf16>
    %28 = vector.extract_strided_slice %1 {offsets = [1, 1, 1, 0], sizes = [1, 7, 7, 128], strides = [1, 1, 1, 1]} : vector<4x9x9x128xbf16> to vector<1x7x7x128xbf16>
    %29 = vector.shape_cast %28 : vector<1x7x7x128xbf16> to vector<7x7x128xbf16>
    %30 = vector.extract_strided_slice %1 {offsets = [0, 1, 2, 0], sizes = [1, 7, 7, 128], strides = [1, 1, 1, 1]} : vector<4x9x9x128xbf16> to vector<1x7x7x128xbf16>
    %31 = vector.shape_cast %30 : vector<1x7x7x128xbf16> to vector<7x7x128xbf16>
    %32 = vector.extract_strided_slice %1 {offsets = [2, 1, 0, 0], sizes = [1, 7, 7, 128], strides = [1, 1, 1, 1]} : vector<4x9x9x128xbf16> to vector<1x7x7x128xbf16>
    %33 = vector.shape_cast %32 : vector<1x7x7x128xbf16> to vector<7x7x128xbf16>
    %34 = vector.extract_strided_slice %1 {offsets = [3, 1, 0, 0], sizes = [1, 7, 7, 128], strides = [1, 1, 1, 1]} : vector<4x9x9x128xbf16> to vector<1x7x7x128xbf16>
    %35 = vector.shape_cast %34 : vector<1x7x7x128xbf16> to vector<7x7x128xbf16>
    %36 = vector.extract_strided_slice %1 {offsets = [2, 1, 1, 0], sizes = [1, 7, 7, 128], strides = [1, 1, 1, 1]} : vector<4x9x9x128xbf16> to vector<1x7x7x128xbf16>
    %37 = vector.shape_cast %36 : vector<1x7x7x128xbf16> to vector<7x7x128xbf16>
    %38 = vector.extract_strided_slice %1 {offsets = [3, 1, 1, 0], sizes = [1, 7, 7, 128], strides = [1, 1, 1, 1]} : vector<4x9x9x128xbf16> to vector<1x7x7x128xbf16>
    %39 = vector.shape_cast %38 : vector<1x7x7x128xbf16> to vector<7x7x128xbf16>
    %40 = vector.extract_strided_slice %1 {offsets = [2, 1, 2, 0], sizes = [1, 7, 7, 128], strides = [1, 1, 1, 1]} : vector<4x9x9x128xbf16> to vector<1x7x7x128xbf16>
    %41 = vector.shape_cast %40 : vector<1x7x7x128xbf16> to vector<7x7x128xbf16>
    %42 = vector.extract_strided_slice %1 {offsets = [0, 2, 0, 0], sizes = [1, 7, 7, 128], strides = [1, 1, 1, 1]} : vector<4x9x9x128xbf16> to vector<1x7x7x128xbf16>
    %43 = vector.shape_cast %42 : vector<1x7x7x128xbf16> to vector<7x7x128xbf16>
    %44 = vector.extract_strided_slice %1 {offsets = [1, 2, 0, 0], sizes = [1, 7, 7, 128], strides = [1, 1, 1, 1]} : vector<4x9x9x128xbf16> to vector<1x7x7x128xbf16>
    %45 = vector.shape_cast %44 : vector<1x7x7x128xbf16> to vector<7x7x128xbf16>
    %46 = vector.extract_strided_slice %1 {offsets = [0, 2, 1, 0], sizes = [1, 7, 7, 128], strides = [1, 1, 1, 1]} : vector<4x9x9x128xbf16> to vector<1x7x7x128xbf16>
    %47 = vector.shape_cast %46 : vector<1x7x7x128xbf16> to vector<7x7x128xbf16>
    %48 = vector.extract_strided_slice %1 {offsets = [1, 2, 1, 0], sizes = [1, 7, 7, 128], strides = [1, 1, 1, 1]} : vector<4x9x9x128xbf16> to vector<1x7x7x128xbf16>
    %49 = vector.shape_cast %48 : vector<1x7x7x128xbf16> to vector<7x7x128xbf16>
    %50 = vector.extract_strided_slice %1 {offsets = [0, 2, 2, 0], sizes = [1, 7, 7, 128], strides = [1, 1, 1, 1]} : vector<4x9x9x128xbf16> to vector<1x7x7x128xbf16>
    %51 = vector.shape_cast %50 : vector<1x7x7x128xbf16> to vector<7x7x128xbf16>
    %52 = tpu.concatenate %3, %5, %7, %9, %11, %13, %15, %17, %19, %21, %23, %25, %27, %29, %31, %33 in 2 : vector<7x7x128xbf16>, vector<7x7x128xbf16>, vector<7x7x128xbf16>, vector<7x7x128xbf16>, vector<7x7x128xbf16>, vector<7x7x128xbf16>, vector<7x7x128xbf16>, vector<7x7x128xbf16>, vector<7x7x128xbf16>, vector<7x7x128xbf16>, vector<7x7x128xbf16>, vector<7x7x128xbf16>, vector<7x7x128xbf16>, vector<7x7x128xbf16>, vector<7x7x128xbf16>, vector<7x7x128xbf16> -> vector<7x7x2048xbf16>
    %53 = tpu.concatenate %35, %37, %39, %41, %43, %45, %47, %49, %51 in 2 : vector<7x7x128xbf16>, vector<7x7x128xbf16>, vector<7x7x128xbf16>, vector<7x7x128xbf16>, vector<7x7x128xbf16>, vector<7x7x128xbf16>, vector<7x7x128xbf16>, vector<7x7x128xbf16>, vector<7x7x128xbf16> -> vector<7x7x1152xbf16>
    %54 = tpu.concatenate %52, %53 in 2 : vector<7x7x2048xbf16>, vector<7x7x1152xbf16> -> vector<7x7x3200xbf16>
    %c0_4 = arith.constant 0 : index
    %c0_5 = arith.constant 0 : index
    %55 = vector.load %arg2[%c0_4, %c0_5] : memref<3200x128xbf16, #tpu.memory_space<vmem>>, vector<3200x128xbf16>
    %c0_6 = arith.constant 0 : index
    %c0_7 = arith.constant 0 : index
    %56 = vector.load %arg3[%c0_6, %c0_7] : memref<1x128xf32, #tpu.memory_space<vmem>>, vector<1x128xf32>
    %57 = vector.extract_strided_slice %54 {offsets = [0, 0, 0], sizes = [1, 7, 3200], strides = [1, 1, 1]} : vector<7x7x3200xbf16> to vector<1x7x3200xbf16>
    %58 = vector.shape_cast %57 : vector<1x7x3200xbf16> to vector<7x3200xbf16>
    %cst = arith.constant dense<0.000000e+00> : vector<7x128xf32>
    %59 = tpu.matmul %58, %55, %cst {dimension_numbers = #tpu.dot_dimension_numbers<[1], [0], [0], [1], [0, 0, 1, 1], [], []>} : vector<7x3200xbf16>, vector<3200x128xbf16>, vector<7x128xf32> -> vector<7x128xf32>
    %60 = vector.broadcast %56 : vector<1x128xf32> to vector<7x128xf32>
    %61 = arith.addf %59, %60 : vector<7x128xf32>
    %cst_8 = arith.constant 0.000000e+00 : f32
    %62 = vector.broadcast %cst_8 : f32 to vector<7x128xf32>
    %63 = arith.maximumf %61, %62 : vector<7x128xf32>
    %64 = arith.truncf %63 : vector<7x128xf32> to vector<7x128xbf16>
    %c0_9 = arith.constant 0 : index
    %c0_10 = arith.constant 0 : index
    %c0_11 = arith.constant 0 : index
    %c0_12 = arith.constant 0 : index
    %65 = vector.load %arg4[%c0_9, %c0_10, %c0_11, %c0_12] : memref<1x7x7x128xbf16, #tpu.memory_space<vmem>>, vector<1x1x7x128xbf16>
    %66 = vector.shape_cast %65 : vector<1x1x7x128xbf16> to vector<7x128xbf16>
    %67 = vector.shape_cast %64 : vector<7x128xbf16> to vector<1x1x7x128xbf16>
    tpu.vector_store %arg4[%c0_9, %c0_10, %c0_11, %c0_12], %67 {strides = array<i32>} : memref<1x7x7x128xbf16, #tpu.memory_space<vmem>>, vector<1x1x7x128xbf16>,
    %68 = vector.extract_strided_slice %54 {offsets = [1, 0, 0], sizes = [1, 7, 3200], strides = [1, 1, 1]} : vector<7x7x3200xbf16> to vector<1x7x3200xbf16>
    %69 = vector.shape_cast %68 : vector<1x7x3200xbf16> to vector<7x3200xbf16>
    %cst_13 = arith.constant dense<0.000000e+00> : vector<7x128xf32>
    %70 = tpu.matmul %69, %55, %cst_13 {dimension_numbers = #tpu.dot_dimension_numbers<[1], [0], [0], [1], [0, 0, 1, 1], [], []>} : vector<7x3200xbf16>, vector<3200x128xbf16>, vector<7x128xf32> -> vector<7x128xf32>
    %71 = vector.broadcast %56 : vector<1x128xf32> to vector<7x128xf32>
    %72 = arith.addf %70, %71 : vector<7x128xf32>
    %cst_14 = arith.constant 0.000000e+00 : f32
    %73 = vector.broadcast %cst_14 : f32 to vector<7x128xf32>
    %74 = arith.maximumf %72, %73 : vector<7x128xf32>
    %75 = arith.truncf %74 : vector<7x128xf32> to vector<7x128xbf16>
    %c0_15 = arith.constant 0 : index
    %c1 = arith.constant 1 : index
    %c0_16 = arith.constant 0 : index
    %c0_17 = arith.constant 0 : index
    %76 = vector.load %arg4[%c0_15, %c1, %c0_16, %c0_17] : memref<1x7x7x128xbf16, #tpu.memory_space<vmem>>, vector<1x1x7x128xbf16>
    %77 = vector.shape_cast %76 : vector<1x1x7x128xbf16> to vector<7x128xbf16>
    %78 = vector.shape_cast %75 : vector<7x128xbf16> to vector<1x1x7x128xbf16>
    tpu.vector_store %arg4[%c0_15, %c1, %c0_16, %c0_17], %78 {strides = array<i32>} : memref<1x7x7x128xbf16, #tpu.memory_space<vmem>>, vector<1x1x7x128xbf16>,
    %79 = vector.extract_strided_slice %54 {offsets = [2, 0, 0], sizes = [1, 7, 3200], strides = [1, 1, 1]} : vector<7x7x3200xbf16> to vector<1x7x3200xbf16>
    %80 = vector.shape_cast %79 : vector<1x7x3200xbf16> to vector<7x3200xbf16>
    %cst_18 = arith.constant dense<0.000000e+00> : vector<7x128xf32>
    %81 = tpu.matmul %80, %55, %cst_18 {dimension_numbers = #tpu.dot_dimension_numbers<[1], [0], [0], [1], [0, 0, 1, 1], [], []>} : vector<7x3200xbf16>, vector<3200x128xbf16>, vector<7x128xf32> -> vector<7x128xf32>
    %82 = vector.broadcast %56 : vector<1x128xf32> to vector<7x128xf32>
    %83 = arith.addf %81, %82 : vector<7x128xf32>
    %cst_19 = arith.constant 0.000000e+00 : f32
    %84 = vector.broadcast %cst_19 : f32 to vector<7x128xf32>
    %85 = arith.maximumf %83, %84 : vector<7x128xf32>
    %86 = arith.truncf %85 : vector<7x128xf32> to vector<7x128xbf16>
    %c0_20 = arith.constant 0 : index
    %c2 = arith.constant 2 : index
    %c0_21 = arith.constant 0 : index
    %c0_22 = arith.constant 0 : index
    %87 = vector.load %arg4[%c0_20, %c2, %c0_21, %c0_22] : memref<1x7x7x128xbf16, #tpu.memory_space<vmem>>, vector<1x1x7x128xbf16>
    %88 = vector.shape_cast %87 : vector<1x1x7x128xbf16> to vector<7x128xbf16>
    %89 = vector.shape_cast %86 : vector<7x128xbf16> to vector<1x1x7x128xbf16>
    tpu.vector_store %arg4[%c0_20, %c2, %c0_21, %c0_22], %89 {strides = array<i32>} : memref<1x7x7x128xbf16, #tpu.memory_space<vmem>>, vector<1x1x7x128xbf16>,
    %90 = vector.extract_strided_slice %54 {offsets = [3, 0, 0], sizes = [1, 7, 3200], strides = [1, 1, 1]} : vector<7x7x3200xbf16> to vector<1x7x3200xbf16>
    %91 = vector.shape_cast %90 : vector<1x7x3200xbf16> to vector<7x3200xbf16>
    %cst_23 = arith.constant dense<0.000000e+00> : vector<7x128xf32>
    %92 = tpu.matmul %91, %55, %cst_23 {dimension_numbers = #tpu.dot_dimension_numbers<[1], [0], [0], [1], [0, 0, 1, 1], [], []>} : vector<7x3200xbf16>, vector<3200x128xbf16>, vector<7x128xf32> -> vector<7x128xf32>
    %93 = vector.broadcast %56 : vector<1x128xf32> to vector<7x128xf32>
    %94 = arith.addf %92, %93 : vector<7x128xf32>
    %cst_24 = arith.constant 0.000000e+00 : f32
    %95 = vector.broadcast %cst_24 : f32 to vector<7x128xf32>
    %96 = arith.maximumf %94, %95 : vector<7x128xf32>
    %97 = arith.truncf %96 : vector<7x128xf32> to vector<7x128xbf16>
    %c0_25 = arith.constant 0 : index
    %c3 = arith.constant 3 : index
    %c0_26 = arith.constant 0 : index
    %c0_27 = arith.constant 0 : index
    %98 = vector.load %arg4[%c0_25, %c3, %c0_26, %c0_27] : memref<1x7x7x128xbf16, #tpu.memory_space<vmem>>, vector<1x1x7x128xbf16>
    %99 = vector.shape_cast %98 : vector<1x1x7x128xbf16> to vector<7x128xbf16>
    %100 = vector.shape_cast %97 : vector<7x128xbf16> to vector<1x1x7x128xbf16>
    tpu.vector_store %arg4[%c0_25, %c3, %c0_26, %c0_27], %100 {strides = array<i32>} : memref<1x7x7x128xbf16, #tpu.memory_space<vmem>>, vector<1x1x7x128xbf16>,
    %101 = vector.extract_strided_slice %54 {offsets = [4, 0, 0], sizes = [1, 7, 3200], strides = [1, 1, 1]} : vector<7x7x3200xbf16> to vector<1x7x3200xbf16>
    %102 = vector.shape_cast %101 : vector<1x7x3200xbf16> to vector<7x3200xbf16>
    %cst_28 = arith.constant dense<0.000000e+00> : vector<7x128xf32>
    %103 = tpu.matmul %102, %55, %cst_28 {dimension_numbers = #tpu.dot_dimension_numbers<[1], [0], [0], [1], [0, 0, 1, 1], [], []>} : vector<7x3200xbf16>, vector<3200x128xbf16>, vector<7x128xf32> -> vector<7x128xf32>
    %104 = vector.broadcast %56 : vector<1x128xf32> to vector<7x128xf32>
    %105 = arith.addf %103, %104 : vector<7x128xf32>
    %cst_29 = arith.constant 0.000000e+00 : f32
    %106 = vector.broadcast %cst_29 : f32 to vector<7x128xf32>
    %107 = arith.maximumf %105, %106 : vector<7x128xf32>
    %108 = arith.truncf %107 : vector<7x128xf32> to vector<7x128xbf16>
    %c0_30 = arith.constant 0 : index
    %c4 = arith.constant 4 : index
    %c0_31 = arith.constant 0 : index
    %c0_32 = arith.constant 0 : index
    %109 = vector.load %arg4[%c0_30, %c4, %c0_31, %c0_32] : memref<1x7x7x128xbf16, #tpu.memory_space<vmem>>, vector<1x1x7x128xbf16>
    %110 = vector.shape_cast %109 : vector<1x1x7x128xbf16> to vector<7x128xbf16>
    %111 = vector.shape_cast %108 : vector<7x128xbf16> to vector<1x1x7x128xbf16>
    tpu.vector_store %arg4[%c0_30, %c4, %c0_31, %c0_32], %111 {strides = array<i32>} : memref<1x7x7x128xbf16, #tpu.memory_space<vmem>>, vector<1x1x7x128xbf16>,
    %112 = vector.extract_strided_slice %54 {offsets = [5, 0, 0], sizes = [1, 7, 3200], strides = [1, 1, 1]} : vector<7x7x3200xbf16> to vector<1x7x3200xbf16>
    %113 = vector.shape_cast %112 : vector<1x7x3200xbf16> to vector<7x3200xbf16>
    %cst_33 = arith.constant dense<0.000000e+00> : vector<7x128xf32>
    %114 = tpu.matmul %113, %55, %cst_33 {dimension_numbers = #tpu.dot_dimension_numbers<[1], [0], [0], [1], [0, 0, 1, 1], [], []>} : vector<7x3200xbf16>, vector<3200x128xbf16>, vector<7x128xf32> -> vector<7x128xf32>
    %115 = vector.broadcast %56 : vector<1x128xf32> to vector<7x128xf32>
    %116 = arith.addf %114, %115 : vector<7x128xf32>
    %cst_34 = arith.constant 0.000000e+00 : f32
    %117 = vector.broadcast %cst_34 : f32 to vector<7x128xf32>
    %118 = arith.maximumf %116, %117 : vector<7x128xf32>
    %119 = arith.truncf %118 : vector<7x128xf32> to vector<7x128xbf16>
    %c0_35 = arith.constant 0 : index
    %c5 = arith.constant 5 : index
    %c0_36 = arith.constant 0 : index
    %c0_37 = arith.constant 0 : index
    %120 = vector.load %arg4[%c0_35, %c5, %c0_36, %c0_37] : memref<1x7x7x128xbf16, #tpu.memory_space<vmem>>, vector<1x1x7x128xbf16>
    %121 = vector.shape_cast %120 : vector<1x1x7x128xbf16> to vector<7x128xbf16>
    %122 = vector.shape_cast %119 : vector<7x128xbf16> to vector<1x1x7x128xbf16>
    tpu.vector_store %arg4[%c0_35, %c5, %c0_36, %c0_37], %122 {strides = array<i32>} : memref<1x7x7x128xbf16, #tpu.memory_space<vmem>>, vector<1x1x7x128xbf16>,
    %123 = vector.extract_strided_slice %54 {offsets = [6, 0, 0], sizes = [1, 7, 3200], strides = [1, 1, 1]} : vector<7x7x3200xbf16> to vector<1x7x3200xbf16>
    %124 = vector.shape_cast %123 : vector<1x7x3200xbf16> to vector<7x3200xbf16>
    %cst_38 = arith.constant dense<0.000000e+00> : vector<7x128xf32>
    %125 = tpu.matmul %124, %55, %cst_38 {dimension_numbers = #tpu.dot_dimension_numbers<[1], [0], [0], [1], [0, 0, 1, 1], [], []>} : vector<7x3200xbf16>, vector<3200x128xbf16>, vector<7x128xf32> -> vector<7x128xf32>
    %126 = vector.broadcast %56 : vector<1x128xf32> to vector<7x128xf32>
    %127 = arith.addf %125, %126 : vector<7x128xf32>
    %cst_39 = arith.constant 0.000000e+00 : f32
    %128 = vector.broadcast %cst_39 : f32 to vector<7x128xf32>
    %129 = arith.maximumf %127, %128 : vector<7x128xf32>
    %130 = arith.truncf %129 : vector<7x128xf32> to vector<7x128xbf16>
    %c0_40 = arith.constant 0 : index
    %c6 = arith.constant 6 : index
    %c0_41 = arith.constant 0 : index
    %c0_42 = arith.constant 0 : index
    %131 = vector.load %arg4[%c0_40, %c6, %c0_41, %c0_42] : memref<1x7x7x128xbf16, #tpu.memory_space<vmem>>, vector<1x1x7x128xbf16>
    %132 = vector.shape_cast %131 : vector<1x1x7x128xbf16> to vector<7x128xbf16>
    %133 = vector.shape_cast %130 : vector<7x128xbf16> to vector<1x1x7x128xbf16>
    tpu.vector_store %arg4[%c0_40, %c6, %c0_41, %c0_42], %133 {strides = array<i32>} : memref<1x7x7x128xbf16, #tpu.memory_space<vmem>>, vector<1x1x7x128xbf16>,
    return
  }
  func.func @transform_0(%arg0: i32) -> (i32, i32, i32, i32, i32) {
    %c0_i32 = arith.constant 0 : i32
    %c0_i32_0 = arith.constant 0 : i32
    %c0_i32_1 = arith.constant 0 : i32
    %c0_i32_2 = arith.constant 0 : i32
    %c0_i32_3 = arith.constant 0 : i32
    return %arg0, %c0_i32, %c0_i32_0, %c0_i32_1, %c0_i32_2 : i32, i32, i32, i32, i32
  }
  func.func @transform_1(%arg0: i32) -> (i32, i32) {
    %c0_i32 = arith.constant 0 : i32
    %c0_i32_0 = arith.constant 0 : i32
    %c0_i32_1 = arith.constant 0 : i32
    return %c0_i32, %c0_i32_0 : i32, i32
  }
  func.func @transform_2(%arg0: i32) -> (i32, i32) {
    %c0_i32 = arith.constant 0 : i32
    %c0_i32_0 = arith.constant 0 : i32
    %c0_i32_1 = arith.constant 0 : i32
    return %c0_i32, %c0_i32_0 : i32, i32
  }
  func.func @transform_3(%arg0: i32) -> (i32, i32, i32, i32) {
    %c0_i32 = arith.constant 0 : i32
    %c0_i32_0 = arith.constant 0 : i32
    %c0_i32_1 = arith.constant 0 : i32
    %c0_i32_2 = arith.constant 0 : i32
    return %arg0, %c0_i32, %c0_i32_0, %c0_i32_1 : i32, i32, i32, i32
  }
}

module attributes {stable_mosaic.version = 11 : i64} {
  func.func @_conv_patch_kernel(%arg0: i32, %arg1: memref<1x4x4x4x128xbf16, #tpu.memory_space<vmem>>, %arg2: memref<3200x128xbf16, #tpu.memory_space<vmem>>, %arg3: memref<1x128xf32, #tpu.memory_space<vmem>>, %arg4: memref<1x2x2x128xbf16, #tpu.memory_space<vmem>>) attributes {dimension_semantics = [#tpu.dimension_semantics<parallel>], iteration_bounds = array<i64: 2>, scalar_prefetch = 0 : i64, scratch_operands = 0 : i64, tpu.core_type = #tpu.core_type<tc>, window_params = [{transform_indices = @transform_0, window_bounds = array<i64: 1, 4, 4, 4, 128>}, {pipeline_mode = #tpu.pipeline_mode<synchronous>, transform_indices = @transform_1, window_bounds = array<i64: 3200, 128>}, {pipeline_mode = #tpu.pipeline_mode<synchronous>, transform_indices = @transform_2, window_bounds = array<i64: 1, 128>}, {transform_indices = @transform_3, window_bounds = array<i64: 1, 2, 2, 128>}]} {
    %c0 = arith.constant 0 : index
    %c0_0 = arith.constant 0 : index
    %c0_1 = arith.constant 0 : index
    %c0_2 = arith.constant 0 : index
    %c0_3 = arith.constant 0 : index
    %0 = vector.load %arg1[%c0, %c0_0, %c0_1, %c0_2, %c0_3] : memref<1x4x4x4x128xbf16, #tpu.memory_space<vmem>>, vector<1x4x4x4x128xbf16>
    %1 = vector.shape_cast %0 : vector<1x4x4x4x128xbf16> to vector<4x4x4x128xbf16>
    %2 = vector.extract_strided_slice %1 {offsets = [0, 0, 0, 0], sizes = [1, 2, 2, 128], strides = [1, 1, 1, 1]} : vector<4x4x4x128xbf16> to vector<1x2x2x128xbf16>
    %3 = vector.shape_cast %2 : vector<1x2x2x128xbf16> to vector<2x2x128xbf16>
    %4 = vector.extract_strided_slice %1 {offsets = [1, 0, 0, 0], sizes = [1, 2, 2, 128], strides = [1, 1, 1, 1]} : vector<4x4x4x128xbf16> to vector<1x2x2x128xbf16>
    %5 = vector.shape_cast %4 : vector<1x2x2x128xbf16> to vector<2x2x128xbf16>
    %6 = vector.extract_strided_slice %1 {offsets = [0, 0, 1, 0], sizes = [1, 2, 2, 128], strides = [1, 1, 1, 1]} : vector<4x4x4x128xbf16> to vector<1x2x2x128xbf16>
    %7 = vector.shape_cast %6 : vector<1x2x2x128xbf16> to vector<2x2x128xbf16>
    %8 = vector.extract_strided_slice %1 {offsets = [1, 0, 1, 0], sizes = [1, 2, 2, 128], strides = [1, 1, 1, 1]} : vector<4x4x4x128xbf16> to vector<1x2x2x128xbf16>
    %9 = vector.shape_cast %8 : vector<1x2x2x128xbf16> to vector<2x2x128xbf16>
    %10 = vector.extract_strided_slice %1 {offsets = [0, 0, 2, 0], sizes = [1, 2, 2, 128], strides = [1, 1, 1, 1]} : vector<4x4x4x128xbf16> to vector<1x2x2x128xbf16>
    %11 = vector.shape_cast %10 : vector<1x2x2x128xbf16> to vector<2x2x128xbf16>
    %12 = vector.extract_strided_slice %1 {offsets = [2, 0, 0, 0], sizes = [1, 2, 2, 128], strides = [1, 1, 1, 1]} : vector<4x4x4x128xbf16> to vector<1x2x2x128xbf16>
    %13 = vector.shape_cast %12 : vector<1x2x2x128xbf16> to vector<2x2x128xbf16>
    %14 = vector.extract_strided_slice %1 {offsets = [3, 0, 0, 0], sizes = [1, 2, 2, 128], strides = [1, 1, 1, 1]} : vector<4x4x4x128xbf16> to vector<1x2x2x128xbf16>
    %15 = vector.shape_cast %14 : vector<1x2x2x128xbf16> to vector<2x2x128xbf16>
    %16 = vector.extract_strided_slice %1 {offsets = [2, 0, 1, 0], sizes = [1, 2, 2, 128], strides = [1, 1, 1, 1]} : vector<4x4x4x128xbf16> to vector<1x2x2x128xbf16>
    %17 = vector.shape_cast %16 : vector<1x2x2x128xbf16> to vector<2x2x128xbf16>
    %18 = vector.extract_strided_slice %1 {offsets = [3, 0, 1, 0], sizes = [1, 2, 2, 128], strides = [1, 1, 1, 1]} : vector<4x4x4x128xbf16> to vector<1x2x2x128xbf16>
    %19 = vector.shape_cast %18 : vector<1x2x2x128xbf16> to vector<2x2x128xbf16>
    %20 = vector.extract_strided_slice %1 {offsets = [2, 0, 2, 0], sizes = [1, 2, 2, 128], strides = [1, 1, 1, 1]} : vector<4x4x4x128xbf16> to vector<1x2x2x128xbf16>
    %21 = vector.shape_cast %20 : vector<1x2x2x128xbf16> to vector<2x2x128xbf16>
    %22 = vector.extract_strided_slice %1 {offsets = [0, 1, 0, 0], sizes = [1, 2, 2, 128], strides = [1, 1, 1, 1]} : vector<4x4x4x128xbf16> to vector<1x2x2x128xbf16>
    %23 = vector.shape_cast %22 : vector<1x2x2x128xbf16> to vector<2x2x128xbf16>
    %24 = vector.extract_strided_slice %1 {offsets = [1, 1, 0, 0], sizes = [1, 2, 2, 128], strides = [1, 1, 1, 1]} : vector<4x4x4x128xbf16> to vector<1x2x2x128xbf16>
    %25 = vector.shape_cast %24 : vector<1x2x2x128xbf16> to vector<2x2x128xbf16>
    %26 = vector.extract_strided_slice %1 {offsets = [0, 1, 1, 0], sizes = [1, 2, 2, 128], strides = [1, 1, 1, 1]} : vector<4x4x4x128xbf16> to vector<1x2x2x128xbf16>
    %27 = vector.shape_cast %26 : vector<1x2x2x128xbf16> to vector<2x2x128xbf16>
    %28 = vector.extract_strided_slice %1 {offsets = [1, 1, 1, 0], sizes = [1, 2, 2, 128], strides = [1, 1, 1, 1]} : vector<4x4x4x128xbf16> to vector<1x2x2x128xbf16>
    %29 = vector.shape_cast %28 : vector<1x2x2x128xbf16> to vector<2x2x128xbf16>
    %30 = vector.extract_strided_slice %1 {offsets = [0, 1, 2, 0], sizes = [1, 2, 2, 128], strides = [1, 1, 1, 1]} : vector<4x4x4x128xbf16> to vector<1x2x2x128xbf16>
    %31 = vector.shape_cast %30 : vector<1x2x2x128xbf16> to vector<2x2x128xbf16>
    %32 = vector.extract_strided_slice %1 {offsets = [2, 1, 0, 0], sizes = [1, 2, 2, 128], strides = [1, 1, 1, 1]} : vector<4x4x4x128xbf16> to vector<1x2x2x128xbf16>
    %33 = vector.shape_cast %32 : vector<1x2x2x128xbf16> to vector<2x2x128xbf16>
    %34 = vector.extract_strided_slice %1 {offsets = [3, 1, 0, 0], sizes = [1, 2, 2, 128], strides = [1, 1, 1, 1]} : vector<4x4x4x128xbf16> to vector<1x2x2x128xbf16>
    %35 = vector.shape_cast %34 : vector<1x2x2x128xbf16> to vector<2x2x128xbf16>
    %36 = vector.extract_strided_slice %1 {offsets = [2, 1, 1, 0], sizes = [1, 2, 2, 128], strides = [1, 1, 1, 1]} : vector<4x4x4x128xbf16> to vector<1x2x2x128xbf16>
    %37 = vector.shape_cast %36 : vector<1x2x2x128xbf16> to vector<2x2x128xbf16>
    %38 = vector.extract_strided_slice %1 {offsets = [3, 1, 1, 0], sizes = [1, 2, 2, 128], strides = [1, 1, 1, 1]} : vector<4x4x4x128xbf16> to vector<1x2x2x128xbf16>
    %39 = vector.shape_cast %38 : vector<1x2x2x128xbf16> to vector<2x2x128xbf16>
    %40 = vector.extract_strided_slice %1 {offsets = [2, 1, 2, 0], sizes = [1, 2, 2, 128], strides = [1, 1, 1, 1]} : vector<4x4x4x128xbf16> to vector<1x2x2x128xbf16>
    %41 = vector.shape_cast %40 : vector<1x2x2x128xbf16> to vector<2x2x128xbf16>
    %42 = vector.extract_strided_slice %1 {offsets = [0, 2, 0, 0], sizes = [1, 2, 2, 128], strides = [1, 1, 1, 1]} : vector<4x4x4x128xbf16> to vector<1x2x2x128xbf16>
    %43 = vector.shape_cast %42 : vector<1x2x2x128xbf16> to vector<2x2x128xbf16>
    %44 = vector.extract_strided_slice %1 {offsets = [1, 2, 0, 0], sizes = [1, 2, 2, 128], strides = [1, 1, 1, 1]} : vector<4x4x4x128xbf16> to vector<1x2x2x128xbf16>
    %45 = vector.shape_cast %44 : vector<1x2x2x128xbf16> to vector<2x2x128xbf16>
    %46 = vector.extract_strided_slice %1 {offsets = [0, 2, 1, 0], sizes = [1, 2, 2, 128], strides = [1, 1, 1, 1]} : vector<4x4x4x128xbf16> to vector<1x2x2x128xbf16>
    %47 = vector.shape_cast %46 : vector<1x2x2x128xbf16> to vector<2x2x128xbf16>
    %48 = vector.extract_strided_slice %1 {offsets = [1, 2, 1, 0], sizes = [1, 2, 2, 128], strides = [1, 1, 1, 1]} : vector<4x4x4x128xbf16> to vector<1x2x2x128xbf16>
    %49 = vector.shape_cast %48 : vector<1x2x2x128xbf16> to vector<2x2x128xbf16>
    %50 = vector.extract_strided_slice %1 {offsets = [0, 2, 2, 0], sizes = [1, 2, 2, 128], strides = [1, 1, 1, 1]} : vector<4x4x4x128xbf16> to vector<1x2x2x128xbf16>
    %51 = vector.shape_cast %50 : vector<1x2x2x128xbf16> to vector<2x2x128xbf16>
    %52 = tpu.concatenate %3, %5, %7, %9, %11, %13, %15, %17, %19, %21, %23, %25, %27, %29, %31, %33 in 2 : vector<2x2x128xbf16>, vector<2x2x128xbf16>, vector<2x2x128xbf16>, vector<2x2x128xbf16>, vector<2x2x128xbf16>, vector<2x2x128xbf16>, vector<2x2x128xbf16>, vector<2x2x128xbf16>, vector<2x2x128xbf16>, vector<2x2x128xbf16>, vector<2x2x128xbf16>, vector<2x2x128xbf16>, vector<2x2x128xbf16>, vector<2x2x128xbf16>, vector<2x2x128xbf16>, vector<2x2x128xbf16> -> vector<2x2x2048xbf16>
    %53 = tpu.concatenate %35, %37, %39, %41, %43, %45, %47, %49, %51 in 2 : vector<2x2x128xbf16>, vector<2x2x128xbf16>, vector<2x2x128xbf16>, vector<2x2x128xbf16>, vector<2x2x128xbf16>, vector<2x2x128xbf16>, vector<2x2x128xbf16>, vector<2x2x128xbf16>, vector<2x2x128xbf16> -> vector<2x2x1152xbf16>
    %54 = tpu.concatenate %52, %53 in 2 : vector<2x2x2048xbf16>, vector<2x2x1152xbf16> -> vector<2x2x3200xbf16>
    %c0_4 = arith.constant 0 : index
    %c0_5 = arith.constant 0 : index
    %55 = vector.load %arg2[%c0_4, %c0_5] : memref<3200x128xbf16, #tpu.memory_space<vmem>>, vector<3200x128xbf16>
    %c0_6 = arith.constant 0 : index
    %c0_7 = arith.constant 0 : index
    %56 = vector.load %arg3[%c0_6, %c0_7] : memref<1x128xf32, #tpu.memory_space<vmem>>, vector<1x128xf32>
    %57 = vector.extract_strided_slice %54 {offsets = [0, 0, 0], sizes = [1, 2, 3200], strides = [1, 1, 1]} : vector<2x2x3200xbf16> to vector<1x2x3200xbf16>
    %58 = vector.shape_cast %57 : vector<1x2x3200xbf16> to vector<2x3200xbf16>
    %cst = arith.constant dense<0.000000e+00> : vector<2x128xf32>
    %59 = tpu.matmul %58, %55, %cst {dimension_numbers = #tpu.dot_dimension_numbers<[1], [0], [0], [1], [0, 0, 1, 1], [], []>} : vector<2x3200xbf16>, vector<3200x128xbf16>, vector<2x128xf32> -> vector<2x128xf32>
    %60 = vector.broadcast %56 : vector<1x128xf32> to vector<2x128xf32>
    %61 = arith.addf %59, %60 : vector<2x128xf32>
    %cst_8 = arith.constant 0.000000e+00 : f32
    %62 = vector.broadcast %cst_8 : f32 to vector<2x128xf32>
    %63 = arith.maximumf %61, %62 : vector<2x128xf32>
    %64 = arith.truncf %63 : vector<2x128xf32> to vector<2x128xbf16>
    %c0_9 = arith.constant 0 : index
    %c0_10 = arith.constant 0 : index
    %c0_11 = arith.constant 0 : index
    %c0_12 = arith.constant 0 : index
    %65 = vector.load %arg4[%c0_9, %c0_10, %c0_11, %c0_12] : memref<1x2x2x128xbf16, #tpu.memory_space<vmem>>, vector<1x1x2x128xbf16>
    %66 = vector.shape_cast %65 : vector<1x1x2x128xbf16> to vector<2x128xbf16>
    %67 = vector.shape_cast %64 : vector<2x128xbf16> to vector<1x1x2x128xbf16>
    tpu.vector_store %arg4[%c0_9, %c0_10, %c0_11, %c0_12], %67 {strides = array<i32>} : memref<1x2x2x128xbf16, #tpu.memory_space<vmem>>, vector<1x1x2x128xbf16>,
    %68 = vector.extract_strided_slice %54 {offsets = [1, 0, 0], sizes = [1, 2, 3200], strides = [1, 1, 1]} : vector<2x2x3200xbf16> to vector<1x2x3200xbf16>
    %69 = vector.shape_cast %68 : vector<1x2x3200xbf16> to vector<2x3200xbf16>
    %cst_13 = arith.constant dense<0.000000e+00> : vector<2x128xf32>
    %70 = tpu.matmul %69, %55, %cst_13 {dimension_numbers = #tpu.dot_dimension_numbers<[1], [0], [0], [1], [0, 0, 1, 1], [], []>} : vector<2x3200xbf16>, vector<3200x128xbf16>, vector<2x128xf32> -> vector<2x128xf32>
    %71 = vector.broadcast %56 : vector<1x128xf32> to vector<2x128xf32>
    %72 = arith.addf %70, %71 : vector<2x128xf32>
    %cst_14 = arith.constant 0.000000e+00 : f32
    %73 = vector.broadcast %cst_14 : f32 to vector<2x128xf32>
    %74 = arith.maximumf %72, %73 : vector<2x128xf32>
    %75 = arith.truncf %74 : vector<2x128xf32> to vector<2x128xbf16>
    %c0_15 = arith.constant 0 : index
    %c1 = arith.constant 1 : index
    %c0_16 = arith.constant 0 : index
    %c0_17 = arith.constant 0 : index
    %76 = vector.load %arg4[%c0_15, %c1, %c0_16, %c0_17] : memref<1x2x2x128xbf16, #tpu.memory_space<vmem>>, vector<1x1x2x128xbf16>
    %77 = vector.shape_cast %76 : vector<1x1x2x128xbf16> to vector<2x128xbf16>
    %78 = vector.shape_cast %75 : vector<2x128xbf16> to vector<1x1x2x128xbf16>
    tpu.vector_store %arg4[%c0_15, %c1, %c0_16, %c0_17], %78 {strides = array<i32>} : memref<1x2x2x128xbf16, #tpu.memory_space<vmem>>, vector<1x1x2x128xbf16>,
    return
  }
  func.func @transform_0(%arg0: i32) -> (i32, i32, i32, i32, i32) {
    %c0_i32 = arith.constant 0 : i32
    %c0_i32_0 = arith.constant 0 : i32
    %c0_i32_1 = arith.constant 0 : i32
    %c0_i32_2 = arith.constant 0 : i32
    %c0_i32_3 = arith.constant 0 : i32
    return %arg0, %c0_i32, %c0_i32_0, %c0_i32_1, %c0_i32_2 : i32, i32, i32, i32, i32
  }
  func.func @transform_1(%arg0: i32) -> (i32, i32) {
    %c0_i32 = arith.constant 0 : i32
    %c0_i32_0 = arith.constant 0 : i32
    %c0_i32_1 = arith.constant 0 : i32
    return %c0_i32, %c0_i32_0 : i32, i32
  }
  func.func @transform_2(%arg0: i32) -> (i32, i32) {
    %c0_i32 = arith.constant 0 : i32
    %c0_i32_0 = arith.constant 0 : i32
    %c0_i32_1 = arith.constant 0 : i32
    return %c0_i32, %c0_i32_0 : i32, i32
  }
  func.func @transform_3(%arg0: i32) -> (i32, i32, i32, i32) {
    %c0_i32 = arith.constant 0 : i32
    %c0_i32_0 = arith.constant 0 : i32
    %c0_i32_1 = arith.constant 0 : i32
    %c0_i32_2 = arith.constant 0 : i32
    return %arg0, %c0_i32, %c0_i32_0, %c0_i32_1 : i32, i32, i32, i32
  }
}

module attributes {stable_mosaic.version = 11 : i64} {
  func.func @_gemm_bias_act_kernel(%arg0: i32, %arg1: memref<2x512xbf16, #tpu.memory_space<vmem>>, %arg2: memref<512x128xbf16, #tpu.memory_space<vmem>>, %arg3: memref<1x128xf32, #tpu.memory_space<vmem>>, %arg4: memref<2x128xf32, #tpu.memory_space<vmem>>) attributes {dimension_semantics = [#tpu.dimension_semantics<parallel>], iteration_bounds = array<i64: 1>, scalar_prefetch = 0 : i64, scratch_operands = 0 : i64, tpu.core_type = #tpu.core_type<tc>, window_params = [{transform_indices = @transform_0, window_bounds = array<i64: 2, 512>}, {pipeline_mode = #tpu.pipeline_mode<synchronous>, transform_indices = @transform_1, window_bounds = array<i64: 512, 128>}, {pipeline_mode = #tpu.pipeline_mode<synchronous>, transform_indices = @transform_2, window_bounds = array<i64: 1, 128>}, {transform_indices = @transform_3, window_bounds = array<i64: 2, 128>}]} {
    %c0 = arith.constant 0 : index
    %c0_0 = arith.constant 0 : index
    %0 = vector.load %arg1[%c0, %c0_0] : memref<2x512xbf16, #tpu.memory_space<vmem>>, vector<2x512xbf16>
    %c0_1 = arith.constant 0 : index
    %c0_2 = arith.constant 0 : index
    %1 = vector.load %arg2[%c0_1, %c0_2] : memref<512x128xbf16, #tpu.memory_space<vmem>>, vector<512x128xbf16>
    %cst = arith.constant dense<0.000000e+00> : vector<2x128xf32>
    %2 = tpu.matmul %0, %1, %cst {dimension_numbers = #tpu.dot_dimension_numbers<[1], [0], [0], [1], [0, 0, 1, 1], [], []>} : vector<2x512xbf16>, vector<512x128xbf16>, vector<2x128xf32> -> vector<2x128xf32>
    %c0_3 = arith.constant 0 : index
    %c0_4 = arith.constant 0 : index
    %3 = vector.load %arg3[%c0_3, %c0_4] : memref<1x128xf32, #tpu.memory_space<vmem>>, vector<1x128xf32>
    %4 = vector.broadcast %3 : vector<1x128xf32> to vector<2x128xf32>
    %5 = arith.addf %2, %4 : vector<2x128xf32>
    %c0_5 = arith.constant 0 : index
    %c0_6 = arith.constant 0 : index
    %6 = vector.load %arg4[%c0_5, %c0_6] : memref<2x128xf32, #tpu.memory_space<vmem>>, vector<2x128xf32>
    tpu.vector_store %arg4[%c0_5, %c0_6], %5 {strides = array<i32>} : memref<2x128xf32, #tpu.memory_space<vmem>>, vector<2x128xf32>,
    return
  }
  func.func @transform_0(%arg0: i32) -> (i32, i32) {
    %c0_i32 = arith.constant 0 : i32
    %c0_i32_0 = arith.constant 0 : i32
    return %arg0, %c0_i32 : i32, i32
  }
  func.func @transform_1(%arg0: i32) -> (i32, i32) {
    %c0_i32 = arith.constant 0 : i32
    %c0_i32_0 = arith.constant 0 : i32
    %c0_i32_1 = arith.constant 0 : i32
    return %c0_i32, %c0_i32_0 : i32, i32
  }
  func.func @transform_2(%arg0: i32) -> (i32, i32) {
    %c0_i32 = arith.constant 0 : i32
    %c0_i32_0 = arith.constant 0 : i32
    %c0_i32_1 = arith.constant 0 : i32
    return %c0_i32, %c0_i32_0 : i32, i32
  }
  func.func @transform_3(%arg0: i32) -> (i32, i32) {
    %c0_i32 = arith.constant 0 : i32
    %c0_i32_0 = arith.constant 0 : i32
    return %arg0, %c0_i32 : i32, i32
  }
}

</mosaic_0001>

<bundles_post_ra>
// kernel: _lambda_.4
= control target key start
LH: loop header
LB: loop body
LE: loop exit
PB: predicated region body
PF: predicated region fallthrough
CT: control target
= control target key end

     0   :  { %s1353_s12 = smov 0   ;;  %s1355_s13 = smov 0   ;;  %s1613_s0 = inlined_call_operand.vmem [shape: bf16[648,128], index: 0, kind: input, shape index: {}]   ;;  %s1614_s1 = inlined_call_operand.vmem [shape: bf16[128,128], index: 1, kind: input, shape index: {}]   ;;  %s1615_s2 = inlined_call_operand.vmem [shape: f32[1,128], index: 2, kind: input, shape index: {}]   ;;  %s1616_s3 = inlined_call_operand.vmem [shape: bf16[648,128], index: 3, kind: output, shape index: {}]  }
   0x1   :  { %s1357_s14 = smov 0  }
   0x2 LB: > { %s1366_s15 = sadd.s32 4294967295, %s1297_s14   ;;  %s1368_s16 = sadd.s32 1, %s1297_s14   ;;  %s1297_s14 = sphi %s1357_s14, %s1623_s14   ;;  %s1293_s13 = sphi %s1355_s13, %s1622_s13   ;;  %s1289_s12 = sphi %s1353_s12, %s1621_s12  }
   0x3   : > { %s85_s17 = ssub.s32 %s1297_s14, %s1368_s16  ;;  %s88_s18 = sadd.s32 1, %s1293_s13 }
   0x4   : > { %p86_p0 = scmp.eq.s32.totalorder %s85_s17, 0  ;;  %p98_p1 = scmp.ne.s32.totalorder %s1293_s13, %s1289_s12 }
   0x5   : > { %p99_p2 = scmp.eq.s32.totalorder %s1366_s15, 3  ;;  %p897_p3 = scmp.ge.s32.totalorder %s1297_s14, 1 }
   0x6   : > { %s1376_s19 = scalar_select %p86_p0, %s1293_s13, %s88_s18  }
   0x7   : > { %p1378_p4 = por %p99_p2, %p98_p1  ;;  %p146_p5 = scmp.lt.s32.totalorder %s1297_s14, 5 }
   0x9   : > { %p147_p6 = pnand %p897_p3, %p146_p5 }
   0xa   : > { %s1391_s25 = smul.u32 (!%p147_p6), 21, %s1366_s15  ;;  %s170_s24 = sand.u32 (!%p147_p6), 1, %s1289_s12  }
   0xb   : > { %150 = sbr.rel (%p147_p6) target bundleno = 360 (0x168), region = 32 }
   0xc   : > { %p178_p7 = scmp.lt.s32.totalorder (!%p147_p6), %s1391_s25, 80  ;;  %s1128_s26 = smul.u32 (!%p147_p6), 84, %s170_s24 }
   0xe   : > { %s1476_s12 = scalar_lea.vmem (!%p147_p6), [#allocation2], %s1128_s26  }
  0x10   : > { %v1220_v0 = vld [vmem:[%s1614_s1 + $0x38] sm:$0xff]   ;;  %v1331_v1 = vmov 0.0   ;;  %v1221_v2 = vld [vmem:[%s1614_s1 + $0x30] sm:$0xff]   ;;  %vm1332_vm0 = vmmov 0   ;;  %v1222_v3 = vld [vmem:[%s1614_s1 + $0x28] sm:$0xff]   ;;  %s179_s28 = scalar_select %p178_p7, %s1391_s25, 80 }
  0x11   : > { %1052 = vmatprep.subr.bf16.mxu0 %v1331_v1  ;;  %1112 = vmatprep.subr.bf16.mxu1 %v1331_v1  ;;  %v1223_v4 = vld [vmem:[%s1614_s1 + $0x20] sm:$0xff]   ;;  %v1224_v5 = vld [vmem:[%s1614_s1 + $0x18] sm:$0xff]   ;;  %v1225_v6 = vld [vmem:[%s1614_s1 + $0x10] sm:$0xff]   ;;  %s604_s27 = ssub.s32 (%p1378_p4), 81, %s1391_s25 }
  0x12   : > { %1053 = vmatpush3.bf16.msra.mxu0 %v1220_v0  ;;  %1120 = vmatpush3.bf16.msra.mxu1 %v1220_v0  ;;  %s898_s29 = sshll.u32 %s179_s28, 2  ;;  %v1226_v7 = vld [vmem:[%s1614_s1 + $0x8] sm:$0xff]   ;;  %v1227_v8 = vld [vmem:[%s1614_s1] sm:$0xff]   ;;  %s973_s28 = smul.u32 (%p1378_p4), 84, %s1366_s15 }
  0x13   : > { %1054 = vmatprep.subr.bf16.mxu0 %v1331_v1  ;;  %1113 = vmatprep.subr.bf16.mxu1 %v1331_v1  ;;  %s1409_s5 = scalar_lea.vmem %s1613_s0, %s898_s29  ;;  %v1468_v20 = vld [vmem:[%s1615_s2] ss:$0 sm:$0xff]  ;;  %p605_p8 = scmp.lt.s32.totalorder (%p1378_p4), %s604_s27, 21 }
  0x14   : > { %1068 = vmatprep.mubr.msk.bf16.mxu0 %vm1332_vm0, %v1331_v1  ;;  %1092 = vmatprep.mubr.msk.bf16.mxu1 %vm1332_vm0, %v1331_v1  ;;  %v1228_v9 = vld [vmem:[%s1409_s5] sm:$0xff]   ;;  %v1229_v10 = vld [vmem:[%s1409_s5 + $0x30] sm:$0xff]   ;;  %v1230_v11 = vld [vmem:[%s1409_s5 + $0x8] sm:$0xff]   ;;  %s1512_s4 = scalar_lea.vmem (%p1378_p4), %s1616_s3, %s973_s28  }
  0x15   : > { %v1231_v12 = vld [vmem:[%s1409_s5 + $0x38] sm:$0xff]   ;;  %v1232_v13 = vld [vmem:[%s1409_s5 + $0x10] sm:$0xff]   ;;  %v1233_v14 = vld [vmem:[%s1409_s5 + $0x40] sm:$0xff]  }
  0x16   : > { %1055 = vmatpush3.bf16.msra.mxu0 %v1221_v2  ;;  %1121 = vmatpush3.bf16.msra.mxu1 %v1221_v2  ;;  %v1234_v15 = vld [vmem:[%s1409_s5 + $0x18] sm:$0xff]   ;;  %v1235_v16 = vld [vmem:[%s1409_s5 + $0x48] sm:$0xff]   ;;  %v1236_v17 = vld [vmem:[%s1409_s5 + $0x20] sm:$0xff]  }
  0x17   : > { %1056 = vmatprep.subr.bf16.mxu0 %v1331_v1  ;;  %1114 = vmatprep.subr.bf16.mxu1 %v1331_v1  ;;  %v1237_v18 = vld [vmem:[%s1409_s5 + $0x50] ss:$0 sps:$4 sm:$0xff]   ;;  %v1238_v19 = vld [vmem:[%s1409_s5 + $0x28] sm:$0xff]  }
  0x1a   : > { %1057 = vmatpush3.bf16.msra.mxu0 %v1222_v3  ;;  %1122 = vmatpush3.bf16.msra.mxu1 %v1222_v3 }
  0x1b   : > { %1058 = vmatprep.subr.bf16.mxu0 %v1331_v1  ;;  %1115 = vmatprep.subr.bf16.mxu1 %v1331_v1 }
  0x1e   : > { %1059 = vmatpush3.bf16.msra.mxu0 %v1223_v4  ;;  %1123 = vmatpush3.bf16.msra.mxu1 %v1223_v4 }
  0x1f   : > { %1060 = vmatprep.subr.bf16.mxu0 %v1331_v1  ;;  %1116 = vmatprep.subr.bf16.mxu1 %v1331_v1 }
  0x22   : > { %1061 = vmatpush3.bf16.msra.mxu0 %v1224_v5  ;;  %1124 = vmatpush3.bf16.msra.mxu1 %v1224_v5 }
  0x23   : > { %1062 = vmatprep.subr.bf16.mxu0 %v1331_v1  ;;  %1117 = vmatprep.subr.bf16.mxu1 %v1331_v1 }
  0x26   : > { %1063 = vmatpush3.bf16.msra.mxu0 %v1225_v6  ;;  %1125 = vmatpush3.bf16.msra.mxu1 %v1225_v6 }
  0x27   : > { %1064 = vmatprep.subr.bf16.mxu0 %v1331_v1  ;;  %1118 = vmatprep.subr.bf16.mxu1 %v1331_v1 }
  0x2a   : > { %1065 = vmatpush3.bf16.msra.mxu0 %v1226_v7  ;;  %1126 = vmatpush3.bf16.msra.mxu1 %v1226_v7 }
  0x2b   : > { %1066 = vmatprep.subr.bf16.mxu0 %v1331_v1  ;;  %1119 = vmatprep.subr.bf16.mxu1 %v1331_v1 }
  0x2e   : > { %1067 = vmatpush3.bf16.msra.mxu0 %v1227_v8  ;;  %1127 = vmatpush3.bf16.msra.mxu1 %v1227_v8 }
  0x31   : > { %1069 = vmatmul.mubr.bf16.vlgmr.msra.gmra.mxu0 %v1228_v9  ;;  %1093 = vmatmul.mubr.bf16.vlgmr.msra.gmra.mxu1 %v1229_v10 }
  0x32   : > { %1072 = vmatprep.mubr.msk.bf16.mxu0 %vm1332_vm0, %v1331_v1  ;;  %1096 = vmatprep.mubr.msk.bf16.mxu1 %vm1332_vm0, %v1331_v1 }
  0x39   : > { %1073 = vmatmul.mubr.bf16.gmra.mxu0 %v1230_v11  ;;  %1097 = vmatmul.mubr.bf16.gmra.mxu1 %v1231_v12 }
  0x3a   : > { %1076 = vmatprep.mubr.msk.bf16.mxu0 %vm1332_vm0, %v1331_v1  ;;  %1100 = vmatprep.mubr.msk.bf16.mxu1 %vm1332_vm0, %v1331_v1 }
  0x41   : > { %1077 = vmatmul.mubr.bf16.gmra.mxu0 %v1232_v13  ;;  %1101 = vmatmul.mubr.bf16.gmra.mxu1 %v1233_v14 }
  0x42   : > { %1080 = vmatprep.mubr.msk.bf16.mxu0 %vm1332_vm0, %v1331_v1  ;;  %1104 = vmatprep.mubr.msk.bf16.mxu1 %vm1332_vm0, %v1331_v1 }
  0x49   : > { %1081 = vmatmul.mubr.bf16.gmra.mxu0 %v1234_v15  ;;  %1105 = vmatmul.mubr.bf16.gmra.mxu1 %v1235_v16 }
  0x4a   : > { %1084 = vmatprep.mubr.msk.bf16.mxu0 %vm1332_vm0, %v1331_v1  ;;  %1108 = vmatprep.mubr.msk.bf16.mxu1 %vm1332_vm0, %v1331_v1 }
  0x51   : > { %1085 = vmatmul.mubr.bf16.gmra.mxu0 %v1236_v17  ;;  %1109 = vmatmul.mubr.bf16.gmra.mxu1 %v1237_v18 }
  0x52   : > { %1088 = vmatprep.mubr.msk.bf16.mxu0 %vm1332_vm0, %v1331_v1 }
  0x59   : > { %1089 = vmatmul.mubr.bf16.gmra.mxu0 %v1238_v19 }
  0xf1   : > { %v383_v21 = vpop.f32.mrf.mxu0  ;;  %v431_v22 = vpop.f32.mrf.mxu1 }
  0xf2   : > { %v432_v23 = vadd.f32 %v1468_v20, %v431_v22  ;;  %v384_v26 = vadd.f32 %v1468_v20, %v383_v21 }
  0xf3   : > { %v1070_v24 = vpop.f32.mrf.mxu0  ;;  %v1094_v25 = vpop.f32.mrf.mxu1 }
  0xf4   : > { %v481_v30 = vmax.f32 %v432_v23, 0.0  ;;  %v469_v34 = vmax.f32 %v384_v26, 0.0 }
  0xf5   : > { %v386_v27 = vpop.f32.mrf.mxu0  ;;  %v434_v28 = vpop.f32.mrf.mxu1 }
  0xf6   : > { %v387_v29 = vadd.f32 %v1468_v20, %v386_v27  ;;  %v435_v31 = vadd.f32 %v1468_v20, %v434_v28 }
  0xf7   : > { %v1071_v32 = vpop.f32.mrf.mxu0  ;;  %v1095_v33 = vpop.f32.mrf.mxu1 }
  0xf8   : > { %v470_v35 = vmax.f32 %v387_v29, 0.0  ;;  %v482_v36 = vmax.f32 %v435_v31, 0.0 }
  0xf9   : > { %v391_v37 = vpop.f32.mrf.mxu0  ;;  %v439_v38 = vpop.f32.mrf.mxu1 }
  0xfa   : > { %v977_v39 = vpack.c.bf16 %v470_v35, %v469_v34  ;;  %v1007_v40 = vpack.c.bf16 %v482_v36, %v481_v30  ;;  %v440_v41 = vadd.f32 %v1468_v20, %v439_v38  ;;  %v392_v44 = vadd.f32 %v1468_v20, %v391_v37 }
  0xfb   : > { %v1074_v42 = vpop.f32.mrf.mxu0  ;;  %v1098_v43 = vpop.f32.mrf.mxu1 }
  0xfc   : > { %978 = vst [vmem:[%s1476_s12] sm:$0xff] %v977_v39   ;;  %1029 = vst [vmem:[%s1476_s12 + $0x30] sm:$0xff] %v1007_v40   ;;  %v483_v48 = vmax.f32 %v440_v41, 0.0  ;;  %v471_v52 = vmax.f32 %v392_v44, 0.0 }
  0xfd   : > { %v394_v45 = vpop.f32.mrf.mxu0  ;;  %v442_v46 = vpop.f32.mrf.mxu1 }
  0xfe   : > { %v395_v47 = vadd.f32 %v1468_v20, %v394_v45  ;;  %v443_v49 = vadd.f32 %v1468_v20, %v442_v46 }
  0xff   : > { %v1075_v50 = vpop.f32.mrf.mxu0  ;;  %v1099_v51 = vpop.f32.mrf.mxu1 }
 0x100   : > { %v472_v53 = vmax.f32 %v395_v47, 0.0  ;;  %v484_v54 = vmax.f32 %v443_v49, 0.0 }
 0x101   : > { %v399_v55 = vpop.f32.mrf.mxu0  ;;  %v447_v56 = vpop.f32.mrf.mxu1 }
 0x102   : > { %v982_v57 = vpack.c.bf16 %v472_v53, %v471_v52  ;;  %v1012_v58 = vpack.c.bf16 %v484_v54, %v483_v48  ;;  %v448_v59 = vadd.f32 %v1468_v20, %v447_v56  ;;  %v400_v62 = vadd.f32 %v1468_v20, %v399_v55 }
 0x103   : > { %v1078_v60 = vpop.f32.mrf.mxu0  ;;  %v1102_v61 = vpop.f32.mrf.mxu1 }
 0x104   : > { %1024 = vst [vmem:[%s1476_s12 + $0x8] sm:$0xff] %v982_v57   ;;  %1030 = vst [vmem:[%s1476_s12 + $0x38] sm:$0xff] %v1012_v58   ;;  %v485_v2 = vmax.f32 %v448_v59, 0.0  ;;  %v473_v6 = vmax.f32 %v400_v62, 0.0 }
 0x105   : > { %v402_v63 = vpop.f32.mrf.mxu0  ;;  %v450_v0 = vpop.f32.mrf.mxu1 }
 0x106   : > { %v403_v1 = vadd.f32 %v1468_v20, %v402_v63  ;;  %v451_v3 = vadd.f32 %v1468_v20, %v450_v0 }
 0x107   : > { %v1079_v4 = vpop.f32.mrf.mxu0  ;;  %v1103_v5 = vpop.f32.mrf.mxu1 }
 0x108   : > { %v474_v7 = vmax.f32 %v403_v1, 0.0  ;;  %v486_v8 = vmax.f32 %v451_v3, 0.0 }
 0x109   : > { %v407_v9 = vpop.f32.mrf.mxu0  ;;  %v455_v10 = vpop.f32.mrf.mxu1 }
 0x10a   : > { %v987_v11 = vpack.c.bf16 %v474_v7, %v473_v6  ;;  %v1017_v12 = vpack.c.bf16 %v486_v8, %v485_v2  ;;  %v456_v13 = vadd.f32 %v1468_v20, %v455_v10  ;;  %v408_v16 = vadd.f32 %v1468_v20, %v407_v9 }
 0x10b   : > { %v1082_v14 = vpop.f32.mrf.mxu0  ;;  %v1106_v15 = vpop.f32.mrf.mxu1 }
 0x10c   : > { %1025 = vst [vmem:[%s1476_s12 + $0x10] sm:$0xff] %v987_v11   ;;  %1031 = vst [vmem:[%s1476_s12 + $0x40] sm:$0xff] %v1017_v12   ;;  %v487_v21 = vmax.f32 %v456_v13, 0.0  ;;  %v475_v25 = vmax.f32 %v408_v16, 0.0 }
 0x10d   : > { %v410_v17 = vpop.f32.mrf.mxu0  ;;  %v458_v18 = vpop.f32.mrf.mxu1 }
 0x10e   : > { %v411_v19 = vadd.f32 %v1468_v20, %v410_v17  ;;  %v459_v22 = vadd.f32 %v1468_v20, %v458_v18 }
 0x10f   : > { %v1083_v23 = vpop.f32.mrf.mxu0  ;;  %v1107_v24 = vpop.f32.mrf.mxu1 }
 0x110   : > { %v476_v26 = vmax.f32 %v411_v19, 0.0  ;;  %v488_v27 = vmax.f32 %v459_v22, 0.0 }
 0x111   : > { %v415_v28 = vpop.f32.mrf.mxu0  ;;  %v463_v29 = vpop.f32.mrf.mxu1 }
 0x112   : > { %v992_v30 = vpack.c.bf16 %v476_v26, %v475_v25  ;;  %v1022_v31 = vpack.c.bf16 %v488_v27, %v487_v21  ;;  %v464_v32 = vadd.f32 %v1468_v20, %v463_v29  ;;  %v416_v35 = vadd.f32 %v1468_v20, %v415_v28 }
 0x113   : > { %v1086_v33 = vpop.f32.mrf.mxu0  ;;  %v1110_v34 = vpop.f32.mrf.mxu1 }
 0x114   : > { %1026 = vst [vmem:[%s1476_s12 + $0x18] sm:$0xff] %v992_v30   ;;  %1032 = vst [vmem:[%s1476_s12 + $0x48] sm:$0xff] %v1022_v31   ;;  %v489_v36 = vmax.f32 %v464_v32, 0.0  ;;  %v477_v43 = vmax.f32 %v416_v35, 0.0 }
 0x115   : > { %v418_v37 = vpop.f32.mrf.mxu0  ;;  %v466_v38 = vpop.f32.mrf.mxu1 }
 0x116   : > { %v419_v39 = vadd.f32 %v1468_v20, %v418_v37  ;;  %v972_v40 = vpack.c.bf16 %v489_v36, %v489_v36 }
 0x117   : > { %v1087_v41 = vpop.f32.mrf.mxu0  ;;  %v1111_v42 = vpop.f32.mrf.mxu1 }
 0x118   : > { %v478_v44 = vmax.f32 %v419_v39, 0.0  ;;  %595 = vst [vmem:[%s1476_s12 + $0x50] sm:$0xf] %v972_v40 }
 0x119   : > { %v423_v45 = vpop.f32.mrf.mxu0 }
 0x11a   : > { %v997_v46 = vpack.c.bf16 %v478_v44, %v477_v43  ;;  %v424_v48 = vadd.f32 %v1468_v20, %v423_v45 }
 0x11b   : > { %v1090_v47 = vpop.f32.mrf.mxu0 }
 0x11c   : > { %1027 = vst [vmem:[%s1476_s12 + $0x20] sm:$0xff] %v997_v46   ;;  %v479_v52 = vmax.f32 %v424_v48, 0.0 }
 0x11d   : > { %v426_v49 = vpop.f32.mrf.mxu0 }
 0x11e   : > { %v427_v50 = vadd.f32 %v1468_v20, %v426_v49 }
 0x11f   : > { %v1091_v51 = vpop.f32.mrf.mxu0 }
 0x120   : > { %v480_v53 = vmax.f32 %v427_v50, 0.0  ;;  %602 = sbr.rel (!%p1378_p4) target bundleno = 360 (0x168), region = 36 }
 0x122   : > { %v1002_v54 = vpack.c.bf16 %v480_v53, %v479_v52 }
 0x124   : > { %1028 = vst [vmem:[%s1476_s12 + $0x28] sm:$0xff] %v1002_v54  }
 0x125   : > { %s1625_s27 = smov (!%p605_p8, %s604_s27), 21 }
 0x126   : > { %s940_s5 = sshll.u32 %s1625_s27, 6 }
 0x127   : > { %p943_p9 = scmp.eq.s32.totalorder %s940_s5, 0 }
 0x128   : > { %1239 = sdivrem.u32 (!%p943_p9), %s1625_s27, 21 }
 0x129   : > { %613 = sbr.rel (%p943_p9) target bundleno = 360 (0x168), region = 40 }
 0x131   : > { %s1518_s20 = spop.drf %1239 }
 0x132   : > { %p944_p10 = scmp.le.s32.totalorder %s1518_s20, 0 }
 0x133   : > { %s1618_s15 = smov (!%p944_p10), %s1512_s4  ;;  %s1619_s25 = smov (!%p944_p10), %s1476_s12 }
 0x134   : > { %850 = sbr.rel (%p944_p10) target bundleno = 335 (0x14f), region = 112  ;;  %s1527_s6 = smov (!%p944_p10), 0  }
 0x135   : > { %s1529_s7 = smov (!%p944_p10), 0  }
 0x139 LB: >> { %v631_v20 = vld [vmem:[%s1305_s25] sm:$0xf]  ;;  %v633_v55 = vld [vmem:[%s1305_s25 + $0x4] sm:$0xf]  ;;  %v635_v56 = vld [vmem:[%s1305_s25 + $0x8] sm:$0xf]  ;;  %s1313_s7 = sphi %s1529_s7, %s625_s7   ;;  %s1309_s6 = sphi %s1527_s6, %s1620_s6   ;;  %s1305_s25 = sphi %s1619_s25, %s678_s25   ;;  %s1301_s15 = sphi %s1618_s15, %s679_s15  }
 0x13a   : >> { %632 = vst [vmem:[%s1301_s15] sm:$0xf] %v631_v20  ;;  %634 = vst [vmem:[%s1301_s15 + $0x4] sm:$0xf] %v633_v55  ;;  %v637_v57 = vld [vmem:[%s1305_s25 + $0xc] sm:$0xf]  ;;  %s673_s8 = sadd.s32 1, %s1309_s6 }
 0x13b   : >> { %636 = vst [vmem:[%s1301_s15 + $0x8] sm:$0xf] %v635_v56  ;;  %v639_v58 = vld [vmem:[%s1305_s25 + $0x10] sm:$0xf]  ;;  %v641_v59 = vld [vmem:[%s1305_s25 + $0x14] sm:$0xf]  ;;  %p674_p11 = scmp.ge.s32.totalorder %s673_s8, %s1518_s20 }
 0x13c   : >> { %638 = vst [vmem:[%s1301_s15 + $0xc] sm:$0xf] %v637_v57  ;;  %640 = vst [vmem:[%s1301_s15 + $0x10] sm:$0xf] %v639_v58  ;;  %v643_v60 = vld [vmem:[%s1305_s25 + $0x18] sm:$0xf] }
 0x13d   : >> { %642 = vst [vmem:[%s1301_s15 + $0x14] sm:$0xf] %v641_v59  ;;  %v645_v61 = vld [vmem:[%s1305_s25 + $0x1c] sm:$0xf]  ;;  %v647_v62 = vld [vmem:[%s1305_s25 + $0x20] sm:$0xf] }
 0x13e   : >> { %644 = vst [vmem:[%s1301_s15 + $0x18] sm:$0xf] %v643_v60  ;;  %646 = vst [vmem:[%s1301_s15 + $0x1c] sm:$0xf] %v645_v61  ;;  %v649_v63 = vld [vmem:[%s1305_s25 + $0x24] sm:$0xf] }
 0x13f   : >> { %648 = vst [vmem:[%s1301_s15 + $0x20] sm:$0xf] %v647_v62  ;;  %v651_v0 = vld [vmem:[%s1305_s25 + $0x28] sm:$0xf]  ;;  %v653_v1 = vld [vmem:[%s1305_s25 + $0x2c] sm:$0xf] }
 0x140   : >> { %650 = vst [vmem:[%s1301_s15 + $0x24] sm:$0xf] %v649_v63  ;;  %652 = vst [vmem:[%s1301_s15 + $0x28] sm:$0xf] %v651_v0  ;;  %v655_v2 = vld [vmem:[%s1305_s25 + $0x30] sm:$0xf] }
 0x141   : >> { %654 = vst [vmem:[%s1301_s15 + $0x2c] sm:$0xf] %v653_v1  ;;  %v657_v3 = vld [vmem:[%s1305_s25 + $0x34] sm:$0xf]  ;;  %v659_v4 = vld [vmem:[%s1305_s25 + $0x38] sm:$0xf] }
 0x142   : >> { %656 = vst [vmem:[%s1301_s15 + $0x30] sm:$0xf] %v655_v2  ;;  %658 = vst [vmem:[%s1301_s15 + $0x34] sm:$0xf] %v657_v3  ;;  %v661_v5 = vld [vmem:[%s1305_s25 + $0x3c] sm:$0xf] }
 0x143   : >> { %660 = vst [vmem:[%s1301_s15 + $0x38] sm:$0xf] %v659_v4  ;;  %v663_v6 = vld [vmem:[%s1305_s25 + $0x40] sm:$0xf]  ;;  %v665_v7 = vld [vmem:[%s1305_s25 + $0x44] sm:$0xf] }
 0x144   : >> { %662 = vst [vmem:[%s1301_s15 + $0x3c] sm:$0xf] %v661_v5  ;;  %664 = vst [vmem:[%s1301_s15 + $0x40] sm:$0xf] %v663_v6  ;;  %v667_v8 = vld [vmem:[%s1305_s25 + $0x48] sm:$0xf] }
 0x145   : >> { %666 = vst [vmem:[%s1301_s15 + $0x44] sm:$0xf] %v665_v7  ;;  %v669_v9 = vld [vmem:[%s1305_s25 + $0x4c] sm:$0xf]  ;;  %v671_v10 = vld [vmem:[%s1305_s25 + $0x50] sm:$0xf] }
 0x146   : >> { %668 = vst [vmem:[%s1301_s15 + $0x48] sm:$0xf] %v667_v8  ;;  %670 = vst [vmem:[%s1301_s15 + $0x4c] sm:$0xf] %v669_v9  ;;  %s1627_s8 = smov (%p674_p11, %s673_s8), 0  ;;  %s625_s7 = sadd.s32 1, %s1313_s7  }
 0x147   : >> { %672 = vst [vmem:[%s1301_s15 + $0x50] sm:$0xf] %v671_v10  ;;  %s676_s9 = smul.u32 84, %s1627_s8  ;;  %p624_p12 = scmp.ge.s32.totalorder %s625_s7, %s1518_s20 }
 0x148   : >> { %s1620_s6 = smov %s1627_s8 }
 0x149   : >> { %s678_s25 = scalar_lea.vmem %s1476_s12, %s676_s9 [#allocation2]   ;;  %s679_s15 = scalar_lea.vmem %s1512_s4, %s676_s9  }
 0x14a   : > { %627 = sbr.rel (!%p624_p12) target bundleno = 313 (0x139), region = 118 }
 0x14f PF: > { %1241 = sdivrem.u32 %s1625_s27, 21 }
 0x150   : > { %s945_s10 = smul.u32 84, %s1518_s20 }
 0x152   : > { %s684_s11 = scalar_lea.vmem %s1476_s12, %s945_s10 [#allocation2]   ;;  %s686_s14 = scalar_lea.vmem %s1512_s4, %s945_s10  }
 0x158   : > { %s1242_s17 = spop.drf %1241 }
 0x159   : > { %p947_p13 = scmp.le.s32.totalorder %s1242_s17, 0 }
 0x15a   : > { %s1315_s18 = smov (!%p947_p13), %s686_s14   ;;  %s1319_s21 = smov (!%p947_p13), %s684_s11  }
 0x15b   : > { %864 = sbr.rel (%p947_p13) target bundleno = 360 (0x168), region = 123  ;;  %s1323_s22 = smov (!%p947_p13), 0  }
 0x15c   : > { %s1327_s23 = smov (!%p947_p13), 0  }
 0x160 LB: >> { %v696_v11 = vld [vmem:[%s1321_s21] sm:$0xf]  ;;  %s698_s24 = sadd.s32 1, %s1325_s22  ;;  %s690_s23 = sadd.s32 1, %s1329_s23   ;;  %s1329_s23 = sphi %s1327_s23, %s690_s23   ;;  %s1325_s22 = sphi %s1323_s22, %s1324_s22   ;;  %s1321_s21 = sphi %s1319_s21, %s703_s21   ;;  %s1317_s18 = sphi %s1315_s18, %s704_s18  }
 0x161   : >> { %697 = vst [vmem:[%s1317_s18] sm:$0xf] %v696_v11  ;;  %p699_p0 = scmp.ge.s32.totalorder %s698_s24, %s1242_s17  ;;  %p689_p1 = scmp.ge.s32.totalorder %s690_s23, %s1242_s17 }
 0x163   : >> { %s1629_s24 = smov (%p699_p0, %s698_s24), 0  ;;  %692 = sbr.rel (!%p689_p1) target bundleno = 352 (0x160), region = 129 }
 0x164   : >> { %s948_s26 = sshll.u32 %s1629_s24, 2  ;;  %s1324_s22 = smov %s1629_s24  }
 0x165   : >> { %s703_s21 = scalar_lea.vmem %s684_s11, %s948_s26 [#allocation2]   ;;  %s704_s18 = scalar_lea.vmem %s686_s14, %s948_s26  }
 0x168 PF: > { %p10_p2 = scmp.ge.s32.totalorder %s1368_s16, 6   ;;  %s1621_s12 = smov %s1293_s13 }
 0x169   : > { %s1622_s13 = smov %s1376_s19  ;;  %s1623_s14 = smov %s1368_s16 }
 0x16a   :  { %12 = sbr.rel (!%p10_p2) target bundleno = 2 (0x2), region = 140 }

// kernel: _lambda_.7
= control target key start
LH: loop header
LB: loop body
LE: loop exit
PB: predicated region body
PF: predicated region fallthrough
CT: control target
= control target key end

     0   :  { %v100_v30 = vlaneseq  ;;  %v538_v34 = vmov 1966171168   ;;  %s665_s0 = inlined_call_operand.vmem [shape: bf16[2,512], index: 0, kind: input, shape index: {}]   ;;  %s666_s1 = inlined_call_operand.vmem [shape: bf16[512,128], index: 1, kind: input, shape index: {}]   ;;  %s667_s2 = inlined_call_operand.vmem [shape: f32[1,128], index: 2, kind: input, shape index: {}]   ;;  %s668_s3 = inlined_call_operand.hbm [shape: f32[2,128], index: 3, kind: output, shape index: {}]  }
   0x1   :  { %v484_v0 = vld [vmem:[%s666_s1 + $0x78] sm:$0xff]   ;;  %v488_v4 = vld [vmem:[%s666_s1 + $0x70] sm:$0xff]   ;;  %v492_v8 = vld [vmem:[%s666_s1 + $0x68] sm:$0xff]   ;;  %v98_v35 = vunpack.c.l.s4 %v538_v34 }
   0x2   :  { %v485_v1 = vld [vmem:[%s666_s1 + $0xf8] sm:$0xff]   ;;  %438 = vmatprep.subr.bf16.mxu0 %v484_v0  ;;  %v489_v5 = vld [vmem:[%s666_s1 + $0xf0] sm:$0xff]   ;;  %v493_v9 = vld [vmem:[%s666_s1 + $0xe8] sm:$0xff]   ;;  %v101_v36 = vshrl.u32 %v100_v30, 7 }
   0x3   :  { %v486_v2 = vld [vmem:[%s666_s1 + $0x38] sm:$0xff]   ;;  %460 = vmatprep.subr.bf16.mxu1 %v485_v1  ;;  %v490_v6 = vld [vmem:[%s666_s1 + $0x30] sm:$0xff]   ;;  %v494_v10 = vld [vmem:[%s666_s1 + $0x28] sm:$0xff]  }
   0x4   :  { %v487_v3 = vld [vmem:[%s666_s1 + $0xb8] sm:$0xff]   ;;  %439 = vmatpush3.bf16.msra.mxu0 %v486_v2  ;;  %v491_v7 = vld [vmem:[%s666_s1 + $0xb0] sm:$0xff]   ;;  %v495_v11 = vld [vmem:[%s666_s1 + $0xa8] sm:$0xff]  }
   0x5   :  { %461 = vmatpush3.bf16.msra.mxu1 %v487_v3  ;;  %440 = vmatprep.subr.bf16.mxu0 %v488_v4  ;;  %v496_v12 = vld [vmem:[%s666_s1 + $0x60] sm:$0xff]   ;;  %v500_v16 = vld [vmem:[%s666_s1 + $0x58] sm:$0xff]   ;;  %v504_v20 = vld [vmem:[%s666_s1 + $0x50] sm:$0xff]  }
   0x6   :  { %462 = vmatprep.subr.bf16.mxu1 %v489_v5  ;;  %v497_v13 = vld [vmem:[%s666_s1 + $0xe0] sm:$0xff]   ;;  %v501_v17 = vld [vmem:[%s666_s1 + $0xd8] sm:$0xff]   ;;  %v505_v21 = vld [vmem:[%s666_s1 + $0xd0] sm:$0xff]  }
   0x7   :  { %v498_v14 = vld [vmem:[%s666_s1 + $0x20] sm:$0xff]   ;;  %v502_v18 = vld [vmem:[%s666_s1 + $0x18] sm:$0xff]   ;;  %v506_v22 = vld [vmem:[%s666_s1 + $0x10] sm:$0xff]  }
   0x8   :  { %441 = vmatpush3.bf16.msra.mxu0 %v490_v6  ;;  %v499_v15 = vld [vmem:[%s666_s1 + $0xa0] sm:$0xff]   ;;  %v503_v19 = vld [vmem:[%s666_s1 + $0x98] sm:$0xff]   ;;  %v507_v23 = vld [vmem:[%s666_s1 + $0x90] sm:$0xff]  }
   0x9   :  { %463 = vmatpush3.bf16.msra.mxu1 %v491_v7  ;;  %442 = vmatprep.subr.bf16.mxu0 %v492_v8  ;;  %v508_v24 = vld [vmem:[%s666_s1 + $0x48] sm:$0xff]   ;;  %v512_v28 = vld [vmem:[%s666_s1 + $0x40] sm:$0xff]  }
   0xa   :  { %464 = vmatprep.subr.bf16.mxu1 %v493_v9  ;;  %v509_v25 = vld [vmem:[%s666_s1 + $0xc8] sm:$0xff]   ;;  %v513_v29 = vld [vmem:[%s666_s1 + $0xc0] sm:$0xff]  }
   0xb   :  { %v510_v26 = vld [vmem:[%s666_s1 + $0x8] sm:$0xff]   ;;  %v514_v31 = vld [vmem:[%s666_s1] sm:$0xff]  }
   0xc   :  { %443 = vmatpush3.bf16.msra.mxu0 %v494_v10  ;;  %v511_v27 = vld [vmem:[%s666_s1 + $0x88] sm:$0xff]   ;;  %v515_v32 = vld [vmem:[%s666_s1 + $0x80] sm:$0xff]  }
   0xd   :  { %465 = vmatpush3.bf16.msra.mxu1 %v495_v11  ;;  %444 = vmatprep.subr.bf16.mxu0 %v496_v12  ;;  %v405_v33 = vld.sshfl [vmem:[%s665_s0] sm:$0x33 pattern:$0x75316420] }
   0xe   :  { %466 = vmatprep.subr.bf16.mxu1 %v497_v13 }
  0x10   :  { %445 = vmatpush3.bf16.msra.mxu0 %v498_v14 }
  0x11   :  { %467 = vmatpush3.bf16.msra.mxu1 %v499_v15  ;;  %446 = vmatprep.subr.bf16.mxu0 %v500_v16 }
  0x12   :  { %468 = vmatprep.subr.bf16.mxu1 %v501_v17 }
  0x14   :  { %447 = vmatpush3.bf16.msra.mxu0 %v502_v18 }
  0x15   :  { %469 = vmatpush3.bf16.msra.mxu1 %v503_v19  ;;  %448 = vmatprep.subr.bf16.mxu0 %v504_v20 }
  0x16   :  { %470 = vmatprep.subr.bf16.mxu1 %v505_v21 }
  0x18   :  { %449 = vmatpush3.bf16.msra.mxu0 %v506_v22 }
  0x19   :  { %471 = vmatpush3.bf16.msra.mxu1 %v507_v23  ;;  %450 = vmatprep.subr.bf16.mxu0 %v508_v24 }
  0x1a   :  { %472 = vmatprep.subr.bf16.mxu1 %v509_v25 }
  0x1c   :  { %451 = vmatpush3.bf16.msra.mxu0 %v510_v26 }
  0x1d   :  { %473 = vmatpush3.bf16.msra.mxu1 %v511_v27  ;;  %452 = vmatprep.subr.bf16.mxu0 %v512_v28 }
  0x1e   :  { %474 = vmatprep.subr.bf16.mxu1 %v513_v29 }
  0x20   :  { %453 = vmatpush3.bf16.msra.mxu0 %v514_v31 }
  0x21   :  { %475 = vmatpush3.bf16.msra.mxu1 %v515_v32 }
  0x22   :  { %8 = vsyncpa [#allocation3], 0  ;;  %v96_v37 = vcombine.high %v405_v33, %v405_v33  ;;  %v99_v38 = vunpack.c.0.s8 %v98_v35  ;;  %v404_v46 = vld [vmem:[%s667_s2] ss:$0 sm:$0xff]  ;;  %s539_s24 = smov [#allocation2]  }
  0x23   :  { %s396_s25 = sshll.u32 %s539_s24, 4  ;;  %s397_s25 = int_to_ptr.vmem [resolvable:$true] %s396_s25 }
  0x24   :  { %v102_v39 = vsub.s32 %v99_v38, %v101_v36  ;;  %s516_s26 = scalar_lea.vmem %s397_s25, 32  ;;  %p521_p1 = scmp.lt.s32.totalorder %s397_s25, %s397_s25 }
  0x25   :  { %p517_p0 = scmp.ne.s32.totalorder %s397_s25, %s516_s26  ;;  %p522_p2 = scmp.lt.s32.totalorder %s516_s26, %s516_s26 }
  0x26   :  { %v110_v40 = vrot.slane %v96_v37, %v102_v39  ;;  %v103_v41 = vrot.slane %v405_v33, %v102_v39 }
  0x27   :  { %p523_p3 = por %p522_p2, %p521_p1 }
  0x28   :  { %341 = vmatprep.mubr.bf16.mxu0 %v110_v40  ;;  %v112_v42 = vcombine.high %v110_v40, %v110_v40  ;;  %v111_v43 = vcombine.high %v103_v41, %v103_v41 }
  0x29   :  { %342 = vmatmul.mubr.bf16.vlgmr.msra.gmra.mxu0 %v103_v41  ;;  %p524_p4 = pnand %p523_p3, %p517_p0 }
  0x2a   :  { %381 = vmatprep.mubr.bf16.mxu1 %v112_v42 }
  0x2b   :  { %382 = vmatmul.mubr.bf16.vlgmr.msra.gmra.mxu1 %v111_v43 }
  0xe9   :  { %v454_v44 = vpop.f32.mrf.mxu0 }
  0xeb   :  { %v476_v45 = vpop.f32.mrf.mxu1  ;;  %v455_v47 = vpop.f32.mrf.mxu0 }
  0xec   :  { %v456_v48 = vadd.f32 %v455_v47, %v454_v44 }
  0xed   :  { %v477_v49 = vpop.f32.mrf.mxu1  ;;  %v457_v50 = vpop.f32.mrf.mxu0 }
  0xee   :  { %v344_v51 = vadd.f32 %v456_v48, %v404_v46  ;;  %v478_v52 = vadd.f32 %v477_v49, %v476_v45 }
  0xef   :  { %v479_v53 = vpop.f32.mrf.mxu1  ;;  %v458_v54 = vpop.f32.mrf.mxu0 }
  0xf0   :  { %v384_v55 = vadd.f32 %v478_v52, %v344_v51 }
  0xf1   :  { %v480_v56 = vpop.f32.mrf.mxu1 }
  0xf2   :  { %389 = vst [vmem:[#allocation2] sm:$0x3] %v384_v55 }
  0xf3   :  { %527 = shalt.err (!%p524_p4)
}
  0xf4   :  { %399 = dma.vmem_to_hbm [thread:$0]  %s397_s25, 32, %s668_s3, [#allocation3]  }
  0xf5   :  { %536 = dma.done.wait [#allocation3], 32  }
  0xf6   :  { %537 = vsyncadd [#allocation3], 4294967264 }
  0xf7   :  { %403 = vsyncpa [#allocation3], 1 }

// kernel: _lambda_.6
= control target key start
LH: loop header
LB: loop body
LE: loop exit
PB: predicated region body
PF: predicated region fallthrough
CT: control target
= control target key end

     0   :  { %s4304_s12 = smov 0   ;;  %s5764_s0 = inlined_call_operand.vmem [shape: bf16[2,4,4,4,128], index: 0, kind: input, shape index: {}]   ;;  %s5765_s1 = inlined_call_operand.vmem [shape: bf16[3200,128], index: 1, kind: input, shape index: {}]   ;;  %s5766_s2 = inlined_call_operand.vmem [shape: f32[1,128], index: 2, kind: input, shape index: {}]   ;;  %s5767_s3 = inlined_call_operand.vmem [shape: bf16[2,2,2,128], index: 3, kind: output, shape index: {}]  }
   0x1 LB: > { %s3129_s13 = sadd.s32 4294967295, %s4279_s12   ;;  %p3133_p0 = scmp.ge.s32.totalorder %s4279_s12, 1  ;;  %s4279_s12 = sphi %s4304_s12, %s13_s12  }
   0x2   : > { %p137_p1 = scmp.lt.s32.totalorder %s4279_s12, 3 }
   0x4   : > { %p138_p2 = pnand %p3133_p0, %p137_p1 }
   0x6   : > { %141 = sbr.rel (%p138_p2) target bundleno = 640 (0x280), region = 32 }
   0xb   : > { %v3939_v0 = vld [vmem:[%s5765_s1 + $0x78] sm:$0xff]   ;;  %v3943_v4 = vld [vmem:[%s5765_s1 + $0x70] sm:$0xff]   ;;  %v3947_v8 = vld [vmem:[%s5765_s1 + $0x68] sm:$0xff]   ;;  %p160_p3 = scmp.lt.s32.totalorder %s3129_s13, 1  ;;  %v189_v30 = vlaneseq  ;;  %v4281_v35 = vmov 1983009808  }
   0xc   : > { %v3940_v1 = vld [vmem:[%s5765_s1 + $0xf8] sm:$0xff]   ;;  %3342 = vmatprep.subr.bf16.mxu0 %v3939_v0  ;;  %v3944_v5 = vld [vmem:[%s5765_s1 + $0xf0] sm:$0xff]   ;;  %v3948_v9 = vld [vmem:[%s5765_s1 + $0xe8] sm:$0xff]   ;;  %v187_v36 = vunpack.c.l.s4 %v4281_v35  ;;  %vm4283_vm0 = vmmov 0  }
   0xd   : > { %v3941_v2 = vld [vmem:[%s5765_s1 + $0x38] sm:$0xff]   ;;  %3364 = vmatprep.subr.bf16.mxu1 %v3940_v1  ;;  %v3945_v6 = vld [vmem:[%s5765_s1 + $0x30] sm:$0xff]   ;;  %v3949_v10 = vld [vmem:[%s5765_s1 + $0x28] sm:$0xff]   ;;  %s5856_s13 = smov (!%p160_p3, %s3129_s13), 1  ;;  %v190_v37 = vshrl.u32 %v189_v30, 7 }
   0xe   : > { %v3942_v3 = vld [vmem:[%s5765_s1 + $0xb8] sm:$0xff]   ;;  %3343 = vmatpush3.bf16.msra.mxu0 %v3941_v2  ;;  %v3946_v7 = vld [vmem:[%s5765_s1 + $0xb0] sm:$0xff]   ;;  %v3950_v11 = vld [vmem:[%s5765_s1 + $0xa8] sm:$0xff]   ;;  %s3341_s18 = sshll.u32 %s5856_s13, 5  ;;  %v188_v40 = vunpack.c.0.s8 %v187_v36 }
   0xf   : > { %3365 = vmatpush3.bf16.msra.mxu1 %v3942_v3  ;;  %3344 = vmatprep.subr.bf16.mxu0 %v3943_v4  ;;  %v3951_v12 = vld [vmem:[%s5765_s1 + $0x60] sm:$0xff]   ;;  %v3955_v16 = vld [vmem:[%s5765_s1 + $0x58] sm:$0xff]   ;;  %v3959_v20 = vld [vmem:[%s5765_s1 + $0x50] sm:$0xff]   ;;  %s4412_s27 = scalar_lea.vmem %s5764_s0, %s3341_s18 }
  0x10   : > { %3366 = vmatprep.subr.bf16.mxu1 %v3944_v5  ;;  %v3952_v13 = vld [vmem:[%s5765_s1 + $0xe0] sm:$0xff]   ;;  %v3956_v17 = vld [vmem:[%s5765_s1 + $0xd8] sm:$0xff]   ;;  %v3960_v21 = vld [vmem:[%s5765_s1 + $0xd0] sm:$0xff]   ;;  %v4431_v42 = vsub.s32 %v188_v40, %v190_v37 }
  0x11   : > { %v3953_v14 = vld [vmem:[%s5765_s1 + $0x20] sm:$0xff]   ;;  %v3957_v18 = vld [vmem:[%s5765_s1 + $0x18] sm:$0xff]   ;;  %v3961_v22 = vld [vmem:[%s5765_s1 + $0x10] sm:$0xff]  }
  0x12   : > { %3345 = vmatpush3.bf16.msra.mxu0 %v3945_v6  ;;  %v3954_v15 = vld [vmem:[%s5765_s1 + $0xa0] sm:$0xff]   ;;  %v3958_v19 = vld [vmem:[%s5765_s1 + $0x98] sm:$0xff]   ;;  %v3962_v23 = vld [vmem:[%s5765_s1 + $0x90] sm:$0xff]  }
  0x13   : > { %3367 = vmatpush3.bf16.msra.mxu1 %v3946_v7  ;;  %3346 = vmatprep.subr.bf16.mxu0 %v3947_v8  ;;  %v3963_v24 = vld [vmem:[%s5765_s1 + $0x48] sm:$0xff]   ;;  %v3967_v28 = vld [vmem:[%s5765_s1 + $0x40] sm:$0xff]   ;;  %v3971_v38 = vld [vmem:[%s5765_s1 + $0x178] sm:$0xff]  }
  0x14   : > { %3368 = vmatprep.subr.bf16.mxu1 %v3948_v9  ;;  %v3964_v25 = vld [vmem:[%s5765_s1 + $0xc8] sm:$0xff]   ;;  %v3968_v29 = vld [vmem:[%s5765_s1 + $0xc0] sm:$0xff]   ;;  %v3972_v39 = vld [vmem:[%s5765_s1 + $0x1f8] sm:$0xff]  }
  0x15   : > { %v3965_v26 = vld [vmem:[%s5765_s1 + $0x8] sm:$0xff]   ;;  %v3969_v31 = vld [vmem:[%s5765_s1] sm:$0xff]   ;;  %v3973_v41 = vld [vmem:[%s5765_s1 + $0x138] sm:$0xff]  }
  0x16   : > { %3347 = vmatpush3.bf16.msra.mxu0 %v3949_v10  ;;  %v3966_v27 = vld [vmem:[%s5765_s1 + $0x88] sm:$0xff]   ;;  %v3970_v32 = vld [vmem:[%s5765_s1 + $0x80] sm:$0xff]   ;;  %v3975_v43 = vld [vmem:[%s5765_s1 + $0x170] sm:$0xff]  }
  0x17   : > { %3369 = vmatpush3.bf16.msra.mxu1 %v3950_v11  ;;  %3348 = vmatprep.subr.bf16.mxu0 %v3951_v12  ;;  %v174_v33 = vld [vmem:[%s4412_s27 + $0x8] sm:$0x3]  ;;  %v170_v34 = vld [vmem:[%s4412_s27] sm:$0x3]  ;;  %v3977_v46 = vld [vmem:[%s5765_s1 + $0x130] sm:$0xff]  }
  0x18   : > { %3370 = vmatprep.subr.bf16.mxu1 %v3952_v13  ;;  %2061 = vmatprep.mubr.bf16.mxu0 %v174_v33  ;;  %v224_v44 = vrot.slane %v174_v33, %v4431_v42  ;;  %v4438_v45 = vrot.slane %v170_v34, %v4431_v42  ;;  %v3979_v51 = vld [vmem:[%s5765_s1 + $0x168] sm:$0xff]   ;;  %v3974_v53 = vld [vmem:[%s5765_s1 + $0x1b8] sm:$0xff]   ;;  %v3976_v57 = vld [vmem:[%s5765_s1 + $0x1f0] sm:$0xff]  }
  0x19   : > { %v3981_v55 = vld [vmem:[%s5765_s1 + $0x128] sm:$0xff]   ;;  %v3983_v59 = vld [vmem:[%s5765_s1 + $0x160] sm:$0xff]   ;;  %v3978_v60 = vld [vmem:[%s5765_s1 + $0x1b0] sm:$0xff]  }
  0x1a   : > { %3349 = vmatpush3.bf16.msra.mxu0 %v3953_v14  ;;  %v233_v47 = vshrl.u32 %v224_v44, 16  ;;  %v235_v48 = vshll.u32 %v224_v44, 16  ;;  %v201_v49 = vshrl.u32 %v4438_v45, 16  ;;  %v203_v50 = vshll.u32 %v4438_v45, 16  ;;  %v3985_v61 = vld [vmem:[%s5765_s1 + $0x120] sm:$0xff]   ;;  %v3980_v62 = vld [vmem:[%s5765_s1 + $0x1e8] sm:$0xff]  }
  0x1b   : > { %3371 = vmatpush3.bf16.msra.mxu1 %v3954_v15  ;;  %3350 = vmatprep.subr.bf16.mxu0 %v3955_v16  ;;  %v3987_v63 = vld [vmem:[%s5765_s1 + $0x158] sm:$0xff]   ;;  %v3982_v0 = vld [vmem:[%s5765_s1 + $0x1a8] sm:$0xff]   ;;  %v3984_v2 = vld [vmem:[%s5765_s1 + $0x1e0] sm:$0xff]   ;;  %v248_v14 = vrot.slane %v4438_v45, 1 }
  0x1c   : > { %3372 = vmatprep.subr.bf16.mxu1 %v3956_v17  ;;  %v237_v52 = vrot.slane %v235_v48, 1  ;;  %v205_v54 = vrot.slane %v203_v50, 1  ;;  %v3989_v1 = vld [vmem:[%s5765_s1 + $0x118] sm:$0xff]   ;;  %v3991_v3 = vld [vmem:[%s5765_s1 + $0x150] sm:$0xff]   ;;  %v3986_v4 = vld [vmem:[%s5765_s1 + $0x1a0] sm:$0xff]  }
  0x1d   : > { %v3993_v5 = vld [vmem:[%s5765_s1 + $0x110] sm:$0xff]   ;;  %v3988_v6 = vld [vmem:[%s5765_s1 + $0x1d8] sm:$0xff]   ;;  %v3995_v7 = vld [vmem:[%s5765_s1 + $0x148] sm:$0xff]  }
  0x1e   : > { %3351 = vmatpush3.bf16.msra.mxu0 %v3957_v18  ;;  %v238_v56 = vor.u32 %v237_v52, %v233_v47  ;;  %v206_v58 = vor.u32 %v205_v54, %v201_v49  ;;  %v3990_v8 = vld [vmem:[%s5765_s1 + $0x198] sm:$0xff]   ;;  %v3997_v9 = vld [vmem:[%s5765_s1 + $0x108] sm:$0xff]   ;;  %v3992_v10 = vld [vmem:[%s5765_s1 + $0x1d0] sm:$0xff]  }
  0x1f   : > { %3373 = vmatpush3.bf16.msra.mxu1 %v3958_v19  ;;  %3352 = vmatprep.subr.bf16.mxu0 %v3959_v20  ;;  %v3999_v11 = vld [vmem:[%s5765_s1 + $0x140] sm:$0xff]   ;;  %v3994_v12 = vld [vmem:[%s5765_s1 + $0x190] sm:$0xff]   ;;  %v3996_v15 = vld [vmem:[%s5765_s1 + $0x1c8] sm:$0xff]  }
  0x20   : > { %3374 = vmatprep.subr.bf16.mxu1 %v3960_v21  ;;  %2101 = vmatprep.mubr.bf16.mxu1 %v238_v56  ;;  %v4001_v13 = vld [vmem:[%s5765_s1 + $0x100] sm:$0xff]   ;;  %v178_v16 = vld [vmem:[%s4412_s27 + $0x10] sm:$0x3]  ;;  %v4003_v18 = vld [vmem:[%s5765_s1 + $0x278] sm:$0xff]  }
  0x21   : > { %v260_v17 = vrot.slane %v178_v16, %v4431_v42  ;;  %v3998_v19 = vld [vmem:[%s5765_s1 + $0x188] sm:$0xff]   ;;  %v4004_v30 = vld [vmem:[%s5765_s1 + $0x2f8] sm:$0xff]   ;;  %v4008_v35 = vld [vmem:[%s5765_s1 + $0x2f0] sm:$0xff]  }
  0x22   : > { %3353 = vmatpush3.bf16.msra.mxu0 %v3961_v22  ;;  %v4005_v22 = vld [vmem:[%s5765_s1 + $0x238] sm:$0xff]   ;;  %v4015_v36 = vld [vmem:[%s5765_s1 + $0x260] sm:$0xff]   ;;  %v4010_v37 = vld [vmem:[%s5765_s1 + $0x2b0] sm:$0xff]  }
  0x23   : > { %3375 = vmatpush3.bf16.msra.mxu1 %v3962_v23  ;;  %3354 = vmatprep.subr.bf16.mxu0 %v3963_v24  ;;  %v269_v20 = vshrl.u32 %v260_v17, 16  ;;  %v271_v21 = vshll.u32 %v260_v17, 16  ;;  %v316_v23 = vrot.slane %v260_v17, 1  ;;  %v4000_v24 = vld [vmem:[%s5765_s1 + $0x1c0] sm:$0xff]   ;;  %v4006_v33 = vld [vmem:[%s5765_s1 + $0x2b8] sm:$0xff]   ;;  %v4025_v48 = vld [vmem:[%s5765_s1 + $0x210] sm:$0xff]  }
  0x24   : > { %3376 = vmatprep.subr.bf16.mxu1 %v3964_v25  ;;  %v4019_v40 = vld [vmem:[%s5765_s1 + $0x258] sm:$0xff]   ;;  %v4016_v45 = vld [vmem:[%s5765_s1 + $0x2e0] sm:$0xff]   ;;  %v4029_v54 = vld [vmem:[%s5765_s1 + $0x208] sm:$0xff]  }
  0x25   : > { %v273_v25 = vrot.slane %v271_v21, 1  ;;  %v4018_v47 = vld [vmem:[%s5765_s1 + $0x2a0] sm:$0xff]   ;;  %v4020_v50 = vld [vmem:[%s5765_s1 + $0x2d8] sm:$0xff]   ;;  %v4024_v56 = vld [vmem:[%s5765_s1 + $0x2d0] sm:$0xff]  }
  0x26   : > { %3355 = vmatpush3.bf16.msra.mxu0 %v3965_v26  ;;  %v4002_v26 = vld [vmem:[%s5765_s1 + $0x180] sm:$0xff]   ;;  %v4022_v52 = vld [vmem:[%s5765_s1 + $0x298] sm:$0xff]   ;;  %v4042_v17 = vld [vmem:[%s5765_s1 + $0x3b0] sm:$0xff]  }
  0x27   : > { %3377 = vmatpush3.bf16.msra.mxu1 %v3966_v27  ;;  %3356 = vmatprep.subr.bf16.mxu0 %v3967_v28  ;;  %v4007_v27 = vld [vmem:[%s5765_s1 + $0x270] sm:$0xff]   ;;  %v274_v28 = vor.u32 %v273_v25, %v269_v20  ;;  %v4049_v20 = vld [vmem:[%s5765_s1 + $0x320] sm:$0xff]   ;;  %v4046_v21 = vld [vmem:[%s5765_s1 + $0x3a8] sm:$0xff]  }
  0x28   : > { %3378 = vmatprep.subr.bf16.mxu1 %v3968_v29  ;;  %v4009_v29 = vld [vmem:[%s5765_s1 + $0x230] sm:$0xff]  }
  0x2a   : > { %3357 = vmatpush3.bf16.msra.mxu0 %v3969_v31  ;;  %v181_v31 = vld [vmem:[%s4412_s27 + $0x18] sm:$0x3] }
  0x2b   : > { %3379 = vmatpush3.bf16.msra.mxu1 %v3970_v32  ;;  %3386 = vmatprep.subr.bf16.mxu0 %v3971_v38  ;;  %v4011_v32 = vld [vmem:[%s5765_s1 + $0x268] sm:$0xff]   ;;  %v4017_v38 = vld [vmem:[%s5765_s1 + $0x220] sm:$0xff]   ;;  %v292_v44 = vrot.slane %v181_v31, %v4431_v42 }
  0x2c   : > { %3408 = vmatprep.subr.bf16.mxu1 %v3972_v39  ;;  %v4012_v39 = vld [vmem:[%s5765_s1 + $0x2e8] sm:$0xff]  }
  0x2d   : > { %2062 = vmatmul.mubr.bf16.vlgmr.msra.gmra.mxu0 %v170_v34  ;;  %v4013_v34 = vld [vmem:[%s5765_s1 + $0x228] sm:$0xff]   ;;  %v303_v49 = vshll.u32 %v292_v44, 16 }
  0x2e   : > { %3387 = vmatpush3.bf16.msra.mxu0 %v3973_v41  ;;  %2102 = vmatmul.mubr.bf16.vlgmr.msra.gmra.mxu1 %v206_v58  ;;  %v4014_v41 = vld [vmem:[%s5765_s1 + $0x2a8] sm:$0xff]   ;;  %v4026_v58 = vld [vmem:[%s5765_s1 + $0x290] sm:$0xff]  }
  0x2f   : > { %3388 = vmatprep.subr.bf16.mxu0 %v3975_v43  ;;  %3409 = vmatpush3.bf16.msra.mxu1 %v3974_v53  ;;  %v4021_v43 = vld [vmem:[%s5765_s1 + $0x218] sm:$0xff]   ;;  %v301_v53 = vshrl.u32 %v292_v44, 16  ;;  %v4739_v44 = vld [vmem:[%s4412_s27 + $0x12] sm:$0x3] }
  0x30   : > { %3410 = vmatprep.subr.bf16.mxu1 %v3976_v57  ;;  %2141 = vmatprep.mubr.bf16.mxu0 %v178_v16  ;;  %v4031_v57 = vld [vmem:[%s5765_s1 + $0x240] sm:$0xff]   ;;  %v4045_v16 = vld [vmem:[%s5765_s1 + $0x328] sm:$0xff]  }
  0x31   : > { %2181 = vmatprep.mubr.bf16.mxu1 %v274_v28  ;;  %v4052_v28 = vld [vmem:[%s5765_s1 + $0x3d8] sm:$0xff]  }
  0x32   : > { %3389 = vmatpush3.bf16.msra.mxu0 %v3977_v46  ;;  %v4023_v46 = vld [vmem:[%s5765_s1 + $0x250] sm:$0xff]  }
  0x33   : > { %3390 = vmatprep.subr.bf16.mxu0 %v3979_v51  ;;  %3411 = vmatpush3.bf16.msra.mxu1 %v3978_v60  ;;  %v4027_v51 = vld [vmem:[%s5765_s1 + $0x248] sm:$0xff]  }
  0x34   : > { %3412 = vmatprep.subr.bf16.mxu1 %v3980_v62  ;;  %v4028_v60 = vld [vmem:[%s5765_s1 + $0x2c8] sm:$0xff]  }
  0x35   : > { %v4619_v62 = vld [vmem:[%s4412_s27 + $0xa] sm:$0x3] }
  0x36   : > { %3391 = vmatpush3.bf16.msra.mxu0 %v3981_v55  ;;  %v305_v55 = vrot.slane %v303_v49, 1  ;;  %v4066_v49 = vld [vmem:[%s5765_s1 + $0x380] sm:$0xff]  }
  0x37   : > { %3392 = vmatprep.subr.bf16.mxu0 %v3983_v59  ;;  %3413 = vmatpush3.bf16.msra.mxu1 %v3982_v0  ;;  %v4033_v59 = vld [vmem:[%s5765_s1 + $0x200] sm:$0xff]   ;;  %v4035_v0 = vld [vmem:[%s5765_s1 + $0x378] sm:$0xff]  }
  0x38   : > { %3414 = vmatprep.subr.bf16.mxu1 %v3984_v2  ;;  %v4032_v2 = vld [vmem:[%s5765_s1 + $0x2c0] sm:$0xff]  }
  0x3a   : > { %3393 = vmatpush3.bf16.msra.mxu0 %v3985_v61  ;;  %v306_v61 = vor.u32 %v305_v55, %v301_v53  ;;  %v4068_v53 = vld [vmem:[%s5765_s1 + $0x4f8] sm:$0xff]   ;;  %v4773_v55 = vld [vmem:[%s5765_s1 + $0x430] sm:$0xff]  }
  0x3b   : > { %3394 = vmatprep.subr.bf16.mxu0 %v3987_v63  ;;  %3415 = vmatpush3.bf16.msra.mxu1 %v3986_v4  ;;  %v231_v63 = vrot.slane %v4619_v62, %v4431_v42  ;;  %v4037_v4 = vld [vmem:[%s5765_s1 + $0x338] sm:$0xff]  }
  0x3c   : > { %3416 = vmatprep.subr.bf16.mxu1 %v3988_v6 }
  0x3d   : > { %v240_v6 = vshrl.u32 %v231_v63, 16 }
  0x3e   : > { %3395 = vmatpush3.bf16.msra.mxu0 %v3989_v1  ;;  %v4030_v1 = vld [vmem:[%s5765_s1 + $0x288] sm:$0xff]  }
  0x3f   : > { %3396 = vmatprep.subr.bf16.mxu0 %v3991_v3  ;;  %3417 = vmatpush3.bf16.msra.mxu1 %v3990_v8  ;;  %v242_v3 = vshll.u32 %v231_v63, 16  ;;  %v4796_v63 = vld [vmem:[%s5765_s1 + $0x428] sm:$0xff]  }
  0x40   : > { %3418 = vmatprep.subr.bf16.mxu1 %v3992_v10  ;;  %v4041_v10 = vld [vmem:[%s5765_s1 + $0x330] sm:$0xff]  }
  0x41   : > { %v244_v8 = vrot.slane %v242_v3, 1  ;;  %v4820_v3 = vld [vmem:[%s5765_s1 + $0x420] sm:$0xff]  }
  0x42   : > { %3397 = vmatpush3.bf16.msra.mxu0 %v3993_v5  ;;  %v4034_v5 = vld [vmem:[%s5765_s1 + $0x280] sm:$0xff]  }
  0x43   : > { %3398 = vmatprep.subr.bf16.mxu0 %v3995_v7  ;;  %3419 = vmatpush3.bf16.msra.mxu1 %v3994_v12  ;;  %v4039_v7 = vld [vmem:[%s5765_s1 + $0x370] sm:$0xff]   ;;  %v4651_v12 = vld [vmem:[%s4412_s27 + $0x2] sm:$0x3] }
  0x44   : > { %3420 = vmatprep.subr.bf16.mxu1 %v3996_v15  ;;  %v4040_v15 = vld [vmem:[%s5765_s1 + $0x3f0] sm:$0xff]   ;;  %v4693_v25 = vrot.slane %v4651_v12, %v4431_v42 }
  0x46   : > { %3399 = vmatpush3.bf16.msra.mxu0 %v3997_v9  ;;  %v4036_v9 = vld [vmem:[%s5765_s1 + $0x3f8] sm:$0xff]  }
  0x47   : > { %3400 = vmatprep.subr.bf16.mxu0 %v3999_v11  ;;  %3421 = vmatpush3.bf16.msra.mxu1 %v3998_v19  ;;  %v4648_v11 = vor.u32 %v244_v8, %v240_v6  ;;  %v4044_v19 = vld [vmem:[%s5765_s1 + $0x3e8] sm:$0xff]   ;;  %v4836_v6 = vld [vmem:[%s5765_s1 + $0x4e0] sm:$0xff]  }
  0x48   : > { %3422 = vmatprep.subr.bf16.mxu1 %v4000_v24  ;;  %v4053_v24 = vld [vmem:[%s5765_s1 + $0x318] sm:$0xff]   ;;  %v4848_v8 = vld [vmem:[%s5765_s1 + $0x4a0] sm:$0xff]  }
  0x4a   : > { %3401 = vmatpush3.bf16.msra.mxu0 %v4001_v13  ;;  %v4038_v13 = vld [vmem:[%s5765_s1 + $0x3b8] sm:$0xff]  }
  0x4b   : > { %3430 = vmatprep.subr.bf16.mxu0 %v4003_v18  ;;  %3423 = vmatpush3.bf16.msra.mxu1 %v4002_v26  ;;  %v4047_v18 = vld [vmem:[%s5765_s1 + $0x360] sm:$0xff]  }
  0x4c   : > { %3452 = vmatprep.subr.bf16.mxu1 %v4004_v30  ;;  %v4050_v26 = vld [vmem:[%s5765_s1 + $0x3a0] sm:$0xff]   ;;  %v4054_v30 = vld [vmem:[%s5765_s1 + $0x398] sm:$0xff]  }
  0x4d   : > { %2142 = vmatmul.mubr.bf16.vlgmr.msra.gmra.mxu0 %v248_v14  ;;  %v4043_v14 = vld [vmem:[%s5765_s1 + $0x368] sm:$0xff]  }
  0x4e   : > { %3431 = vmatpush3.bf16.msra.mxu0 %v4005_v22  ;;  %2221 = vmatprep.mubr.bf16.mxu0 %v316_v23  ;;  %v4051_v22 = vld [vmem:[%s5765_s1 + $0x358] sm:$0xff]   ;;  %v4048_v23 = vld [vmem:[%s5765_s1 + $0x3e0] sm:$0xff]  }
  0x4f   : > { %3432 = vmatprep.subr.bf16.mxu0 %v4007_v27  ;;  %2182 = vmatmul.mubr.bf16.vlgmr.msra.gmra.mxu1 %v181_v31  ;;  %v4055_v27 = vld [vmem:[%s5765_s1 + $0x350] sm:$0xff]   ;;  %v210_v31 = vshll.u32 %v4693_v25, 16 }
  0x50   : > { %3453 = vmatpush3.bf16.msra.mxu1 %v4006_v33  ;;  %2261 = vmatprep.mubr.bf16.mxu1 %v4619_v62  ;;  %v4056_v33 = vld [vmem:[%s5765_s1 + $0x3d0] sm:$0xff]  }
  0x51   : > { %3454 = vmatprep.subr.bf16.mxu1 %v4008_v35  ;;  %v208_v35 = vshrl.u32 %v4693_v25, 16 }
  0x52   : > { %3433 = vmatpush3.bf16.msra.mxu0 %v4009_v29  ;;  %v4057_v29 = vld [vmem:[%s5765_s1 + $0x310] sm:$0xff]  }
  0x53   : > { %3434 = vmatprep.subr.bf16.mxu0 %v4011_v32  ;;  %v4059_v32 = vld [vmem:[%s5765_s1 + $0x348] sm:$0xff]  }
  0x54   : > { %3455 = vmatpush3.bf16.msra.mxu1 %v4010_v37  ;;  %v212_v37 = vrot.slane %v210_v31, 1 }
  0x55   : > { %3456 = vmatprep.subr.bf16.mxu1 %v4012_v39  ;;  %v4060_v39 = vld [vmem:[%s5765_s1 + $0x3c8] sm:$0xff]  }
  0x56   : > { %3435 = vmatpush3.bf16.msra.mxu0 %v4013_v34  ;;  %v4061_v34 = vld [vmem:[%s5765_s1 + $0x308] sm:$0xff]  }
  0x57   : > { %3436 = vmatprep.subr.bf16.mxu0 %v4015_v36  ;;  %v4058_v36 = vld [vmem:[%s5765_s1 + $0x390] sm:$0xff]  }
  0x58   : > { %3457 = vmatpush3.bf16.msra.mxu1 %v4014_v41  ;;  %v4062_v41 = vld [vmem:[%s5765_s1 + $0x388] sm:$0xff]  }
  0x59   : > { %3458 = vmatprep.subr.bf16.mxu1 %v4016_v45  ;;  %v4743_v45 = vrot.slane %v4739_v44, %v4431_v42 }
  0x5a   : > { %3437 = vmatpush3.bf16.msra.mxu0 %v4017_v38  ;;  %v4063_v38 = vld [vmem:[%s5765_s1 + $0x340] sm:$0xff]  }
  0x5b   : > { %3438 = vmatprep.subr.bf16.mxu0 %v4019_v40  ;;  %v4065_v40 = vld [vmem:[%s5765_s1 + $0x300] sm:$0xff]  }
  0x5c   : > { %3459 = vmatpush3.bf16.msra.mxu1 %v4018_v47  ;;  %v4064_v47 = vld [vmem:[%s5765_s1 + $0x3c0] sm:$0xff]  }
  0x5d   : > { %3460 = vmatprep.subr.bf16.mxu1 %v4020_v50  ;;  %v276_v50 = vshrl.u32 %v4743_v45, 16 }
  0x5e   : > { %3439 = vmatpush3.bf16.msra.mxu0 %v4021_v43  ;;  %v4736_v43 = vor.u32 %v212_v37, %v208_v35  ;;  %v4969_v35 = vld [vmem:[%s5765_s1 + $0x530] sm:$0xff]   ;;  %v4976_v37 = vld [vmem:[%s5765_s1 + $0x5b8] sm:$0xff]  }
  0x5f   : > { %3440 = vmatprep.subr.bf16.mxu0 %v4023_v46  ;;  %v4067_v46 = vld [vmem:[%s5765_s1 + $0x478] sm:$0xff]   ;;  %5801 = vst [vmem:[#allocation4_spill] sm:$0xff] %v4976_v37 }
  0x60   : > { %3461 = vmatpush3.bf16.msra.mxu1 %v4022_v52  ;;  %v4764_v52 = vld [vmem:[%s5765_s1 + $0x470] sm:$0xff]  }
  0x61   : > { %3462 = vmatprep.subr.bf16.mxu1 %v4024_v56  ;;  %v4070_v56 = vld [vmem:[%s5765_s1 + $0x4b8] sm:$0xff]  }
  0x62   : > { %3441 = vmatpush3.bf16.msra.mxu0 %v4025_v48  ;;  %v4069_v48 = vld [vmem:[%s5765_s1 + $0x438] sm:$0xff]  }
  0x63   : > { %3442 = vmatprep.subr.bf16.mxu0 %v4027_v51  ;;  %v278_v51 = vshll.u32 %v4743_v45, 16 }
  0x64   : > { %3463 = vmatpush3.bf16.msra.mxu1 %v4026_v58  ;;  %v5769_v58 = vrot.slane %v4693_v25, 1 }
  0x65   : > { %3464 = vmatprep.subr.bf16.mxu1 %v4028_v60  ;;  %v4072_v60 = vld [vmem:[%s5765_s1 + $0x4f0] sm:$0xff]  }
  0x66   : > { %3443 = vmatpush3.bf16.msra.mxu0 %v4029_v54  ;;  %v280_v54 = vrot.slane %v278_v51, 1  ;;  %v5038_v51 = vld [vmem:[%s5765_s1 + $0x5e0] sm:$0xff]  }
  0x67   : > { %3444 = vmatprep.subr.bf16.mxu0 %v4031_v57  ;;  %5806 = vst [vmem:[#allocation9_spill] sm:$0xff] %v5038_v51 }
  0x68   : > { %3465 = vmatpush3.bf16.msra.mxu1 %v4030_v1  ;;  %v4778_v57 = vor.u32 %v280_v54, %v276_v50  ;;  %v4807_v1 = vld [vmem:[%s5765_s1 + $0x460] sm:$0xff]   ;;  %v5032_v50 = vld [vmem:[%s5765_s1 + $0x558] sm:$0xff]  }
  0x69   : > { %3466 = vmatprep.subr.bf16.mxu1 %v4032_v2  ;;  %v4812_v2 = vld [vmem:[%s5765_s1 + $0x4e8] sm:$0xff]   ;;  %v5049_v54 = vld [vmem:[%s5765_s1 + $0x5a0] sm:$0xff]  }
  0x6a   : > { %3445 = vmatpush3.bf16.msra.mxu0 %v4033_v59  ;;  %v4785_v59 = vld [vmem:[%s5765_s1 + $0x468] sm:$0xff]   ;;  %5807 = vst [vmem:[#allocation10_spill] sm:$0xff] %v5049_v54 }
  0x6b   : > { %3474 = vmatprep.subr.bf16.mxu0 %v4035_v0  ;;  %v4074_v0 = vld [vmem:[%s5765_s1 + $0x4b0] sm:$0xff]  }
  0x6c   : > { %3467 = vmatpush3.bf16.msra.mxu1 %v4034_v5  ;;  %v4831_v5 = vld [vmem:[%s5765_s1 + $0x458] sm:$0xff]  }
  0x6d   : > { %2222 = vmatmul.mubr.bf16.vlgmr.msra.gmra.mxu0 %v306_v61  ;;  %3496 = vmatprep.subr.bf16.mxu1 %v4036_v9  ;;  %v5768_v61 = vrot.slane %v4743_v45, 1  ;;  %v4854_v9 = vld [vmem:[%s5765_s1 + $0x450] sm:$0xff]  }
  0x6e   : > { %3475 = vmatpush3.bf16.msra.mxu0 %v4037_v4  ;;  %2301 = vmatprep.mubr.bf16.mxu0 %v4648_v11  ;;  %v4825_v4 = vld [vmem:[%s5765_s1 + $0x4a8] sm:$0xff]  }
  0x6f   : > { %3476 = vmatprep.subr.bf16.mxu0 %v4039_v7  ;;  %2262 = vmatmul.mubr.bf16.vlgmr.msra.gmra.mxu1 %v4651_v12  ;;  %v4843_v7 = vld [vmem:[%s5765_s1 + $0x418] sm:$0xff]  }
  0x70   : > { %3497 = vmatpush3.bf16.msra.mxu1 %v4038_v13  ;;  %2341 = vmatprep.mubr.bf16.mxu1 %v4739_v44  ;;  %v4867_v13 = vld [vmem:[%s5765_s1 + $0x410] sm:$0xff]  }
  0x71   : > { %3498 = vmatprep.subr.bf16.mxu1 %v4040_v15  ;;  %v4878_v15 = vld [vmem:[%s5765_s1 + $0x448] sm:$0xff]  }
  0x72   : > { %3477 = vmatpush3.bf16.msra.mxu0 %v4041_v10  ;;  %v4860_v10 = vld [vmem:[%s5765_s1 + $0x4d8] sm:$0xff]  }
  0x73   : > { %3478 = vmatprep.subr.bf16.mxu0 %v4043_v14  ;;  %v4872_v14 = vld [vmem:[%s5765_s1 + $0x498] sm:$0xff]  }
  0x74   : > { %3499 = vmatpush3.bf16.msra.mxu1 %v4042_v17  ;;  %v4891_v17 = vld [vmem:[%s5765_s1 + $0x408] sm:$0xff]  }
  0x75   : > { %3500 = vmatprep.subr.bf16.mxu1 %v4044_v19  ;;  %v4902_v19 = vld [vmem:[%s5765_s1 + $0x440] sm:$0xff]  }
  0x76   : > { %3479 = vmatpush3.bf16.msra.mxu0 %v4045_v16  ;;  %v4884_v16 = vld [vmem:[%s5765_s1 + $0x4d0] sm:$0xff]  }
  0x77   : > { %3480 = vmatprep.subr.bf16.mxu0 %v4047_v18  ;;  %v4896_v18 = vld [vmem:[%s5765_s1 + $0x490] sm:$0xff]  }
  0x78   : > { %3501 = vmatpush3.bf16.msra.mxu1 %v4046_v21  ;;  %v4915_v21 = vld [vmem:[%s5765_s1 + $0x400] sm:$0xff]  }
  0x79   : > { %3502 = vmatprep.subr.bf16.mxu1 %v4048_v23 }
  0x7a   : > { %3481 = vmatpush3.bf16.msra.mxu0 %v4049_v20  ;;  %v4908_v20 = vld [vmem:[%s5765_s1 + $0x4c8] sm:$0xff]  }
  0x7b   : > { %3482 = vmatprep.subr.bf16.mxu0 %v4051_v22  ;;  %v4918_v22 = vld [vmem:[%s4412_s27 + $0x1a] sm:$0x3] }
  0x7c   : > { %3503 = vmatpush3.bf16.msra.mxu1 %v4050_v26  ;;  %v299_v23 = vrot.slane %v4918_v22, %v4431_v42  ;;  %v4932_v26 = vld [vmem:[%s5765_s1 + $0x488] sm:$0xff]  }
  0x7d   : > { %3504 = vmatprep.subr.bf16.mxu1 %v4052_v28 }
  0x7e   : > { %3483 = vmatpush3.bf16.msra.mxu0 %v4053_v24  ;;  %v4926_v24 = vld [vmem:[%s5765_s1 + $0x578] sm:$0xff]   ;;  %v310_v28 = vshll.u32 %v299_v23, 16  ;;  %v308_v31 = vshrl.u32 %v299_v23, 16 }
  0x7f   : > { %3484 = vmatprep.subr.bf16.mxu0 %v4055_v27  ;;  %v4938_v27 = vld [vmem:[%s5765_s1 + $0x4c0] sm:$0xff]   ;;  %v5073_v23 = vld [vmem:[%s5765_s1 + $0x598] sm:$0xff]  }
  0x80   : > { %3505 = vmatpush3.bf16.msra.mxu1 %v4054_v30  ;;  %v4950_v30 = vld [vmem:[%s5765_s1 + $0x538] sm:$0xff]   ;;  %5809 = vst [vmem:[#allocation12_spill] sm:$0xff] %v5073_v23 }
  0x81   : > { %3506 = vmatprep.subr.bf16.mxu1 %v4056_v33  ;;  %v4957_v33 = vld [vmem:[%s5765_s1 + $0x570] sm:$0xff]  }
  0x82   : > { %3485 = vmatpush3.bf16.msra.mxu0 %v4057_v29  ;;  %v4944_v29 = vld [vmem:[%s5765_s1 + $0x480] sm:$0xff]  }
  0x83   : > { %3486 = vmatprep.subr.bf16.mxu0 %v4059_v32  ;;  %5799 = vst [vmem:[#allocation2_spill] sm:$0xff] %v4944_v29  ;;  %v312_v32 = vrot.slane %v310_v28, 1  ;;  %v5080_v28 = vld [vmem:[%s5765_s1 + $0x548] sm:$0xff]  }
  0x84   : > { %3507 = vmatpush3.bf16.msra.mxu1 %v4058_v36  ;;  %5810 = vst [vmem:[#allocation13_spill] sm:$0xff] %v5080_v28 }
  0x85   : > { %3508 = vmatprep.subr.bf16.mxu1 %v4060_v39  ;;  %v4971_v36 = vor.u32 %v312_v32, %v308_v31  ;;  %v4989_v39 = vld [vmem:[%s5765_s1 + $0x5f0] sm:$0xff]   ;;  %v5092_v32 = vld [vmem:[%s5765_s1 + $0x508] sm:$0xff]  }
  0x86   : > { %3487 = vmatpush3.bf16.msra.mxu0 %v4061_v34  ;;  %v4963_v34 = vld [vmem:[%s5765_s1 + $0x5f8] sm:$0xff]   ;;  %5802 = vst [vmem:[#allocation5_spill] sm:$0xff] %v4989_v39  ;;  %v5086_v31 = vld [vmem:[%s5765_s1 + $0x5d0] sm:$0xff]   ;;  %5812 = vst [vmem:[#allocation15_spill] sm:$0xff] %v5092_v32 }
  0x87   : > { %3488 = vmatprep.subr.bf16.mxu0 %v4063_v38  ;;  %5800 = vst [vmem:[#allocation3_spill] sm:$0xff] %v4963_v34  ;;  %v4983_v38 = vld [vmem:[%s5765_s1 + $0x568] sm:$0xff]   ;;  %5811 = vst [vmem:[#allocation14_spill] sm:$0xff] %v5086_v31 }
  0x88   : > { %3509 = vmatpush3.bf16.msra.mxu1 %v4062_v41  ;;  %v5001_v41 = vld [vmem:[%s5765_s1 + $0x5b0] sm:$0xff]  }
  0x89   : > { %3510 = vmatprep.subr.bf16.mxu1 %v4064_v47  ;;  %5803 = vst [vmem:[#allocation6_spill] sm:$0xff] %v5001_v41  ;;  %v5014_v47 = vld [vmem:[%s5765_s1 + $0x5e8] sm:$0xff]  }
  0x8a   : > { %3489 = vmatpush3.bf16.msra.mxu0 %v4065_v40  ;;  %v4995_v40 = vld [vmem:[%s5765_s1 + $0x528] sm:$0xff]   ;;  %5804 = vst [vmem:[#allocation7_spill] sm:$0xff] %v5014_v47 }
  0x8b   : > { %3518 = vmatprep.subr.bf16.mxu0 %v4067_v46  ;;  %v5008_v46 = vld [vmem:[%s5765_s1 + $0x560] sm:$0xff]  }
  0x8c   : > { %3511 = vmatpush3.bf16.msra.mxu1 %v4066_v49  ;;  %v5025_v49 = vld [vmem:[%s5765_s1 + $0x5a8] sm:$0xff]  }
  0x8d   : > { %2302 = vmatmul.mubr.bf16.vlgmr.msra.gmra.mxu0 %v4736_v43  ;;  %3540 = vmatprep.subr.bf16.mxu1 %v4068_v53  ;;  %5805 = vst [vmem:[#allocation8_spill] sm:$0xff] %v5025_v49  ;;  %v5044_v53 = vld [vmem:[%s5765_s1 + $0x518] sm:$0xff]  }
  0x8e   : > { %3519 = vmatpush3.bf16.msra.mxu0 %v4069_v48  ;;  %2381 = vmatprep.mubr.bf16.mxu0 %v4778_v57  ;;  %v5020_v48 = vld [vmem:[%s5765_s1 + $0x520] sm:$0xff]  }
  0x8f   : > { %3520 = vmatprep.subr.bf16.mxu0 %v4764_v52  ;;  %2342 = vmatmul.mubr.bf16.vlgmr.msra.gmra.mxu1 %v5769_v58  ;;  %v5104_v58 = vld [vmem:[%s5765_s1 + $0x540] sm:$0xff]  }
  0x90   : > { %3541 = vmatpush3.bf16.msra.mxu1 %v4070_v56  ;;  %2421 = vmatprep.mubr.bf16.mxu1 %v5768_v61  ;;  %v5056_v56 = vld [vmem:[%s5765_s1 + $0x550] sm:$0xff]   ;;  %5814 = vst [vmem:[#allocation17_spill] sm:$0xff] %v5104_v58 }
  0x91   : > { %3542 = vmatprep.subr.bf16.mxu1 %v4072_v60  ;;  %v5062_v60 = vld [vmem:[%s5765_s1 + $0x5d8] sm:$0xff]   ;;  %v5097_v61 = vld [vmem:[%s5765_s1 + $0x590] sm:$0xff]  }
  0x92   : > { %3521 = vmatpush3.bf16.msra.mxu0 %v4773_v55  ;;  %5808 = vst [vmem:[#allocation11_spill] sm:$0xff] %v5062_v60  ;;  %5813 = vst [vmem:[#allocation16_spill] sm:$0xff] %v5097_v61 }
  0x93   : > { %3522 = vmatprep.subr.bf16.mxu0 %v4785_v59 }
  0x94   : > { %3543 = vmatpush3.bf16.msra.mxu1 %v4074_v0  ;;  %v5068_v0 = vld [vmem:[%s5765_s1 + $0x510] sm:$0xff]  }
  0x95   : > { %3544 = vmatprep.subr.bf16.mxu1 %v4812_v2 }
  0x96   : > { %3523 = vmatpush3.bf16.msra.mxu0 %v4796_v63 }
  0x97   : > { %3524 = vmatprep.subr.bf16.mxu0 %v4807_v1 }
  0x98   : > { %3545 = vmatpush3.bf16.msra.mxu1 %v4825_v4 }
  0x99   : > { %3546 = vmatprep.subr.bf16.mxu1 %v4836_v6 }
  0x9a   : > { %3525 = vmatpush3.bf16.msra.mxu0 %v4820_v3 }
  0x9b   : > { %3526 = vmatprep.subr.bf16.mxu0 %v4831_v5 }
  0x9c   : > { %3547 = vmatpush3.bf16.msra.mxu1 %v4848_v8 }
  0x9d   : > { %3548 = vmatprep.subr.bf16.mxu1 %v4860_v10 }
  0x9e   : > { %3527 = vmatpush3.bf16.msra.mxu0 %v4843_v7 }
  0x9f   : > { %3528 = vmatprep.subr.bf16.mxu0 %v4854_v9 }
  0xa0   : > { %3549 = vmatpush3.bf16.msra.mxu1 %v4872_v14 }
  0xa1   : > { %3550 = vmatprep.subr.bf16.mxu1 %v4884_v16 }
  0xa2   : > { %3529 = vmatpush3.bf16.msra.mxu0 %v4867_v13 }
  0xa3   : > { %3530 = vmatprep.subr.bf16.mxu0 %v4878_v15 }
  0xa4   : > { %3551 = vmatpush3.bf16.msra.mxu1 %v4896_v18 }
  0xa5   : > { %3552 = vmatprep.subr.bf16.mxu1 %v4908_v20 }
  0xa6   : > { %3531 = vmatpush3.bf16.msra.mxu0 %v4891_v17 }
  0xa7   : > { %3532 = vmatprep.subr.bf16.mxu0 %v4902_v19 }
  0xa8   : > { %3553 = vmatpush3.bf16.msra.mxu1 %v4932_v26 }
  0xa9   : > { %3554 = vmatprep.subr.bf16.mxu1 %v4938_v27 }
  0xaa   : > { %3533 = vmatpush3.bf16.msra.mxu0 %v4915_v21 }
  0xab   : > { %3562 = vmatprep.subr.bf16.mxu0 %v4926_v24 }
  0xac   : > { %3555 = vmatpush3.bf16.msra.mxu1 %v4944_v29 }
  0xad   : > { %2382 = vmatmul.mubr.bf16.vlgmr.msra.gmra.mxu0 %v4918_v22  ;;  %3584 = vmatprep.subr.bf16.mxu1 %v4963_v34 }
  0xae   : > { %3563 = vmatpush3.bf16.msra.mxu0 %v4950_v30 }
  0xaf   : > { %3564 = vmatprep.subr.bf16.mxu0 %v4957_v33  ;;  %2422 = vmatmul.mubr.bf16.vlgmr.msra.gmra.mxu1 %v4971_v36 }
  0xb0   : > { %3585 = vmatpush3.bf16.msra.mxu1 %v4976_v37  ;;  %v5794_v37 = vmov 0.0  }
  0xb1   : > { %3586 = vmatprep.subr.bf16.mxu1 %v4989_v39 }
  0xb2   : > { %3565 = vmatpush3.bf16.msra.mxu0 %v4969_v35 }
  0xb3   : > { %3566 = vmatprep.subr.bf16.mxu0 %v4983_v38 }
  0xb4   : > { %3587 = vmatpush3.bf16.msra.mxu1 %v5001_v41  ;;  %v5140_v41 = vld [vmem:[%s5765_s1 + $0x638] sm:$0xff]  }
  0xb5   : > { %3588 = vmatprep.subr.bf16.mxu1 %v5014_v47 }
  0xb6   : > { %3567 = vmatpush3.bf16.msra.mxu0 %v4995_v40 }
  0xb7   : > { %3568 = vmatprep.subr.bf16.mxu0 %v5008_v46 }
  0xb8   : > { %3589 = vmatpush3.bf16.msra.mxu1 %v5025_v49 }
  0xb9   : > { %3590 = vmatprep.subr.bf16.mxu1 %v5038_v51  ;;  %v5124_v51 = vld [vmem:[%s4412_s27 + $0xc] sm:$0x3] }
  0xba   : > { %3569 = vmatpush3.bf16.msra.mxu0 %v5020_v48  ;;  %v343_v49 = vrot.slane %v5124_v51, %v4431_v42  ;;  %2461 = vmatprep.mubr.bf16.mxu0 %v5124_v51 }
  0xbb   : > { %3570 = vmatprep.subr.bf16.mxu0 %v5032_v50 }
  0xbc   : > { %3591 = vmatpush3.bf16.msra.mxu1 %v5049_v54  ;;  %v5121_v54 = vld [vmem:[%s5765_s1 + $0x588] sm:$0xff]   ;;  %v345_v39 = vshrl.u32 %v343_v49, 16 }
  0xbd   : > { %3592 = vmatprep.subr.bf16.mxu1 %v5062_v60  ;;  %v5110_v60 = vld [vmem:[%s5765_s1 + $0x5c8] sm:$0xff]   ;;  %5817 = vst [vmem:[#allocation20_spill] sm:$0xff] %v5121_v54 }
  0xbe   : > { %3571 = vmatpush3.bf16.msra.mxu0 %v5044_v53  ;;  %5815 = vst [vmem:[#allocation18_spill] sm:$0xff] %v5110_v60 }
  0xbf   : > { %3572 = vmatprep.subr.bf16.mxu0 %v5056_v56 }
  0xc0   : > { %3593 = vmatpush3.bf16.msra.mxu1 %v5073_v23  ;;  %v5116_v23 = vld [vmem:[%s5765_s1 + $0x500] sm:$0xff]  }
  0xc1   : > { %3594 = vmatprep.subr.bf16.mxu1 %v5086_v31  ;;  %5816 = vst [vmem:[#allocation19_spill] sm:$0xff] %v5116_v23  ;;  %v5127_v31 = vld [vmem:[%s4412_s27 + $0x4] sm:$0x3] }
  0xc2   : > { %3573 = vmatpush3.bf16.msra.mxu0 %v5068_v0  ;;  %v5135_v47 = vrot.slane %v5127_v31, %v4431_v42 }
  0xc3   : > { %3574 = vmatprep.subr.bf16.mxu0 %v5080_v28 }
  0xc4   : > { %3595 = vmatpush3.bf16.msra.mxu1 %v5097_v61  ;;  %v5146_v61 = vld [vmem:[%s5765_s1 + $0x5c0] sm:$0xff]  }
  0xc5   : > { %3596 = vmatprep.subr.bf16.mxu1 %v5110_v60  ;;  %5818 = vst [vmem:[#allocation21_spill] sm:$0xff] %v5146_v61  ;;  %v5157_v60 = vld [vmem:[%s5765_s1 + $0x580] sm:$0xff]  }
  0xc6   : > { %3575 = vmatpush3.bf16.msra.mxu0 %v5092_v32  ;;  %v329_v32 = vshrl.u32 %v5135_v47, 16  ;;  %5819 = vst [vmem:[#allocation22_spill] sm:$0xff] %v5157_v60 }
  0xc7   : > { %3576 = vmatprep.subr.bf16.mxu0 %v5104_v58  ;;  %v331_v58 = vshll.u32 %v5135_v47, 16 }
  0xc8   : > { %3597 = vmatpush3.bf16.msra.mxu1 %v5121_v54 }
  0xc9   : > { %v333_v29 = vrot.slane %v331_v58, 1  ;;  %3598 = vmatprep.subr.bf16.mxu1 %v5146_v61  ;;  %v4139_v58 = vld [vmem:[%s5765_s1 + $0x78] sm:$0xff]   ;;  %v4150_v61 = vld [vmem:[%s5765_s1 + $0x10] sm:$0xff]  }
  0xca   : > { %3577 = vmatpush3.bf16.msra.mxu0 %v5116_v23  ;;  %v347_v23 = vshll.u32 %v343_v49, 16  ;;  %v5163_v49 = vld [vmem:[%s5765_s1 + $0x630] sm:$0xff]  }
  0xcb   : > { %3888 = vmatprep.subr.bf16.mxu0 %v5794_v37  ;;  %v5171_v54 = vor.u32 %v333_v29, %v329_v32  ;;  %v4140_v29 = vld [vmem:[%s5765_s1 + $0x38] sm:$0xff]   ;;  %v4142_v32 = vld [vmem:[%s5765_s1 + $0x30] sm:$0xff]  }
  0xcc   : > { %v349_v34 = vrot.slane %v347_v23, 1  ;;  %3599 = vmatpush3.bf16.msra.mxu1 %v5157_v60  ;;  %v5197_v23 = vld [vmem:[%s5765_s1 + $0x620] sm:$0xff]   ;;  %v4148_v60 = vld [vmem:[%s5765_s1 + $0x18] sm:$0xff]  }
  0xcd   : > { %2462 = vmatmul.mubr.bf16.vlgmr.msra.gmra.mxu0 %v5127_v31  ;;  %3615 = vmatprep.subr.bf16.mxu1 %v4139_v58  ;;  %5821 = vst [vmem:[#allocation24_spill] sm:$0xff] %v5197_v23  ;;  %v5210_v58 = vld [vmem:[%s5765_s1 + $0x618] sm:$0xff]  }
  0xce   : > { %3889 = vmatpush3.bf16.msra.mxu0 %v5140_v41  ;;  %v5167_v28 = vor.u32 %v349_v34, %v345_v39  ;;  %3904 = vmatprep.mubr.msk.bf16.mxu0 %vm4283_vm0, %v5794_v37  ;;  %v5182_v34 = vld [vmem:[%s5765_s1 + $0x628] sm:$0xff]   ;;  %v4141_v39 = vld [vmem:[%s5765_s1 + $0x70] sm:$0xff]   ;;  %5822 = vst [vmem:[#allocation25_spill] sm:$0xff] %v5210_v58 }
  0xcf   : > { %3890 = vmatprep.subr.bf16.mxu0 %v5794_v37  ;;  %5820 = vst [vmem:[#allocation23_spill] sm:$0xff] %v5182_v34 }
  0xd0   : > { %2501 = vmatprep.mubr.bf16.mxu1 %v5167_v28 }
  0xd1   : > { %2502 = vmatmul.mubr.bf16.vlgmr.msra.gmra.mxu1 %v5171_v54 }
  0xd2   : > { %3891 = vmatpush3.bf16.msra.mxu0 %v5163_v49  ;;  %3616 = vmatpush3.bf16.msra.mxu1 %v4140_v29  ;;  %v4144_v29 = vld [vmem:[%s5765_s1 + $0x28] sm:$0xff]  }
  0xd3   : > { %3892 = vmatprep.subr.bf16.mxu0 %v5794_v37  ;;  %2584 = vmatprep.mubr.bf16.mxu1 %v4619_v62  ;;  %v4143_v62 = vld [vmem:[%s5765_s1 + $0x68] sm:$0xff]  }
  0xd4   : > { %3617 = vmatprep.subr.bf16.mxu1 %v4141_v39  ;;  %v4145_v39 = vld [vmem:[%s5765_s1 + $0x60] sm:$0xff]  }
  0xd6   : > { %3893 = vmatpush3.bf16.msra.mxu0 %v5182_v34  ;;  %3618 = vmatpush3.bf16.msra.mxu1 %v4142_v32  ;;  %v5223_v32 = vld [vmem:[%s5765_s1 + $0x610] sm:$0xff]  }
  0xd7   : > { %3894 = vmatprep.subr.bf16.mxu0 %v5794_v37  ;;  %3619 = vmatprep.subr.bf16.mxu1 %v4143_v62  ;;  %5823 = vst [vmem:[#allocation26_spill] sm:$0xff] %v5223_v32  ;;  %v4146_v62 = vld [vmem:[%s5765_s1 + $0x20] sm:$0xff]  }
  0xda   : > { %3895 = vmatpush3.bf16.msra.mxu0 %v5197_v23  ;;  %3620 = vmatpush3.bf16.msra.mxu1 %v4144_v29  ;;  %v4147_v29 = vld [vmem:[%s5765_s1 + $0x58] sm:$0xff]  }
  0xdb   : > { %3896 = vmatprep.subr.bf16.mxu0 %v5794_v37  ;;  %3621 = vmatprep.subr.bf16.mxu1 %v4145_v39  ;;  %v5236_v39 = vld [vmem:[%s5765_s1 + $0x608] sm:$0xff]  }
  0xdc   : > { %5824 = vst [vmem:[#allocation27_spill] sm:$0xff] %v5236_v39 }
  0xde   : > { %3897 = vmatpush3.bf16.msra.mxu0 %v5210_v58  ;;  %3622 = vmatpush3.bf16.msra.mxu1 %v4146_v62  ;;  %v4149_v62 = vld [vmem:[%s5765_s1 + $0x50] sm:$0xff]  }
  0xdf   : > { %3898 = vmatprep.subr.bf16.mxu0 %v5794_v37  ;;  %3623 = vmatprep.subr.bf16.mxu1 %v4147_v29  ;;  %v5249_v29 = vld [vmem:[%s5765_s1 + $0x600] sm:$0xff]  }
  0xe2   : > { %3899 = vmatpush3.bf16.msra.mxu0 %v5223_v32  ;;  %3624 = vmatpush3.bf16.msra.mxu1 %v4148_v60  ;;  %v5798_v60 = vrot.slane %v5135_v47, 1 }
  0xe3   : > { %3900 = vmatprep.subr.bf16.mxu0 %v5794_v37  ;;  %3625 = vmatprep.subr.bf16.mxu1 %v4149_v62  ;;  %v4151_v62 = vld [vmem:[%s5765_s1 + $0x48] sm:$0xff]  }
  0xe6   : > { %3901 = vmatpush3.bf16.msra.mxu0 %v5236_v39  ;;  %3626 = vmatpush3.bf16.msra.mxu1 %v4150_v61  ;;  %v4153_v61 = vld [vmem:[%s5765_s1 + $0x8] sm:$0xff]  }
  0xe7   : > { %3902 = vmatprep.subr.bf16.mxu0 %v5794_v37  ;;  %3627 = vmatprep.subr.bf16.mxu1 %v4151_v62  ;;  %v4152_v37 = vld [vmem:[%s5765_s1 + $0xf8] sm:$0xff]   ;;  %v4154_v62 = vld [vmem:[%s5765_s1 + $0x40] sm:$0xff]  }
  0xea   : > { %3903 = vmatpush3.bf16.msra.mxu0 %v5249_v29  ;;  %3628 = vmatpush3.bf16.msra.mxu1 %v4153_v61  ;;  %v4159_v61 = vld [vmem:[%s5765_s1 + $0xb0] sm:$0xff]  }
  0xeb   : > { %3637 = vmatprep.subr.bf16.mxu0 %v4152_v37  ;;  %3629 = vmatprep.subr.bf16.mxu1 %v4154_v62  ;;  %v4156_v37 = vld [vmem:[%s5765_s1 + $0xf0] sm:$0xff]  }
  0xed   : > { %v3358_v32 = vpop.f32.mrf.mxu0  ;;  %3905 = vmatmul.mubr.bf16.vlgmr.msra.gmra.mxu0 %v5798_v60 }
  0xee   : > { %2624 = vmatprep.mubr.bf16.mxu0 %v4648_v11  ;;  %v4160_v11 = vld [vmem:[%s5765_s1 + $0xe8] sm:$0xff]   ;;  %v3380_v62 = vpop.f32.mrf.mxu1 }
  0xef   : > { %v3359_v58 = vpop.f32.mrf.mxu0 }
  0xf0   : > { %v3360_v39 = vadd.f32 %v3359_v58, %v3358_v32  ;;  %v4155_v58 = vld [vmem:[%s5765_s1 + $0xb8] sm:$0xff]   ;;  %v5287_v32 = vld [vmem:[%s5766_s2] ss:$0 sm:$0xff] }
  0xf1   : > { %v3361_v23 = vpop.f32.mrf.mxu0  ;;  %3638 = vmatpush3.bf16.msra.mxu0 %v4155_v58  ;;  %v4161_v58 = vld [vmem:[%s5765_s1 + $0x138] sm:$0xff]  }
  0xf2   : > { %3639 = vmatprep.subr.bf16.mxu0 %v4156_v37  ;;  %v4158_v23 = vld [vmem:[%s5765_s1 + $0x178] sm:$0xff]   ;;  %v2064_v37 = vadd.f32 %v3360_v39, %v5287_v32 }
  0xf3   : > { %v3362_v34 = vpop.f32.mrf.mxu0 }
  0xf4   : > { %v4157_v34 = vld [vmem:[%s5765_s1] sm:$0xff]  }
  0xf5   : > { %3630 = vmatpush3.bf16.msra.mxu1 %v4157_v34  ;;  %3640 = vmatpush3.bf16.msra.mxu0 %v4159_v61  ;;  %v3381_v34 = vpop.f32.mrf.mxu1  ;;  %v4163_v61 = vld [vmem:[%s5765_s1 + $0xa8] sm:$0xff]  }
  0xf6   : > { %3659 = vmatprep.subr.bf16.mxu1 %v4158_v23  ;;  %3641 = vmatprep.subr.bf16.mxu0 %v4160_v11  ;;  %v4162_v23 = vld [vmem:[%s5765_s1 + $0x170] sm:$0xff]   ;;  %v4164_v11 = vld [vmem:[%s5765_s1 + $0xe0] sm:$0xff]  }
  0xf7   : > { %v3383_v39 = vpop.f32.mrf.mxu1 }
  0xf8   : > { %2585 = vmatmul.mubr.bf16.vlgmr.msra.gmra.mxu1 %v4651_v12  ;;  %v3382_v12 = vadd.f32 %v3381_v34, %v3380_v62  ;;  %v4167_v62 = vld [vmem:[%s5765_s1 + $0xa0] sm:$0xff]   ;;  %v4169_v34 = vld [vmem:[%s5765_s1 + $0x128] sm:$0xff]   ;;  %v4174_v39 = vld [vmem:[%s5765_s1 + $0x158] sm:$0xff]  }
  0xf9   : > { %3660 = vmatpush3.bf16.msra.mxu1 %v4161_v58  ;;  %2664 = vmatprep.mubr.bf16.mxu1 %v4739_v44  ;;  %v4165_v44 = vld [vmem:[%s5765_s1 + $0x130] sm:$0xff]   ;;  %v3384_v60 = vpop.f32.mrf.mxu1 }
  0xfa   : > { %3661 = vmatprep.subr.bf16.mxu1 %v4162_v23  ;;  %3642 = vmatpush3.bf16.msra.mxu0 %v4163_v61  ;;  %v2104_v58 = vadd.f32 %v3382_v12, %v2064_v37  ;;  %v4166_v23 = vld [vmem:[%s5765_s1 + $0x168] sm:$0xff]   ;;  %v4168_v37 = vld [vmem:[%s5765_s1 + $0xd8] sm:$0xff]   ;;  %v4170_v60 = vld [vmem:[%s5765_s1 + $0x160] sm:$0xff]  }
  0xfb   : > { %3643 = vmatprep.subr.bf16.mxu0 %v4164_v11  ;;  %v4171_v61 = vld [vmem:[%s5765_s1 + $0x98] sm:$0xff]   ;;  %v4172_v12 = vld [vmem:[%s5765_s1 + $0xd0] sm:$0xff]   ;;  %v4173_v11 = vld [vmem:[%s5765_s1 + $0x120] sm:$0xff]  }
  0xfd   : > { %3662 = vmatpush3.bf16.msra.mxu1 %v4165_v44  ;;  %v4175_v44 = vld [vmem:[%s5765_s1 + $0x90] sm:$0xff]  }
  0xfe   : > { %3663 = vmatprep.subr.bf16.mxu1 %v4166_v23  ;;  %3644 = vmatpush3.bf16.msra.mxu0 %v4167_v62  ;;  %v4176_v23 = vld [vmem:[%s5765_s1 + $0xc8] sm:$0xff]   ;;  %v4177_v62 = vld [vmem:[%s5765_s1 + $0x118] sm:$0xff]  }
  0xff   : > { %3645 = vmatprep.subr.bf16.mxu0 %v4168_v37  ;;  %v4178_v37 = vld [vmem:[%s5765_s1 + $0x150] sm:$0xff]  }
 0x101   : > { %3664 = vmatpush3.bf16.msra.mxu1 %v4169_v34  ;;  %v4179_v34 = vld [vmem:[%s5765_s1 + $0x88] sm:$0xff]  }
 0x102   : > { %3665 = vmatprep.subr.bf16.mxu1 %v4170_v60  ;;  %3646 = vmatpush3.bf16.msra.mxu0 %v4171_v61  ;;  %v4180_v60 = vld [vmem:[%s5765_s1 + $0xc0] sm:$0xff]   ;;  %v4181_v61 = vld [vmem:[%s5765_s1 + $0x110] sm:$0xff]  }
 0x103   : > { %3647 = vmatprep.subr.bf16.mxu0 %v4172_v12 }
 0x105   : > { %3666 = vmatpush3.bf16.msra.mxu1 %v4173_v11  ;;  %v4182_v11 = vld [vmem:[%s5765_s1 + $0x148] sm:$0xff]  }
 0x106   : > { %3667 = vmatprep.subr.bf16.mxu1 %v4174_v39  ;;  %3648 = vmatpush3.bf16.msra.mxu0 %v4175_v44  ;;  %v4183_v39 = vld [vmem:[%s5765_s1 + $0x80] sm:$0xff]   ;;  %v4184_v44 = vld [vmem:[%s5765_s1 + $0x1f8] sm:$0xff]  }
 0x107   : > { %3649 = vmatprep.subr.bf16.mxu0 %v4176_v23 }
 0x109   : > { %3668 = vmatpush3.bf16.msra.mxu1 %v4177_v62 }
 0x10a   : > { %3669 = vmatprep.subr.bf16.mxu1 %v4178_v37  ;;  %3650 = vmatpush3.bf16.msra.mxu0 %v4179_v34  ;;  %v4185_v37 = vld [vmem:[%s5765_s1 + $0x108] sm:$0xff]  }
 0x10b   : > { %3651 = vmatprep.subr.bf16.mxu0 %v4180_v60  ;;  %v4186_v60 = vld [vmem:[%s5765_s1 + $0x140] sm:$0xff]  }
 0x10d   : > { %3670 = vmatpush3.bf16.msra.mxu1 %v4181_v61  ;;  %v3402_v12 = vpop.f32.mrf.mxu0  ;;  %v4187_v61 = vld [vmem:[%s5765_s1 + $0x1b8] sm:$0xff]  }
 0x10e   : > { %3671 = vmatprep.subr.bf16.mxu1 %v4182_v11  ;;  %3652 = vmatpush3.bf16.msra.mxu0 %v4183_v39 }
 0x10f   : > { %3681 = vmatprep.subr.bf16.mxu0 %v4184_v44  ;;  %v3403_v23 = vpop.f32.mrf.mxu0  ;;  %v4190_v44 = vld [vmem:[%s5765_s1 + $0x278] sm:$0xff]  }
 0x110   : > { %v3404_v62 = vadd.f32 %v3403_v23, %v3402_v12  ;;  %v4188_v12 = vld [vmem:[%s5765_s1 + $0x1f0] sm:$0xff]   ;;  %v4192_v23 = vld [vmem:[%s5765_s1 + $0x1e8] sm:$0xff]  }
 0x111   : > { %3672 = vmatpush3.bf16.msra.mxu1 %v4185_v37  ;;  %2625 = vmatmul.mubr.bf16.vlgmr.msra.gmra.mxu0 %v4736_v43  ;;  %v3405_v34 = vpop.f32.mrf.mxu0  ;;  %v4189_v43 = vld [vmem:[%s5765_s1 + $0x100] sm:$0xff]   ;;  %v4193_v37 = vld [vmem:[%s5765_s1 + $0x238] sm:$0xff]  }
 0x112   : > { %3673 = vmatprep.subr.bf16.mxu1 %v4186_v60  ;;  %3682 = vmatpush3.bf16.msra.mxu0 %v4187_v61  ;;  %v2144_v11 = vadd.f32 %v3404_v62, %v2104_v58  ;;  %v4191_v58 = vld [vmem:[%s5765_s1 + $0x1b0] sm:$0xff]   ;;  %v5825_v62 = vrot.slane %v4693_v25, 1  ;;  %v5826_v34 = vrot.slane %v4743_v45, 1 }
 0x113   : > { %3683 = vmatprep.subr.bf16.mxu0 %v4188_v12  ;;  %v3406_v39 = vpop.f32.mrf.mxu0  ;;  %2704 = vmatprep.mubr.bf16.mxu0 %v4778_v57  ;;  %v3424_v57 = vpop.f32.mrf.mxu1  ;;  %v4194_v61 = vld [vmem:[%s5765_s1 + $0x270] sm:$0xff]   ;;  %v4195_v12 = vld [vmem:[%s5765_s1 + $0x1a8] sm:$0xff]  }
 0x114   : > { %v4196_v39 = vld [vmem:[%s5765_s1 + $0x1e0] sm:$0xff]  }
 0x115   : > { %3674 = vmatpush3.bf16.msra.mxu1 %v4189_v43  ;;  %v3425_v60 = vpop.f32.mrf.mxu1 }
 0x116   : > { %3703 = vmatprep.subr.bf16.mxu1 %v4190_v44  ;;  %3684 = vmatpush3.bf16.msra.mxu0 %v4191_v58  ;;  %v3426_v25 = vadd.f32 %v3425_v60, %v3424_v57  ;;  %v4197_v44 = vld [vmem:[%s5765_s1 + $0x230] sm:$0xff]   ;;  %v4199_v57 = vld [vmem:[%s5765_s1 + $0x1a0] sm:$0xff]  }
 0x117   : > { %3685 = vmatprep.subr.bf16.mxu0 %v4192_v23  ;;  %v3427_v43 = vpop.f32.mrf.mxu1  ;;  %v4198_v23 = vld [vmem:[%s5765_s1 + $0x268] sm:$0xff]   ;;  %v4204_v60 = vld [vmem:[%s5765_s1 + $0x1d0] sm:$0xff]  }
 0x118   : > { %2665 = vmatmul.mubr.bf16.vlgmr.msra.gmra.mxu1 %v5825_v62  ;;  %v2184_v45 = vadd.f32 %v3426_v25, %v2144_v11  ;;  %v4200_v11 = vld [vmem:[%s5765_s1 + $0x1d8] sm:$0xff]   ;;  %v4201_v62 = vld [vmem:[%s5765_s1 + $0x228] sm:$0xff]   ;;  %v4207_v25 = vld [vmem:[%s5765_s1 + $0x190] sm:$0xff]  }
 0x119   : > { %3704 = vmatpush3.bf16.msra.mxu1 %v4193_v37  ;;  %2744 = vmatprep.mubr.bf16.mxu1 %v5826_v34  ;;  %v3428_v58 = vpop.f32.mrf.mxu1  ;;  %v4202_v37 = vld [vmem:[%s5765_s1 + $0x260] sm:$0xff]   ;;  %v4203_v34 = vld [vmem:[%s5765_s1 + $0x198] sm:$0xff]  }
 0x11a   : > { %3705 = vmatprep.subr.bf16.mxu1 %v4194_v61  ;;  %3686 = vmatpush3.bf16.msra.mxu0 %v4195_v12  ;;  %v4205_v61 = vld [vmem:[%s5765_s1 + $0x220] sm:$0xff]   ;;  %v4206_v12 = vld [vmem:[%s5765_s1 + $0x258] sm:$0xff]   ;;  %v4211_v58 = vld [vmem:[%s5765_s1 + $0x188] sm:$0xff]  }
 0x11b   : > { %3687 = vmatprep.subr.bf16.mxu0 %v4196_v39  ;;  %v4208_v39 = vld [vmem:[%s5765_s1 + $0x1c8] sm:$0xff]   ;;  %v4209_v43 = vld [vmem:[%s5765_s1 + $0x218] sm:$0xff]  }
 0x11d   : > { %3706 = vmatpush3.bf16.msra.mxu1 %v4197_v44  ;;  %v4210_v44 = vld [vmem:[%s5765_s1 + $0x250] sm:$0xff]  }
 0x11e   : > { %3707 = vmatprep.subr.bf16.mxu1 %v4198_v23  ;;  %3688 = vmatpush3.bf16.msra.mxu0 %v4199_v57  ;;  %v4212_v23 = vld [vmem:[%s5765_s1 + $0x1c0] sm:$0xff]   ;;  %v4213_v57 = vld [vmem:[%s5765_s1 + $0x210] sm:$0xff]  }
 0x11f   : > { %3689 = vmatprep.subr.bf16.mxu0 %v4200_v11  ;;  %v4214_v11 = vld [vmem:[%s5765_s1 + $0x248] sm:$0xff]  }
 0x121   : > { %3708 = vmatpush3.bf16.msra.mxu1 %v4201_v62  ;;  %v4215_v62 = vld [vmem:[%s5765_s1 + $0x180] sm:$0xff]  }
 0x122   : > { %3709 = vmatprep.subr.bf16.mxu1 %v4202_v37  ;;  %3690 = vmatpush3.bf16.msra.mxu0 %v4203_v34  ;;  %v4216_v34 = vld [vmem:[%s5765_s1 + $0x2f8] sm:$0xff]  }
 0x123   : > { %3691 = vmatprep.subr.bf16.mxu0 %v4204_v60 }
 0x125   : > { %3710 = vmatpush3.bf16.msra.mxu1 %v4205_v61  ;;  %v4217_v61 = vld [vmem:[%s5765_s1 + $0x208] sm:$0xff]  }
 0x126   : > { %3711 = vmatprep.subr.bf16.mxu1 %v4206_v12  ;;  %3692 = vmatpush3.bf16.msra.mxu0 %v4207_v25  ;;  %v4218_v25 = vld [vmem:[%s5765_s1 + $0x240] sm:$0xff]  }
 0x127   : > { %3693 = vmatprep.subr.bf16.mxu0 %v4208_v39  ;;  %v4219_v39 = vld [vmem:[%s5765_s1 + $0x2b8] sm:$0xff]  }
 0x129   : > { %3712 = vmatpush3.bf16.msra.mxu1 %v4209_v43 }
 0x12a   : > { %3713 = vmatprep.subr.bf16.mxu1 %v4210_v44  ;;  %3694 = vmatpush3.bf16.msra.mxu0 %v4211_v58  ;;  %v4220_v58 = vld [vmem:[%s5765_s1 + $0x2f0] sm:$0xff]  }
 0x12b   : > { %3695 = vmatprep.subr.bf16.mxu0 %v4212_v23  ;;  %v4221_v23 = vld [vmem:[%s5765_s1 + $0x200] sm:$0xff]  }
 0x12d   : > { %3714 = vmatpush3.bf16.msra.mxu1 %v4213_v57  ;;  %v3446_v37 = vpop.f32.mrf.mxu0  ;;  %v4222_v57 = vld [vmem:[%s5765_s1 + $0x378] sm:$0xff]  }
 0x12e   : > { %3715 = vmatprep.subr.bf16.mxu1 %v4214_v11  ;;  %3696 = vmatpush3.bf16.msra.mxu0 %v4215_v62  ;;  %v4225_v62 = vld [vmem:[%s5765_s1 + $0x338] sm:$0xff]  }
 0x12f   : > { %3725 = vmatprep.subr.bf16.mxu0 %v4216_v34  ;;  %v3447_v60 = vpop.f32.mrf.mxu0  ;;  %v3468_v11 = vpop.f32.mrf.mxu1  ;;  %v4226_v34 = vld [vmem:[%s5765_s1 + $0x370] sm:$0xff]  }
 0x130   : > { %v3448_v12 = vadd.f32 %v3447_v60, %v3446_v37  ;;  %v4227_v60 = vld [vmem:[%s5765_s1 + $0x2a8] sm:$0xff]  }
 0x131   : > { %3716 = vmatpush3.bf16.msra.mxu1 %v4217_v61  ;;  %2705 = vmatmul.mubr.bf16.vlgmr.msra.gmra.mxu0 %v4918_v22  ;;  %v3449_v43 = vpop.f32.mrf.mxu0  ;;  %v3469_v37 = vpop.f32.mrf.mxu1 }
 0x132   : > { %3717 = vmatprep.subr.bf16.mxu1 %v4218_v25  ;;  %3726 = vmatpush3.bf16.msra.mxu0 %v4219_v39  ;;  %v2224_v44 = vadd.f32 %v3448_v12, %v2184_v45  ;;  %v4223_v45 = vld [vmem:[%s5765_s1 + $0x2b0] sm:$0xff]   ;;  %v3470_v61 = vadd.f32 %v3469_v37, %v3468_v11  ;;  %v4230_v43 = vld [vmem:[%s5765_s1 + $0x368] sm:$0xff]   ;;  %v4238_v11 = vld [vmem:[%s5765_s1 + $0x358] sm:$0xff]  }
 0x133   : > { %3727 = vmatprep.subr.bf16.mxu0 %v4220_v58  ;;  %2784 = vmatprep.mubr.bf16.mxu0 %v5124_v51  ;;  %v3450_v22 = vpop.f32.mrf.mxu0  ;;  %v4224_v51 = vld [vmem:[%s5765_s1 + $0x2e8] sm:$0xff]   ;;  %v3471_v12 = vpop.f32.mrf.mxu1  ;;  %v4231_v58 = vld [vmem:[%s5765_s1 + $0x2a0] sm:$0xff]   ;;  %v180_v37 = vld [vmem:[%s4412_s27 + $0x14] sm:$0x3] }
 0x134   : > { %v2264_v25 = vadd.f32 %v3470_v61, %v2224_v44  ;;  %v4232_v44 = vld [vmem:[%s5765_s1 + $0x2d8] sm:$0xff]   ;;  %v4233_v22 = vld [vmem:[%s5765_s1 + $0x328] sm:$0xff]   ;;  %v5553_v61 = vrot.slane %v180_v37, %v4431_v42 }
 0x135   : > { %3718 = vmatpush3.bf16.msra.mxu1 %v4221_v23  ;;  %v3472_v39 = vpop.f32.mrf.mxu1  ;;  %v4234_v23 = vld [vmem:[%s5765_s1 + $0x360] sm:$0xff]   ;;  %v4243_v12 = vld [vmem:[%s5765_s1 + $0x288] sm:$0xff]  }
 0x136   : > { %3747 = vmatprep.subr.bf16.mxu1 %v4222_v57  ;;  %3728 = vmatpush3.bf16.msra.mxu0 %v4223_v45  ;;  %v4235_v57 = vld [vmem:[%s5765_s1 + $0x298] sm:$0xff]   ;;  %v4236_v45 = vld [vmem:[%s5765_s1 + $0x2d0] sm:$0xff]  }
 0x137   : > { %3729 = vmatprep.subr.bf16.mxu0 %v4224_v51  ;;  %v4237_v51 = vld [vmem:[%s5765_s1 + $0x320] sm:$0xff]   ;;  %v4245_v39 = vld [vmem:[%s5765_s1 + $0x310] sm:$0xff]  }
 0x138   : > { %2745 = vmatmul.mubr.bf16.vlgmr.msra.gmra.mxu1 %v4971_v36  ;;  %v4228_v36 = vld [vmem:[%s5765_s1 + $0x2e0] sm:$0xff]  }
 0x139   : > { %3748 = vmatpush3.bf16.msra.mxu1 %v4225_v62  ;;  %2824 = vmatprep.mubr.bf16.mxu1 %v5167_v28  ;;  %v4229_v28 = vld [vmem:[%s5765_s1 + $0x330] sm:$0xff]  }
 0x13a   : > { %3749 = vmatprep.subr.bf16.mxu1 %v4226_v34  ;;  %3730 = vmatpush3.bf16.msra.mxu0 %v4227_v60  ;;  %v4239_v62 = vld [vmem:[%s5765_s1 + $0x290] sm:$0xff]   ;;  %v4240_v34 = vld [vmem:[%s5765_s1 + $0x2c8] sm:$0xff]   ;;  %v4241_v60 = vld [vmem:[%s5765_s1 + $0x318] sm:$0xff]  }
 0x13b   : > { %3731 = vmatprep.subr.bf16.mxu0 %v4228_v36  ;;  %v4242_v36 = vld [vmem:[%s5765_s1 + $0x350] sm:$0xff]  }
 0x13d   : > { %3750 = vmatpush3.bf16.msra.mxu1 %v4229_v28  ;;  %v4244_v28 = vld [vmem:[%s5765_s1 + $0x2c0] sm:$0xff]  }
 0x13e   : > { %3751 = vmatprep.subr.bf16.mxu1 %v4230_v43  ;;  %3732 = vmatpush3.bf16.msra.mxu0 %v4231_v58  ;;  %v365_v43 = vshll.u32 %v5553_v61, 16  ;;  %v4246_v58 = vld [vmem:[%s5765_s1 + $0x348] sm:$0xff]  }
 0x13f   : > { %3733 = vmatprep.subr.bf16.mxu0 %v4232_v44  ;;  %v4247_v44 = vld [vmem:[%s5765_s1 + $0x280] sm:$0xff]  }
 0x141   : > { %3752 = vmatpush3.bf16.msra.mxu1 %v4233_v22 }
 0x142   : > { %3753 = vmatprep.subr.bf16.mxu1 %v4234_v23  ;;  %3734 = vmatpush3.bf16.msra.mxu0 %v4235_v57  ;;  %v4248_v23 = vld [vmem:[%s5765_s1 + $0x3f8] sm:$0xff]   ;;  %v4249_v57 = vld [vmem:[%s5765_s1 + $0x308] sm:$0xff]  }
 0x143   : > { %3735 = vmatprep.subr.bf16.mxu0 %v4236_v45 }
 0x145   : > { %3754 = vmatpush3.bf16.msra.mxu1 %v4237_v51  ;;  %v363_v51 = vshrl.u32 %v5553_v61, 16 }
 0x146   : > { %3755 = vmatprep.subr.bf16.mxu1 %v4238_v11  ;;  %3736 = vmatpush3.bf16.msra.mxu0 %v4239_v62  ;;  %v367_v11 = vrot.slane %v365_v43, 1  ;;  %v4250_v62 = vld [vmem:[%s5765_s1 + $0x340] sm:$0xff]  }
 0x147   : > { %3737 = vmatprep.subr.bf16.mxu0 %v4240_v34  ;;  %v4251_v34 = vld [vmem:[%s5765_s1 + $0x3b8] sm:$0xff]  }
 0x148   : > { %v368_v43 = vor.u32 %v367_v11, %v363_v51  ;;  %v4259_v51 = vld [vmem:[%s5765_s1 + $0x3e0] sm:$0xff]  }
 0x149   : > { %3756 = vmatpush3.bf16.msra.mxu1 %v4241_v60 }
 0x14a   : > { %3757 = vmatprep.subr.bf16.mxu1 %v4242_v36  ;;  %3738 = vmatpush3.bf16.msra.mxu0 %v4243_v12 }
 0x14b   : > { %3739 = vmatprep.subr.bf16.mxu0 %v4244_v28  ;;  %v4253_v28 = vld [vmem:[%s5765_s1 + $0x300] sm:$0xff]  }
 0x14d   : > { %3758 = vmatpush3.bf16.msra.mxu1 %v4245_v39  ;;  %v3490_v22 = vpop.f32.mrf.mxu0 }
 0x14e   : > { %3759 = vmatprep.subr.bf16.mxu1 %v4246_v58  ;;  %3740 = vmatpush3.bf16.msra.mxu0 %v4247_v44  ;;  %v4254_v58 = vld [vmem:[%s5765_s1 + $0x478] sm:$0xff]   ;;  %v4255_v44 = vld [vmem:[%s5765_s1 + $0x3b0] sm:$0xff]  }
 0x14f   : > { %3769 = vmatprep.subr.bf16.mxu0 %v4248_v23  ;;  %v3491_v45 = vpop.f32.mrf.mxu0 }
 0x150   : > { %v3492_v60 = vadd.f32 %v3491_v45, %v3490_v22  ;;  %v4257_v22 = vld [vmem:[%s5765_s1 + $0x438] sm:$0xff]  }
 0x151   : > { %3760 = vmatpush3.bf16.msra.mxu1 %v4249_v57  ;;  %2785 = vmatmul.mubr.bf16.vlgmr.msra.gmra.mxu0 %v5127_v31  ;;  %v3493_v36 = vpop.f32.mrf.mxu0  ;;  %v4252_v31 = vld [vmem:[%s5765_s1 + $0x3f0] sm:$0xff]   ;;  %v4258_v57 = vld [vmem:[%s5765_s1 + $0x3a8] sm:$0xff]  }
 0x152   : > { %3761 = vmatprep.subr.bf16.mxu1 %v4250_v62  ;;  %3770 = vmatpush3.bf16.msra.mxu0 %v4251_v34  ;;  %v2304_v12 = vadd.f32 %v3492_v60, %v2264_v25  ;;  %v4256_v25 = vld [vmem:[%s5765_s1 + $0x3e8] sm:$0xff]   ;;  %v4261_v34 = vld [vmem:[%s5765_s1 + $0x3d8] sm:$0xff]   ;;  %v386_v36 = vrot.slane %v5553_v61, 1  ;;  %v4271_v61 = vld [vmem:[%s5765_s1 + $0x4f0] sm:$0xff]  }
 0x153   : > { %3771 = vmatprep.subr.bf16.mxu0 %v4252_v31  ;;  %2864 = vmatprep.mubr.bf16.mxu0 %v180_v37  ;;  %v3494_v39 = vpop.f32.mrf.mxu0  ;;  %v3512_v37 = vpop.f32.mrf.mxu1  ;;  %v4269_v60 = vld [vmem:[%s5765_s1 + $0x4f8] sm:$0xff]  }
 0x154   : > { %v4270_v31 = vld [vmem:[%s5765_s1 + $0x4b8] sm:$0xff]  }
 0x155   : > { %3762 = vmatpush3.bf16.msra.mxu1 %v4253_v28  ;;  %v3513_v23 = vpop.f32.mrf.mxu1  ;;  %v177_v28 = vld [vmem:[%s4412_s27 + $0xe] sm:$0x3] }
 0x156   : > { %3791 = vmatprep.subr.bf16.mxu1 %v4254_v58  ;;  %3772 = vmatpush3.bf16.msra.mxu0 %v4255_v44  ;;  %v3514_v45 = vadd.f32 %v3513_v23, %v3512_v37  ;;  %v5836_v58 = vmov 0.0   ;;  %v5837_v44 = vld [vmem:[#allocation6_spill] sm:$0xff]  ;;  %v5838_v37 = vld [vmem:[#allocation7_spill] sm:$0xff] }
 0x157   : > { %3773 = vmatprep.subr.bf16.mxu0 %v4256_v25 }
 0x158   : > { %2825 = vmatmul.mubr.bf16.vlgmr.msra.gmra.mxu1 %v5171_v54  ;;  %v3515_v54 = vpop.f32.mrf.mxu1  ;;  %v5614_v11 = vadd.f32 %v3514_v45, %v2304_v12  ;;  %v5840_v45 = vld [vmem:[#allocation9_spill] sm:$0xff] }
 0x159   : > { %3792 = vmatpush3.bf16.msra.mxu1 %v4257_v22  ;;  %2904 = vmatprep.mubr.bf16.mxu1 %v368_v43 }
 0x15a   : > { %3793 = vmatprep.subr.bf16.mxu1 %v4764_v52  ;;  %3774 = vmatpush3.bf16.msra.mxu0 %v4258_v57  ;;  %v3516_v62 = vpop.f32.mrf.mxu1  ;;  %v4260_v52 = vld [vmem:[%s5765_s1 + $0x3a0] sm:$0xff]   ;;  %v5839_v57 = vld [vmem:[#allocation8_spill] sm:$0xff] }
 0x15b   : > { %3775 = vmatprep.subr.bf16.mxu0 %v4259_v51  ;;  %v5841_v62 = vld [vmem:[#allocation10_spill] sm:$0xff] }
 0x15d   : > { %3794 = vmatpush3.bf16.msra.mxu1 %v4773_v55  ;;  %v4262_v55 = vld [vmem:[%s5765_s1 + $0x398] sm:$0xff]  }
 0x15e   : > { %3795 = vmatprep.subr.bf16.mxu1 %v4785_v59  ;;  %3776 = vmatpush3.bf16.msra.mxu0 %v4260_v52  ;;  %v4263_v59 = vld [vmem:[%s5765_s1 + $0x3d0] sm:$0xff]   ;;  %v5842_v52 = vld [vmem:[#allocation11_spill] sm:$0xff] }
 0x15f   : > { %3777 = vmatprep.subr.bf16.mxu0 %v4261_v34  ;;  %v5843_v34 = vld [vmem:[#allocation23_spill] sm:$0xff] }
 0x161   : > { %3796 = vmatpush3.bf16.msra.mxu1 %v4796_v63  ;;  %v4264_v63 = vld [vmem:[%s5765_s1 + $0x390] sm:$0xff]  }
 0x162   : > { %3797 = vmatprep.subr.bf16.mxu1 %v4807_v1  ;;  %3778 = vmatpush3.bf16.msra.mxu0 %v4262_v55  ;;  %v4265_v1 = vld [vmem:[%s5765_s1 + $0x3c8] sm:$0xff]  }
 0x163   : > { %3779 = vmatprep.subr.bf16.mxu0 %v4263_v59  ;;  %v5844_v59 = vld [vmem:[#allocation12_spill] sm:$0xff] }
 0x165   : > { %3798 = vmatpush3.bf16.msra.mxu1 %v4820_v3  ;;  %v4266_v3 = vld [vmem:[%s5765_s1 + $0x388] sm:$0xff]  }
 0x166   : > { %3799 = vmatprep.subr.bf16.mxu1 %v4831_v5  ;;  %3780 = vmatpush3.bf16.msra.mxu0 %v4264_v63  ;;  %v4267_v5 = vld [vmem:[%s5765_s1 + $0x3c0] sm:$0xff]  }
 0x167   : > { %3781 = vmatprep.subr.bf16.mxu0 %v4265_v1  ;;  %v5845_v63 = vld [vmem:[#allocation14_spill] sm:$0xff]  ;;  %v5846_v1 = vld [vmem:[#allocation24_spill] sm:$0xff] }
 0x169   : > { %3800 = vmatpush3.bf16.msra.mxu1 %v4843_v7  ;;  %v4268_v7 = vld [vmem:[%s5765_s1 + $0x380] sm:$0xff]  }
 0x16a   : > { %3801 = vmatprep.subr.bf16.mxu1 %v4854_v9  ;;  %3782 = vmatpush3.bf16.msra.mxu0 %v4266_v3 }
 0x16b   : > { %3783 = vmatprep.subr.bf16.mxu0 %v4267_v5 }
 0x16d   : > { %3802 = vmatpush3.bf16.msra.mxu1 %v4867_v13  ;;  %v5653_v9 = vpop.f32.mrf.mxu0  ;;  %v5827_v13 = vrot.slane %v5135_v47, 1 }
 0x16e   : > { %3803 = vmatprep.subr.bf16.mxu1 %v4878_v15  ;;  %3784 = vmatpush3.bf16.msra.mxu0 %v4268_v7  ;;  %v5848_v7 = vld [vmem:[#allocation18_spill] sm:$0xff] }
 0x16f   : > { %3813 = vmatprep.subr.bf16.mxu0 %v4269_v60  ;;  %v5662_v15 = vpop.f32.mrf.mxu0  ;;  %v5679_v39 = vpop.f32.mrf.mxu1 }
 0x170   : > { %v3536_v55 = vadd.f32 %v5662_v15, %v5653_v9 }
 0x171   : > { %3804 = vmatpush3.bf16.msra.mxu1 %v4891_v17  ;;  %2865 = vmatmul.mubr.bf16.vlgmr.msra.gmra.mxu0 %v5827_v13  ;;  %v3537_v12 = vpop.f32.mrf.mxu0  ;;  %v183_v17 = vld [vmem:[%s4412_s27 + $0x1c] sm:$0x3]  ;;  %v5682_v43 = vpop.f32.mrf.mxu1 }
 0x172   : > { %3805 = vmatprep.subr.bf16.mxu1 %v4902_v19  ;;  %3814 = vmatpush3.bf16.msra.mxu0 %v4270_v31  ;;  %v4272_v19 = vld [vmem:[%s5765_s1 + $0x4b0] sm:$0xff]   ;;  %v2384_v3 = vadd.f32 %v3536_v55, %v5614_v11  ;;  %v3558_v5 = vadd.f32 %v5682_v43, %v5679_v39  ;;  %v5851_v11 = vld [vmem:[#allocation21_spill] sm:$0xff]  ;;  %v5854_v39 = vld [vmem:[#allocation27_spill] sm:$0xff] }
 0x173   : > { %3815 = vmatprep.subr.bf16.mxu0 %v4271_v61  ;;  %2944 = vmatprep.mubr.bf16.mxu0 %v386_v36  ;;  %v3538_v47 = vpop.f32.mrf.mxu0  ;;  %v5849_v36 = vld [vmem:[#allocation25_spill] sm:$0xff]  ;;  %v5850_v31 = vld [vmem:[#allocation20_spill] sm:$0xff] }
 0x174   : > { %v2424_v15 = vadd.f32 %v3558_v5, %v2384_v3 }
 0x175   : > { %3806 = vmatpush3.bf16.msra.mxu1 %v4915_v21  ;;  %v3559_v21 = vpop.f32.mrf.mxu1 }
 0x176   : > { %3835 = vmatprep.subr.bf16.mxu1 %v4926_v24  ;;  %3816 = vmatpush3.bf16.msra.mxu0 %v4272_v19  ;;  %v5853_v19 = vld [vmem:[#allocation22_spill] sm:$0xff] }
 0x177   : > { %3817 = vmatprep.subr.bf16.mxu0 %v4812_v2  ;;  %v3560_v24 = vpop.f32.mrf.mxu1  ;;  %v377_v2 = vrot.slane %v183_v17, %v4431_v42 }
 0x178   : > { %2905 = vmatmul.mubr.bf16.vlgmr.msra.gmra.mxu1 %v183_v17  ;;  %v5852_v17 = vld [vmem:[#allocation26_spill] sm:$0xff] }
 0x179   : > { %3836 = vmatpush3.bf16.msra.mxu1 %v4950_v30  ;;  %2984 = vmatprep.mubr.bf16.mxu1 %v177_v28 }
 0x17a   : > { %3837 = vmatprep.subr.bf16.mxu1 %v4957_v33  ;;  %3818 = vmatpush3.bf16.msra.mxu0 %v4825_v4  ;;  %v411_v4 = vrot.slane %v177_v28, %v4431_v42 }
 0x17b   : > { %3819 = vmatprep.subr.bf16.mxu0 %v4836_v6  ;;  %v381_v6 = vshll.u32 %v377_v2, 16 }
 0x17d   : > { %3838 = vmatpush3.bf16.msra.mxu1 %v4969_v35  ;;  %v383_v30 = vrot.slane %v381_v6, 1  ;;  %v5830_v35 = vld [vmem:[#allocation3_spill] sm:$0xff] }
 0x17e   : > { %3839 = vmatprep.subr.bf16.mxu1 %v4983_v38  ;;  %3820 = vmatpush3.bf16.msra.mxu0 %v4848_v8  ;;  %v415_v8 = vshll.u32 %v411_v4, 16 }
 0x17f   : > { %3821 = vmatprep.subr.bf16.mxu0 %v4860_v10  ;;  %v379_v10 = vshrl.u32 %v377_v2, 16 }
 0x181   : > { %3840 = vmatpush3.bf16.msra.mxu1 %v4995_v40  ;;  %v384_v33 = vor.u32 %v383_v30, %v379_v10 }
 0x182   : > { %3841 = vmatprep.subr.bf16.mxu1 %v5008_v46  ;;  %3822 = vmatpush3.bf16.msra.mxu0 %v4872_v14  ;;  %v413_v14 = vshrl.u32 %v411_v4, 16  ;;  %v5831_v46 = vld [vmem:[#allocation15_spill] sm:$0xff] }
 0x183   : > { %3823 = vmatprep.subr.bf16.mxu0 %v4884_v16  ;;  %v417_v16 = vrot.slane %v415_v8, 1 }
 0x185   : > { %3842 = vmatpush3.bf16.msra.mxu1 %v5020_v48  ;;  %v418_v38 = vor.u32 %v417_v16, %v413_v14 }
 0x186   : > { %3843 = vmatprep.subr.bf16.mxu1 %v5032_v50  ;;  %3824 = vmatpush3.bf16.msra.mxu0 %v4896_v18  ;;  %v5828_v18 = vld [vmem:[#allocation13_spill] sm:$0xff] }
 0x187   : > { %3825 = vmatprep.subr.bf16.mxu0 %v4908_v20  ;;  %v5829_v20 = vld [vmem:[#allocation2_spill] sm:$0xff]  ;;  %v5834_v50 = vld [vmem:[#allocation5_spill] sm:$0xff] }
 0x189   : > { %3844 = vmatpush3.bf16.msra.mxu1 %v5044_v53 }
 0x18a   : > { %3845 = vmatprep.subr.bf16.mxu1 %v5056_v56  ;;  %3826 = vmatpush3.bf16.msra.mxu0 %v4932_v26  ;;  %v5832_v26 = vld [vmem:[#allocation17_spill] sm:$0xff]  ;;  %v5835_v56 = vld [vmem:[#allocation19_spill] sm:$0xff] }
 0x18b   : > { %3827 = vmatprep.subr.bf16.mxu0 %v4938_v27  ;;  %v5833_v27 = vld [vmem:[#allocation4_spill] sm:$0xff] }
 0x18d   : > { %3846 = vmatpush3.bf16.msra.mxu1 %v5068_v0  ;;  %v3578_v40 = vpop.f32.mrf.mxu0  ;;  %v173_v0 = vld [vmem:[%s4412_s27 + $0x6] sm:$0x3]  ;;  %s3136_s27 = sshll.u32 %s5856_s13, 1 }
 0x18e   : > { %3847 = vmatprep.subr.bf16.mxu1 %v5828_v18  ;;  %3828 = vmatpush3.bf16.msra.mxu0 %v5829_v20  ;;  %s5756_s15 = scalar_lea.vmem %s5767_s3, %s3136_s27 }
 0x18f   : > { %3857 = vmatprep.subr.bf16.mxu0 %v5830_v35  ;;  %v3579_v48 = vpop.f32.mrf.mxu0 }
 0x190   : > { %v3580_v9 = vadd.f32 %v3579_v48, %v3578_v40 }
 0x191   : > { %3848 = vmatpush3.bf16.msra.mxu1 %v5831_v46  ;;  %2945 = vmatmul.mubr.bf16.vlgmr.msra.gmra.mxu0 %v384_v33  ;;  %v3581_v53 = vpop.f32.mrf.mxu0  ;;  %v3600_v22 = vpop.f32.mrf.mxu1 }
 0x192   : > { %3849 = vmatprep.subr.bf16.mxu1 %v5832_v26  ;;  %3858 = vmatpush3.bf16.msra.mxu0 %v5833_v27  ;;  %v2464_v12 = vadd.f32 %v3580_v9, %v2424_v15 }
 0x193   : > { %3859 = vmatprep.subr.bf16.mxu0 %v5834_v50  ;;  %3024 = vmatprep.mubr.bf16.mxu0 %v418_v38  ;;  %v3582_v25 = vpop.f32.mrf.mxu0  ;;  %v3601_v23 = vpop.f32.mrf.mxu1 }
 0x194   : > { %v3602_v61 = vadd.f32 %v3601_v23, %v3600_v22 }
 0x195   : > { %3850 = vmatpush3.bf16.msra.mxu1 %v5835_v56  ;;  %v3603_v51 = vpop.f32.mrf.mxu1 }
 0x196   : > { %3908 = vmatprep.subr.bf16.mxu1 %v5836_v58  ;;  %3860 = vmatpush3.bf16.msra.mxu0 %v5837_v44  ;;  %v2504_v28 = vadd.f32 %v3602_v61, %v2464_v12 }
 0x197   : > { %3861 = vmatprep.subr.bf16.mxu0 %v5838_v37  ;;  %v3604_v54 = vpop.f32.mrf.mxu1 }
 0x198   : > { %2985 = vmatmul.mubr.bf16.vlgmr.msra.gmra.mxu1 %v173_v0 }
 0x199   : > { %3909 = vmatpush3.bf16.msra.mxu1 %v5140_v41  ;;  %3924 = vmatprep.mubr.msk.bf16.mxu1 %vm4283_vm0, %v5836_v58  ;;  %v395_v41 = vrot.slane %v173_v0, %v4431_v42  ;;  %v5847_v42 = vld [vmem:[#allocation16_spill] sm:$0xff] }
 0x19a   : > { %3910 = vmatprep.subr.bf16.mxu1 %v5836_v58  ;;  %3862 = vmatpush3.bf16.msra.mxu0 %v5839_v57 }
 0x19b   : > { %3863 = vmatprep.subr.bf16.mxu0 %v5840_v45  ;;  %v397_v60 = vshrl.u32 %v395_v41, 16  ;;  %v420_v4 = vrot.slane %v395_v41, 1 }
 0x19d   : > { %3911 = vmatpush3.bf16.msra.mxu1 %v5163_v49  ;;  %v399_v49 = vshll.u32 %v395_v41, 16 }
 0x19e   : > { %3912 = vmatprep.subr.bf16.mxu1 %v5836_v58  ;;  %3864 = vmatpush3.bf16.msra.mxu0 %v5841_v62 }
 0x19f   : > { %3865 = vmatprep.subr.bf16.mxu0 %v5842_v52  ;;  %v401_v13 = vrot.slane %v399_v49, 1 }
 0x1a1   : > { %3913 = vmatpush3.bf16.msra.mxu1 %v5843_v34  ;;  %v402_v47 = vor.u32 %v401_v13, %v397_v60 }
 0x1a2   : > { %3914 = vmatprep.subr.bf16.mxu1 %v5836_v58  ;;  %3866 = vmatpush3.bf16.msra.mxu0 %v5844_v59 }
 0x1a3   : > { %3867 = vmatprep.subr.bf16.mxu0 %v5845_v63 }
 0x1a5   : > { %3915 = vmatpush3.bf16.msra.mxu1 %v5846_v1 }
 0x1a6   : > { %3916 = vmatprep.subr.bf16.mxu1 %v5836_v58  ;;  %3868 = vmatpush3.bf16.msra.mxu0 %v5847_v42 }
 0x1a7   : > { %3869 = vmatprep.subr.bf16.mxu0 %v5848_v7 }
 0x1a9   : > { %3917 = vmatpush3.bf16.msra.mxu1 %v5849_v36 }
 0x1aa   : > { %3918 = vmatprep.subr.bf16.mxu1 %v5836_v58  ;;  %3870 = vmatpush3.bf16.msra.mxu0 %v5850_v31 }
 0x1ab   : > { %3871 = vmatprep.subr.bf16.mxu0 %v5851_v11 }
 0x1ad   : > { %3919 = vmatpush3.bf16.msra.mxu1 %v5852_v17  ;;  %v2543_v43 = vpop.f32.mrf.mxu0 }
 0x1ae   : > { %3920 = vmatprep.subr.bf16.mxu1 %v5836_v58  ;;  %3872 = vmatpush3.bf16.msra.mxu0 %v5853_v19  ;;  %v2544_v21 = vadd.f32 %v2543_v43, %v2504_v28 }
 0x1af   : > { %v3906_v24 = vpop.f32.mrf.mxu0 }
 0x1b0   : > { %v2549_v2 = vmax.f32 %v2544_v21, 0.0 }
 0x1b1   : > { %3921 = vmatpush3.bf16.msra.mxu1 %v5854_v39  ;;  %3025 = vmatmul.mubr.bf16.vlgmr.msra.gmra.mxu0 %v402_v47  ;;  %v2546_v6 = vpop.f32.mrf.mxu0 }
 0x1b2   : > { %3922 = vmatprep.subr.bf16.mxu1 %v5836_v58  ;;  %v2550_v8 = vpack.c.bf16 %v2549_v2, %v2549_v2 }
 0x1b3   : > { %v3907_v10 = vpop.f32.mrf.mxu0 }
 0x1b4   : > { %2551 = vst [vmem:[%s5756_s15] sm:$0x1] %v2550_v8 }
 0x1b5   : > { %3923 = vmatpush3.bf16.msra.mxu1 %v5249_v29 }
 0x1b8   : > { %3925 = vmatmul.mubr.bf16.vlgmr.msra.gmra.mxu1 %v420_v4  ;;  %v3631_v30 = vpop.f32.mrf.mxu1 }
 0x1ba   : > { %v3632_v14 = vpop.f32.mrf.mxu1 }
 0x1bb   : > { %v3633_v16 = vadd.f32 %v3632_v14, %v3631_v30 }
 0x1bc   : > { %v3634_v33 = vpop.f32.mrf.mxu1 }
 0x1bd   : > { %v2587_v29 = vadd.f32 %v3633_v16, %v5287_v32 }
 0x1be   : > { %v3635_v18 = vpop.f32.mrf.mxu1 }
 0x1d1   : > { %v3653_v20 = vpop.f32.mrf.mxu0 }
 0x1d3   : > { %v3654_v35 = vpop.f32.mrf.mxu0 }
 0x1d4   : > { %v3655_v38 = vadd.f32 %v3654_v35, %v3653_v20 }
 0x1d5   : > { %v3656_v40 = vpop.f32.mrf.mxu0 }
 0x1d6   : > { %v2627_v46 = vadd.f32 %v3655_v38, %v2587_v29 }
 0x1d7   : > { %v3657_v26 = vpop.f32.mrf.mxu0 }
 0x1d8   : > { %v3675_v27 = vpop.f32.mrf.mxu1 }
 0x1da   : > { %v3676_v48 = vpop.f32.mrf.mxu1 }
 0x1db   : > { %v3677_v50 = vadd.f32 %v3676_v48, %v3675_v27 }
 0x1dc   : > { %v3678_v53 = vpop.f32.mrf.mxu1 }
 0x1dd   : > { %v2667_v56 = vadd.f32 %v3677_v50, %v2627_v46 }
 0x1de   : > { %v3679_v0 = vpop.f32.mrf.mxu1 }
 0x1f1   : > { %v3697_v58 = vpop.f32.mrf.mxu0 }
 0x1f3   : > { %v3698_v44 = vpop.f32.mrf.mxu0 }
 0x1f4   : > { %v3699_v25 = vadd.f32 %v3698_v44, %v3697_v58 }
 0x1f5   : > { %v3700_v37 = vpop.f32.mrf.mxu0 }
 0x1f6   : > { %v2707_v22 = vadd.f32 %v3699_v25, %v2667_v56 }
 0x1f7   : > { %v3701_v23 = vpop.f32.mrf.mxu0 }
 0x1f8   : > { %v3719_v57 = vpop.f32.mrf.mxu1 }
 0x1fa   : > { %v3720_v45 = vpop.f32.mrf.mxu1 }
 0x1fb   : > { %v3721_v51 = vadd.f32 %v3720_v45, %v3719_v57 }
 0x1fc   : > { %v3722_v32 = vpop.f32.mrf.mxu1 }
 0x1fd   : > { %v2747_v54 = vadd.f32 %v3721_v51, %v2707_v22 }
 0x1fe   : > { %v3723_v62 = vpop.f32.mrf.mxu1 }
 0x211   : > { %v3741_v52 = vpop.f32.mrf.mxu0 }
 0x213   : > { %v3742_v41 = vpop.f32.mrf.mxu0 }
 0x214   : > { %v3743_v34 = vadd.f32 %v3742_v41, %v3741_v52 }
 0x215   : > { %v3744_v55 = vpop.f32.mrf.mxu0 }
 0x216   : > { %v2787_v59 = vadd.f32 %v3743_v34, %v2747_v54 }
 0x217   : > { %v3745_v63 = vpop.f32.mrf.mxu0 }
 0x218   : > { %v3763_v49 = vpop.f32.mrf.mxu1 }
 0x21a   : > { %v3764_v1 = vpop.f32.mrf.mxu1 }
 0x21b   : > { %v3765_v3 = vadd.f32 %v3764_v1, %v3763_v49 }
 0x21c   : > { %v3766_v5 = vpop.f32.mrf.mxu1 }
 0x21d   : > { %v2827_v42 = vadd.f32 %v3765_v3, %v2787_v59 }
 0x21e   : > { %v3767_v7 = vpop.f32.mrf.mxu1 }
 0x231   : > { %v3785_v9 = vpop.f32.mrf.mxu0 }
 0x233   : > { %v3786_v60 = vpop.f32.mrf.mxu0 }
 0x234   : > { %v3787_v24 = vadd.f32 %v3786_v60, %v3785_v9 }
 0x235   : > { %v3788_v36 = vpop.f32.mrf.mxu0 }
 0x236   : > { %v2867_v2 = vadd.f32 %v3787_v24, %v2827_v42 }
 0x237   : > { %v3789_v13 = vpop.f32.mrf.mxu0 }
 0x238   : > { %v3807_v15 = vpop.f32.mrf.mxu1 }
 0x23a   : > { %v3808_v31 = vpop.f32.mrf.mxu1 }
 0x23b   : > { %v3809_v4 = vadd.f32 %v3808_v31, %v3807_v15 }
 0x23c   : > { %v3810_v11 = vpop.f32.mrf.mxu1 }
 0x23d   : > { %v2907_v8 = vadd.f32 %v3809_v4, %v2867_v2 }
 0x23e   : > { %v3811_v12 = vpop.f32.mrf.mxu1 }
 0x251   : > { %v3829_v61 = vpop.f32.mrf.mxu0 }
 0x253   : > { %v3830_v17 = vpop.f32.mrf.mxu0 }
 0x254   : > { %v3831_v6 = vadd.f32 %v3830_v17, %v3829_v61 }
 0x255   : > { %v3832_v47 = vpop.f32.mrf.mxu0 }
 0x256   : > { %v2947_v10 = vadd.f32 %v3831_v6, %v2907_v8 }
 0x257   : > { %v3833_v19 = vpop.f32.mrf.mxu0 }
 0x258   : > { %v3851_v28 = vpop.f32.mrf.mxu1 }
 0x25a   : > { %v3852_v39 = vpop.f32.mrf.mxu1 }
 0x25b   : > { %v3853_v30 = vadd.f32 %v3852_v39, %v3851_v28 }
 0x25c   : > { %v3854_v43 = vpop.f32.mrf.mxu1 }
 0x25d   : > { %v2987_v33 = vadd.f32 %v3853_v30, %v2947_v10 }
 0x25e   : > { %v3855_v21 = vpop.f32.mrf.mxu1 }
 0x271   : > { %v3873_v14 = vpop.f32.mrf.mxu0 }
 0x273   : > { %v3874_v16 = vpop.f32.mrf.mxu0 }
 0x274   : > { %v3875_v18 = vadd.f32 %v3874_v16, %v3873_v14 }
 0x275   : > { %v3876_v20 = vpop.f32.mrf.mxu0 }
 0x276   : > { %v3027_v35 = vadd.f32 %v3875_v18, %v2987_v33 }
 0x277   : > { %v3877_v29 = vpop.f32.mrf.mxu0 }
 0x278   : > { %v3066_v38 = vpop.f32.mrf.mxu1 }
 0x279   : > { %v3067_v40 = vadd.f32 %v3066_v38, %v3027_v35 }
 0x27a   : > { %v3926_v46 = vpop.f32.mrf.mxu1 }
 0x27b   : > { %v3072_v26 = vmax.f32 %v3067_v40, 0.0 }
 0x27c   : > { %v3069_v27 = vpop.f32.mrf.mxu1 }
 0x27d   : > { %v3073_v48 = vpack.c.bf16 %v3072_v26, %v3072_v26 }
 0x27e   : > { %v3927_v50 = vpop.f32.mrf.mxu1 }
 0x27f   : > { %3338 = vst [vmem:[%s5756_s15 + $0x1] sm:$0x1] %v3073_v48 }
 0x280 PF: > { %s13_s12 = sadd.s32 1, %s4279_s12  }
 0x281   : > { %p10_p4 = scmp.ge.s32.totalorder %s13_s12, 4  }
 0x283   :  { %12 = sbr.rel (!%p10_p4) target bundleno = 1 (0x1), region = 63 }

// kernel: _lambda_.5
= control target key start
LH: loop header
LB: loop body
LE: loop exit
PB: predicated region body
PF: predicated region fallthrough
CT: control target
= control target key end

     0   :  { %s9249_s12 = smov 0   ;;  %s14737_s0 = inlined_call_operand.vmem [shape: bf16[2,4,9,9,128], index: 0, kind: input, shape index: {}]   ;;  %s14738_s1 = inlined_call_operand.vmem [shape: bf16[3200,128], index: 1, kind: input, shape index: {}]   ;;  %s14739_s2 = inlined_call_operand.vmem [shape: f32[1,128], index: 2, kind: input, shape index: {}]   ;;  %s14740_s3 = inlined_call_operand.vmem [shape: bf16[2,7,7,128], index: 3, kind: output, shape index: {}]  }
   0x1 LB: > { %s6028_s13 = sadd.s32 4294967295, %s9225_s12   ;;  %p6032_p0 = scmp.ge.s32.totalorder %s9225_s12, 1  ;;  %s9225_s12 = sphi %s9249_s12, %s13_s12  }
   0x2   : > { %p137_p1 = scmp.lt.s32.totalorder %s9225_s12, 3 }
   0x4   : > { %p138_p2 = pnand %p6032_p0, %p137_p1 }
   0x6   : > { %141 = sbr.rel (%p138_p2) target bundleno = 1688 (0x698), region = 32 }
   0xb   : > { %v8364_v0 = vld [vmem:[%s14738_s1 + $0x78] sm:$0xff]   ;;  %v8368_v4 = vld [vmem:[%s14738_s1 + $0x70] sm:$0xff]   ;;  %v8372_v8 = vld [vmem:[%s14738_s1 + $0x68] sm:$0xff]   ;;  %p161_p3 = scmp.lt.s32.totalorder %s6028_s13, 1  ;;  %vm9228_vm0 = vmmov 0   ;;  %vm2811_vm1 = vcmask 1043456  }
   0xc   : > { %v8365_v1 = vld [vmem:[%s14738_s1 + $0x38] sm:$0xff]   ;;  %6301 = vmatprep.subr.bf16.mxu0 %v8364_v0  ;;  %v8369_v5 = vld [vmem:[%s14738_s1 + $0x30] sm:$0xff]   ;;  %v8373_v9 = vld [vmem:[%s14738_s1 + $0x28] sm:$0xff]   ;;  %vm2812_vm2 = vsmask.f32 3328 }
   0xd   : > { %v8366_v2 = vld [vmem:[%s14738_s1 + $0xf8] sm:$0xff]   ;;  %6302 = vmatpush3.bf16.msra.mxu0 %v8365_v1  ;;  %v8370_v6 = vld [vmem:[%s14738_s1 + $0xf0] sm:$0xff]   ;;  %v8374_v10 = vld [vmem:[%s14738_s1 + $0xe8] sm:$0xff]   ;;  %s16004_s13 = smov (!%p161_p3, %s6028_s13), 1 }
   0xe   : > { %v8367_v3 = vld [vmem:[%s14738_s1 + $0xb8] sm:$0xff]   ;;  %6323 = vmatprep.subr.bf16.mxu1 %v8366_v2  ;;  %6303 = vmatprep.subr.bf16.mxu0 %v8368_v4  ;;  %v8371_v7 = vld [vmem:[%s14738_s1 + $0xb0] sm:$0xff]   ;;  %v8375_v11 = vld [vmem:[%s14738_s1 + $0xa8] sm:$0xff]   ;;  %s8352_s14 = smul.u32 288, %s16004_s13 }
   0xf   : > { %6324 = vmatpush3.bf16.msra.mxu1 %v8367_v3  ;;  %v8376_v12 = vld [vmem:[%s14738_s1 + $0x60] sm:$0xff]   ;;  %v8380_v16 = vld [vmem:[%s14738_s1 + $0x58] sm:$0xff]   ;;  %v8384_v20 = vld [vmem:[%s14738_s1 + $0x50] sm:$0xff]   ;;  %s8353_s21 = smul.u32 28, %s16004_s13 }
  0x10   : > { %6325 = vmatprep.subr.bf16.mxu1 %v8370_v6  ;;  %v8377_v13 = vld [vmem:[%s14738_s1 + $0x20] sm:$0xff]   ;;  %v8381_v17 = vld [vmem:[%s14738_s1 + $0x18] sm:$0xff]   ;;  %v8385_v21 = vld [vmem:[%s14738_s1 + $0x10] sm:$0xff]   ;;  %s9354_s25 = scalar_lea.vmem %s14737_s0, %s8352_s14 }
  0x11   : > { %6304 = vmatpush3.bf16.msra.mxu0 %v8369_v5  ;;  %v8378_v14 = vld [vmem:[%s14738_s1 + $0xe0] sm:$0xff]   ;;  %v8382_v18 = vld [vmem:[%s14738_s1 + $0xd8] sm:$0xff]   ;;  %v8386_v22 = vld [vmem:[%s14738_s1 + $0xd0] sm:$0xff]   ;;  %s11135_s24 = scalar_lea.vmem %s14740_s3, %s8353_s21 }
  0x12   : > { %6305 = vmatprep.subr.bf16.mxu0 %v8372_v8  ;;  %v8379_v15 = vld [vmem:[%s14738_s1 + $0xa0] sm:$0xff]   ;;  %v8383_v19 = vld [vmem:[%s14738_s1 + $0x98] sm:$0xff]   ;;  %v8387_v23 = vld [vmem:[%s14738_s1 + $0x90] sm:$0xff]  }
  0x13   : > { %6326 = vmatpush3.bf16.msra.mxu1 %v8371_v7  ;;  %v8388_v24 = vld [vmem:[%s14738_s1 + $0x48] sm:$0xff]   ;;  %v8392_v28 = vld [vmem:[%s14738_s1 + $0x40] sm:$0xff]   ;;  %v8399_v36 = vld [vmem:[%s14738_s1 + $0x178] sm:$0xff]  }
  0x14   : > { %6327 = vmatprep.subr.bf16.mxu1 %v8374_v10  ;;  %v8389_v25 = vld [vmem:[%s14738_s1 + $0x8] sm:$0xff]   ;;  %v8393_v29 = vld [vmem:[%s14738_s1] sm:$0xff]   ;;  %v8400_v40 = vld [vmem:[%s14738_s1 + $0x138] sm:$0xff]  }
  0x15   : > { %6306 = vmatpush3.bf16.msra.mxu0 %v8373_v9  ;;  %v8390_v26 = vld [vmem:[%s14738_s1 + $0xc8] sm:$0xff]   ;;  %v8394_v30 = vld [vmem:[%s14738_s1 + $0xc0] sm:$0xff]   ;;  %v8401_v43 = vld [vmem:[%s14738_s1 + $0x1f8] sm:$0xff]  }
  0x16   : > { %6307 = vmatprep.subr.bf16.mxu0 %v8376_v12  ;;  %v8391_v27 = vld [vmem:[%s14738_s1 + $0x88] sm:$0xff]   ;;  %v8396_v33 = vld [vmem:[%s14738_s1 + $0x80] sm:$0xff]   ;;  %v8402_v45 = vld [vmem:[%s14738_s1 + $0x1b8] sm:$0xff]  }
  0x17   : > { %6328 = vmatpush3.bf16.msra.mxu1 %v8375_v11  ;;  %v190_v31 = vld [vmem:[%s9354_s25 + $0x48] sm:$0xf]  ;;  %v9367_v34 = vld [vmem:[%s9354_s25] sm:$0xf]  ;;  %v8403_v47 = vld [vmem:[%s14738_s1 + $0x170] sm:$0xff]  }
  0x18   : > { %6329 = vmatprep.subr.bf16.mxu1 %v8378_v14  ;;  %v6042_v32 = vcombine.low %v190_v31, %v190_v31  ;;  %2321 = vmatprep.mubr.bf16.mxu0 %v190_v31  ;;  %v6035_v35 = vcombine.low %v9367_v34, %v9367_v34  ;;  %v8404_v49 = vld [vmem:[%s14738_s1 + $0x130] sm:$0xff]   ;;  %v8407_v52 = vld [vmem:[%s14738_s1 + $0x168] sm:$0xff]   ;;  %v8411_v56 = vld [vmem:[%s14738_s1 + $0x160] sm:$0xff]  }
  0x19   : > { %6308 = vmatpush3.bf16.msra.mxu0 %v8377_v13  ;;  %v8405_v50 = vld [vmem:[%s14738_s1 + $0x1f0] sm:$0xff]   ;;  %v8408_v53 = vld [vmem:[%s14738_s1 + $0x128] sm:$0xff]   ;;  %v8412_v57 = vld [vmem:[%s14738_s1 + $0x120] sm:$0xff]  }
  0x1a   : > { %6309 = vmatprep.subr.bf16.mxu0 %v8380_v16  ;;  %v322_v37 = vshrl.u32 %v6042_v32, 16  ;;  %v324_v38 = vshll.u32 %v6042_v32, 16  ;;  %v247_v39 = vshll.u32 %v6035_v35, 16  ;;  %v245_v41 = vshrl.u32 %v6035_v35, 16  ;;  %v8406_v51 = vld [vmem:[%s14738_s1 + $0x1b0] sm:$0xff]   ;;  %v8409_v54 = vld [vmem:[%s14738_s1 + $0x1e8] sm:$0xff]   ;;  %vm11143_vm3 = vmand %vm2811_vm1, %vm2812_vm2 }
  0x1b   : > { %6330 = vmatpush3.bf16.msra.mxu1 %v8379_v15  ;;  %v8410_v55 = vld [vmem:[%s14738_s1 + $0x1a8] sm:$0xff]   ;;  %v8413_v58 = vld [vmem:[%s14738_s1 + $0x1e0] sm:$0xff]   ;;  %v8415_v60 = vld [vmem:[%s14738_s1 + $0x158] sm:$0xff]  }
  0x1c   : > { %6331 = vmatprep.subr.bf16.mxu1 %v8382_v18  ;;  %v326_v42 = vrot.slane %v324_v38, 1  ;;  %v249_v44 = vrot.slane %v247_v39, 1  ;;  %v8414_v59 = vld [vmem:[%s14738_s1 + $0x1a0] sm:$0xff]   ;;  %v8416_v61 = vld [vmem:[%s14738_s1 + $0x118] sm:$0xff]   ;;  %v8419_v0 = vld [vmem:[%s14738_s1 + $0x150] sm:$0xff]  }
  0x1d   : > { %6310 = vmatpush3.bf16.msra.mxu0 %v8381_v17  ;;  %v8417_v62 = vld [vmem:[%s14738_s1 + $0x1d8] sm:$0xff]   ;;  %v173_v1 = vld [vmem:[%s9354_s25 + $0x4] sm:$0x1]  ;;  %v8420_v2 = vld [vmem:[%s14738_s1 + $0x110] sm:$0xff]  }
  0x1e   : > { %6311 = vmatprep.subr.bf16.mxu0 %v8384_v20  ;;  %v327_v46 = vor.u32 %v326_v42, %v322_v37  ;;  %v250_v48 = vor.u32 %v249_v44, %v245_v41  ;;  %v8418_v63 = vld [vmem:[%s14738_s1 + $0x198] sm:$0xff]   ;;  %v8421_v3 = vld [vmem:[%s14738_s1 + $0x1d0] sm:$0xff]   ;;  %v8423_v5 = vld [vmem:[%s14738_s1 + $0x148] sm:$0xff]   ;;  %v6049_v7 = vcombine.low %v9367_v34, %v173_v1 }
  0x1f   : > { %6332 = vmatpush3.bf16.msra.mxu1 %v8383_v19  ;;  %v8422_v4 = vld [vmem:[%s14738_s1 + $0x190] sm:$0xff]   ;;  %v8424_v6 = vld [vmem:[%s14738_s1 + $0x108] sm:$0xff]   ;;  %v8427_v10 = vld [vmem:[%s14738_s1 + $0x140] sm:$0xff]  }
  0x20   : > { %6333 = vmatprep.subr.bf16.mxu1 %v8386_v22  ;;  %2361 = vmatprep.mubr.bf16.mxu1 %v327_v46  ;;  %v8425_v8 = vld [vmem:[%s14738_s1 + $0x1c8] sm:$0xff]   ;;  %v8428_v11 = vld [vmem:[%s14738_s1 + $0x100] sm:$0xff]   ;;  %v398_v12 = vrot.slane %v6049_v7, 1  ;;  %v199_v14 = vld [vmem:[%s9354_s25 + $0x90] sm:$0xf] }
  0x21   : > { %6312 = vmatpush3.bf16.msra.mxu0 %v8385_v21  ;;  %v8426_v9 = vld [vmem:[%s14738_s1 + $0x188] sm:$0xff]   ;;  %v8429_v13 = vld [vmem:[%s14738_s1 + $0x1c0] sm:$0xff]   ;;  %v200_v15 = vld [vmem:[%s9354_s25 + $0x94] sm:$0x1]  ;;  %v6056_v16 = vcombine.low %v199_v14, %v199_v14 }
  0x22   : > { %6313 = vmatprep.subr.bf16.mxu0 %v8388_v24  ;;  %v6070_v17 = vcombine.low %v199_v14, %v200_v15  ;;  %v8432_v18 = vld [vmem:[%s14738_s1 + $0x180] sm:$0xff]   ;;  %v8433_v20 = vld [vmem:[%s14738_s1 + $0x278] sm:$0xff]   ;;  %v8440_v31 = vld [vmem:[%s14738_s1 + $0x2f0] sm:$0xff]  }
  0x23   : > { %6334 = vmatpush3.bf16.msra.mxu1 %v8387_v23  ;;  %v436_v19 = vshll.u32 %v6056_v16, 16  ;;  %v434_v21 = vshrl.u32 %v6056_v16, 16  ;;  %v8434_v22 = vld [vmem:[%s14738_s1 + $0x238] sm:$0xff]   ;;  %v8441_v32 = vld [vmem:[%s14738_s1 + $0x2b0] sm:$0xff]   ;;  %v8444_v35 = vld [vmem:[%s14738_s1 + $0x2e8] sm:$0xff]  }
  0x24   : > { %6335 = vmatprep.subr.bf16.mxu1 %v8390_v26  ;;  %v215_v24 = vld [vmem:[%s9354_s25 + $0xd8] sm:$0xf]  ;;  %v8446_v37 = vld [vmem:[%s14738_s1 + $0x260] sm:$0xff]   ;;  %v8454_v46 = vld [vmem:[%s14738_s1 + $0x250] sm:$0xff]  }
  0x25   : > { %6314 = vmatpush3.bf16.msra.mxu0 %v8389_v25  ;;  %v438_v23 = vrot.slane %v436_v19, 1  ;;  %v8436_v25 = vld [vmem:[%s14738_s1 + $0x2f8] sm:$0xff]   ;;  %v8447_v38 = vld [vmem:[%s14738_s1 + $0x220] sm:$0xff]   ;;  %v8473_v7 = vld [vmem:[%s14738_s1 + $0x370] sm:$0xff]  }
  0x26   : > { %6315 = vmatprep.subr.bf16.mxu0 %v8392_v28  ;;  %v8437_v26 = vld [vmem:[%s14738_s1 + $0x2b8] sm:$0xff]   ;;  %v8448_v39 = vld [vmem:[%s14738_s1 + $0x2e0] sm:$0xff]   ;;  %v8479_v15 = vld [vmem:[%s14738_s1 + $0x3e8] sm:$0xff]  }
  0x27   : > { %6336 = vmatpush3.bf16.msra.mxu1 %v8391_v27  ;;  %v587_v27 = vrot.slane %v6070_v17, 1  ;;  %v439_v28 = vor.u32 %v438_v23, %v434_v21  ;;  %v8450_v41 = vld [vmem:[%s14738_s1 + $0x258] sm:$0xff]   ;;  %v8480_v16 = vld [vmem:[%s14738_s1 + $0x3a8] sm:$0xff]   ;;  %v8481_v17 = vld [vmem:[%s14738_s1 + $0x360] sm:$0xff]  }
  0x28   : > { %6337 = vmatprep.subr.bf16.mxu1 %v8394_v30  ;;  %v8439_v30 = vld [vmem:[%s14738_s1 + $0x230] sm:$0xff]   ;;  %v8451_v42 = vld [vmem:[%s14738_s1 + $0x218] sm:$0xff]   ;;  %v8483_v19 = vld [vmem:[%s14738_s1 + $0x3e0] sm:$0xff]  }
  0x29   : > { %6316 = vmatpush3.bf16.msra.mxu0 %v8393_v29  ;;  %v8438_v29 = vld [vmem:[%s14738_s1 + $0x270] sm:$0xff]   ;;  %v8452_v44 = vld [vmem:[%s14738_s1 + $0x2d8] sm:$0xff]  }
  0x2a   : > { %6345 = vmatprep.subr.bf16.mxu0 %v8399_v36  ;;  %v8445_v36 = vld [vmem:[%s14738_s1 + $0x2a8] sm:$0xff]   ;;  %v8468_v1 = vld [vmem:[%s14738_s1 + $0x338] sm:$0xff]  }
  0x2b   : > { %6338 = vmatpush3.bf16.msra.mxu1 %v8396_v33  ;;  %v8442_v33 = vld [vmem:[%s14738_s1 + $0x268] sm:$0xff]   ;;  %v8485_v21 = vld [vmem:[%s14738_s1 + $0x358] sm:$0xff]  }
  0x2c   : > { %2322 = vmatmul.mubr.bf16.vlgmr.msra.gmra.mxu0 %v9367_v34  ;;  %6367 = vmatprep.subr.bf16.mxu1 %v8401_v43  ;;  %v8443_v34 = vld [vmem:[%s14738_s1 + $0x228] sm:$0xff]   ;;  %v6063_v43 = vcombine.low %v215_v24, %v215_v24 }
  0x2d   : > { %6346 = vmatpush3.bf16.msra.mxu0 %v8400_v40  ;;  %2401 = vmatprep.mubr.bf16.mxu0 %v199_v14  ;;  %v8449_v40 = vld [vmem:[%s14738_s1 + $0x2a0] sm:$0xff]   ;;  %v8478_v14 = vld [vmem:[%s14738_s1 + $0x328] sm:$0xff]  }
  0x2e   : > { %6347 = vmatprep.subr.bf16.mxu0 %v8403_v47  ;;  %2362 = vmatmul.mubr.bf16.vlgmr.msra.gmra.mxu1 %v250_v48  ;;  %v8455_v47 = vld [vmem:[%s14738_s1 + $0x210] sm:$0xff]   ;;  %v513_v48 = vshll.u32 %v6063_v43, 16 }
  0x2f   : > { %6368 = vmatpush3.bf16.msra.mxu1 %v8402_v45  ;;  %2441 = vmatprep.mubr.bf16.mxu1 %v439_v28  ;;  %v8453_v45 = vld [vmem:[%s14738_s1 + $0x298] sm:$0xff]  }
  0x30   : > { %6369 = vmatprep.subr.bf16.mxu1 %v8405_v50  ;;  %v8457_v50 = vld [vmem:[%s14738_s1 + $0x290] sm:$0xff]  }
  0x31   : > { %6348 = vmatpush3.bf16.msra.mxu0 %v8404_v49  ;;  %v8456_v49 = vld [vmem:[%s14738_s1 + $0x2d0] sm:$0xff]  }
  0x32   : > { %6349 = vmatprep.subr.bf16.mxu0 %v8407_v52  ;;  %v511_v52 = vshrl.u32 %v6063_v43, 16  ;;  %v8500_v43 = vld [vmem:[%s14738_s1 + $0x380] sm:$0xff]  }
  0x33   : > { %6370 = vmatpush3.bf16.msra.mxu1 %v8406_v51  ;;  %v8458_v51 = vld [vmem:[%s14738_s1 + $0x248] sm:$0xff]  }
  0x34   : > { %6371 = vmatprep.subr.bf16.mxu1 %v8409_v54  ;;  %v515_v54 = vrot.slane %v513_v48, 1 }
  0x35   : > { %6350 = vmatpush3.bf16.msra.mxu0 %v8408_v53  ;;  %v8459_v53 = vld [vmem:[%s14738_s1 + $0x208] sm:$0xff]  }
  0x36   : > { %6351 = vmatprep.subr.bf16.mxu0 %v8411_v56  ;;  %v8461_v56 = vld [vmem:[%s14738_s1 + $0x288] sm:$0xff]  }
  0x37   : > { %6372 = vmatpush3.bf16.msra.mxu1 %v8410_v55  ;;  %v8460_v55 = vld [vmem:[%s14738_s1 + $0x2c8] sm:$0xff]  }
  0x38   : > { %6373 = vmatprep.subr.bf16.mxu1 %v8413_v58  ;;  %v8463_v58 = vld [vmem:[%s14738_s1 + $0x200] sm:$0xff]  }
  0x39   : > { %6352 = vmatpush3.bf16.msra.mxu0 %v8412_v57  ;;  %v8462_v57 = vld [vmem:[%s14738_s1 + $0x240] sm:$0xff]  }
  0x3a   : > { %6353 = vmatprep.subr.bf16.mxu0 %v8415_v60  ;;  %v516_v60 = vor.u32 %v515_v54, %v511_v52  ;;  %v9708_v52 = vld [vmem:[%s14738_s1 + $0x470] sm:$0xff]  }
  0x3b   : > { %6374 = vmatpush3.bf16.msra.mxu1 %v8414_v59  ;;  %v8464_v59 = vld [vmem:[%s14738_s1 + $0x2c0] sm:$0xff]   ;;  %v9713_v54 = vld [vmem:[%s14738_s1 + $0x430] sm:$0xff]  }
  0x3c   : > { %6375 = vmatprep.subr.bf16.mxu1 %v8417_v62  ;;  %v8466_v62 = vld [vmem:[%s14738_s1 + $0x378] sm:$0xff]  }
  0x3d   : > { %6354 = vmatpush3.bf16.msra.mxu0 %v8416_v61  ;;  %v8465_v61 = vld [vmem:[%s14738_s1 + $0x280] sm:$0xff]  }
  0x3e   : > { %6355 = vmatprep.subr.bf16.mxu0 %v8419_v0 }
  0x3f   : > { %6376 = vmatpush3.bf16.msra.mxu1 %v8418_v63  ;;  %v9573_v63 = vld [vmem:[%s9354_s25 + $0x50] sm:$0xf] }
  0x40   : > { %6377 = vmatprep.subr.bf16.mxu1 %v8421_v3  ;;  %v6043_v0 = vcombine.low %v9573_v63, %v9573_v63 }
  0x41   : > { %6356 = vmatpush3.bf16.msra.mxu0 %v8420_v2  ;;  %v9582_v2 = vld [vmem:[%s9354_s25 + $0x8] sm:$0xf] }
  0x42   : > { %6357 = vmatprep.subr.bf16.mxu0 %v8423_v5  ;;  %v331_v3 = vshll.u32 %v6043_v0, 16  ;;  %v8472_v5 = vld [vmem:[%s14738_s1 + $0x3b8] sm:$0xff]   ;;  %v6036_v23 = vcombine.low %v9582_v2, %v9582_v2 }
  0x43   : > { %6378 = vmatpush3.bf16.msra.mxu1 %v8422_v4  ;;  %v8471_v4 = vld [vmem:[%s14738_s1 + $0x3f8] sm:$0xff]  }
  0x44   : > { %6379 = vmatprep.subr.bf16.mxu1 %v8425_v8  ;;  %v8474_v8 = vld [vmem:[%s14738_s1 + $0x330] sm:$0xff]   ;;  %v254_v28 = vshll.u32 %v6036_v23, 16 }
  0x45   : > { %6358 = vmatpush3.bf16.msra.mxu0 %v8424_v6  ;;  %v329_v6 = vshrl.u32 %v6043_v0, 16  ;;  %v9748_v0 = vld [vmem:[%s14738_s1 + $0x460] sm:$0xff]  }
  0x46   : > { %6359 = vmatprep.subr.bf16.mxu0 %v8427_v10  ;;  %v8475_v10 = vld [vmem:[%s14738_s1 + $0x3f0] sm:$0xff]  }
  0x47   : > { %6380 = vmatpush3.bf16.msra.mxu1 %v8426_v9  ;;  %v333_v9 = vrot.slane %v331_v3, 1  ;;  %v8517_v3 = vld [vmem:[%s14738_s1 + $0x4a0] sm:$0xff]  }
  0x48   : > { %6381 = vmatprep.subr.bf16.mxu1 %v8429_v13  ;;  %v8477_v13 = vld [vmem:[%s14738_s1 + $0x368] sm:$0xff]  }
  0x49   : > { %6360 = vmatpush3.bf16.msra.mxu0 %v8428_v11  ;;  %v8476_v11 = vld [vmem:[%s14738_s1 + $0x3b0] sm:$0xff]  }
  0x4a   : > { %6389 = vmatprep.subr.bf16.mxu0 %v8433_v20  ;;  %v8484_v20 = vld [vmem:[%s14738_s1 + $0x3a0] sm:$0xff]  }
  0x4b   : > { %6382 = vmatpush3.bf16.msra.mxu1 %v8432_v18  ;;  %v8482_v18 = vld [vmem:[%s14738_s1 + $0x320] sm:$0xff]  }
  0x4c   : > { %2402 = vmatmul.mubr.bf16.vlgmr.msra.gmra.mxu0 %v398_v12  ;;  %6411 = vmatprep.subr.bf16.mxu1 %v8436_v25  ;;  %v9603_v12 = vor.u32 %v333_v9, %v329_v6  ;;  %v8488_v25 = vld [vmem:[%s14738_s1 + $0x398] sm:$0xff]   ;;  %v9794_v9 = vld [vmem:[%s14738_s1 + $0x410] sm:$0xff]  }
  0x4d   : > { %6390 = vmatpush3.bf16.msra.mxu0 %v8434_v22  ;;  %2481 = vmatprep.mubr.bf16.mxu0 %v587_v27  ;;  %v8486_v22 = vld [vmem:[%s14738_s1 + $0x318] sm:$0xff]   ;;  %v8490_v27 = vld [vmem:[%s14738_s1 + $0x310] sm:$0xff]  }
  0x4e   : > { %6391 = vmatprep.subr.bf16.mxu0 %v8438_v29  ;;  %2442 = vmatmul.mubr.bf16.vlgmr.msra.gmra.mxu1 %v215_v24  ;;  %v8487_v24 = vld [vmem:[%s14738_s1 + $0x3d8] sm:$0xff]   ;;  %v8491_v29 = vld [vmem:[%s14738_s1 + $0x3d0] sm:$0xff]  }
  0x4f   : > { %6412 = vmatpush3.bf16.msra.mxu1 %v8437_v26  ;;  %2521 = vmatprep.mubr.bf16.mxu1 %v9573_v63  ;;  %v8489_v26 = vld [vmem:[%s14738_s1 + $0x350] sm:$0xff]   ;;  %v9777_v6 = vld [vmem:[%s14738_s1 + $0x4d8] sm:$0xff]  }
  0x50   : > { %6413 = vmatprep.subr.bf16.mxu1 %v8440_v31  ;;  %v8493_v31 = vld [vmem:[%s14738_s1 + $0x348] sm:$0xff]  }
  0x51   : > { %6392 = vmatpush3.bf16.msra.mxu0 %v8439_v30  ;;  %v8492_v30 = vld [vmem:[%s14738_s1 + $0x390] sm:$0xff]  }
  0x52   : > { %6393 = vmatprep.subr.bf16.mxu0 %v8442_v33  ;;  %v8494_v33 = vld [vmem:[%s14738_s1 + $0x308] sm:$0xff]  }
  0x53   : > { %6414 = vmatpush3.bf16.msra.mxu1 %v8441_v32  ;;  %v175_v32 = vld [vmem:[%s9354_s25 + $0xc] sm:$0x1] }
  0x54   : > { %6415 = vmatprep.subr.bf16.mxu1 %v8444_v35  ;;  %v8495_v35 = vld [vmem:[%s14738_s1 + $0x3c8] sm:$0xff]  }
  0x55   : > { %6394 = vmatpush3.bf16.msra.mxu0 %v8443_v34  ;;  %v252_v34 = vshrl.u32 %v6036_v23, 16  ;;  %v9866_v23 = vld [vmem:[%s14738_s1 + $0x578] sm:$0xff]  }
  0x56   : > { %6395 = vmatprep.subr.bf16.mxu0 %v8446_v37  ;;  %v8496_v37 = vld [vmem:[%s14738_s1 + $0x388] sm:$0xff]  }
  0x57   : > { %6416 = vmatpush3.bf16.msra.mxu1 %v8445_v36  ;;  %v256_v36 = vrot.slane %v254_v28, 1 }
  0x58   : > { %6417 = vmatprep.subr.bf16.mxu1 %v8448_v39  ;;  %v8498_v39 = vld [vmem:[%s14738_s1 + $0x300] sm:$0xff]  }
  0x59   : > { %6396 = vmatpush3.bf16.msra.mxu0 %v8447_v38  ;;  %v8497_v38 = vld [vmem:[%s14738_s1 + $0x340] sm:$0xff]  }
  0x5a   : > { %6397 = vmatprep.subr.bf16.mxu0 %v8450_v41  ;;  %v8499_v41 = vld [vmem:[%s14738_s1 + $0x3c0] sm:$0xff]  }
  0x5b   : > { %6418 = vmatpush3.bf16.msra.mxu1 %v8449_v40  ;;  %v6050_v40 = vcombine.low %v9582_v2, %v175_v32  ;;  %v9894_v32 = vld [vmem:[%s14738_s1 + $0x570] sm:$0xff]  }
  0x5c   : > { %6419 = vmatprep.subr.bf16.mxu1 %v8452_v44  ;;  %v8501_v44 = vld [vmem:[%s14738_s1 + $0x478] sm:$0xff]  }
  0x5d   : > { %6398 = vmatpush3.bf16.msra.mxu0 %v8451_v42  ;;  %v9679_v42 = vor.u32 %v256_v36, %v252_v34  ;;  %v9697_v48 = vrot.slane %v6050_v40, 1  ;;  %v9900_v34 = vld [vmem:[%s14738_s1 + $0x530] sm:$0xff]   ;;  %v9934_v40 = vld [vmem:[%s14738_s1 + $0x5e8] sm:$0xff]  }
  0x5e   : > { %6399 = vmatprep.subr.bf16.mxu0 %v8454_v46  ;;  %v9909_v36 = vld [vmem:[%s14738_s1 + $0x5f0] sm:$0xff]   ;;  %15164 = vst [vmem:[#allocation3_spill] sm:$0xff] %v9934_v40 }
  0x5f   : > { %6420 = vmatpush3.bf16.msra.mxu1 %v8453_v45  ;;  %v9688_v45 = vld [vmem:[%s9354_s25 + $0x98] sm:$0xf] }
  0x60   : > { %6421 = vmatprep.subr.bf16.mxu1 %v8456_v49  ;;  %v6057_v46 = vcombine.low %v9688_v45, %v9688_v45  ;;  %v8504_v49 = vld [vmem:[%s14738_s1 + $0x4f8] sm:$0xff]  }
  0x61   : > { %6400 = vmatpush3.bf16.msra.mxu0 %v8455_v47  ;;  %v8503_v47 = vld [vmem:[%s14738_s1 + $0x438] sm:$0xff]  }
  0x62   : > { %6401 = vmatprep.subr.bf16.mxu0 %v8458_v51  ;;  %v441_v51 = vshrl.u32 %v6057_v46, 16 }
  0x63   : > { %6422 = vmatpush3.bf16.msra.mxu1 %v8457_v50  ;;  %v8505_v50 = vld [vmem:[%s14738_s1 + $0x4b8] sm:$0xff]  }
  0x64   : > { %6423 = vmatprep.subr.bf16.mxu1 %v8460_v55  ;;  %v8508_v55 = vld [vmem:[%s14738_s1 + $0x4f0] sm:$0xff]  }
  0x65   : > { %6402 = vmatpush3.bf16.msra.mxu0 %v8459_v53  ;;  %v443_v53 = vshll.u32 %v6057_v46, 16  ;;  %v9958_v46 = vld [vmem:[%s14738_s1 + $0x5e0] sm:$0xff]  }
  0x66   : > { %6403 = vmatprep.subr.bf16.mxu0 %v8462_v57  ;;  %v8509_v57 = vld [vmem:[%s14738_s1 + $0x4b0] sm:$0xff]   ;;  %15166 = vst [vmem:[#allocation5_spill] sm:$0xff] %v9958_v46 }
  0x67   : > { %6424 = vmatpush3.bf16.msra.mxu1 %v8461_v56  ;;  %v445_v56 = vrot.slane %v443_v53, 1  ;;  %v9988_v53 = vld [vmem:[%s14738_s1 + $0x598] sm:$0xff]  }
  0x68   : > { %6425 = vmatprep.subr.bf16.mxu1 %v8464_v59  ;;  %15169 = vst [vmem:[#allocation8_spill] sm:$0xff] %v9988_v53 }
  0x69   : > { %6404 = vmatpush3.bf16.msra.mxu0 %v8463_v58  ;;  %v9727_v58 = vld [vmem:[%s14738_s1 + $0x468] sm:$0xff]   ;;  %v9729_v59 = vor.u32 %v445_v56, %v441_v51  ;;  %v9982_v51 = vld [vmem:[%s14738_s1 + $0x5d8] sm:$0xff]   ;;  %v9999_v56 = vld [vmem:[%s14738_s1 + $0x510] sm:$0xff]  }
  0x6a   : > { %6433 = vmatprep.subr.bf16.mxu0 %v8466_v62  ;;  %v8513_v62 = vld [vmem:[%s14738_s1 + $0x4a8] sm:$0xff]   ;;  %15168 = vst [vmem:[#allocation7_spill] sm:$0xff] %v9982_v51 }
  0x6b   : > { %6426 = vmatpush3.bf16.msra.mxu1 %v8465_v61  ;;  %v8512_v61 = vld [vmem:[%s14738_s1 + $0x4e8] sm:$0xff]  }
  0x6c   : > { %2482 = vmatmul.mubr.bf16.vlgmr.msra.gmra.mxu0 %v516_v60  ;;  %6455 = vmatprep.subr.bf16.mxu1 %v8471_v4  ;;  %v9734_v60 = vld [vmem:[%s14738_s1 + $0x428] sm:$0xff]   ;;  %v9766_v4 = vld [vmem:[%s14738_s1 + $0x458] sm:$0xff]  }
  0x6d   : > { %6434 = vmatpush3.bf16.msra.mxu0 %v8468_v1  ;;  %2561 = vmatprep.mubr.bf16.mxu0 %v9603_v12  ;;  %v9753_v1 = vld [vmem:[%s14738_s1 + $0x420] sm:$0xff]  }
  0x6e   : > { %2522 = vmatmul.mubr.bf16.vlgmr.msra.gmra.mxu1 %v9582_v2  ;;  %6435 = vmatprep.subr.bf16.mxu0 %v8473_v7  ;;  %v8516_v2 = vld [vmem:[%s14738_s1 + $0x4e0] sm:$0xff]   ;;  %v9783_v7 = vld [vmem:[%s14738_s1 + $0x498] sm:$0xff]  }
  0x6f   : > { %6456 = vmatpush3.bf16.msra.mxu1 %v8472_v5  ;;  %2601 = vmatprep.mubr.bf16.mxu1 %v9688_v45  ;;  %v9771_v5 = vld [vmem:[%s14738_s1 + $0x418] sm:$0xff]  }
  0x70   : > { %6457 = vmatprep.subr.bf16.mxu1 %v8475_v10  ;;  %v9800_v10 = vld [vmem:[%s14738_s1 + $0x4d0] sm:$0xff]  }
  0x71   : > { %6436 = vmatpush3.bf16.msra.mxu0 %v8474_v8  ;;  %v9789_v8 = vld [vmem:[%s14738_s1 + $0x450] sm:$0xff]  }
  0x72   : > { %6437 = vmatprep.subr.bf16.mxu0 %v8477_v13  ;;  %v9813_v13 = vld [vmem:[%s14738_s1 + $0x448] sm:$0xff]  }
  0x73   : > { %6458 = vmatpush3.bf16.msra.mxu1 %v8476_v11  ;;  %v9807_v11 = vld [vmem:[%s14738_s1 + $0x490] sm:$0xff]  }
  0x74   : > { %6459 = vmatprep.subr.bf16.mxu1 %v8479_v15  ;;  %v9824_v15 = vld [vmem:[%s14738_s1 + $0x4c8] sm:$0xff]  }
  0x75   : > { %6438 = vmatpush3.bf16.msra.mxu0 %v8478_v14  ;;  %v9818_v14 = vld [vmem:[%s14738_s1 + $0x408] sm:$0xff]  }
  0x76   : > { %6439 = vmatprep.subr.bf16.mxu0 %v8481_v17  ;;  %v9837_v17 = vld [vmem:[%s14738_s1 + $0x440] sm:$0xff]  }
  0x77   : > { %6460 = vmatpush3.bf16.msra.mxu1 %v8480_v16  ;;  %v9831_v16 = vld [vmem:[%s14738_s1 + $0x488] sm:$0xff]  }
  0x78   : > { %6461 = vmatprep.subr.bf16.mxu1 %v8483_v19  ;;  %v9848_v19 = vld [vmem:[%s14738_s1 + $0x4c0] sm:$0xff]  }
  0x79   : > { %6440 = vmatpush3.bf16.msra.mxu0 %v8482_v18  ;;  %v9842_v18 = vld [vmem:[%s14738_s1 + $0x400] sm:$0xff]  }
  0x7a   : > { %6441 = vmatprep.subr.bf16.mxu0 %v8485_v21  ;;  %v9859_v21 = vld [vmem:[%s9354_s25 + $0xe0] sm:$0xf] }
  0x7b   : > { %6462 = vmatpush3.bf16.msra.mxu1 %v8484_v20  ;;  %v9855_v20 = vld [vmem:[%s14738_s1 + $0x480] sm:$0xff]  }
  0x7c   : > { %6463 = vmatprep.subr.bf16.mxu1 %v8487_v24  ;;  %v202_v24 = vld [vmem:[%s9354_s25 + $0x9c] sm:$0x1] }
  0x7d   : > { %6442 = vmatpush3.bf16.msra.mxu0 %v8486_v22  ;;  %v6064_v22 = vcombine.low %v9859_v21, %v9859_v21 }
  0x7e   : > { %6443 = vmatprep.subr.bf16.mxu0 %v8489_v26  ;;  %v9874_v26 = vld [vmem:[%s14738_s1 + $0x538] sm:$0xff]  }
  0x7f   : > { %6464 = vmatpush3.bf16.msra.mxu1 %v8488_v25  ;;  %v6071_v25 = vcombine.low %v9688_v45, %v202_v24  ;;  %v520_v28 = vshll.u32 %v6064_v22, 16  ;;  %v10041_v24 = vld [vmem:[%s14738_s1 + $0x540] sm:$0xff]  }
  0x80   : > { %6465 = vmatprep.subr.bf16.mxu1 %v8491_v29  ;;  %v9881_v29 = vld [vmem:[%s14738_s1 + $0x5f8] sm:$0xff]  }
  0x81   : > { %6444 = vmatpush3.bf16.msra.mxu0 %v8490_v27  ;;  %v518_v27 = vshrl.u32 %v6064_v22, 16  ;;  %v10036_v22 = vld [vmem:[%s14738_s1 + $0x588] sm:$0xff]  }
  0x82   : > { %6445 = vmatprep.subr.bf16.mxu0 %v8493_v31  ;;  %v9889_v31 = vld [vmem:[%s14738_s1 + $0x5b8] sm:$0xff]   ;;  %15173 = vst [vmem:[#allocation12_spill] sm:$0xff] %v10036_v22 }
  0x83   : > { %6466 = vmatpush3.bf16.msra.mxu1 %v8492_v30  ;;  %v9883_v30 = vrot.slane %v6071_v25, 1  ;;  %v10047_v25 = vld [vmem:[%s14738_s1 + $0x500] sm:$0xff]  }
  0x84   : > { %6467 = vmatprep.subr.bf16.mxu1 %v8495_v35 }
  0x85   : > { %6446 = vmatpush3.bf16.msra.mxu0 %v8494_v33  ;;  %v522_v33 = vrot.slane %v520_v28, 1  ;;  %v10057_v28 = vld [vmem:[%s9354_s25 + $0x58] sm:$0xf] }
  0x86   : > { %6447 = vmatprep.subr.bf16.mxu0 %v8497_v38  ;;  %v9921_v38 = vld [vmem:[%s14738_s1 + $0x568] sm:$0xff]  }
  0x87   : > { %6468 = vmatpush3.bf16.msra.mxu1 %v8496_v37  ;;  %v9904_v35 = vor.u32 %v522_v33, %v518_v27  ;;  %v9915_v37 = vld [vmem:[%s14738_s1 + $0x5b0] sm:$0xff]   ;;  %v10054_v27 = vld [vmem:[%s14738_s1 + $0x5c0] sm:$0xff]   ;;  %v6044_v33 = vcombine.low %v10057_v28, %v10057_v28 }
  0x88   : > { %6469 = vmatprep.subr.bf16.mxu1 %v8499_v41  ;;  %15163 = vst [vmem:[#allocation2_spill] sm:$0xff] %v9915_v37  ;;  %v9940_v41 = vld [vmem:[%s14738_s1 + $0x5a8] sm:$0xff]   ;;  %15174 = vst [vmem:[#allocation13_spill] sm:$0xff] %v10054_v27 }
  0x89   : > { %6448 = vmatpush3.bf16.msra.mxu0 %v8498_v39  ;;  %v9927_v39 = vld [vmem:[%s14738_s1 + $0x528] sm:$0xff]   ;;  %15165 = vst [vmem:[#allocation4_spill] sm:$0xff] %v9940_v41 }
  0x8a   : > { %6477 = vmatprep.subr.bf16.mxu0 %v8501_v44  ;;  %v9951_v44 = vld [vmem:[%s14738_s1 + $0x520] sm:$0xff]  }
  0x8b   : > { %6470 = vmatpush3.bf16.msra.mxu1 %v8500_v43  ;;  %v9945_v43 = vld [vmem:[%s14738_s1 + $0x560] sm:$0xff]  }
  0x8c   : > { %2562 = vmatmul.mubr.bf16.vlgmr.msra.gmra.mxu0 %v9679_v42  ;;  %6499 = vmatprep.subr.bf16.mxu1 %v8504_v49  ;;  %v9969_v49 = vld [vmem:[%s14738_s1 + $0x558] sm:$0xff]  }
  0x8d   : > { %6478 = vmatpush3.bf16.msra.mxu0 %v8503_v47  ;;  %2641 = vmatprep.mubr.bf16.mxu0 %v9729_v59  ;;  %v9964_v47 = vld [vmem:[%s14738_s1 + $0x5a0] sm:$0xff]  }
  0x8e   : > { %2602 = vmatmul.mubr.bf16.vlgmr.msra.gmra.mxu1 %v9697_v48  ;;  %6479 = vmatprep.subr.bf16.mxu0 %v9708_v52  ;;  %15167 = vst [vmem:[#allocation6_spill] sm:$0xff] %v9964_v47 }
  0x8f   : > { %6500 = vmatpush3.bf16.msra.mxu1 %v8505_v50  ;;  %2681 = vmatprep.mubr.bf16.mxu1 %v9883_v30  ;;  %v9975_v50 = vld [vmem:[%s14738_s1 + $0x518] sm:$0xff]  }
  0x90   : > { %6501 = vmatprep.subr.bf16.mxu1 %v8508_v55  ;;  %v9993_v55 = vld [vmem:[%s14738_s1 + $0x550] sm:$0xff]  }
  0x91   : > { %6480 = vmatpush3.bf16.msra.mxu0 %v9713_v54 }
  0x92   : > { %6481 = vmatprep.subr.bf16.mxu0 %v9727_v58 }
  0x93   : > { %6502 = vmatpush3.bf16.msra.mxu1 %v8509_v57  ;;  %v10006_v57 = vld [vmem:[%s14738_s1 + $0x5d0] sm:$0xff]  }
  0x94   : > { %6503 = vmatprep.subr.bf16.mxu1 %v8512_v61  ;;  %15170 = vst [vmem:[#allocation9_spill] sm:$0xff] %v10006_v57  ;;  %v10012_v61 = vld [vmem:[%s14738_s1 + $0x590] sm:$0xff]  }
  0x95   : > { %6482 = vmatpush3.bf16.msra.mxu0 %v9734_v60  ;;  %15171 = vst [vmem:[#allocation10_spill] sm:$0xff] %v10012_v61 }
  0x96   : > { %6483 = vmatprep.subr.bf16.mxu0 %v9748_v0 }
  0x97   : > { %6504 = vmatpush3.bf16.msra.mxu1 %v8513_v62  ;;  %v10017_v62 = vld [vmem:[%s14738_s1 + $0x548] sm:$0xff]  }
  0x98   : > { %6505 = vmatprep.subr.bf16.mxu1 %v8516_v2  ;;  %v10023_v2 = vld [vmem:[%s14738_s1 + $0x508] sm:$0xff]  }
  0x99   : > { %6484 = vmatpush3.bf16.msra.mxu0 %v9753_v1 }
  0x9a   : > { %6485 = vmatprep.subr.bf16.mxu0 %v9766_v4 }
  0x9b   : > { %6506 = vmatpush3.bf16.msra.mxu1 %v8517_v3  ;;  %v10030_v3 = vld [vmem:[%s14738_s1 + $0x5c8] sm:$0xff]  }
  0x9c   : > { %6507 = vmatprep.subr.bf16.mxu1 %v9777_v6  ;;  %15172 = vst [vmem:[#allocation11_spill] sm:$0xff] %v10030_v3 }
  0x9d   : > { %6486 = vmatpush3.bf16.msra.mxu0 %v9771_v5 }
  0x9e   : > { %6487 = vmatprep.subr.bf16.mxu0 %v9789_v8 }
  0x9f   : > { %6508 = vmatpush3.bf16.msra.mxu1 %v9783_v7 }
  0xa0   : > { %6509 = vmatprep.subr.bf16.mxu1 %v9800_v10 }
  0xa1   : > { %6488 = vmatpush3.bf16.msra.mxu0 %v9794_v9 }
  0xa2   : > { %6489 = vmatprep.subr.bf16.mxu0 %v9813_v13 }
  0xa3   : > { %6510 = vmatpush3.bf16.msra.mxu1 %v9807_v11 }
  0xa4   : > { %6511 = vmatprep.subr.bf16.mxu1 %v9824_v15 }
  0xa5   : > { %6490 = vmatpush3.bf16.msra.mxu0 %v9818_v14 }
  0xa6   : > { %6491 = vmatprep.subr.bf16.mxu0 %v9837_v17 }
  0xa7   : > { %6512 = vmatpush3.bf16.msra.mxu1 %v9831_v16 }
  0xa8   : > { %6513 = vmatprep.subr.bf16.mxu1 %v9848_v19 }
  0xa9   : > { %6492 = vmatpush3.bf16.msra.mxu0 %v9842_v18 }
  0xaa   : > { %6521 = vmatprep.subr.bf16.mxu0 %v9866_v23 }
  0xab   : > { %6514 = vmatpush3.bf16.msra.mxu1 %v9855_v20 }
  0xac   : > { %2642 = vmatmul.mubr.bf16.vlgmr.msra.gmra.mxu0 %v9859_v21  ;;  %6543 = vmatprep.subr.bf16.mxu1 %v9881_v29 }
  0xad   : > { %6522 = vmatpush3.bf16.msra.mxu0 %v9874_v26  ;;  %2721 = vmatprep.mubr.bf16.mxu0 %v10057_v28 }
  0xae   : > { %6523 = vmatprep.subr.bf16.mxu0 %v9894_v32  ;;  %2682 = vmatmul.mubr.bf16.vlgmr.msra.gmra.mxu1 %v9904_v35 }
  0xaf   : > { %6544 = vmatpush3.bf16.msra.mxu1 %v9889_v31 }
  0xb0   : > { %6545 = vmatprep.subr.bf16.mxu1 %v9909_v36 }
  0xb1   : > { %6524 = vmatpush3.bf16.msra.mxu0 %v9900_v34 }
  0xb2   : > { %6525 = vmatprep.subr.bf16.mxu0 %v9921_v38 }
  0xb3   : > { %6546 = vmatpush3.bf16.msra.mxu1 %v9915_v37 }
  0xb4   : > { %6547 = vmatprep.subr.bf16.mxu1 %v9934_v40  ;;  %v15178_v40 = vmov 0.0  }
  0xb5   : > { %6526 = vmatpush3.bf16.msra.mxu0 %v9927_v39 }
  0xb6   : > { %6527 = vmatprep.subr.bf16.mxu0 %v9945_v43 }
  0xb7   : > { %6548 = vmatpush3.bf16.msra.mxu1 %v9940_v41 }
  0xb8   : > { %6549 = vmatprep.subr.bf16.mxu1 %v9958_v46 }
  0xb9   : > { %6528 = vmatpush3.bf16.msra.mxu0 %v9951_v44 }
  0xba   : > { %6529 = vmatprep.subr.bf16.mxu0 %v9969_v49 }
  0xbb   : > { %6550 = vmatpush3.bf16.msra.mxu1 %v9964_v47  ;;  %v10076_v47 = vld [vmem:[%s14738_s1 + $0x638] sm:$0xff]  }
  0xbc   : > { %6551 = vmatprep.subr.bf16.mxu1 %v9982_v51  ;;  %v338_v51 = vshll.u32 %v6044_v33, 16  ;;  %15176 = vst [vmem:[#allocation15_spill] sm:$0xff] %v10076_v47 }
  0xbd   : > { %6530 = vmatpush3.bf16.msra.mxu0 %v9975_v50 }
  0xbe   : > { %6531 = vmatprep.subr.bf16.mxu0 %v9993_v55 }
  0xbf   : > { %6552 = vmatpush3.bf16.msra.mxu1 %v9988_v53  ;;  %v336_v53 = vshrl.u32 %v6044_v33, 16  ;;  %v10086_v33 = vld [vmem:[%s14738_s1 + $0x630] sm:$0xff]  }
  0xc0   : > { %6553 = vmatprep.subr.bf16.mxu1 %v10006_v57  ;;  %v14748_v57 = vmov 0.0   ;;  %15177 = vst [vmem:[#allocation16_spill] sm:$0xff] %v10086_v33 }
  0xc1   : > { %6532 = vmatpush3.bf16.msra.mxu0 %v9999_v56 }
  0xc2   : > { %6533 = vmatprep.subr.bf16.mxu0 %v10017_v62 }
  0xc3   : > { %6554 = vmatpush3.bf16.msra.mxu1 %v10012_v61  ;;  %v10064_v61 = vld [vmem:[%s9354_s25 + $0x10] sm:$0xf] }
  0xc4   : > { %6555 = vmatprep.subr.bf16.mxu1 %v10030_v3  ;;  %v10071_v3 = vld [vmem:[%s14738_s1 + $0x580] sm:$0xff]   ;;  %v6037_v46 = vcombine.low %v10064_v61, %v10064_v61 }
  0xc5   : > { %6534 = vmatpush3.bf16.msra.mxu0 %v10023_v2  ;;  %15175 = vst [vmem:[#allocation14_spill] sm:$0xff] %v10071_v3 }
  0xc6   : > { %6535 = vmatprep.subr.bf16.mxu0 %v10041_v24  ;;  %v261_v41 = vshll.u32 %v6037_v46, 16 }
  0xc7   : > { %6556 = vmatpush3.bf16.msra.mxu1 %v10036_v22  ;;  %v259_v22 = vshrl.u32 %v6037_v46, 16  ;;  %v10097_v46 = vld [vmem:[%s14738_s1 + $0x78] sm:$0xff]  }
  0xc8   : > { %6557 = vmatprep.subr.bf16.mxu1 %v10054_v27  ;;  %15179 = vst [vmem:[#allocation17_spill] sm:$0xff] %v10097_v46 }
  0xc9   : > { %6536 = vmatpush3.bf16.msra.mxu0 %v10047_v25 }
  0xca   : > { %8212 = vmatprep.subr.bf16.mxu0 %v14748_v57  ;;  %v340_v57 = vrot.slane %v338_v51, 1  ;;  %v263_v51 = vrot.slane %v261_v41, 1  ;;  %v10114_v41 = vld [vmem:[%s14738_s1 + $0x38] sm:$0xff]  }
  0xcb   : > { %6558 = vmatpush3.bf16.msra.mxu1 %v10071_v3  ;;  %v10107_v3 = vld [vmem:[%s14738_s1 + $0x628] sm:$0xff]   ;;  %15181 = vst [vmem:[#allocation19_spill] sm:$0xff] %v10114_v41 }
  0xcc   : > { %2722 = vmatmul.mubr.bf16.vlgmr.msra.gmra.mxu0 %v10064_v61  ;;  %v10092_v27 = vor.u32 %v340_v57, %v336_v53  ;;  %6574 = vmatprep.subr.bf16.mxu1 %v10097_v46  ;;  %15180 = vst [vmem:[#allocation18_spill] sm:$0xff] %v10107_v3  ;;  %v10121_v53 = vld [vmem:[%s14738_s1 + $0x70] sm:$0xff]   ;;  %v10128_v57 = vld [vmem:[%s14738_s1 + $0x620] sm:$0xff]  }
  0xcd   : > { %8213 = vmatpush3.bf16.msra.mxu0 %v10076_v47  ;;  %8228 = vmatprep.mubr.msk.bf16.mxu0 %vm9228_vm0, %v15178_v40  ;;  %v10101_v47 = vor.u32 %v263_v51, %v259_v22  ;;  %15182 = vst [vmem:[#allocation20_spill] sm:$0xff] %v10121_v53  ;;  %15183 = vst [vmem:[#allocation21_spill] sm:$0xff] %v10128_v57  ;;  %v10140_v22 = vld [vmem:[%s14738_s1 + $0x68] sm:$0xff]   ;;  %v10147_v51 = vld [vmem:[%s14738_s1 + $0x618] sm:$0xff]  }
  0xce   : > { %8214 = vmatprep.subr.bf16.mxu0 %v15178_v40  ;;  %2761 = vmatprep.mubr.bf16.mxu1 %v10092_v27  ;;  %15185 = vst [vmem:[#allocation23_spill] sm:$0xff] %v10140_v22  ;;  %15186 = vst [vmem:[#allocation24_spill] sm:$0xff] %v10147_v51  ;;  %v177_v46 = vld [vmem:[%s9354_s25 + $0x14] sm:$0x1] }
  0xcf   : > { %2762 = vmatmul.mubr.bf16.vlgmr.msra.gmra.mxu1 %v10101_v47 }
  0xd0   : > { %6575 = vmatpush3.bf16.msra.mxu1 %v10114_v41  ;;  %2849 = vmatprep.mubr.bf16.mxu1 %v9573_v63  ;;  %v10134_v63 = vld [vmem:[%s14738_s1 + $0x30] sm:$0xff]   ;;  %v10185_v41 = vld [vmem:[%s14738_s1 + $0x608] sm:$0xff]  }
  0xd1   : > { %8215 = vmatpush3.bf16.msra.mxu0 %v10086_v33  ;;  %6576 = vmatprep.subr.bf16.mxu1 %v10121_v53  ;;  %15184 = vst [vmem:[#allocation22_spill] sm:$0xff] %v10134_v63  ;;  %v10166_v53 = vld [vmem:[%s14738_s1 + $0x610] sm:$0xff]   ;;  %15192 = vst [vmem:[#allocation30_spill] sm:$0xff] %v10185_v41  ;;  %v10233_v33 = vld [vmem:[%s14738_s1 + $0x8] sm:$0xff]  }
  0xd2   : > { %8216 = vmatprep.subr.bf16.mxu0 %v15178_v40  ;;  %15189 = vst [vmem:[#allocation27_spill] sm:$0xff] %v10166_v53  ;;  %15199 = vst [vmem:[#allocation37_spill] sm:$0xff] %v10233_v33 }
  0xd4   : > { %6577 = vmatpush3.bf16.msra.mxu1 %v10134_v63  ;;  %v10153_v63 = vld [vmem:[%s14738_s1 + $0x28] sm:$0xff]  }
  0xd5   : > { %8217 = vmatpush3.bf16.msra.mxu0 %v10107_v3  ;;  %6578 = vmatprep.subr.bf16.mxu1 %v10140_v22  ;;  %15187 = vst [vmem:[#allocation25_spill] sm:$0xff] %v10153_v63  ;;  %v10159_v22 = vld [vmem:[%s14738_s1 + $0x60] sm:$0xff]   ;;  %v10227_v3 = vld [vmem:[%s14738_s1 + $0xf8] sm:$0xff]  }
  0xd6   : > { %8218 = vmatprep.subr.bf16.mxu0 %v15178_v40  ;;  %15188 = vst [vmem:[#allocation26_spill] sm:$0xff] %v10159_v22  ;;  %15198 = vst [vmem:[#allocation36_spill] sm:$0xff] %v10227_v3 }
  0xd8   : > { %6579 = vmatpush3.bf16.msra.mxu1 %v10153_v63  ;;  %v10172_v63 = vld [vmem:[%s14738_s1 + $0x20] sm:$0xff]  }
  0xd9   : > { %8219 = vmatpush3.bf16.msra.mxu0 %v10128_v57  ;;  %6580 = vmatprep.subr.bf16.mxu1 %v10159_v22  ;;  %15190 = vst [vmem:[#allocation28_spill] sm:$0xff] %v10172_v63  ;;  %v10178_v22 = vld [vmem:[%s14738_s1 + $0x58] sm:$0xff]  }
  0xda   : > { %8220 = vmatprep.subr.bf16.mxu0 %v15178_v40  ;;  %15191 = vst [vmem:[#allocation29_spill] sm:$0xff] %v10178_v22 }
  0xdc   : > { %6581 = vmatpush3.bf16.msra.mxu1 %v10172_v63  ;;  %v10192_v63 = vld [vmem:[%s14738_s1 + $0x18] sm:$0xff]  }
  0xdd   : > { %8221 = vmatpush3.bf16.msra.mxu0 %v10147_v51  ;;  %6582 = vmatprep.subr.bf16.mxu1 %v10178_v22  ;;  %15193 = vst [vmem:[#allocation31_spill] sm:$0xff] %v10192_v63  ;;  %v6051_v51 = vcombine.low %v10064_v61, %v177_v46  ;;  %v10199_v22 = vld [vmem:[%s14738_s1 + $0x50] sm:$0xff]  }
  0xde   : > { %8222 = vmatprep.subr.bf16.mxu0 %v15178_v40  ;;  %15194 = vst [vmem:[#allocation32_spill] sm:$0xff] %v10199_v22  ;;  %v10212_v46 = vld [vmem:[%s14738_s1 + $0x10] sm:$0xff]  }
  0xdf   : > { %15196 = vst [vmem:[#allocation34_spill] sm:$0xff] %v10212_v46 }
  0xe0   : > { %6583 = vmatpush3.bf16.msra.mxu1 %v10192_v63  ;;  %v10215_v63 = vrot.slane %v6051_v51, 1 }
  0xe1   : > { %8223 = vmatpush3.bf16.msra.mxu0 %v10166_v53  ;;  %6584 = vmatprep.subr.bf16.mxu1 %v10199_v22  ;;  %v10206_v53 = vld [vmem:[%s14738_s1 + $0x600] sm:$0xff]   ;;  %v10220_v22 = vld [vmem:[%s14738_s1 + $0x48] sm:$0xff]  }
  0xe2   : > { %8224 = vmatprep.subr.bf16.mxu0 %v15178_v40  ;;  %15195 = vst [vmem:[#allocation33_spill] sm:$0xff] %v10206_v53  ;;  %15197 = vst [vmem:[#allocation35_spill] sm:$0xff] %v10220_v22 }
  0xe4   : > { %6585 = vmatpush3.bf16.msra.mxu1 %v10212_v46 }
  0xe5   : > { %8225 = vmatpush3.bf16.msra.mxu0 %v10185_v41  ;;  %6586 = vmatprep.subr.bf16.mxu1 %v10220_v22  ;;  %v10240_v22 = vld [vmem:[%s14739_s2] ss:$0 sm:$0xff] }
  0xe6   : > { %8226 = vmatprep.subr.bf16.mxu0 %v15178_v40  ;;  %15200 = vst [vmem:[#allocation38_spill] sm:$0xff] %v10240_v22 }
  0xe8   : > { %6587 = vmatpush3.bf16.msra.mxu1 %v10233_v33  ;;  %v10257_v33 = vld [vmem:[%s14738_s1 + $0xf0] sm:$0xff]  }
  0xe9   : > { %8227 = vmatpush3.bf16.msra.mxu0 %v10206_v53  ;;  %15203 = vst [vmem:[#allocation41_spill] sm:$0xff] %v10257_v33  ;;  %v10265_v53 = vld [vmem:[%s14738_s1] sm:$0xff]  }
  0xea   : > { %6596 = vmatprep.subr.bf16.mxu0 %v10227_v3  ;;  %v10245_v3 = vld [vmem:[%s14738_s1 + $0x40] sm:$0xff]   ;;  %15204 = vst [vmem:[#allocation42_spill] sm:$0xff] %v10265_v53 }
  0xeb   : > { %15201 = vst [vmem:[#allocation39_spill] sm:$0xff] %v10245_v3  ;;  %6588 = vmatprep.subr.bf16.mxu1 %v10245_v3 }
  0xec   : > { %v6317_v57 = vpop.f32.mrf.mxu0  ;;  %8229 = vmatmul.mubr.bf16.vlgmr.msra.gmra.mxu0 %v10215_v63  ;;  %6589 = vmatpush3.bf16.msra.mxu1 %v10265_v53  ;;  %v8637_v53 = vld [vmem:[%s9354_s25 + $0x8] sm:$0xf] }
  0xed   : > { %2889 = vmatprep.mubr.bf16.mxu0 %v9603_v12  ;;  %v10277_v12 = vld [vmem:[%s14738_s1 + $0xb0] sm:$0xff]  }
  0xee   : > { %v6318_v41 = vpop.f32.mrf.mxu0 }
  0xef   : > { %v6319_v46 = vadd.f32 %v6318_v41, %v6317_v57  ;;  %v10251_v41 = vld [vmem:[%s14738_s1 + $0xb8] sm:$0xff]   ;;  %2850 = vmatmul.mubr.bf16.vlgmr.msra.gmra.mxu1 %v8637_v53  ;;  %v10321_v53 = vld [vmem:[%s14738_s1 + $0x168] sm:$0xff]  }
  0xf0   : > { %v6320_v51 = vpop.f32.mrf.mxu0  ;;  %15202 = vst [vmem:[#allocation40_spill] sm:$0xff] %v10251_v41  ;;  %6597 = vmatpush3.bf16.msra.mxu0 %v10251_v41  ;;  %v10271_v41 = vld [vmem:[%s14738_s1 + $0x178] sm:$0xff]   ;;  %2929 = vmatprep.mubr.bf16.mxu1 %v9688_v45  ;;  %v10315_v45 = vld [vmem:[%s14738_s1 + $0x130] sm:$0xff]   ;;  %15211 = vst [vmem:[#allocation49_spill] sm:$0xff] %v10321_v53 }
  0xf1   : > { %v6339_v51 = vpop.f32.mrf.mxu1  ;;  %6598 = vmatprep.subr.bf16.mxu0 %v10257_v33  ;;  %v2324_v3 = vadd.f32 %v6319_v46, %v10240_v22  ;;  %15205 = vst [vmem:[#allocation43_spill] sm:$0xff] %v10271_v41  ;;  %6618 = vmatprep.subr.bf16.mxu1 %v10271_v41  ;;  %v10283_v46 = vld [vmem:[%s14738_s1 + $0xe8] sm:$0xff]   ;;  %v10297_v41 = vld [vmem:[%s14738_s1 + $0x170] sm:$0xff]   ;;  %15210 = vst [vmem:[#allocation48_spill] sm:$0xff] %v10315_v45 }
  0xf2   : > { %v6321_v57 = vpop.f32.mrf.mxu0  ;;  %15207 = vst [vmem:[#allocation45_spill] sm:$0xff] %v10297_v41 }
  0xf3   : > { %v6340_v57 = vpop.f32.mrf.mxu1 }
  0xf4   : > { %v6341_v33 = vadd.f32 %v6340_v57, %v6339_v51  ;;  %6599 = vmatpush3.bf16.msra.mxu0 %v10277_v12  ;;  %v10290_v51 = vld [vmem:[%s14738_s1 + $0x138] sm:$0xff]  }
  0xf5   : > { %6600 = vmatprep.subr.bf16.mxu0 %v10283_v46  ;;  %v6342_v22 = vpop.f32.mrf.mxu1  ;;  %15206 = vst [vmem:[#allocation44_spill] sm:$0xff] %v10290_v51  ;;  %6619 = vmatpush3.bf16.msra.mxu1 %v10290_v51  ;;  %v10357_v51 = vld [vmem:[%s14738_s1 + $0xd0] sm:$0xff]  }
  0xf6   : > { %v2364_v37 = vadd.f32 %v6341_v33, %v2324_v3  ;;  %6620 = vmatprep.subr.bf16.mxu1 %v10297_v41  ;;  %v10303_v3 = vld [vmem:[%s14738_s1 + $0xa8] sm:$0xff]   ;;  %v10309_v33 = vld [vmem:[%s14738_s1 + $0xe0] sm:$0xff]   ;;  %v10351_v41 = vld [vmem:[%s14738_s1 + $0x98] sm:$0xff]   ;;  %15217 = vst [vmem:[#allocation55_spill] sm:$0xff] %v10357_v51 }
  0xf7   : > { %v6343_v57 = vpop.f32.mrf.mxu1  ;;  %15208 = vst [vmem:[#allocation46_spill] sm:$0xff] %v10303_v3  ;;  %15209 = vst [vmem:[#allocation47_spill] sm:$0xff] %v10309_v33  ;;  %v10327_v22 = vld [vmem:[%s14738_s1 + $0xa0] sm:$0xff]  }
  0xf8   : > { %6601 = vmatpush3.bf16.msra.mxu0 %v10303_v3  ;;  %15212 = vst [vmem:[#allocation50_spill] sm:$0xff] %v10327_v22  ;;  %v10333_v57 = vld [vmem:[%s14738_s1 + $0xd8] sm:$0xff]   ;;  %15216 = vst [vmem:[#allocation54_spill] sm:$0xff] %v10351_v41 }
  0xf9   : > { %6602 = vmatprep.subr.bf16.mxu0 %v10309_v33  ;;  %6621 = vmatpush3.bf16.msra.mxu1 %v10315_v45  ;;  %15213 = vst [vmem:[#allocation51_spill] sm:$0xff] %v10333_v57  ;;  %v10339_v45 = vld [vmem:[%s14738_s1 + $0x128] sm:$0xff]  }
  0xfa   : > { %6622 = vmatprep.subr.bf16.mxu1 %v10321_v53  ;;  %15214 = vst [vmem:[#allocation52_spill] sm:$0xff] %v10339_v45  ;;  %v10345_v53 = vld [vmem:[%s14738_s1 + $0x160] sm:$0xff]  }
  0xfb   : > { %15215 = vst [vmem:[#allocation53_spill] sm:$0xff] %v10345_v53 }
  0xfc   : > { %6603 = vmatpush3.bf16.msra.mxu0 %v10327_v22 }
  0xfd   : > { %6604 = vmatprep.subr.bf16.mxu0 %v10333_v57  ;;  %6623 = vmatpush3.bf16.msra.mxu1 %v10339_v45  ;;  %v10363_v45 = vld [vmem:[%s14738_s1 + $0x120] sm:$0xff]   ;;  %v10429_v57 = vld [vmem:[%s14738_s1 + $0x1f8] sm:$0xff]  }
  0xfe   : > { %6624 = vmatprep.subr.bf16.mxu1 %v10345_v53  ;;  %15218 = vst [vmem:[#allocation56_spill] sm:$0xff] %v10363_v45  ;;  %v10369_v53 = vld [vmem:[%s14738_s1 + $0x158] sm:$0xff]   ;;  %15229 = vst [vmem:[#allocation67_spill] sm:$0xff] %v10429_v57 }
  0xff   : > { %15219 = vst [vmem:[#allocation57_spill] sm:$0xff] %v10369_v53 }
 0x100   : > { %6605 = vmatpush3.bf16.msra.mxu0 %v10351_v41  ;;  %v10375_v41 = vld [vmem:[%s14738_s1 + $0x90] sm:$0xff]  }
 0x101   : > { %6606 = vmatprep.subr.bf16.mxu0 %v10357_v51  ;;  %6625 = vmatpush3.bf16.msra.mxu1 %v10363_v45  ;;  %15220 = vst [vmem:[#allocation58_spill] sm:$0xff] %v10375_v41  ;;  %v10381_v51 = vld [vmem:[%s14738_s1 + $0xc8] sm:$0xff]   ;;  %v10387_v45 = vld [vmem:[%s14738_s1 + $0x118] sm:$0xff]  }
 0x102   : > { %6626 = vmatprep.subr.bf16.mxu1 %v10369_v53  ;;  %15221 = vst [vmem:[#allocation59_spill] sm:$0xff] %v10381_v51  ;;  %15222 = vst [vmem:[#allocation60_spill] sm:$0xff] %v10387_v45  ;;  %v10393_v53 = vld [vmem:[%s14738_s1 + $0x150] sm:$0xff]  }
 0x103   : > { %15223 = vst [vmem:[#allocation61_spill] sm:$0xff] %v10393_v53 }
 0x104   : > { %6607 = vmatpush3.bf16.msra.mxu0 %v10375_v41  ;;  %v10399_v41 = vld [vmem:[%s14738_s1 + $0x88] sm:$0xff]  }
 0x105   : > { %6608 = vmatprep.subr.bf16.mxu0 %v10381_v51  ;;  %6627 = vmatpush3.bf16.msra.mxu1 %v10387_v45  ;;  %15224 = vst [vmem:[#allocation62_spill] sm:$0xff] %v10399_v41  ;;  %v10405_v51 = vld [vmem:[%s14738_s1 + $0xc0] sm:$0xff]   ;;  %v10411_v45 = vld [vmem:[%s14738_s1 + $0x110] sm:$0xff]  }
 0x106   : > { %6628 = vmatprep.subr.bf16.mxu1 %v10393_v53  ;;  %15225 = vst [vmem:[#allocation63_spill] sm:$0xff] %v10405_v51  ;;  %15226 = vst [vmem:[#allocation64_spill] sm:$0xff] %v10411_v45  ;;  %v10417_v53 = vld [vmem:[%s14738_s1 + $0x148] sm:$0xff]  }
 0x107   : > { %15227 = vst [vmem:[#allocation65_spill] sm:$0xff] %v10417_v53 }
 0x108   : > { %6609 = vmatpush3.bf16.msra.mxu0 %v10399_v41  ;;  %v10423_v41 = vld [vmem:[%s14738_s1 + $0x80] sm:$0xff]  }
 0x109   : > { %6610 = vmatprep.subr.bf16.mxu0 %v10405_v51  ;;  %6629 = vmatpush3.bf16.msra.mxu1 %v10411_v45  ;;  %15228 = vst [vmem:[#allocation66_spill] sm:$0xff] %v10423_v41 }
 0x10a   : > { %6630 = vmatprep.subr.bf16.mxu1 %v10417_v53  ;;  %v10435_v53 = vld [vmem:[%s14738_s1 + $0x108] sm:$0xff]  }
 0x10b   : > { %15230 = vst [vmem:[#allocation68_spill] sm:$0xff] %v10435_v53 }
 0x10c   : > { %6611 = vmatpush3.bf16.msra.mxu0 %v10423_v41  ;;  %v6361_v51 = vpop.f32.mrf.mxu0  ;;  %v10442_v41 = vld [vmem:[%s14738_s1 + $0x140] sm:$0xff]  }
 0x10d   : > { %6640 = vmatprep.subr.bf16.mxu0 %v10429_v57  ;;  %6631 = vmatpush3.bf16.msra.mxu1 %v10435_v53  ;;  %15231 = vst [vmem:[#allocation69_spill] sm:$0xff] %v10442_v41  ;;  %v10448_v57 = vld [vmem:[%s14738_s1 + $0x1b8] sm:$0xff]  }
 0x10e   : > { %v6362_v45 = vpop.f32.mrf.mxu0  ;;  %6632 = vmatprep.subr.bf16.mxu1 %v10442_v41  ;;  %v10461_v41 = vld [vmem:[%s14738_s1 + $0x100] sm:$0xff]  }
 0x10f   : > { %2890 = vmatmul.mubr.bf16.vlgmr.msra.gmra.mxu0 %v9679_v42  ;;  %v6363_v22 = vadd.f32 %v6362_v45, %v6361_v51  ;;  %v10454_v42 = vld [vmem:[%s14738_s1 + $0x1f0] sm:$0xff]   ;;  %v6383_v51 = vpop.f32.mrf.mxu1  ;;  %15232 = vst [vmem:[#allocation70_spill] sm:$0xff] %v10461_v41 }
 0x110   : > { %6641 = vmatpush3.bf16.msra.mxu0 %v10448_v57  ;;  %v6364_v33 = vpop.f32.mrf.mxu0  ;;  %2969 = vmatprep.mubr.bf16.mxu0 %v9729_v59  ;;  %v10473_v59 = vld [vmem:[%s14738_s1 + $0x1b0] sm:$0xff]  }
 0x111   : > { %v2404_v3 = vadd.f32 %v6363_v22, %v2364_v37  ;;  %6642 = vmatprep.subr.bf16.mxu0 %v10454_v42  ;;  %6633 = vmatpush3.bf16.msra.mxu1 %v10461_v41  ;;  %v10467_v37 = vld [vmem:[%s14738_s1 + $0x278] sm:$0xff]   ;;  %v6384_v33 = vpop.f32.mrf.mxu1  ;;  %15234 = vst [vmem:[#allocation72_spill] sm:$0xff] %v10473_v59 }
 0x112   : > { %v6365_v45 = vpop.f32.mrf.mxu0  ;;  %15233 = vst [vmem:[#allocation71_spill] sm:$0xff] %v10467_v37  ;;  %6662 = vmatprep.subr.bf16.mxu1 %v10467_v37  ;;  %v6385_v22 = vadd.f32 %v6384_v33, %v6383_v51  ;;  %v10486_v37 = vld [vmem:[%s14738_s1 + $0x238] sm:$0xff]   ;;  %v10495_v51 = vld [vmem:[%s14738_s1 + $0x270] sm:$0xff]   ;;  %v10519_v33 = vld [vmem:[%s14738_s1 + $0x268] sm:$0xff]  }
 0x113   : > { %v10479_v45 = vld [vmem:[%s14738_s1 + $0x1e8] sm:$0xff]   ;;  %v6386_v41 = vpop.f32.mrf.mxu1  ;;  %15236 = vst [vmem:[#allocation74_spill] sm:$0xff] %v10486_v37  ;;  %15237 = vst [vmem:[#allocation75_spill] sm:$0xff] %v10495_v51 }
 0x114   : > { %6643 = vmatpush3.bf16.msra.mxu0 %v10473_v59  ;;  %15235 = vst [vmem:[#allocation73_spill] sm:$0xff] %v10479_v45  ;;  %2930 = vmatmul.mubr.bf16.vlgmr.msra.gmra.mxu1 %v9697_v48  ;;  %v10489_v53 = vadd.f32 %v6385_v22, %v2404_v3  ;;  %v10501_v48 = vld [vmem:[%s14738_s1 + $0x1a8] sm:$0xff]   ;;  %v10507_v3 = vld [vmem:[%s14738_s1 + $0x1e0] sm:$0xff]   ;;  %15241 = vst [vmem:[#allocation79_spill] sm:$0xff] %v10519_v33 }
 0x115   : > { %6644 = vmatprep.subr.bf16.mxu0 %v10479_v45  ;;  %6663 = vmatpush3.bf16.msra.mxu1 %v10486_v37  ;;  %15238 = vst [vmem:[#allocation76_spill] sm:$0xff] %v10501_v48  ;;  %v6387_v41 = vpop.f32.mrf.mxu1  ;;  %15239 = vst [vmem:[#allocation77_spill] sm:$0xff] %v10507_v3  ;;  %v10525_v22 = vld [vmem:[%s14738_s1 + $0x1a0] sm:$0xff]   ;;  %v10555_v37 = vld [vmem:[%s14738_s1 + $0x1d0] sm:$0xff]  }
 0x116   : > { %3009 = vmatprep.mubr.bf16.mxu1 %v9883_v30  ;;  %6664 = vmatprep.subr.bf16.mxu1 %v10495_v51  ;;  %v10513_v30 = vld [vmem:[%s14738_s1 + $0x230] sm:$0xff]   ;;  %15242 = vst [vmem:[#allocation80_spill] sm:$0xff] %v10525_v22  ;;  %v10531_v41 = vld [vmem:[%s14738_s1 + $0x1d8] sm:$0xff]   ;;  %15247 = vst [vmem:[#allocation85_spill] sm:$0xff] %v10555_v37 }
 0x117   : > { %15240 = vst [vmem:[#allocation78_spill] sm:$0xff] %v10513_v30  ;;  %15243 = vst [vmem:[#allocation81_spill] sm:$0xff] %v10531_v41  ;;  %v10549_v51 = vld [vmem:[%s14738_s1 + $0x198] sm:$0xff]   ;;  %v10863_v45 = vld [vmem:[%s14738_s1 + $0x300] sm:$0xff]  }
 0x118   : > { %6645 = vmatpush3.bf16.msra.mxu0 %v10501_v48  ;;  %15246 = vst [vmem:[#allocation84_spill] sm:$0xff] %v10549_v51  ;;  %v10660_v48 = vld [vmem:[%s14738_s1 + $0x200] sm:$0xff]   ;;  %15296 = vst [vmem:[#allocation134_spill] sm:$0xff] %v10863_v45 }
 0x119   : > { %6646 = vmatprep.subr.bf16.mxu0 %v10507_v3  ;;  %6665 = vmatpush3.bf16.msra.mxu1 %v10513_v30  ;;  %v10537_v30 = vld [vmem:[%s14738_s1 + $0x228] sm:$0xff]   ;;  %15264 = vst [vmem:[#allocation102_spill] sm:$0xff] %v10660_v48 }
 0x11a   : > { %6666 = vmatprep.subr.bf16.mxu1 %v10519_v33  ;;  %15244 = vst [vmem:[#allocation82_spill] sm:$0xff] %v10537_v30  ;;  %v10543_v33 = vld [vmem:[%s14738_s1 + $0x260] sm:$0xff]  }
 0x11b   : > { %15245 = vst [vmem:[#allocation83_spill] sm:$0xff] %v10543_v33 }
 0x11c   : > { %6647 = vmatpush3.bf16.msra.mxu0 %v10525_v22 }
 0x11d   : > { %6648 = vmatprep.subr.bf16.mxu0 %v10531_v41  ;;  %6667 = vmatpush3.bf16.msra.mxu1 %v10537_v30  ;;  %v10561_v30 = vld [vmem:[%s14738_s1 + $0x220] sm:$0xff]   ;;  %v10627_v41 = vld [vmem:[%s14738_s1 + $0x2f8] sm:$0xff]  }
 0x11e   : > { %6668 = vmatprep.subr.bf16.mxu1 %v10543_v33  ;;  %15248 = vst [vmem:[#allocation86_spill] sm:$0xff] %v10561_v30  ;;  %v10567_v33 = vld [vmem:[%s14738_s1 + $0x258] sm:$0xff]   ;;  %15259 = vst [vmem:[#allocation97_spill] sm:$0xff] %v10627_v41 }
 0x11f   : > { %15249 = vst [vmem:[#allocation87_spill] sm:$0xff] %v10567_v33 }
 0x120   : > { %6649 = vmatpush3.bf16.msra.mxu0 %v10549_v51  ;;  %v10573_v51 = vld [vmem:[%s14738_s1 + $0x190] sm:$0xff]  }
 0x121   : > { %6650 = vmatprep.subr.bf16.mxu0 %v10555_v37  ;;  %6669 = vmatpush3.bf16.msra.mxu1 %v10561_v30  ;;  %15250 = vst [vmem:[#allocation88_spill] sm:$0xff] %v10573_v51  ;;  %v10579_v37 = vld [vmem:[%s14738_s1 + $0x1c8] sm:$0xff]   ;;  %v10585_v30 = vld [vmem:[%s14738_s1 + $0x218] sm:$0xff]  }
 0x122   : > { %6670 = vmatprep.subr.bf16.mxu1 %v10567_v33  ;;  %15251 = vst [vmem:[#allocation89_spill] sm:$0xff] %v10579_v37  ;;  %15252 = vst [vmem:[#allocation90_spill] sm:$0xff] %v10585_v30  ;;  %v10591_v33 = vld [vmem:[%s14738_s1 + $0x250] sm:$0xff]  }
 0x123   : > { %15253 = vst [vmem:[#allocation91_spill] sm:$0xff] %v10591_v33 }
 0x124   : > { %6651 = vmatpush3.bf16.msra.mxu0 %v10573_v51  ;;  %v10597_v51 = vld [vmem:[%s14738_s1 + $0x188] sm:$0xff]  }
 0x125   : > { %6652 = vmatprep.subr.bf16.mxu0 %v10579_v37  ;;  %6671 = vmatpush3.bf16.msra.mxu1 %v10585_v30  ;;  %15254 = vst [vmem:[#allocation92_spill] sm:$0xff] %v10597_v51  ;;  %v10603_v37 = vld [vmem:[%s14738_s1 + $0x1c0] sm:$0xff]   ;;  %v10609_v30 = vld [vmem:[%s14738_s1 + $0x210] sm:$0xff]  }
 0x126   : > { %6672 = vmatprep.subr.bf16.mxu1 %v10591_v33  ;;  %15255 = vst [vmem:[#allocation93_spill] sm:$0xff] %v10603_v37  ;;  %15256 = vst [vmem:[#allocation94_spill] sm:$0xff] %v10609_v30  ;;  %v10615_v33 = vld [vmem:[%s14738_s1 + $0x248] sm:$0xff]  }
 0x127   : > { %15257 = vst [vmem:[#allocation95_spill] sm:$0xff] %v10615_v33 }
 0x128   : > { %6653 = vmatpush3.bf16.msra.mxu0 %v10597_v51  ;;  %v10621_v51 = vld [vmem:[%s14738_s1 + $0x180] sm:$0xff]  }
 0x129   : > { %6654 = vmatprep.subr.bf16.mxu0 %v10603_v37  ;;  %6673 = vmatpush3.bf16.msra.mxu1 %v10609_v30  ;;  %15258 = vst [vmem:[#allocation96_spill] sm:$0xff] %v10621_v51  ;;  %v10633_v30 = vld [vmem:[%s14738_s1 + $0x208] sm:$0xff]  }
 0x12a   : > { %6674 = vmatprep.subr.bf16.mxu1 %v10615_v33  ;;  %15260 = vst [vmem:[#allocation98_spill] sm:$0xff] %v10633_v30 }
 0x12c   : > { %6655 = vmatpush3.bf16.msra.mxu0 %v10621_v51  ;;  %v6405_v37 = vpop.f32.mrf.mxu0  ;;  %v10640_v51 = vld [vmem:[%s14738_s1 + $0x240] sm:$0xff]  }
 0x12d   : > { %6684 = vmatprep.subr.bf16.mxu0 %v10627_v41  ;;  %6675 = vmatpush3.bf16.msra.mxu1 %v10633_v30  ;;  %15261 = vst [vmem:[#allocation99_spill] sm:$0xff] %v10640_v51  ;;  %v10646_v41 = vld [vmem:[%s14738_s1 + $0x2b8] sm:$0xff]  }
 0x12e   : > { %v6406_v33 = vpop.f32.mrf.mxu0  ;;  %6676 = vmatprep.subr.bf16.mxu1 %v10640_v51  ;;  %15262 = vst [vmem:[#allocation100_spill] sm:$0xff] %v10646_v41  ;;  %v6427_v30 = vpop.f32.mrf.mxu1 }
 0x12f   : > { %2970 = vmatmul.mubr.bf16.vlgmr.msra.gmra.mxu0 %v9859_v21  ;;  %v6407_v22 = vadd.f32 %v6406_v33, %v6405_v37  ;;  %v10652_v21 = vld [vmem:[%s14738_s1 + $0x2f0] sm:$0xff]  }
 0x130   : > { %6685 = vmatpush3.bf16.msra.mxu0 %v10646_v41  ;;  %v6408_v3 = vpop.f32.mrf.mxu0  ;;  %15263 = vst [vmem:[#allocation101_spill] sm:$0xff] %v10652_v21  ;;  %3049 = vmatprep.mubr.bf16.mxu0 %v10057_v28  ;;  %v6428_v33 = vpop.f32.mrf.mxu1 }
 0x131   : > { %6686 = vmatprep.subr.bf16.mxu0 %v10652_v21  ;;  %v2484_v51 = vadd.f32 %v6407_v22, %v10489_v53  ;;  %6677 = vmatpush3.bf16.msra.mxu1 %v10660_v48  ;;  %v10666_v3 = vld [vmem:[%s14738_s1 + $0x378] sm:$0xff]   ;;  %v10672_v53 = vld [vmem:[%s14738_s1 + $0x2b0] sm:$0xff]   ;;  %v6429_v22 = vadd.f32 %v6428_v33, %v6427_v30 }
 0x132   : > { %v6409_v37 = vpop.f32.mrf.mxu0  ;;  %15265 = vst [vmem:[#allocation103_spill] sm:$0xff] %v10666_v3  ;;  %6706 = vmatprep.subr.bf16.mxu1 %v10666_v3  ;;  %15266 = vst [vmem:[#allocation104_spill] sm:$0xff] %v10672_v53  ;;  %v6430_v48 = vpop.f32.mrf.mxu1  ;;  %v10685_v3 = vld [vmem:[%s14738_s1 + $0x338] sm:$0xff]   ;;  %v10694_v30 = vld [vmem:[%s14738_s1 + $0x370] sm:$0xff]  }
 0x133   : > { %v10678_v37 = vld [vmem:[%s14738_s1 + $0x2e8] sm:$0xff]   ;;  %15268 = vst [vmem:[#allocation106_spill] sm:$0xff] %v10685_v3  ;;  %v10688_v21 = vadd.f32 %v6429_v22, %v2484_v51  ;;  %15269 = vst [vmem:[#allocation107_spill] sm:$0xff] %v10694_v30  ;;  %v10706_v51 = vld [vmem:[%s14738_s1 + $0x2e0] sm:$0xff]  }
 0x134   : > { %6687 = vmatpush3.bf16.msra.mxu0 %v10672_v53  ;;  %15267 = vst [vmem:[#allocation105_spill] sm:$0xff] %v10678_v37  ;;  %3010 = vmatmul.mubr.bf16.vlgmr.msra.gmra.mxu1 %v9904_v35  ;;  %v10700_v35 = vld [vmem:[%s14738_s1 + $0x2a8] sm:$0xff]   ;;  %v6431_v48 = vpop.f32.mrf.mxu1  ;;  %15271 = vst [vmem:[#allocation109_spill] sm:$0xff] %v10706_v51  ;;  %v10712_v33 = vld [vmem:[%s14738_s1 + $0x330] sm:$0xff]  }
 0x135   : > { %6688 = vmatprep.subr.bf16.mxu0 %v10678_v37  ;;  %6707 = vmatpush3.bf16.msra.mxu1 %v10685_v3  ;;  %15270 = vst [vmem:[#allocation108_spill] sm:$0xff] %v10700_v35  ;;  %15272 = vst [vmem:[#allocation110_spill] sm:$0xff] %v10712_v33  ;;  %v10718_v22 = vld [vmem:[%s14738_s1 + $0x368] sm:$0xff]   ;;  %v10724_v48 = vld [vmem:[%s14738_s1 + $0x2a0] sm:$0xff]  }
 0x136   : > { %3089 = vmatprep.mubr.bf16.mxu1 %v10092_v27  ;;  %6708 = vmatprep.subr.bf16.mxu1 %v10694_v30  ;;  %15273 = vst [vmem:[#allocation111_spill] sm:$0xff] %v10718_v22  ;;  %15274 = vst [vmem:[#allocation112_spill] sm:$0xff] %v10724_v48  ;;  %v10730_v30 = vld [vmem:[%s14738_s1 + $0x2d8] sm:$0xff]   ;;  %v10837_v37 = vld [vmem:[%s14738_s1 + $0x308] sm:$0xff]  }
 0x137   : > { %15275 = vst [vmem:[#allocation113_spill] sm:$0xff] %v10730_v30  ;;  %v10748_v3 = vld [vmem:[%s14738_s1 + $0x298] sm:$0xff]   ;;  %15292 = vst [vmem:[#allocation130_spill] sm:$0xff] %v10837_v37 }
 0x138   : > { %6689 = vmatpush3.bf16.msra.mxu0 %v10700_v35  ;;  %15278 = vst [vmem:[#allocation116_spill] sm:$0xff] %v10748_v3  ;;  %v10819_v35 = vld [vmem:[%s14738_s1 + $0x348] sm:$0xff]  }
 0x139   : > { %6690 = vmatprep.subr.bf16.mxu0 %v10706_v51  ;;  %6709 = vmatpush3.bf16.msra.mxu1 %v10712_v33  ;;  %v10736_v33 = vld [vmem:[%s14738_s1 + $0x328] sm:$0xff]   ;;  %v10813_v51 = vld [vmem:[%s14738_s1 + $0x310] sm:$0xff]   ;;  %15289 = vst [vmem:[#allocation127_spill] sm:$0xff] %v10819_v35 }
 0x13a   : > { %6710 = vmatprep.subr.bf16.mxu1 %v10718_v22  ;;  %15276 = vst [vmem:[#allocation114_spill] sm:$0xff] %v10736_v33  ;;  %v10742_v22 = vld [vmem:[%s14738_s1 + $0x360] sm:$0xff]   ;;  %15288 = vst [vmem:[#allocation126_spill] sm:$0xff] %v10813_v51 }
 0x13b   : > { %15277 = vst [vmem:[#allocation115_spill] sm:$0xff] %v10742_v22 }
 0x13c   : > { %6691 = vmatpush3.bf16.msra.mxu0 %v10724_v48 }
 0x13d   : > { %6692 = vmatprep.subr.bf16.mxu0 %v10730_v30  ;;  %6711 = vmatpush3.bf16.msra.mxu1 %v10736_v33  ;;  %v10754_v30 = vld [vmem:[%s14738_s1 + $0x2d0] sm:$0xff]   ;;  %v10760_v33 = vld [vmem:[%s14738_s1 + $0x320] sm:$0xff]  }
 0x13e   : > { %6712 = vmatprep.subr.bf16.mxu1 %v10742_v22  ;;  %15279 = vst [vmem:[#allocation117_spill] sm:$0xff] %v10754_v30  ;;  %15280 = vst [vmem:[#allocation118_spill] sm:$0xff] %v10760_v33  ;;  %v10766_v22 = vld [vmem:[%s14738_s1 + $0x358] sm:$0xff]  }
 0x13f   : > { %15281 = vst [vmem:[#allocation119_spill] sm:$0xff] %v10766_v22 }
 0x140   : > { %6693 = vmatpush3.bf16.msra.mxu0 %v10748_v3  ;;  %v10772_v3 = vld [vmem:[%s14738_s1 + $0x290] sm:$0xff]  }
 0x141   : > { %6694 = vmatprep.subr.bf16.mxu0 %v10754_v30  ;;  %6713 = vmatpush3.bf16.msra.mxu1 %v10760_v33  ;;  %15282 = vst [vmem:[#allocation120_spill] sm:$0xff] %v10772_v3  ;;  %v10776_v30 = vld [vmem:[%s9354_s25 + $0xa0] sm:$0xf]  ;;  %v10781_v33 = vld [vmem:[%s14738_s1 + $0x2c8] sm:$0xff]  }
 0x142   : > { %6714 = vmatprep.subr.bf16.mxu1 %v10766_v22  ;;  %15283 = vst [vmem:[#allocation121_spill] sm:$0xff] %v10781_v33  ;;  %v10787_v22 = vld [vmem:[%s14738_s1 + $0x318] sm:$0xff]   ;;  %v6058_v48 = vcombine.low %v10776_v30, %v10776_v30 }
 0x143   : > { %15284 = vst [vmem:[#allocation122_spill] sm:$0xff] %v10787_v22 }
 0x144   : > { %6695 = vmatpush3.bf16.msra.mxu0 %v10772_v3  ;;  %v10795_v3 = vld [vmem:[%s14738_s1 + $0x350] sm:$0xff]  }
 0x145   : > { %6696 = vmatprep.subr.bf16.mxu0 %v10781_v33  ;;  %6715 = vmatpush3.bf16.msra.mxu1 %v10787_v22  ;;  %15285 = vst [vmem:[#allocation123_spill] sm:$0xff] %v10795_v3  ;;  %v10801_v33 = vld [vmem:[%s14738_s1 + $0x288] sm:$0xff]   ;;  %v10807_v22 = vld [vmem:[%s14738_s1 + $0x2c0] sm:$0xff]  }
 0x146   : > { %6716 = vmatprep.subr.bf16.mxu1 %v10795_v3  ;;  %15286 = vst [vmem:[#allocation124_spill] sm:$0xff] %v10801_v33  ;;  %15287 = vst [vmem:[#allocation125_spill] sm:$0xff] %v10807_v22  ;;  %v450_v3 = vshll.u32 %v6058_v48, 16 }
 0x148   : > { %6697 = vmatpush3.bf16.msra.mxu0 %v10801_v33  ;;  %v10825_v33 = vld [vmem:[%s14738_s1 + $0x280] sm:$0xff]   ;;  %v452_v53 = vrot.slane %v450_v3, 1  ;;  %v10856_v3 = vld [vmem:[%s14738_s1 + $0x3f0] sm:$0xff]  }
 0x149   : > { %6698 = vmatprep.subr.bf16.mxu0 %v10807_v22  ;;  %6717 = vmatpush3.bf16.msra.mxu1 %v10813_v51  ;;  %15290 = vst [vmem:[#allocation128_spill] sm:$0xff] %v10825_v33  ;;  %v10831_v22 = vld [vmem:[%s14738_s1 + $0x3f8] sm:$0xff]   ;;  %15295 = vst [vmem:[#allocation133_spill] sm:$0xff] %v10856_v3 }
 0x14a   : > { %6718 = vmatprep.subr.bf16.mxu1 %v10819_v35  ;;  %15291 = vst [vmem:[#allocation129_spill] sm:$0xff] %v10831_v22  ;;  %v448_v35 = vshrl.u32 %v6058_v48, 16 }
 0x14c   : > { %6699 = vmatpush3.bf16.msra.mxu0 %v10825_v33  ;;  %v6449_v51 = vpop.f32.mrf.mxu0  ;;  %v10844_v33 = vld [vmem:[%s14738_s1 + $0x340] sm:$0xff]  }
 0x14d   : > { %6728 = vmatprep.subr.bf16.mxu0 %v10831_v22  ;;  %6719 = vmatpush3.bf16.msra.mxu1 %v10837_v37  ;;  %15293 = vst [vmem:[#allocation131_spill] sm:$0xff] %v10844_v33  ;;  %v10850_v22 = vld [vmem:[%s14738_s1 + $0x3b8] sm:$0xff]  }
 0x14e   : > { %6720 = vmatprep.subr.bf16.mxu1 %v10844_v33  ;;  %15294 = vst [vmem:[#allocation132_spill] sm:$0xff] %v10850_v22  ;;  %v6450_v41 = vpop.f32.mrf.mxu0  ;;  %v6471_v48 = vpop.f32.mrf.mxu1 }
 0x14f   : > { %3050 = vmatmul.mubr.bf16.vlgmr.msra.gmra.mxu0 %v10064_v61  ;;  %v6451_v37 = vadd.f32 %v6450_v41, %v6449_v51  ;;  %v10867_v51 = vor.u32 %v452_v53, %v448_v35 }
 0x150   : > { %6729 = vmatpush3.bf16.msra.mxu0 %v10850_v22  ;;  %3129 = vmatprep.mubr.bf16.mxu0 %v10776_v30  ;;  %v6452_v33 = vpop.f32.mrf.mxu0  ;;  %v10872_v22 = vld [vmem:[%s14738_s1 + $0x478] sm:$0xff]  }
 0x151   : > { %6730 = vmatprep.subr.bf16.mxu0 %v10856_v3  ;;  %6721 = vmatpush3.bf16.msra.mxu1 %v10863_v45  ;;  %v2564_v41 = vadd.f32 %v6451_v37, %v10688_v21  ;;  %v6472_v3 = vpop.f32.mrf.mxu1  ;;  %v10878_v33 = vld [vmem:[%s14738_s1 + $0x3b0] sm:$0xff]   ;;  %v10884_v21 = vld [vmem:[%s14738_s1 + $0x3e8] sm:$0xff]   ;;  %v10891_v37 = vld [vmem:[%s14738_s1 + $0x438] sm:$0xff]  }
 0x152   : > { %6750 = vmatprep.subr.bf16.mxu1 %v10872_v22  ;;  %v6453_v45 = vpop.f32.mrf.mxu0  ;;  %v6473_v59 = vadd.f32 %v6472_v3, %v6471_v48  ;;  %v10907_v48 = vld [vmem:[%s14738_s1 + $0x3e0] sm:$0xff]  }
 0x153   : > { %v6474_v53 = vpop.f32.mrf.mxu1  ;;  %v10901_v45 = vld [vmem:[%s14738_s1 + $0x3a8] sm:$0xff]  }
 0x154   : > { %6731 = vmatpush3.bf16.msra.mxu0 %v10878_v33  ;;  %3090 = vmatmul.mubr.bf16.vlgmr.msra.gmra.mxu1 %v10101_v47  ;;  %v10894_v35 = vadd.f32 %v6473_v59, %v2564_v41  ;;  %v10921_v59 = vld [vmem:[%s14738_s1 + $0x3d8] sm:$0xff]   ;;  %v204_v41 = vld [vmem:[%s9354_s25 + $0xa4] sm:$0x1] }
 0x155   : > { %6732 = vmatprep.subr.bf16.mxu0 %v10884_v21  ;;  %6751 = vmatpush3.bf16.msra.mxu1 %v10891_v37  ;;  %v6475_v3 = vpop.f32.mrf.mxu1  ;;  %v6072_v53 = vcombine.low %v10776_v30, %v204_v41 }
 0x156   : > { %3169 = vmatprep.mubr.bf16.mxu1 %v10867_v51  ;;  %6752 = vmatprep.subr.bf16.mxu1 %v9708_v52  ;;  %v10915_v52 = vld [vmem:[%s14738_s1 + $0x3a0] sm:$0xff]  }
 0x157   : > { %v10982_v3 = vrot.slane %v6072_v53, 1  ;;  %v11000_v53 = vld [vmem:[%s14738_s1 + $0x4f0] sm:$0xff]  }
 0x158   : > { %6733 = vmatpush3.bf16.msra.mxu0 %v10901_v45  ;;  %15300 = vst [vmem:[#allocation138_spill] sm:$0xff] %v11000_v53 }
 0x159   : > { %6734 = vmatprep.subr.bf16.mxu0 %v10907_v48  ;;  %6753 = vmatpush3.bf16.msra.mxu1 %v9713_v54  ;;  %v10929_v54 = vld [vmem:[%s14738_s1 + $0x398] sm:$0xff]  }
 0x15a   : > { %6754 = vmatprep.subr.bf16.mxu1 %v9727_v58  ;;  %v10935_v58 = vld [vmem:[%s14738_s1 + $0x3d0] sm:$0xff]  }
 0x15c   : > { %6735 = vmatpush3.bf16.msra.mxu0 %v10915_v52 }
 0x15d   : > { %6736 = vmatprep.subr.bf16.mxu0 %v10921_v59  ;;  %6755 = vmatpush3.bf16.msra.mxu1 %v9734_v60  ;;  %v10943_v60 = vld [vmem:[%s14738_s1 + $0x390] sm:$0xff]  }
 0x15e   : > { %6756 = vmatprep.subr.bf16.mxu1 %v9748_v0  ;;  %v10949_v0 = vld [vmem:[%s14738_s1 + $0x3c8] sm:$0xff]  }
 0x160   : > { %6737 = vmatpush3.bf16.msra.mxu0 %v10929_v54 }
 0x161   : > { %6738 = vmatprep.subr.bf16.mxu0 %v10935_v58  ;;  %6757 = vmatpush3.bf16.msra.mxu1 %v9753_v1  ;;  %v10958_v1 = vld [vmem:[%s14738_s1 + $0x388] sm:$0xff]  }
 0x162   : > { %6758 = vmatprep.subr.bf16.mxu1 %v9766_v4  ;;  %v10964_v4 = vld [vmem:[%s14738_s1 + $0x3c0] sm:$0xff]  }
 0x164   : > { %6739 = vmatpush3.bf16.msra.mxu0 %v10943_v60 }
 0x165   : > { %6740 = vmatprep.subr.bf16.mxu0 %v10949_v0  ;;  %6759 = vmatpush3.bf16.msra.mxu1 %v9771_v5  ;;  %v10973_v5 = vld [vmem:[%s14738_s1 + $0x380] sm:$0xff]  }
 0x166   : > { %6760 = vmatprep.subr.bf16.mxu1 %v9789_v8  ;;  %15297 = vst [vmem:[#allocation135_spill] sm:$0xff] %v10973_v5  ;;  %v10979_v8 = vld [vmem:[%s14738_s1 + $0x4f8] sm:$0xff]  }
 0x167   : > { %15298 = vst [vmem:[#allocation136_spill] sm:$0xff] %v10979_v8 }
 0x168   : > { %6741 = vmatpush3.bf16.msra.mxu0 %v10958_v1 }
 0x169   : > { %6742 = vmatprep.subr.bf16.mxu0 %v10964_v4  ;;  %6761 = vmatpush3.bf16.msra.mxu1 %v9794_v9 }
 0x16a   : > { %6762 = vmatprep.subr.bf16.mxu1 %v9813_v13  ;;  %v10992_v13 = vld [vmem:[%s14738_s1 + $0x4b8] sm:$0xff]  }
 0x16b   : > { %15299 = vst [vmem:[#allocation137_spill] sm:$0xff] %v10992_v13 }
 0x16c   : > { %6743 = vmatpush3.bf16.msra.mxu0 %v10973_v5  ;;  %v10984_v9 = vpop.f32.mrf.mxu0  ;;  %v11016_v5 = vld [vmem:[%s9354_s25 + $0x60] sm:$0xf] }
 0x16d   : > { %6772 = vmatprep.subr.bf16.mxu0 %v10979_v8  ;;  %6763 = vmatpush3.bf16.msra.mxu1 %v9818_v14 }
 0x16e   : > { %6764 = vmatprep.subr.bf16.mxu1 %v9837_v17  ;;  %v10995_v41 = vpop.f32.mrf.mxu0  ;;  %v11006_v17 = vld [vmem:[%s9354_s25 + $0xe8] sm:$0xf] }
 0x16f   : > { %3130 = vmatmul.mubr.bf16.vlgmr.msra.gmra.mxu0 %v10215_v63 }
 0x170   : > { %6773 = vmatpush3.bf16.msra.mxu0 %v10992_v13  ;;  %3209 = vmatprep.mubr.bf16.mxu0 %v10982_v3  ;;  %v6496_v14 = vpop.f32.mrf.mxu0  ;;  %v11012_v13 = vld [vmem:[%s14738_s1 + $0x4b0] sm:$0xff]  }
 0x171   : > { %6774 = vmatprep.subr.bf16.mxu0 %v11000_v53  ;;  %6765 = vmatpush3.bf16.msra.mxu1 %v9842_v18  ;;  %v11018_v53 = vpop.f32.mrf.mxu1  ;;  %v11023_v18 = vld [vmem:[%s14738_s1 + $0x4e8] sm:$0xff]   ;;  %v11041_v14 = vld [vmem:[%s14738_s1 + $0x4e0] sm:$0xff]  }
 0x172   : > { %6794 = vmatprep.subr.bf16.mxu1 %v9866_v23  ;;  %v6497_v8 = vpop.f32.mrf.mxu0  ;;  %15301 = vst [vmem:[#allocation139_spill] sm:$0xff] %v11023_v18 }
 0x173   : > { %v11028_v23 = vpop.f32.mrf.mxu1  ;;  %v11035_v8 = vld [vmem:[%s14738_s1 + $0x4a8] sm:$0xff]  }
 0x174   : > { %6775 = vmatpush3.bf16.msra.mxu0 %v11012_v13  ;;  %3170 = vmatmul.mubr.bf16.vlgmr.msra.gmra.mxu1 %v11006_v17  ;;  %15302 = vst [vmem:[#allocation140_spill] sm:$0xff] %v11035_v8 }
 0x175   : > { %6776 = vmatprep.subr.bf16.mxu0 %v11023_v18  ;;  %6795 = vmatpush3.bf16.msra.mxu1 %v9874_v26  ;;  %v6518_v26 = vpop.f32.mrf.mxu1 }
 0x176   : > { %3249 = vmatprep.mubr.bf16.mxu1 %v11016_v5  ;;  %6796 = vmatprep.subr.bf16.mxu1 %v9894_v32  ;;  %v11049_v32 = vld [vmem:[%s14738_s1 + $0x4a0] sm:$0xff]  }
 0x177   : > { %v6519_v18 = vpop.f32.mrf.mxu1  ;;  %v15311_v26 = vld [vmem:[#allocation18_spill] sm:$0xff] }
 0x178   : > { %6777 = vmatpush3.bf16.msra.mxu0 %v11035_v8  ;;  %v6065_v8 = vcombine.low %v11006_v17, %v11006_v17 }
 0x179   : > { %6778 = vmatprep.subr.bf16.mxu0 %v11041_v14  ;;  %6797 = vmatpush3.bf16.msra.mxu1 %v9900_v34  ;;  %v6045_v34 = vcombine.low %v11016_v5, %v11016_v5 }
 0x17a   : > { %6798 = vmatprep.subr.bf16.mxu1 %v9921_v38  ;;  %v527_v38 = vshll.u32 %v6065_v8, 16 }
 0x17c   : > { %6779 = vmatpush3.bf16.msra.mxu0 %v11049_v32  ;;  %v529_v18 = vrot.slane %v527_v38, 1  ;;  %v6495_v38 = vadd.f32 %v10995_v41, %v10984_v9  ;;  %v15316_v9 = vld [vmem:[#allocation11_spill] sm:$0xff] }
 0x17d   : > { %6780 = vmatprep.subr.bf16.mxu0 %v9777_v6  ;;  %6799 = vmatpush3.bf16.msra.mxu1 %v9927_v39  ;;  %v345_v6 = vshll.u32 %v6045_v34, 16  ;;  %v525_v39 = vshrl.u32 %v6065_v8, 16  ;;  %v15310_v8 = vld [vmem:[#allocation7_spill] sm:$0xff] }
 0x17e   : > { %6800 = vmatprep.subr.bf16.mxu1 %v9945_v43 }
 0x17f   : > { %v11070_v43 = vor.u32 %v529_v18, %v525_v39  ;;  %v15313_v39 = vld [vmem:[#allocation9_spill] sm:$0xff] }
 0x180   : > { %6781 = vmatpush3.bf16.msra.mxu0 %v9783_v7  ;;  %v343_v7 = vshrl.u32 %v6045_v34, 16  ;;  %v15314_v18 = vld [vmem:[#allocation21_spill] sm:$0xff] }
 0x181   : > { %6782 = vmatprep.subr.bf16.mxu0 %v9800_v10  ;;  %6801 = vmatpush3.bf16.msra.mxu1 %v9951_v44  ;;  %v347_v10 = vrot.slane %v345_v6, 1  ;;  %v15312_v6 = vld [vmem:[#allocation8_spill] sm:$0xff] }
 0x182   : > { %6802 = vmatprep.subr.bf16.mxu1 %v9969_v49  ;;  %v15304_v49 = vld [vmem:[#allocation3_spill] sm:$0xff] }
 0x184   : > { %6783 = vmatpush3.bf16.msra.mxu0 %v9807_v11  ;;  %v11075_v11 = vor.u32 %v347_v10, %v343_v7  ;;  %v2644_v10 = vadd.f32 %v6495_v38, %v10894_v35  ;;  %v15318_v35 = vld [vmem:[#allocation12_spill] sm:$0xff] }
 0x185   : > { %6784 = vmatprep.subr.bf16.mxu0 %v9824_v15  ;;  %6803 = vmatpush3.bf16.msra.mxu1 %v9975_v50 }
 0x186   : > { %6804 = vmatprep.subr.bf16.mxu1 %v9993_v55  ;;  %v15306_v55 = vld [vmem:[#allocation4_spill] sm:$0xff] }
 0x188   : > { %6785 = vmatpush3.bf16.msra.mxu0 %v9831_v16 }
 0x189   : > { %6786 = vmatprep.subr.bf16.mxu0 %v9848_v19  ;;  %6805 = vmatpush3.bf16.msra.mxu1 %v9999_v56  ;;  %v11085_v19 = vld [vmem:[%s9354_s25 + $0x18] sm:$0xf] }
 0x18a   : > { %6806 = vmatprep.subr.bf16.mxu1 %v10017_v62  ;;  %v15307_v56 = vld [vmem:[#allocation5_spill] sm:$0xff]  ;;  %v6038_v34 = vcombine.low %v11085_v19, %v11085_v19 }
 0x18c   : > { %6787 = vmatpush3.bf16.msra.mxu0 %v9855_v20  ;;  %v6537_v15 = vpop.f32.mrf.mxu0  ;;  %v268_v7 = vshll.u32 %v6038_v34, 16 }
 0x18d   : > { %6816 = vmatprep.subr.bf16.mxu0 %v9881_v29  ;;  %6807 = vmatpush3.bf16.msra.mxu1 %v10023_v2  ;;  %v15303_v29 = vld [vmem:[#allocation2_spill] sm:$0xff]  ;;  %v15308_v2 = vld [vmem:[#allocation16_spill] sm:$0xff] }
 0x18e   : > { %6808 = vmatprep.subr.bf16.mxu1 %v10041_v24  ;;  %v6538_v16 = vpop.f32.mrf.mxu0  ;;  %v15309_v24 = vld [vmem:[#allocation6_spill] sm:$0xff] }
 0x18f   : > { %3210 = vmatmul.mubr.bf16.vlgmr.msra.gmra.mxu0 %v11070_v43  ;;  %v6559_v50 = vpop.f32.mrf.mxu1  ;;  %v6539_v41 = vadd.f32 %v6538_v16, %v6537_v15  ;;  %v15321_v15 = vld [vmem:[#allocation14_spill] sm:$0xff]  ;;  %v15322_v16 = vld [vmem:[#allocation17_spill] sm:$0xff] }
 0x190   : > { %6817 = vmatpush3.bf16.msra.mxu0 %v9889_v31  ;;  %3289 = vmatprep.mubr.bf16.mxu0 %v11075_v11  ;;  %v6540_v20 = vpop.f32.mrf.mxu0  ;;  %v15305_v31 = vld [vmem:[#allocation15_spill] sm:$0xff] }
 0x191   : > { %6818 = vmatprep.subr.bf16.mxu0 %v9909_v36  ;;  %6809 = vmatpush3.bf16.msra.mxu1 %v10047_v25  ;;  %v6560_v36 = vpop.f32.mrf.mxu1  ;;  %v6517_v20 = vadd.f32 %v11028_v23, %v11018_v53 }
 0x192   : > { %8232 = vmatprep.subr.bf16.mxu1 %v15178_v40  ;;  %v6541_v44 = vpop.f32.mrf.mxu0  ;;  %v6561_v23 = vadd.f32 %v6560_v36, %v6559_v50  ;;  %v15324_v36 = vld [vmem:[#allocation19_spill] sm:$0xff] }
 0x193   : > { %v6562_v62 = vpop.f32.mrf.mxu1  ;;  %v15317_v44 = vld [vmem:[#allocation24_spill] sm:$0xff] }
 0x194   : > { %6819 = vmatpush3.bf16.msra.mxu0 %v15303_v29  ;;  %3250 = vmatmul.mubr.bf16.vlgmr.msra.gmra.mxu1 %v11085_v19  ;;  %v15315_v29 = vld [vmem:[#allocation10_spill] sm:$0xff]  ;;  %v15320_v62 = vld [vmem:[#allocation27_spill] sm:$0xff] }
 0x195   : > { %6820 = vmatprep.subr.bf16.mxu0 %v15304_v49  ;;  %8233 = vmatpush3.bf16.msra.mxu1 %v15305_v31  ;;  %v6563_v25 = vpop.f32.mrf.mxu1  ;;  %v266_v49 = vshrl.u32 %v6038_v34, 16  ;;  %v270_v31 = vrot.slane %v268_v7, 1  ;;  %v15326_v7 = vld [vmem:[#allocation33_spill] sm:$0xff] }
 0x196   : > { %8248 = vmatprep.mubr.msk.bf16.mxu1 %vm9228_vm0, %v15178_v40  ;;  %8234 = vmatprep.subr.bf16.mxu1 %v15178_v40 }
 0x198   : > { %6821 = vmatpush3.bf16.msra.mxu0 %v15306_v55  ;;  %v2684_v55 = vadd.f32 %v6517_v20, %v2644_v10  ;;  %v15327_v10 = vmov 0  ;;  %v2814_v20 = vld [vmem:[%s11135_s24] sm:$0xf] }
 0x199   : > { %6822 = vmatprep.subr.bf16.mxu0 %v15307_v56  ;;  %8235 = vmatpush3.bf16.msra.mxu1 %v15308_v2  ;;  %v15319_v56 = vld [vmem:[#allocation13_spill] sm:$0xff]  ;;  %v11121_v2 = vor.u32 %v270_v31, %v266_v49  ;;  %v15328_v10 = vsel %vm11143_vm3, 4294967295, %v15327_v10  ;;  %v15332_v31 = vld [vmem:[#allocation23_spill] sm:$0xff] }
 0x19a   : > { %8236 = vmatprep.subr.bf16.mxu1 %v15178_v40  ;;  %v2724_v53 = vadd.f32 %v6539_v41, %v2684_v55  ;;  %15329 = vst [vmem:[#allocation2_spill] sm:$0xff] %v15328_v10  ;;  %v15330_v41 = vld [vmem:[#allocation36_spill] sm:$0xff]  ;;  %v11809_v10 = vld [vmem:[%s14738_s1 + $0x608] sm:$0xff]  }
 0x19c   : > { %6823 = vmatpush3.bf16.msra.mxu0 %v15309_v24  ;;  %v179_v24 = vld [vmem:[%s9354_s25 + $0x1c] sm:$0x1]  ;;  %v2764_v25 = vadd.f32 %v6561_v23, %v2724_v53 }
 0x19d   : > { %6824 = vmatprep.subr.bf16.mxu0 %v15310_v8  ;;  %8237 = vmatpush3.bf16.msra.mxu1 %v15311_v26  ;;  %v6052_v8 = vcombine.low %v11085_v19, %v179_v24  ;;  %v15323_v26 = vld [vmem:[#allocation30_spill] sm:$0xff]  ;;  %v15335_v53 = vld [vmem:[#allocation25_spill] sm:$0xff] }
 0x19e   : > { %8238 = vmatprep.subr.bf16.mxu1 %v15178_v40 }
 0x1a0   : > { %6825 = vmatpush3.bf16.msra.mxu0 %v15312_v6  ;;  %v15325_v6 = vld [vmem:[#allocation20_spill] sm:$0xff] }
 0x1a1   : > { %6826 = vmatprep.subr.bf16.mxu0 %v15313_v39  ;;  %8239 = vmatpush3.bf16.msra.mxu1 %v15314_v18  ;;  %v11140_v18 = vrot.slane %v6052_v8, 1  ;;  %v15338_v8 = vld [vmem:[#allocation29_spill] sm:$0xff] }
 0x1a2   : > { %8240 = vmatprep.subr.bf16.mxu1 %v15178_v40 }
 0x1a4   : > { %6827 = vmatpush3.bf16.msra.mxu0 %v15315_v29 }
 0x1a5   : > { %6828 = vmatprep.subr.bf16.mxu0 %v15316_v9  ;;  %8241 = vmatpush3.bf16.msra.mxu1 %v15317_v44  ;;  %v15331_v44 = vld [vmem:[#allocation22_spill] sm:$0xff] }
 0x1a6   : > { %8242 = vmatprep.subr.bf16.mxu1 %v15178_v40 }
 0x1a8   : > { %6829 = vmatpush3.bf16.msra.mxu0 %v15318_v35  ;;  %v15333_v35 = vld [vmem:[#allocation40_spill] sm:$0xff] }
 0x1a9   : > { %6830 = vmatprep.subr.bf16.mxu0 %v15319_v56  ;;  %8243 = vmatpush3.bf16.msra.mxu1 %v15320_v62  ;;  %v15334_v56 = vld [vmem:[#allocation41_spill] sm:$0xff]  ;;  %v15336_v62 = vld [vmem:[#allocation26_spill] sm:$0xff] }
 0x1aa   : > { %8244 = vmatprep.subr.bf16.mxu1 %v15178_v40  ;;  %15474 = vst [vmem:[#allocation26_spill] sm:$0xff] %v11809_v10 }
 0x1ac   : > { %6831 = vmatpush3.bf16.msra.mxu0 %v15321_v15  ;;  %v2803_v34 = vpop.f32.mrf.mxu0 }
 0x1ad   : > { %6847 = vmatprep.subr.bf16.mxu0 %v15322_v16  ;;  %8245 = vmatpush3.bf16.msra.mxu1 %v15323_v26  ;;  %v2804_v50 = vadd.f32 %v2803_v34, %v2764_v25  ;;  %v15337_v16 = vld [vmem:[#allocation28_spill] sm:$0xff]  ;;  %v15339_v26 = vld [vmem:[#allocation46_spill] sm:$0xff]  ;;  %v15341_v34 = vld [vmem:[#allocation31_spill] sm:$0xff] }
 0x1ae   : > { %8246 = vmatprep.subr.bf16.mxu1 %v15178_v40  ;;  %v8230_v38 = vpop.f32.mrf.mxu0 }
 0x1af   : > { %3290 = vmatmul.mubr.bf16.vlgmr.msra.gmra.mxu0 %v11121_v2  ;;  %v2809_v39 = vmax.f32 %v2804_v50, 0.0  ;;  %v6590_v55 = vpop.f32.mrf.mxu1  ;;  %v15342_v50 = vld [vmem:[#allocation32_spill] sm:$0xff]  ;;  %v15344_v38 = vld [vmem:[#allocation51_spill] sm:$0xff] }
 0x1b0   : > { %6848 = vmatpush3.bf16.msra.mxu0 %v15324_v36  ;;  %3375 = vmatprep.mubr.bf16.mxu0 %v10057_v28  ;;  %v2806_v29 = vpop.f32.mrf.mxu0  ;;  %v15343_v36 = vld [vmem:[#allocation50_spill] sm:$0xff] }
 0x1b1   : > { %6849 = vmatprep.subr.bf16.mxu0 %v15325_v6  ;;  %8247 = vmatpush3.bf16.msra.mxu1 %v15326_v7  ;;  %v2810_v9 = vpack.c.bf16 %v2809_v39, %v2809_v39  ;;  %v6591_v23 = vpop.f32.mrf.mxu1  ;;  %v15347_v6 = vld [vmem:[#allocation54_spill] sm:$0xff]  ;;  %v15348_v39 = vld [vmem:[#allocation55_spill] sm:$0xff]  ;;  %v15349_v7 = vld [vmem:[#allocation37_spill] sm:$0xff] }
 0x1b2   : > { %6869 = vmatprep.subr.bf16.mxu1 %v15330_v41  ;;  %v8231_v49 = vpop.f32.mrf.mxu0  ;;  %v6592_v24 = vadd.f32 %v6591_v23, %v6590_v55  ;;  %v15351_v29 = vld [vmem:[#allocation58_spill] sm:$0xff]  ;;  %v15357_v55 = vld [vmem:[#allocation44_spill] sm:$0xff] }
 0x1b3   : > { %v2815_v28 = vsel %vm11143_vm3, %v2810_v9, %v2814_v20  ;;  %v6593_v15 = vpop.f32.mrf.mxu1  ;;  %v15350_v20 = vld [vmem:[#allocation39_spill] sm:$0xff]  ;;  %v15353_v41 = vld [vmem:[#allocation42_spill] sm:$0xff] }
 0x1b4   : > { %6850 = vmatpush3.bf16.msra.mxu0 %v15331_v44  ;;  %8249 = vmatmul.mubr.bf16.vlgmr.msra.gmra.mxu1 %v11140_v18  ;;  %2816 = vst [vmem:[%s11135_s24] sm:$0xf] %v2815_v28  ;;  %v15352_v9 = vld [vmem:[#allocation59_spill] sm:$0xff]  ;;  %v15355_v49 = vld [vmem:[#allocation62_spill] sm:$0xff] }
 0x1b5   : > { %6851 = vmatprep.subr.bf16.mxu0 %v15332_v31  ;;  %6870 = vmatpush3.bf16.msra.mxu1 %v15333_v35  ;;  %v6594_v25 = vpop.f32.mrf.mxu1  ;;  %v15354_v44 = vld [vmem:[#allocation43_spill] sm:$0xff]  ;;  %v15360_v15 = vld [vmem:[#allocation66_spill] sm:$0xff] }
 0x1b6   : > { %3415 = vmatprep.mubr.bf16.mxu1 %v10092_v27  ;;  %6871 = vmatprep.subr.bf16.mxu1 %v15334_v56  ;;  %v15340_v27 = vld [vmem:[#allocation47_spill] sm:$0xff]  ;;  %v15358_v56 = vld [vmem:[#allocation45_spill] sm:$0xff] }
 0x1b7   : > { %v15356_v28 = vld [vmem:[#allocation63_spill] sm:$0xff] }
 0x1b8   : > { %6852 = vmatpush3.bf16.msra.mxu0 %v15335_v53  ;;  %v15359_v53 = vld [vmem:[#allocation38_spill] sm:$0xff] }
 0x1b9   : > { %6853 = vmatprep.subr.bf16.mxu0 %v15336_v62  ;;  %6872 = vmatpush3.bf16.msra.mxu1 %v10277_v12  ;;  %v15345_v12 = vld [vmem:[#allocation34_spill] sm:$0xff]  ;;  %v2852_v23 = vadd.f32 %v6592_v24, %v15359_v53  ;;  %v15364_v24 = vld [vmem:[#allocation52_spill] sm:$0xff] }
 0x1ba   : > { %6873 = vmatprep.subr.bf16.mxu1 %v10283_v46  ;;  %v15346_v46 = vld [vmem:[#allocation35_spill] sm:$0xff]  ;;  %v15384_v53 = vld [vmem:[#allocation70_spill] sm:$0xff] }
 0x1bc   : > { %6854 = vmatpush3.bf16.msra.mxu0 %v15337_v16 }
 0x1bd   : > { %6855 = vmatprep.subr.bf16.mxu0 %v15338_v8  ;;  %6874 = vmatpush3.bf16.msra.mxu1 %v15339_v26  ;;  %v15361_v8 = vld [vmem:[#allocation67_spill] sm:$0xff]  ;;  %v15362_v26 = vld [vmem:[#allocation48_spill] sm:$0xff] }
 0x1be   : > { %6875 = vmatprep.subr.bf16.mxu1 %v15340_v27  ;;  %v15363_v27 = vld [vmem:[#allocation49_spill] sm:$0xff] }
 0x1c0   : > { %6856 = vmatpush3.bf16.msra.mxu0 %v15341_v34 }
 0x1c1   : > { %6857 = vmatprep.subr.bf16.mxu0 %v15342_v50  ;;  %6876 = vmatpush3.bf16.msra.mxu1 %v15343_v36  ;;  %v15365_v36 = vld [vmem:[#allocation53_spill] sm:$0xff] }
 0x1c2   : > { %6877 = vmatprep.subr.bf16.mxu1 %v15344_v38 }
 0x1c4   : > { %6858 = vmatpush3.bf16.msra.mxu0 %v15345_v12 }
 0x1c5   : > { %6859 = vmatprep.subr.bf16.mxu0 %v15346_v46  ;;  %6878 = vmatpush3.bf16.msra.mxu1 %v15347_v6  ;;  %v15366_v46 = vld [vmem:[#allocation72_spill] sm:$0xff]  ;;  %v15367_v6 = vld [vmem:[#allocation73_spill] sm:$0xff] }
 0x1c6   : > { %6879 = vmatprep.subr.bf16.mxu1 %v15348_v39  ;;  %v15368_v39 = vld [vmem:[#allocation56_spill] sm:$0xff] }
 0x1c8   : > { %6860 = vmatpush3.bf16.msra.mxu0 %v15349_v7  ;;  %v15371_v7 = vld [vmem:[#allocation77_spill] sm:$0xff] }
 0x1c9   : > { %6861 = vmatprep.subr.bf16.mxu0 %v15350_v20  ;;  %6880 = vmatpush3.bf16.msra.mxu1 %v15351_v29  ;;  %v15373_v20 = vld [vmem:[#allocation61_spill] sm:$0xff]  ;;  %v15374_v29 = vld [vmem:[#allocation80_spill] sm:$0xff] }
 0x1ca   : > { %6881 = vmatprep.subr.bf16.mxu1 %v15352_v9  ;;  %v15375_v9 = vld [vmem:[#allocation81_spill] sm:$0xff] }
 0x1cc   : > { %6862 = vmatpush3.bf16.msra.mxu0 %v15353_v41  ;;  %v15376_v41 = vld [vmem:[#allocation64_spill] sm:$0xff] }
 0x1cd   : > { %6891 = vmatprep.subr.bf16.mxu0 %v15354_v44  ;;  %6882 = vmatpush3.bf16.msra.mxu1 %v15355_v49  ;;  %v15377_v44 = vld [vmem:[#allocation65_spill] sm:$0xff]  ;;  %v15378_v49 = vld [vmem:[#allocation84_spill] sm:$0xff] }
 0x1ce   : > { %6883 = vmatprep.subr.bf16.mxu1 %v15356_v28  ;;  %v15380_v28 = vld [vmem:[#allocation68_spill] sm:$0xff] }
 0x1cf   : > { %v6612_v31 = vpop.f32.mrf.mxu0  ;;  %3376 = vmatmul.mubr.bf16.vlgmr.msra.gmra.mxu0 %v10064_v61 }
 0x1d0   : > { %6892 = vmatpush3.bf16.msra.mxu0 %v15357_v55  ;;  %3455 = vmatprep.mubr.bf16.mxu0 %v10776_v30  ;;  %v15381_v55 = vld [vmem:[#allocation69_spill] sm:$0xff] }
 0x1d1   : > { %v6613_v35 = vpop.f32.mrf.mxu0  ;;  %6893 = vmatprep.subr.bf16.mxu0 %v15358_v56  ;;  %6884 = vmatpush3.bf16.msra.mxu1 %v15360_v15  ;;  %v15383_v56 = vld [vmem:[#allocation89_spill] sm:$0xff] }
 0x1d2   : > { %v6614_v62 = vadd.f32 %v6613_v35, %v6612_v31  ;;  %6913 = vmatprep.subr.bf16.mxu1 %v15361_v8  ;;  %v15379_v31 = vld [vmem:[#allocation85_spill] sm:$0xff]  ;;  %v15382_v35 = vld [vmem:[#allocation88_spill] sm:$0xff] }
 0x1d3   : > { %v6615_v16 = vpop.f32.mrf.mxu0 }
 0x1d4   : > { %v2892_v25 = vadd.f32 %v6614_v62, %v2852_v23  ;;  %6894 = vmatpush3.bf16.msra.mxu0 %v15362_v26  ;;  %v6634_v34 = vpop.f32.mrf.mxu1  ;;  %3416 = vmatmul.mubr.bf16.vlgmr.msra.gmra.mxu1 %v10101_v47  ;;  %v15385_v23 = vld [vmem:[#allocation71_spill] sm:$0xff]  ;;  %v15386_v62 = vld [vmem:[#allocation92_spill] sm:$0xff]  ;;  %v15387_v16 = vld [vmem:[#allocation93_spill] sm:$0xff] }
 0x1d5   : > { %v6616_v61 = vpop.f32.mrf.mxu0  ;;  %6895 = vmatprep.subr.bf16.mxu0 %v15363_v27  ;;  %6914 = vmatpush3.bf16.msra.mxu1 %v10448_v57  ;;  %v15369_v57 = vld [vmem:[#allocation57_spill] sm:$0xff]  ;;  %v15389_v26 = vld [vmem:[#allocation75_spill] sm:$0xff]  ;;  %v15390_v27 = vld [vmem:[#allocation96_spill] sm:$0xff] }
 0x1d6   : > { %3495 = vmatprep.mubr.bf16.mxu1 %v10867_v51  ;;  %v6635_v30 = vpop.f32.mrf.mxu1  ;;  %6915 = vmatprep.subr.bf16.mxu1 %v10454_v42  ;;  %v15370_v51 = vld [vmem:[#allocation76_spill] sm:$0xff] }
 0x1d7   : > { %v6636_v50 = vadd.f32 %v6635_v30, %v6634_v34  ;;  %v15372_v42 = vld [vmem:[#allocation60_spill] sm:$0xff] }
 0x1d8   : > { %6896 = vmatpush3.bf16.msra.mxu0 %v15364_v24  ;;  %v6637_v38 = vpop.f32.mrf.mxu1  ;;  %v15391_v24 = vld [vmem:[#allocation97_spill] sm:$0xff] }
 0x1d9   : > { %6897 = vmatprep.subr.bf16.mxu0 %v15365_v36  ;;  %v2932_v12 = vadd.f32 %v6636_v50, %v2892_v25  ;;  %6916 = vmatpush3.bf16.msra.mxu1 %v15366_v46  ;;  %v15388_v25 = vld [vmem:[#allocation74_spill] sm:$0xff]  ;;  %v15394_v46 = vld [vmem:[#allocation100_spill] sm:$0xff] }
 0x1da   : > { %6917 = vmatprep.subr.bf16.mxu1 %v15367_v6  ;;  %v6638_v47 = vpop.f32.mrf.mxu1  ;;  %v15392_v50 = vld [vmem:[#allocation78_spill] sm:$0xff]  ;;  %v15395_v6 = vld [vmem:[#allocation101_spill] sm:$0xff] }
 0x1db   : > { %v15397_v47 = vld [vmem:[#allocation83_spill] sm:$0xff] }
 0x1dc   : > { %6898 = vmatpush3.bf16.msra.mxu0 %v15368_v39  ;;  %v15396_v39 = vld [vmem:[#allocation82_spill] sm:$0xff] }
 0x1dd   : > { %6899 = vmatprep.subr.bf16.mxu0 %v15369_v57  ;;  %6918 = vmatpush3.bf16.msra.mxu1 %v15370_v51 }
 0x1de   : > { %6919 = vmatprep.subr.bf16.mxu1 %v15371_v7  ;;  %v15398_v7 = vld [vmem:[#allocation104_spill] sm:$0xff] }
 0x1e0   : > { %6900 = vmatpush3.bf16.msra.mxu0 %v15372_v42  ;;  %v15399_v42 = vld [vmem:[#allocation105_spill] sm:$0xff] }
 0x1e1   : > { %6901 = vmatprep.subr.bf16.mxu0 %v15373_v20  ;;  %6920 = vmatpush3.bf16.msra.mxu1 %v15374_v29  ;;  %v15400_v20 = vld [vmem:[#allocation86_spill] sm:$0xff]  ;;  %v15401_v29 = vld [vmem:[#allocation87_spill] sm:$0xff] }
 0x1e2   : > { %6921 = vmatprep.subr.bf16.mxu1 %v15375_v9  ;;  %v15402_v9 = vld [vmem:[#allocation108_spill] sm:$0xff] }
 0x1e4   : > { %6902 = vmatpush3.bf16.msra.mxu0 %v15376_v41  ;;  %v15403_v41 = vld [vmem:[#allocation109_spill] sm:$0xff] }
 0x1e5   : > { %6903 = vmatprep.subr.bf16.mxu0 %v15377_v44  ;;  %6922 = vmatpush3.bf16.msra.mxu1 %v15378_v49  ;;  %v15404_v44 = vld [vmem:[#allocation90_spill] sm:$0xff]  ;;  %v15405_v49 = vld [vmem:[#allocation91_spill] sm:$0xff] }
 0x1e6   : > { %6923 = vmatprep.subr.bf16.mxu1 %v15379_v31  ;;  %v15406_v31 = vld [vmem:[#allocation112_spill] sm:$0xff] }
 0x1e8   : > { %6904 = vmatpush3.bf16.msra.mxu0 %v15380_v28  ;;  %v15407_v28 = vld [vmem:[#allocation113_spill] sm:$0xff] }
 0x1e9   : > { %6905 = vmatprep.subr.bf16.mxu0 %v15381_v55  ;;  %6924 = vmatpush3.bf16.msra.mxu1 %v15382_v35  ;;  %v15408_v55 = vld [vmem:[#allocation94_spill] sm:$0xff]  ;;  %v15409_v35 = vld [vmem:[#allocation95_spill] sm:$0xff] }
 0x1ea   : > { %6925 = vmatprep.subr.bf16.mxu1 %v15383_v56  ;;  %v15410_v56 = vld [vmem:[#allocation116_spill] sm:$0xff] }
 0x1ec   : > { %6906 = vmatpush3.bf16.msra.mxu0 %v15384_v53  ;;  %v15411_v53 = vld [vmem:[#allocation117_spill] sm:$0xff] }
 0x1ed   : > { %6935 = vmatprep.subr.bf16.mxu0 %v15385_v23  ;;  %6926 = vmatpush3.bf16.msra.mxu1 %v15386_v62  ;;  %v15412_v23 = vld [vmem:[#allocation98_spill] sm:$0xff]  ;;  %v15413_v62 = vld [vmem:[#allocation99_spill] sm:$0xff] }
 0x1ee   : > { %6927 = vmatprep.subr.bf16.mxu1 %v15387_v16  ;;  %v15415_v16 = vld [vmem:[#allocation121_spill] sm:$0xff] }
 0x1ef   : > { %v6656_v15 = vpop.f32.mrf.mxu0  ;;  %3456 = vmatmul.mubr.bf16.vlgmr.msra.gmra.mxu0 %v10215_v63  ;;  %v15393_v63 = vld [vmem:[#allocation79_spill] sm:$0xff] }
 0x1f0   : > { %6936 = vmatpush3.bf16.msra.mxu0 %v15388_v25  ;;  %3535 = vmatprep.mubr.bf16.mxu0 %v10982_v3  ;;  %v15416_v25 = vld [vmem:[#allocation102_spill] sm:$0xff] }
 0x1f1   : > { %v6657_v8 = vpop.f32.mrf.mxu0  ;;  %6937 = vmatprep.subr.bf16.mxu0 %v15389_v26  ;;  %6928 = vmatpush3.bf16.msra.mxu1 %v15390_v27  ;;  %v15418_v26 = vld [vmem:[#allocation124_spill] sm:$0xff]  ;;  %v15419_v27 = vld [vmem:[#allocation125_spill] sm:$0xff] }
 0x1f2   : > { %v6658_v61 = vadd.f32 %v6657_v8, %v6656_v15  ;;  %6957 = vmatprep.subr.bf16.mxu1 %v15391_v24  ;;  %v15414_v15 = vld [vmem:[#allocation120_spill] sm:$0xff]  ;;  %v15417_v8 = vld [vmem:[#allocation103_spill] sm:$0xff] }
 0x1f3   : > { %v6659_v34 = vpop.f32.mrf.mxu0  ;;  %v15421_v24 = vld [vmem:[#allocation107_spill] sm:$0xff] }
 0x1f4   : > { %v2972_v30 = vadd.f32 %v6658_v61, %v2932_v12  ;;  %6938 = vmatpush3.bf16.msra.mxu0 %v15392_v50  ;;  %v6678_v38 = vpop.f32.mrf.mxu1  ;;  %3496 = vmatmul.mubr.bf16.vlgmr.msra.gmra.mxu1 %v11006_v17  ;;  %v15420_v34 = vld [vmem:[#allocation106_spill] sm:$0xff] }
 0x1f5   : > { %v6660_v36 = vpop.f32.mrf.mxu0  ;;  %6939 = vmatprep.subr.bf16.mxu0 %v15393_v63  ;;  %6958 = vmatpush3.bf16.msra.mxu1 %v15394_v46  ;;  %v15423_v46 = vld [vmem:[#allocation129_spill] sm:$0xff] }
 0x1f6   : > { %3575 = vmatprep.mubr.bf16.mxu1 %v11016_v5  ;;  %v6679_v3 = vpop.f32.mrf.mxu1  ;;  %6959 = vmatprep.subr.bf16.mxu1 %v15395_v6  ;;  %v15422_v36 = vld [vmem:[#allocation128_spill] sm:$0xff]  ;;  %v11263_v6 = vld [vmem:[%s9354_s25 + $0xa8] sm:$0xf] }
 0x1f7   : > { %v6680_v12 = vadd.f32 %v6679_v3, %v6678_v38  ;;  %v15424_v3 = vld [vmem:[#allocation110_spill] sm:$0xff] }
 0x1f8   : > { %6940 = vmatpush3.bf16.msra.mxu0 %v15396_v39  ;;  %v6681_v57 = vpop.f32.mrf.mxu1  ;;  %v15425_v39 = vld [vmem:[#allocation111_spill] sm:$0xff] }
 0x1f9   : > { %6941 = vmatprep.subr.bf16.mxu0 %v15397_v47  ;;  %v3012_v51 = vadd.f32 %v6680_v12, %v2972_v30  ;;  %6960 = vmatpush3.bf16.msra.mxu1 %v15398_v7  ;;  %v15426_v47 = vld [vmem:[#allocation132_spill] sm:$0xff]  ;;  %v15427_v7 = vld [vmem:[#allocation133_spill] sm:$0xff] }
 0x1fa   : > { %6961 = vmatprep.subr.bf16.mxu1 %v15399_v42  ;;  %v6682_v17 = vpop.f32.mrf.mxu1 }
 0x1fc   : > { %6942 = vmatpush3.bf16.msra.mxu0 %v15400_v20  ;;  %v15429_v20 = vld [vmem:[#allocation115_spill] sm:$0xff] }
 0x1fd   : > { %6943 = vmatprep.subr.bf16.mxu0 %v15401_v29  ;;  %6962 = vmatpush3.bf16.msra.mxu1 %v15402_v9  ;;  %v15430_v9 = vld [vmem:[#allocation118_spill] sm:$0xff] }
 0x1fe   : > { %6963 = vmatprep.subr.bf16.mxu1 %v15403_v41 }
 0x200   : > { %6944 = vmatpush3.bf16.msra.mxu0 %v15404_v44  ;;  %v15431_v44 = vld [vmem:[#allocation119_spill] sm:$0xff] }
 0x201   : > { %6945 = vmatprep.subr.bf16.mxu0 %v15405_v49  ;;  %6964 = vmatpush3.bf16.msra.mxu1 %v15406_v31  ;;  %v15432_v49 = vld [vmem:[#allocation122_spill] sm:$0xff]  ;;  %v15433_v31 = vld [vmem:[#allocation123_spill] sm:$0xff] }
 0x202   : > { %6965 = vmatprep.subr.bf16.mxu1 %v15407_v28  ;;  %v6059_v28 = vcombine.low %v11263_v6, %v11263_v6 }
 0x204   : > { %6946 = vmatpush3.bf16.msra.mxu0 %v15408_v55  ;;  %v457_v55 = vshll.u32 %v6059_v28, 16 }
 0x205   : > { %6947 = vmatprep.subr.bf16.mxu0 %v15409_v35  ;;  %6966 = vmatpush3.bf16.msra.mxu1 %v15410_v56  ;;  %v455_v35 = vshrl.u32 %v6059_v28, 16  ;;  %v11459_v28 = vld [vmem:[%s14738_s1 + $0x488] sm:$0xff]  }
 0x206   : > { %6967 = vmatprep.subr.bf16.mxu1 %v15411_v53  ;;  %v459_v56 = vrot.slane %v457_v55, 1 }
 0x208   : > { %6948 = vmatpush3.bf16.msra.mxu0 %v15412_v23  ;;  %v11297_v53 = vor.u32 %v459_v56, %v455_v35  ;;  %v11482_v56 = vld [vmem:[%s14738_s1 + $0x570] sm:$0xff]  }
 0x209   : > { %6949 = vmatprep.subr.bf16.mxu0 %v15413_v62  ;;  %6968 = vmatpush3.bf16.msra.mxu1 %v15414_v15  ;;  %v15440_v62 = vld [vmem:[#allocation136_spill] sm:$0xff]  ;;  %v11328_v15 = vld [vmem:[%s14738_s1 + $0x468] sm:$0xff]  }
 0x20a   : > { %6969 = vmatprep.subr.bf16.mxu1 %v15415_v16 }
 0x20c   : > { %6950 = vmatpush3.bf16.msra.mxu0 %v15416_v25  ;;  %v15441_v25 = vld [vmem:[#allocation137_spill] sm:$0xff] }
 0x20d   : > { %6979 = vmatprep.subr.bf16.mxu0 %v15417_v8  ;;  %6970 = vmatpush3.bf16.msra.mxu1 %v15418_v26  ;;  %v15442_v26 = vld [vmem:[#allocation138_spill] sm:$0xff] }
 0x20e   : > { %6971 = vmatprep.subr.bf16.mxu1 %v15419_v27  ;;  %v11348_v27 = vld [vmem:[%s14738_s1 + $0x460] sm:$0xff]  }
 0x20f   : > { %v6700_v61 = vpop.f32.mrf.mxu0  ;;  %3536 = vmatmul.mubr.bf16.vlgmr.msra.gmra.mxu0 %v11070_v43 }
 0x210   : > { %6980 = vmatpush3.bf16.msra.mxu0 %v15420_v34  ;;  %3615 = vmatprep.mubr.bf16.mxu0 %v11075_v11 }
 0x211   : > { %v6701_v30 = vpop.f32.mrf.mxu0  ;;  %6981 = vmatprep.subr.bf16.mxu0 %v15421_v24  ;;  %6972 = vmatpush3.bf16.msra.mxu1 %v15422_v36  ;;  %v11356_v24 = vld [vmem:[%s14738_s1 + $0x420] sm:$0xff]   ;;  %v11362_v36 = vld [vmem:[%s14738_s1 + $0x458] sm:$0xff]  }
 0x212   : > { %v6702_v50 = vadd.f32 %v6701_v30, %v6700_v61  ;;  %7001 = vmatprep.subr.bf16.mxu1 %v15423_v46  ;;  %v11342_v61 = vld [vmem:[%s14738_s1 + $0x428] sm:$0xff]   ;;  %v11381_v46 = vld [vmem:[%s9354_s25 + $0xf0] sm:$0xf] }
 0x213   : > { %v6703_v63 = vpop.f32.mrf.mxu0  ;;  %v15443_v30 = vld [vmem:[#allocation139_spill] sm:$0xff] }
 0x214   : > { %v3052_v38 = vadd.f32 %v6702_v50, %v3012_v51  ;;  %6982 = vmatpush3.bf16.msra.mxu0 %v15424_v3  ;;  %v6722_v12 = vpop.f32.mrf.mxu1  ;;  %3576 = vmatmul.mubr.bf16.vlgmr.msra.gmra.mxu1 %v11085_v19  ;;  %v15428_v51 = vld [vmem:[#allocation114_spill] sm:$0xff]  ;;  %v15444_v63 = vld [vmem:[#allocation140_spill] sm:$0xff] }
 0x215   : > { %v6704_v43 = vpop.f32.mrf.mxu0  ;;  %6983 = vmatprep.subr.bf16.mxu0 %v15425_v39  ;;  %7002 = vmatpush3.bf16.msra.mxu1 %v15426_v47  ;;  %v11392_v3 = vld [vmem:[%s14738_s1 + $0x410] sm:$0xff]   ;;  %v6066_v39 = vcombine.low %v11381_v46, %v11381_v46 }
 0x216   : > { %3655 = vmatprep.mubr.bf16.mxu1 %v11263_v6  ;;  %v6723_v57 = vpop.f32.mrf.mxu1  ;;  %7003 = vmatprep.subr.bf16.mxu1 %v15427_v7  ;;  %v11396_v43 = vld [vmem:[%s9354_s25 + $0x68] sm:$0xf] }
 0x217   : > { %v6724_v42 = vadd.f32 %v6723_v57, %v6722_v12  ;;  %v11409_v12 = vld [vmem:[%s14738_s1 + $0x498] sm:$0xff]   ;;  %v6046_v47 = vcombine.low %v11396_v43, %v11396_v43  ;;  %v11417_v57 = vld [vmem:[%s14738_s1 + $0x4d0] sm:$0xff]   ;;  %v11423_v7 = vld [vmem:[%s14738_s1 + $0x408] sm:$0xff]  }
 0x218   : > { %6984 = vmatpush3.bf16.msra.mxu0 %v15428_v51  ;;  %v6725_v17 = vpop.f32.mrf.mxu1  ;;  %v11429_v51 = vld [vmem:[%s14738_s1 + $0x440] sm:$0xff]  }
 0x219   : > { %6985 = vmatprep.subr.bf16.mxu0 %v15429_v20  ;;  %v11272_v29 = vadd.f32 %v6724_v42, %v3052_v38  ;;  %7004 = vmatpush3.bf16.msra.mxu1 %v10878_v33  ;;  %v15434_v33 = vld [vmem:[#allocation126_spill] sm:$0xff]  ;;  %v11376_v38 = vld [vmem:[%s14738_s1 + $0x450] sm:$0xff]   ;;  %v534_v42 = vshll.u32 %v6066_v39, 16  ;;  %v352_v17 = vshll.u32 %v6046_v47, 16 }
 0x21a   : > { %7005 = vmatprep.subr.bf16.mxu1 %v10884_v21  ;;  %v6726_v41 = vpop.f32.mrf.mxu1  ;;  %v15435_v21 = vld [vmem:[#allocation127_spill] sm:$0xff]  ;;  %v11435_v20 = vld [vmem:[%s14738_s1 + $0x490] sm:$0xff]  }
 0x21b   : > { %v11447_v41 = vld [vmem:[%s14738_s1 + $0x400] sm:$0xff]   ;;  %v354_v55 = vrot.slane %v352_v17, 1  ;;  %v11549_v17 = vld [vmem:[%s14738_s1 + $0x5e8] sm:$0xff]  }
 0x21c   : > { %6986 = vmatpush3.bf16.msra.mxu0 %v15430_v9  ;;  %v11441_v9 = vld [vmem:[%s14738_s1 + $0x4c8] sm:$0xff]   ;;  %15449 = vst [vmem:[#allocation16_spill] sm:$0xff] %v11549_v17 }
 0x21d   : > { %6987 = vmatprep.subr.bf16.mxu0 %v15431_v44  ;;  %7006 = vmatpush3.bf16.msra.mxu1 %v10901_v45  ;;  %v15436_v45 = vld [vmem:[#allocation130_spill] sm:$0xff]  ;;  %v11453_v44 = vld [vmem:[%s14738_s1 + $0x578] sm:$0xff]  }
 0x21e   : > { %7007 = vmatprep.subr.bf16.mxu1 %v10907_v48  ;;  %v15437_v48 = vld [vmem:[#allocation131_spill] sm:$0xff] }
 0x220   : > { %6988 = vmatpush3.bf16.msra.mxu0 %v15432_v49  ;;  %v532_v49 = vshrl.u32 %v6066_v39, 16  ;;  %v11537_v39 = vld [vmem:[%s14738_s1 + $0x560] sm:$0xff]  }
 0x221   : > { %6989 = vmatprep.subr.bf16.mxu0 %v15433_v31  ;;  %7008 = vmatpush3.bf16.msra.mxu1 %v10915_v52  ;;  %v15438_v52 = vld [vmem:[#allocation134_spill] sm:$0xff]  ;;  %v536_v31 = vrot.slane %v534_v42, 1  ;;  %v11543_v42 = vld [vmem:[%s14738_s1 + $0x5b0] sm:$0xff]  }
 0x222   : > { %7009 = vmatprep.subr.bf16.mxu1 %v10921_v59  ;;  %v206_v59 = vld [vmem:[%s9354_s25 + $0xac] sm:$0x1]  ;;  %15448 = vst [vmem:[#allocation5_spill] sm:$0xff] %v11543_v42 }
 0x224   : > { %6990 = vmatpush3.bf16.msra.mxu0 %v15434_v33 }
 0x225   : > { %6991 = vmatprep.subr.bf16.mxu0 %v15435_v21  ;;  %7010 = vmatpush3.bf16.msra.mxu1 %v10929_v54  ;;  %v350_v21 = vshrl.u32 %v6046_v47, 16 }
 0x226   : > { %7011 = vmatprep.subr.bf16.mxu1 %v10935_v58  ;;  %v6073_v58 = vcombine.low %v11263_v6, %v206_v59  ;;  %v11491_v59 = vld [vmem:[%s14738_s1 + $0x480] sm:$0xff]  }
 0x228   : > { %6992 = vmatpush3.bf16.msra.mxu0 %v15436_v45  ;;  %v11316_v23 = vrot.slane %v6073_v58, 1  ;;  %v11468_v45 = vld [vmem:[%s14738_s1 + $0x4c0] sm:$0xff]  }
 0x229   : > { %6993 = vmatprep.subr.bf16.mxu0 %v15437_v48  ;;  %7012 = vmatpush3.bf16.msra.mxu1 %v10943_v60  ;;  %v11474_v48 = vld [vmem:[%s14738_s1 + $0x538] sm:$0xff]  }
 0x22a   : > { %7013 = vmatprep.subr.bf16.mxu1 %v10949_v0  ;;  %v15439_v0 = vld [vmem:[#allocation135_spill] sm:$0xff] }
 0x22c   : > { %6994 = vmatpush3.bf16.msra.mxu0 %v15438_v52  ;;  %v11486_v52 = vor.u32 %v536_v31, %v532_v49  ;;  %v11555_v49 = vld [vmem:[%s14738_s1 + $0x520] sm:$0xff]  }
 0x22d   : > { %7023 = vmatprep.subr.bf16.mxu0 %v10872_v22  ;;  %7014 = vmatpush3.bf16.msra.mxu1 %v10958_v1  ;;  %v11311_v22 = vld [vmem:[%s14738_s1 + $0x470] sm:$0xff]  }
 0x22e   : > { %7015 = vmatprep.subr.bf16.mxu1 %v10964_v4 }
 0x22f   : > { %v11300_v54 = vpop.f32.mrf.mxu0  ;;  %3616 = vmatmul.mubr.bf16.vlgmr.msra.gmra.mxu0 %v11121_v2 }
 0x230   : > { %7024 = vmatpush3.bf16.msra.mxu0 %v10891_v37  ;;  %3695 = vmatprep.mubr.bf16.mxu0 %v11297_v53  ;;  %v11322_v37 = vld [vmem:[%s14738_s1 + $0x430] sm:$0xff]  }
 0x231   : > { %v11306_v60 = vpop.f32.mrf.mxu0  ;;  %7025 = vmatprep.subr.bf16.mxu0 %v11311_v22  ;;  %7016 = vmatpush3.bf16.msra.mxu1 %v15439_v0  ;;  %v11494_v0 = vor.u32 %v354_v55, %v350_v21  ;;  %v11561_v21 = vld [vmem:[%s14738_s1 + $0x558] sm:$0xff]   ;;  %v11567_v55 = vld [vmem:[%s14738_s1 + $0x5a8] sm:$0xff]  }
 0x232   : > { %7045 = vmatprep.subr.bf16.mxu1 %v15440_v62  ;;  %v11505_v62 = vld [vmem:[%s14738_s1 + $0x530] sm:$0xff]   ;;  %15450 = vst [vmem:[#allocation6_spill] sm:$0xff] %v11567_v55 }
 0x233   : > { %v6747_v1 = vpop.f32.mrf.mxu0 }
 0x234   : > { %7026 = vmatpush3.bf16.msra.mxu0 %v11322_v37  ;;  %v11331_v16 = vpop.f32.mrf.mxu1  ;;  %3656 = vmatmul.mubr.bf16.vlgmr.msra.gmra.mxu1 %v11140_v18  ;;  %v11499_v1 = vld [vmem:[%s14738_s1 + $0x5f8] sm:$0xff]  }
 0x235   : > { %v6748_v4 = vpop.f32.mrf.mxu0  ;;  %7027 = vmatprep.subr.bf16.mxu0 %v11328_v15  ;;  %7046 = vmatpush3.bf16.msra.mxu1 %v15441_v25  ;;  %15445 = vst [vmem:[#allocation3_spill] sm:$0xff] %v11499_v1  ;;  %v11511_v25 = vld [vmem:[%s14738_s1 + $0x568] sm:$0xff]  }
 0x236   : > { %3735 = vmatprep.mubr.bf16.mxu1 %v11316_v23  ;;  %v11336_v8 = vpop.f32.mrf.mxu1  ;;  %7047 = vmatprep.subr.bf16.mxu1 %v15442_v26 }
 0x238   : > { %7028 = vmatpush3.bf16.msra.mxu0 %v11342_v61  ;;  %v6769_v34 = vpop.f32.mrf.mxu1 }
 0x239   : > { %7029 = vmatprep.subr.bf16.mxu0 %v11348_v27  ;;  %7048 = vmatpush3.bf16.msra.mxu1 %v11012_v13  ;;  %v11370_v13 = vld [vmem:[%s14738_s1 + $0x418] sm:$0xff]  }
 0x23a   : > { %7049 = vmatprep.subr.bf16.mxu1 %v15443_v30  ;;  %v6770_v50 = vpop.f32.mrf.mxu1  ;;  %v11518_v34 = vld [vmem:[%s14738_s1 + $0x5b8] sm:$0xff]  }
 0x23b   : > { %15446 = vst [vmem:[#allocation15_spill] sm:$0xff] %v11518_v34  ;;  %v11525_v50 = vld [vmem:[%s14738_s1 + $0x5f0] sm:$0xff]  }
 0x23c   : > { %7030 = vmatpush3.bf16.msra.mxu0 %v11356_v24  ;;  %15447 = vst [vmem:[#allocation4_spill] sm:$0xff] %v11525_v50 }
 0x23d   : > { %7031 = vmatprep.subr.bf16.mxu0 %v11362_v36  ;;  %7050 = vmatpush3.bf16.msra.mxu1 %v15444_v63  ;;  %v11531_v63 = vld [vmem:[%s14738_s1 + $0x528] sm:$0xff]  }
 0x23e   : > { %7051 = vmatprep.subr.bf16.mxu1 %v11041_v14  ;;  %v11386_v14 = vld [vmem:[%s14738_s1 + $0x4d8] sm:$0xff]  }
 0x240   : > { %7032 = vmatpush3.bf16.msra.mxu0 %v11370_v13 }
 0x241   : > { %7033 = vmatprep.subr.bf16.mxu0 %v11376_v38  ;;  %7052 = vmatpush3.bf16.msra.mxu1 %v11049_v32  ;;  %v11401_v32 = vld [vmem:[%s14738_s1 + $0x448] sm:$0xff]  }
 0x242   : > { %7053 = vmatprep.subr.bf16.mxu1 %v11386_v14 }
 0x244   : > { %7034 = vmatpush3.bf16.msra.mxu0 %v11392_v3 }
 0x245   : > { %7035 = vmatprep.subr.bf16.mxu0 %v11401_v32  ;;  %7054 = vmatpush3.bf16.msra.mxu1 %v11409_v12 }
 0x246   : > { %7055 = vmatprep.subr.bf16.mxu1 %v11417_v57 }
 0x248   : > { %7036 = vmatpush3.bf16.msra.mxu0 %v11423_v7 }
 0x249   : > { %7037 = vmatprep.subr.bf16.mxu0 %v11429_v51  ;;  %7056 = vmatpush3.bf16.msra.mxu1 %v11435_v20 }
 0x24a   : > { %7057 = vmatprep.subr.bf16.mxu1 %v11441_v9 }
 0x24c   : > { %7038 = vmatpush3.bf16.msra.mxu0 %v11447_v41 }
 0x24d   : > { %7067 = vmatprep.subr.bf16.mxu0 %v11453_v44  ;;  %7058 = vmatpush3.bf16.msra.mxu1 %v11459_v28 }
 0x24e   : > { %7059 = vmatprep.subr.bf16.mxu1 %v11468_v45 }
 0x24f   : > { %v11462_v33 = vpop.f32.mrf.mxu0  ;;  %3696 = vmatmul.mubr.bf16.vlgmr.msra.gmra.mxu0 %v11381_v46 }
 0x250   : > { %7068 = vmatpush3.bf16.msra.mxu0 %v11474_v48  ;;  %3775 = vmatprep.mubr.bf16.mxu0 %v11396_v43 }
 0x251   : > { %v11477_v35 = vpop.f32.mrf.mxu0  ;;  %7069 = vmatprep.subr.bf16.mxu0 %v11482_v56  ;;  %7060 = vmatpush3.bf16.msra.mxu1 %v11491_v59 }
 0x252   : > { %7089 = vmatprep.subr.bf16.mxu1 %v11499_v1  ;;  %v11637_v1 = vld [vmem:[%s14738_s1 + $0x508] sm:$0xff]  }
 0x253   : > { %v6791_v58 = vpop.f32.mrf.mxu0 }
 0x254   : > { %7070 = vmatpush3.bf16.msra.mxu0 %v11505_v62  ;;  %v6810_v26 = vpop.f32.mrf.mxu1  ;;  %3736 = vmatmul.mubr.bf16.vlgmr.msra.gmra.mxu1 %v11486_v52  ;;  %v11573_v58 = vld [vmem:[%s14738_s1 + $0x5e0] sm:$0xff]  }
 0x255   : > { %v6792_v4 = vpop.f32.mrf.mxu0  ;;  %7071 = vmatprep.subr.bf16.mxu0 %v11511_v25  ;;  %7090 = vmatpush3.bf16.msra.mxu1 %v11518_v34  ;;  %15451 = vst [vmem:[#allocation7_spill] sm:$0xff] %v11573_v58  ;;  %v11631_v34 = vld [vmem:[%s14738_s1 + $0x5d0] sm:$0xff]  }
 0x256   : > { %3815 = vmatprep.mubr.bf16.mxu1 %v11494_v0  ;;  %v6811_v30 = vpop.f32.mrf.mxu1  ;;  %7091 = vmatprep.subr.bf16.mxu1 %v11525_v50  ;;  %v11579_v4 = vld [vmem:[%s14738_s1 + $0x518] sm:$0xff]   ;;  %v6768_v50 = vadd.f32 %v11336_v8, %v11331_v16  ;;  %15455 = vst [vmem:[#allocation21_spill] sm:$0xff] %v11631_v34  ;;  %v6790_v16 = vadd.f32 %v11477_v35, %v11462_v33  ;;  %v11663_v33 = vld [vmem:[%s14738_s1 + $0x500] sm:$0xff]  }
 0x257   : > { %15459 = vst [vmem:[#allocation12_spill] sm:$0xff] %v11663_v33 }
 0x258   : > { %7072 = vmatpush3.bf16.msra.mxu0 %v11531_v63  ;;  %v6813_v47 = vpop.f32.mrf.mxu1 }
 0x259   : > { %7073 = vmatprep.subr.bf16.mxu0 %v11537_v39  ;;  %7092 = vmatpush3.bf16.msra.mxu1 %v11543_v42  ;;  %v11585_v47 = vld [vmem:[%s14738_s1 + $0x550] sm:$0xff]  }
 0x25a   : > { %7093 = vmatprep.subr.bf16.mxu1 %v11549_v17  ;;  %v6814_v31 = vpop.f32.mrf.mxu1  ;;  %v11602_v17 = vld [vmem:[%s14738_s1 + $0x5d8] sm:$0xff]   ;;  %v11608_v42 = vld [vmem:[%s14738_s1 + $0x510] sm:$0xff]  }
 0x25b   : > { %v11591_v31 = vld [vmem:[%s14738_s1 + $0x5a0] sm:$0xff]   ;;  %15453 = vst [vmem:[#allocation8_spill] sm:$0xff] %v11602_v17 }
 0x25c   : > { %7074 = vmatpush3.bf16.msra.mxu0 %v11555_v49  ;;  %15452 = vst [vmem:[#allocation18_spill] sm:$0xff] %v11591_v31 }
 0x25d   : > { %7075 = vmatprep.subr.bf16.mxu0 %v11561_v21  ;;  %7094 = vmatpush3.bf16.msra.mxu1 %v11567_v55  ;;  %v6746_v55 = vadd.f32 %v11306_v60, %v11300_v54  ;;  %v11622_v60 = vld [vmem:[%s14738_s1 + $0x598] sm:$0xff]  }
 0x25e   : > { %7095 = vmatprep.subr.bf16.mxu1 %v11573_v58  ;;  %v11595_v58 = vld [vmem:[%s9354_s25 + $0x20] sm:$0xf]  ;;  %15454 = vst [vmem:[#allocation9_spill] sm:$0xff] %v11622_v60 }
 0x25f   : > { %v6039_v54 = vcombine.low %v11595_v58, %v11595_v58 }
 0x260   : > { %7076 = vmatpush3.bf16.msra.mxu0 %v11579_v4 }
 0x261   : > { %7077 = vmatprep.subr.bf16.mxu0 %v11585_v47  ;;  %7096 = vmatpush3.bf16.msra.mxu1 %v11591_v31  ;;  %v11614_v31 = vld [vmem:[%s14738_s1 + $0x548] sm:$0xff]   ;;  %v275_v8 = vshll.u32 %v6039_v54, 16 }
 0x262   : > { %7097 = vmatprep.subr.bf16.mxu1 %v11602_v17  ;;  %v3132_v17 = vadd.f32 %v6746_v55, %v11272_v29  ;;  %v11643_v29 = vld [vmem:[%s14738_s1 + $0x540] sm:$0xff]   ;;  %v11651_v55 = vld [vmem:[%s14738_s1 + $0x590] sm:$0xff]  }
 0x263   : > { %15456 = vst [vmem:[#allocation10_spill] sm:$0xff] %v11643_v29  ;;  %15457 = vst [vmem:[#allocation11_spill] sm:$0xff] %v11651_v55 }
 0x264   : > { %7078 = vmatpush3.bf16.msra.mxu0 %v11608_v42 }
 0x265   : > { %7079 = vmatprep.subr.bf16.mxu0 %v11614_v31  ;;  %7098 = vmatpush3.bf16.msra.mxu1 %v11622_v60  ;;  %v11657_v60 = vld [vmem:[%s14738_s1 + $0x5c8] sm:$0xff]  }
 0x266   : > { %7099 = vmatprep.subr.bf16.mxu1 %v11631_v34  ;;  %v3172_v34 = vadd.f32 %v6768_v50, %v3132_v17  ;;  %15458 = vst [vmem:[#allocation24_spill] sm:$0xff] %v11657_v60  ;;  %v277_v50 = vrot.slane %v275_v8, 1  ;;  %v11670_v17 = vld [vmem:[%s14738_s1 + $0x588] sm:$0xff]   ;;  %v11694_v8 = vld [vmem:[%s14738_s1 + $0x580] sm:$0xff]  }
 0x267   : > { %15460 = vst [vmem:[#allocation13_spill] sm:$0xff] %v11670_v17  ;;  %15462 = vst [vmem:[#allocation14_spill] sm:$0xff] %v11694_v8 }
 0x268   : > { %7080 = vmatpush3.bf16.msra.mxu0 %v11637_v1  ;;  %v3212_v35 = vadd.f32 %v6790_v16, %v3172_v34 }
 0x269   : > { %7081 = vmatprep.subr.bf16.mxu0 %v11643_v29  ;;  %7100 = vmatpush3.bf16.msra.mxu1 %v11651_v55  ;;  %v6812_v29 = vadd.f32 %v6811_v30, %v6810_v26  ;;  %v273_v55 = vshrl.u32 %v6039_v54, 16  ;;  %v11683_v26 = vld [vmem:[%s14738_s1 + $0x638] sm:$0xff]  }
 0x26a   : > { %7101 = vmatprep.subr.bf16.mxu1 %v11657_v60 }
 0x26b   : > { %v3252_v30 = vadd.f32 %v6812_v29, %v3212_v35  ;;  %v11689_v16 = vor.u32 %v277_v50, %v273_v55  ;;  %v11714_v35 = vld [vmem:[%s14738_s1 + $0x38] sm:$0xff]  }
 0x26c   : > { %7082 = vmatpush3.bf16.msra.mxu0 %v11663_v33  ;;  %v11677_v33 = vld [vmem:[%s14738_s1 + $0x5c0] sm:$0xff]   ;;  %15464 = vst [vmem:[#allocation30_spill] sm:$0xff] %v11714_v35 }
 0x26d   : > { %8252 = vmatprep.subr.bf16.mxu0 %v15178_v40  ;;  %7102 = vmatpush3.bf16.msra.mxu1 %v11670_v17  ;;  %15461 = vst [vmem:[#allocation27_spill] sm:$0xff] %v11677_v33  ;;  %v11700_v17 = vld [vmem:[%s14738_s1 + $0x78] sm:$0xff]  }
 0x26e   : > { %7103 = vmatprep.subr.bf16.mxu1 %v11677_v33  ;;  %15463 = vst [vmem:[#allocation17_spill] sm:$0xff] %v11700_v17 }
 0x26f   : > { %v6832_v60 = vpop.f32.mrf.mxu0  ;;  %3776 = vmatmul.mubr.bf16.vlgmr.msra.gmra.mxu0 %v11595_v58 }
 0x270   : > { %8253 = vmatpush3.bf16.msra.mxu0 %v11683_v26  ;;  %8268 = vmatprep.mubr.msk.bf16.mxu0 %vm9228_vm0, %v15178_v40 }
 0x271   : > { %v6833_v34 = vpop.f32.mrf.mxu0  ;;  %8254 = vmatprep.subr.bf16.mxu0 %v15178_v40  ;;  %7104 = vmatpush3.bf16.msra.mxu1 %v11694_v8 }
 0x272   : > { %v6834_v54 = vadd.f32 %v6833_v34, %v6832_v60  ;;  %7120 = vmatprep.subr.bf16.mxu1 %v11700_v17  ;;  %v11706_v60 = vld [vmem:[%s14738_s1 + $0x630] sm:$0xff]  }
 0x273   : > { %v6835_v33 = vpop.f32.mrf.mxu0  ;;  %v11721_v34 = vld [vmem:[%s14738_s1 + $0x70] sm:$0xff]  }
 0x274   : > { %8255 = vmatpush3.bf16.msra.mxu0 %v11706_v60  ;;  %v3292_v29 = vadd.f32 %v6834_v54, %v3252_v30  ;;  %3816 = vmatmul.mubr.bf16.vlgmr.msra.gmra.mxu1 %v11689_v16  ;;  %v3331_v33 = vpop.f32.mrf.mxu1  ;;  %15465 = vst [vmem:[#allocation19_spill] sm:$0xff] %v11721_v34  ;;  %v11727_v30 = vld [vmem:[%s14738_s1 + $0x628] sm:$0xff]  }
 0x275   : > { %v6836_v55 = vpop.f32.mrf.mxu0  ;;  %8256 = vmatprep.subr.bf16.mxu0 %v15178_v40  ;;  %7121 = vmatpush3.bf16.msra.mxu1 %v11714_v35  ;;  %v11735_v35 = vld [vmem:[%s14738_s1 + $0x30] sm:$0xff]  }
 0x276   : > { %v3332_v50 = vadd.f32 %v3331_v33, %v3292_v29  ;;  %3901 = vmatprep.mubr.bf16.mxu1 %v11016_v5  ;;  %7122 = vmatprep.subr.bf16.mxu1 %v11721_v34  ;;  %v8250_v54 = vpop.f32.mrf.mxu1  ;;  %v6287_v5 = vld [vmem:[%s11135_s24 + $0x4] sm:$0xf]  ;;  %15466 = vst [vmem:[#allocation20_spill] sm:$0xff] %v11735_v35  ;;  %v11741_v34 = vld [vmem:[%s14738_s1 + $0x68] sm:$0xff]  }
 0x277   : > { %15467 = vst [vmem:[#allocation33_spill] sm:$0xff] %v11741_v34 }
 0x278   : > { %8257 = vmatpush3.bf16.msra.mxu0 %v11727_v30  ;;  %v3337_v55 = vmax.f32 %v3332_v50, 0.0  ;;  %v3334_v29 = vpop.f32.mrf.mxu1  ;;  %v11747_v50 = vld [vmem:[%s14738_s1 + $0x620] sm:$0xff]  }
 0x279   : > { %8258 = vmatprep.subr.bf16.mxu0 %v15178_v40  ;;  %7123 = vmatpush3.bf16.msra.mxu1 %v11735_v35  ;;  %v11757_v29 = vld [vmem:[%s14738_s1 + $0x28] sm:$0xff]   ;;  %v11830_v35 = vld [vmem:[%s14738_s1 + $0x600] sm:$0xff]  }
 0x27a   : > { %v3338_v33 = vpack.c.bf16 %v3337_v55, %v3337_v55  ;;  %7124 = vmatprep.subr.bf16.mxu1 %v11741_v34  ;;  %v8251_v54 = vpop.f32.mrf.mxu1  ;;  %15468 = vst [vmem:[#allocation36_spill] sm:$0xff] %v11757_v29  ;;  %v11763_v34 = vld [vmem:[%s14738_s1 + $0x60] sm:$0xff]   ;;  %15477 = vst [vmem:[#allocation46_spill] sm:$0xff] %v11830_v35 }
 0x27b   : > { %15469 = vst [vmem:[#allocation22_spill] sm:$0xff] %v11763_v34  ;;  %v11782_v54 = vld [vmem:[%s14738_s1 + $0x58] sm:$0xff]  }
 0x27c   : > { %8259 = vmatpush3.bf16.msra.mxu0 %v11747_v50  ;;  %v3341_v55 = vsel %vm11143_vm3, %v3338_v33, %v6287_v5  ;;  %v11769_v5 = vld [vmem:[%s14738_s1 + $0x618] sm:$0xff]   ;;  %v11776_v33 = vld [vmem:[%s14738_s1 + $0x20] sm:$0xff]   ;;  %15471 = vst [vmem:[#allocation40_spill] sm:$0xff] %v11782_v54 }
 0x27d   : > { %8260 = vmatprep.subr.bf16.mxu0 %v15178_v40  ;;  %6288 = vst [vmem:[%s11135_s24 + $0x4] sm:$0xf] %v3341_v55  ;;  %7125 = vmatpush3.bf16.msra.mxu1 %v11757_v29  ;;  %15470 = vst [vmem:[#allocation23_spill] sm:$0xff] %v11776_v33  ;;  %v11788_v55 = vld [vmem:[%s14738_s1 + $0x610] sm:$0xff]  }
 0x27e   : > { %7126 = vmatprep.subr.bf16.mxu1 %v11763_v34  ;;  %v181_v34 = vld [vmem:[%s9354_s25 + $0x24] sm:$0x1] }
 0x27f   : > { %v6053_v29 = vcombine.low %v11595_v58, %v181_v34  ;;  %v11816_v34 = vld [vmem:[%s14738_s1 + $0x10] sm:$0xff]  }
 0x280   : > { %8261 = vmatpush3.bf16.msra.mxu0 %v11769_v5  ;;  %15475 = vst [vmem:[#allocation28_spill] sm:$0xff] %v11816_v34 }
 0x281   : > { %8262 = vmatprep.subr.bf16.mxu0 %v15178_v40  ;;  %7127 = vmatpush3.bf16.msra.mxu1 %v11776_v33  ;;  %v11796_v33 = vld [vmem:[%s14738_s1 + $0x18] sm:$0xff]  }
 0x282   : > { %7128 = vmatprep.subr.bf16.mxu1 %v11782_v54  ;;  %15472 = vst [vmem:[#allocation41_spill] sm:$0xff] %v11796_v33  ;;  %v11803_v54 = vld [vmem:[%s14738_s1 + $0x50] sm:$0xff]  }
 0x283   : > { %15473 = vst [vmem:[#allocation25_spill] sm:$0xff] %v11803_v54 }
 0x284   : > { %8263 = vmatpush3.bf16.msra.mxu0 %v11788_v55 }
 0x285   : > { %8264 = vmatprep.subr.bf16.mxu0 %v15178_v40  ;;  %7129 = vmatpush3.bf16.msra.mxu1 %v11796_v33  ;;  %v11819_v33 = vrot.slane %v6053_v29, 1  ;;  %v11842_v29 = vld [vmem:[%s14738_s1 + $0x8] sm:$0xff]  }
 0x286   : > { %7130 = vmatprep.subr.bf16.mxu1 %v11803_v54  ;;  %v11824_v54 = vld [vmem:[%s14738_s1 + $0x48] sm:$0xff]   ;;  %15479 = vst [vmem:[#allocation31_spill] sm:$0xff] %v11842_v29 }
 0x287   : > { %15476 = vst [vmem:[#allocation29_spill] sm:$0xff] %v11824_v54 }
 0x288   : > { %8265 = vmatpush3.bf16.msra.mxu0 %v11809_v10 }
 0x289   : > { %8266 = vmatprep.subr.bf16.mxu0 %v15178_v40  ;;  %7131 = vmatpush3.bf16.msra.mxu1 %v11816_v34  ;;  %v11836_v34 = vld [vmem:[%s14738_s1 + $0xf8] sm:$0xff]  }
 0x28a   : > { %7132 = vmatprep.subr.bf16.mxu1 %v11824_v54  ;;  %15478 = vst [vmem:[#allocation47_spill] sm:$0xff] %v11836_v34 }
 0x28c   : > { %8267 = vmatpush3.bf16.msra.mxu0 %v11830_v35  ;;  %v11849_v35 = vld [vmem:[%s14738_s1 + $0x40] sm:$0xff]  }
 0x28d   : > { %7142 = vmatprep.subr.bf16.mxu0 %v11836_v34  ;;  %7133 = vmatpush3.bf16.msra.mxu1 %v11842_v29  ;;  %15480 = vst [vmem:[#allocation32_spill] sm:$0xff] %v11849_v35  ;;  %v11855_v34 = vld [vmem:[%s14738_s1 + $0xb8] sm:$0xff]   ;;  %v11861_v29 = vld [vmem:[%s14738_s1 + $0xf0] sm:$0xff]  }
 0x28e   : > { %7134 = vmatprep.subr.bf16.mxu1 %v11849_v35  ;;  %15481 = vst [vmem:[#allocation50_spill] sm:$0xff] %v11855_v34  ;;  %v11868_v35 = vld [vmem:[%s14738_s1] sm:$0xff]  }
 0x28f   : > { %v6863_v54 = vpop.f32.mrf.mxu0  ;;  %8269 = vmatmul.mubr.bf16.vlgmr.msra.gmra.mxu0 %v11819_v33  ;;  %15482 = vst [vmem:[#allocation51_spill] sm:$0xff] %v11868_v35 }
 0x290   : > { %7143 = vmatpush3.bf16.msra.mxu0 %v11855_v34  ;;  %3941 = vmatprep.mubr.bf16.mxu0 %v11075_v11  ;;  %v11874_v34 = vld [vmem:[%s14738_s1 + $0x178] sm:$0xff]   ;;  %v11880_v11 = vld [vmem:[%s14738_s1 + $0xb0] sm:$0xff]  }
 0x291   : > { %v6864_v10 = vpop.f32.mrf.mxu0  ;;  %7144 = vmatprep.subr.bf16.mxu0 %v11861_v29  ;;  %7135 = vmatpush3.bf16.msra.mxu1 %v11868_v35  ;;  %15483 = vst [vmem:[#allocation34_spill] sm:$0xff] %v11874_v34  ;;  %15484 = vst [vmem:[#allocation35_spill] sm:$0xff] %v11880_v11 }
 0x292   : > { %v6865_v17 = vadd.f32 %v6864_v10, %v6863_v54  ;;  %7164 = vmatprep.subr.bf16.mxu1 %v11874_v34  ;;  %v11886_v54 = vld [vmem:[%s14738_s1 + $0xe8] sm:$0xff]   ;;  %v11893_v34 = vld [vmem:[%s14739_s2] ss:$0 sm:$0xff] }
 0x293   : > { %v6866_v8 = vpop.f32.mrf.mxu0  ;;  %15485 = vst [vmem:[#allocation54_spill] sm:$0xff] %v11886_v54  ;;  %15486 = vst [vmem:[#allocation55_spill] sm:$0xff] %v11893_v34 }
 0x294   : > { %7145 = vmatpush3.bf16.msra.mxu0 %v11880_v11  ;;  %v6885_v8 = vpop.f32.mrf.mxu1  ;;  %3902 = vmatmul.mubr.bf16.vlgmr.msra.gmra.mxu1 %v11085_v19  ;;  %v3378_v35 = vadd.f32 %v11893_v34, %v6865_v17  ;;  %v11906_v19 = vld [vmem:[%s14738_s1 + $0x170] sm:$0xff]   ;;  %v11912_v17 = vld [vmem:[%s14738_s1 + $0xa8] sm:$0xff]  }
 0x295   : > { %v6867_v10 = vpop.f32.mrf.mxu0  ;;  %7146 = vmatprep.subr.bf16.mxu0 %v11886_v54  ;;  %3981 = vmatprep.mubr.bf16.mxu1 %v11263_v6  ;;  %15488 = vst [vmem:[#allocation39_spill] sm:$0xff] %v11906_v19  ;;  %v11918_v6 = vld [vmem:[%s14738_s1 + $0xe0] sm:$0xff]  }
 0x296   : > { %v11899_v10 = vld [vmem:[%s14738_s1 + $0x138] sm:$0xff]   ;;  %v6886_v54 = vpop.f32.mrf.mxu1  ;;  %15489 = vst [vmem:[#allocation58_spill] sm:$0xff] %v11918_v6 }
 0x297   : > { %15487 = vst [vmem:[#allocation37_spill] sm:$0xff] %v11899_v10  ;;  %7165 = vmatpush3.bf16.msra.mxu1 %v11899_v10  ;;  %v6887_v34 = vadd.f32 %v6886_v54, %v6885_v8  ;;  %v11930_v54 = vld [vmem:[%s14738_s1 + $0x168] sm:$0xff]   ;;  %v11936_v8 = vld [vmem:[%s14738_s1 + $0xa0] sm:$0xff]  }
 0x298   : > { %7166 = vmatprep.subr.bf16.mxu1 %v11906_v19  ;;  %7147 = vmatpush3.bf16.msra.mxu0 %v11912_v17  ;;  %v6888_v10 = vpop.f32.mrf.mxu1  ;;  %v11924_v19 = vld [vmem:[%s14738_s1 + $0x130] sm:$0xff]   ;;  %15491 = vst [vmem:[#allocation42_spill] sm:$0xff] %v11930_v54  ;;  %15492 = vst [vmem:[#allocation43_spill] sm:$0xff] %v11936_v8 }
 0x299   : > { %7148 = vmatprep.subr.bf16.mxu0 %v11918_v6  ;;  %v3418_v11 = vadd.f32 %v6887_v34, %v3378_v35  ;;  %15490 = vst [vmem:[#allocation59_spill] sm:$0xff] %v11924_v19  ;;  %v11942_v34 = vld [vmem:[%s14738_s1 + $0xd8] sm:$0xff]   ;;  %v11948_v10 = vld [vmem:[%s14738_s1 + $0x128] sm:$0xff]  }
 0x29a   : > { %v6889_v35 = vpop.f32.mrf.mxu1  ;;  %15493 = vst [vmem:[#allocation62_spill] sm:$0xff] %v11942_v34  ;;  %15494 = vst [vmem:[#allocation63_spill] sm:$0xff] %v11948_v10  ;;  %v12076_v6 = vld [vmem:[%s14738_s1 + $0x278] sm:$0xff]  }
 0x29b   : > { %7167 = vmatpush3.bf16.msra.mxu1 %v11924_v19  ;;  %v11960_v35 = vld [vmem:[%s14738_s1 + $0x98] sm:$0xff]   ;;  %v11966_v19 = vld [vmem:[%s14738_s1 + $0xd0] sm:$0xff]   ;;  %15514 = vst [vmem:[#allocation64_spill] sm:$0xff] %v12076_v6 }
 0x29c   : > { %7168 = vmatprep.subr.bf16.mxu1 %v11930_v54  ;;  %7149 = vmatpush3.bf16.msra.mxu0 %v11936_v8  ;;  %v11954_v54 = vld [vmem:[%s14738_s1 + $0x160] sm:$0xff]   ;;  %15496 = vst [vmem:[#allocation45_spill] sm:$0xff] %v11960_v35  ;;  %15497 = vst [vmem:[#allocation38_spill] sm:$0xff] %v11966_v19 }
 0x29d   : > { %7150 = vmatprep.subr.bf16.mxu0 %v11942_v34  ;;  %15495 = vst [vmem:[#allocation44_spill] sm:$0xff] %v11954_v54 }
 0x29f   : > { %7169 = vmatpush3.bf16.msra.mxu1 %v11948_v10  ;;  %v11972_v10 = vld [vmem:[%s14738_s1 + $0x120] sm:$0xff]  }
 0x2a0   : > { %7170 = vmatprep.subr.bf16.mxu1 %v11954_v54  ;;  %7151 = vmatpush3.bf16.msra.mxu0 %v11960_v35  ;;  %15498 = vst [vmem:[#allocation66_spill] sm:$0xff] %v11972_v10  ;;  %v11978_v54 = vld [vmem:[%s14738_s1 + $0x158] sm:$0xff]   ;;  %v11984_v35 = vld [vmem:[%s14738_s1 + $0x90] sm:$0xff]  }
 0x2a1   : > { %7152 = vmatprep.subr.bf16.mxu0 %v11966_v19  ;;  %15499 = vst [vmem:[#allocation67_spill] sm:$0xff] %v11978_v54  ;;  %15500 = vst [vmem:[#allocation48_spill] sm:$0xff] %v11984_v35  ;;  %v11990_v19 = vld [vmem:[%s14738_s1 + $0xc8] sm:$0xff]  }
 0x2a2   : > { %15501 = vst [vmem:[#allocation49_spill] sm:$0xff] %v11990_v19 }
 0x2a3   : > { %7171 = vmatpush3.bf16.msra.mxu1 %v11972_v10  ;;  %v11996_v10 = vld [vmem:[%s14738_s1 + $0x118] sm:$0xff]  }
 0x2a4   : > { %7172 = vmatprep.subr.bf16.mxu1 %v11978_v54  ;;  %7153 = vmatpush3.bf16.msra.mxu0 %v11984_v35  ;;  %15502 = vst [vmem:[#allocation52_spill] sm:$0xff] %v11996_v10  ;;  %v12002_v54 = vld [vmem:[%s14738_s1 + $0x150] sm:$0xff]   ;;  %v12008_v35 = vld [vmem:[%s14738_s1 + $0x88] sm:$0xff]  }
 0x2a5   : > { %7154 = vmatprep.subr.bf16.mxu0 %v11990_v19  ;;  %15503 = vst [vmem:[#allocation53_spill] sm:$0xff] %v12002_v54  ;;  %15504 = vst [vmem:[#allocation72_spill] sm:$0xff] %v12008_v35  ;;  %v12014_v19 = vld [vmem:[%s14738_s1 + $0xc0] sm:$0xff]  }
 0x2a6   : > { %15505 = vst [vmem:[#allocation73_spill] sm:$0xff] %v12014_v19 }
 0x2a7   : > { %7173 = vmatpush3.bf16.msra.mxu1 %v11996_v10  ;;  %v12020_v10 = vld [vmem:[%s14738_s1 + $0x110] sm:$0xff]  }
 0x2a8   : > { %7174 = vmatprep.subr.bf16.mxu1 %v12002_v54  ;;  %7155 = vmatpush3.bf16.msra.mxu0 %v12008_v35  ;;  %15506 = vst [vmem:[#allocation56_spill] sm:$0xff] %v12020_v10  ;;  %v12026_v54 = vld [vmem:[%s14738_s1 + $0x148] sm:$0xff]   ;;  %v12032_v35 = vld [vmem:[%s14738_s1 + $0x80] sm:$0xff]  }
 0x2a9   : > { %7156 = vmatprep.subr.bf16.mxu0 %v12014_v19  ;;  %15507 = vst [vmem:[#allocation57_spill] sm:$0xff] %v12026_v54  ;;  %15508 = vst [vmem:[#allocation76_spill] sm:$0xff] %v12032_v35  ;;  %v12038_v19 = vld [vmem:[%s14738_s1 + $0x1f8] sm:$0xff]  }
 0x2aa   : > { %15509 = vst [vmem:[#allocation77_spill] sm:$0xff] %v12038_v19 }
 0x2ab   : > { %7175 = vmatpush3.bf16.msra.mxu1 %v12020_v10  ;;  %v12044_v10 = vld [vmem:[%s14738_s1 + $0x108] sm:$0xff]  }
 0x2ac   : > { %7176 = vmatprep.subr.bf16.mxu1 %v12026_v54  ;;  %7157 = vmatpush3.bf16.msra.mxu0 %v12032_v35  ;;  %15510 = vst [vmem:[#allocation60_spill] sm:$0xff] %v12044_v10  ;;  %v12051_v35 = vld [vmem:[%s14738_s1 + $0x140] sm:$0xff]  }
 0x2ad   : > { %7186 = vmatprep.subr.bf16.mxu0 %v12038_v19  ;;  %15511 = vst [vmem:[#allocation61_spill] sm:$0xff] %v12051_v35  ;;  %v12057_v19 = vld [vmem:[%s14738_s1 + $0x1b8] sm:$0xff]  }
 0x2ae   : > { %15512 = vst [vmem:[#allocation80_spill] sm:$0xff] %v12057_v19 }
 0x2af   : > { %7177 = vmatpush3.bf16.msra.mxu1 %v12044_v10  ;;  %v6907_v54 = vpop.f32.mrf.mxu0  ;;  %3942 = vmatmul.mubr.bf16.vlgmr.msra.gmra.mxu0 %v11121_v2  ;;  %v12063_v10 = vld [vmem:[%s14738_s1 + $0x1f0] sm:$0xff]  }
 0x2b0   : > { %7178 = vmatprep.subr.bf16.mxu1 %v12051_v35  ;;  %7187 = vmatpush3.bf16.msra.mxu0 %v12057_v19  ;;  %v12070_v35 = vld [vmem:[%s14738_s1 + $0x100] sm:$0xff]  }
 0x2b1   : > { %v6908_v34 = vpop.f32.mrf.mxu0  ;;  %7188 = vmatprep.subr.bf16.mxu0 %v12063_v10  ;;  %4021 = vmatprep.mubr.bf16.mxu0 %v11297_v53  ;;  %15513 = vst [vmem:[#allocation81_spill] sm:$0xff] %v12070_v35  ;;  %v12082_v53 = vld [vmem:[%s14738_s1 + $0x1b0] sm:$0xff]  }
 0x2b2   : > { %v6909_v2 = vadd.f32 %v6908_v34, %v6907_v54  ;;  %15515 = vst [vmem:[#allocation65_spill] sm:$0xff] %v12082_v53  ;;  %v12095_v34 = vld [vmem:[%s14738_s1 + $0x238] sm:$0xff]  }
 0x2b3   : > { %7179 = vmatpush3.bf16.msra.mxu1 %v12070_v35  ;;  %v6910_v8 = vpop.f32.mrf.mxu0  ;;  %15517 = vst [vmem:[#allocation85_spill] sm:$0xff] %v12095_v34 }
 0x2b4   : > { %v3458_v19 = vadd.f32 %v6909_v2, %v3418_v11  ;;  %7208 = vmatprep.subr.bf16.mxu1 %v12076_v6  ;;  %7189 = vmatpush3.bf16.msra.mxu0 %v12082_v53  ;;  %v12088_v8 = vld [vmem:[%s14738_s1 + $0x1e8] sm:$0xff]   ;;  %v6929_v11 = vpop.f32.mrf.mxu1  ;;  %v12478_v53 = vld [vmem:[%s14738_s1 + $0x478] sm:$0xff]  }
 0x2b5   : > { %v6911_v54 = vpop.f32.mrf.mxu0  ;;  %15516 = vst [vmem:[#allocation84_spill] sm:$0xff] %v12088_v8  ;;  %7190 = vmatprep.subr.bf16.mxu0 %v12088_v8  ;;  %15577 = vst [vmem:[#allocation135_spill] sm:$0xff] %v12478_v53 }
 0x2b6   : > { %3982 = vmatmul.mubr.bf16.vlgmr.msra.gmra.mxu1 %v11140_v18  ;;  %v6930_v2 = vpop.f32.mrf.mxu1  ;;  %v12102_v54 = vld [vmem:[%s14738_s1 + $0x270] sm:$0xff]   ;;  %v12108_v18 = vld [vmem:[%s14738_s1 + $0x1a8] sm:$0xff]  }
 0x2b7   : > { %7209 = vmatpush3.bf16.msra.mxu1 %v12095_v34  ;;  %4061 = vmatprep.mubr.bf16.mxu1 %v11316_v23  ;;  %15518 = vst [vmem:[#allocation68_spill] sm:$0xff] %v12102_v54  ;;  %15519 = vst [vmem:[#allocation69_spill] sm:$0xff] %v12108_v18  ;;  %v6931_v6 = vadd.f32 %v6930_v2, %v6929_v11  ;;  %v12114_v23 = vld [vmem:[%s14738_s1 + $0x1e0] sm:$0xff]   ;;  %v12126_v11 = vld [vmem:[%s14738_s1 + $0x268] sm:$0xff]  }
 0x2b8   : > { %7210 = vmatprep.subr.bf16.mxu1 %v12102_v54  ;;  %7191 = vmatpush3.bf16.msra.mxu0 %v12108_v18  ;;  %15520 = vst [vmem:[#allocation88_spill] sm:$0xff] %v12114_v23  ;;  %v6932_v34 = vpop.f32.mrf.mxu1  ;;  %v12120_v54 = vld [vmem:[%s14738_s1 + $0x230] sm:$0xff]   ;;  %15522 = vst [vmem:[#allocation70_spill] sm:$0xff] %v12126_v11  ;;  %v12132_v2 = vld [vmem:[%s14738_s1 + $0x1a0] sm:$0xff]  }
 0x2b9   : > { %7192 = vmatprep.subr.bf16.mxu0 %v12114_v23  ;;  %v3498_v35 = vadd.f32 %v6931_v6, %v3458_v19  ;;  %15521 = vst [vmem:[#allocation89_spill] sm:$0xff] %v12120_v54  ;;  %15523 = vst [vmem:[#allocation71_spill] sm:$0xff] %v12132_v2  ;;  %v12138_v6 = vld [vmem:[%s14738_s1 + $0x1d8] sm:$0xff]   ;;  %v12144_v34 = vld [vmem:[%s14738_s1 + $0x228] sm:$0xff]  }
 0x2ba   : > { %v6933_v19 = vpop.f32.mrf.mxu1  ;;  %15524 = vst [vmem:[#allocation92_spill] sm:$0xff] %v12138_v6  ;;  %15525 = vst [vmem:[#allocation93_spill] sm:$0xff] %v12144_v34  ;;  %v12272_v23 = vld [vmem:[%s14738_s1 + $0x378] sm:$0xff]  }
 0x2bb   : > { %7211 = vmatpush3.bf16.msra.mxu1 %v12120_v54  ;;  %v12156_v19 = vld [vmem:[%s14738_s1 + $0x198] sm:$0xff]   ;;  %v12162_v54 = vld [vmem:[%s14738_s1 + $0x1d0] sm:$0xff]   ;;  %15546 = vst [vmem:[#allocation94_spill] sm:$0xff] %v12272_v23 }
 0x2bc   : > { %7212 = vmatprep.subr.bf16.mxu1 %v12126_v11  ;;  %7193 = vmatpush3.bf16.msra.mxu0 %v12132_v2  ;;  %v12150_v11 = vld [vmem:[%s14738_s1 + $0x260] sm:$0xff]   ;;  %15527 = vst [vmem:[#allocation75_spill] sm:$0xff] %v12156_v19  ;;  %15528 = vst [vmem:[#allocation96_spill] sm:$0xff] %v12162_v54 }
 0x2bd   : > { %7194 = vmatprep.subr.bf16.mxu0 %v12138_v6  ;;  %15526 = vst [vmem:[#allocation74_spill] sm:$0xff] %v12150_v11 }
 0x2bf   : > { %7213 = vmatpush3.bf16.msra.mxu1 %v12144_v34  ;;  %v12168_v34 = vld [vmem:[%s14738_s1 + $0x220] sm:$0xff]  }
 0x2c0   : > { %7214 = vmatprep.subr.bf16.mxu1 %v12150_v11  ;;  %7195 = vmatpush3.bf16.msra.mxu0 %v12156_v19  ;;  %15529 = vst [vmem:[#allocation97_spill] sm:$0xff] %v12168_v34  ;;  %v12174_v11 = vld [vmem:[%s14738_s1 + $0x258] sm:$0xff]   ;;  %v12180_v19 = vld [vmem:[%s14738_s1 + $0x190] sm:$0xff]  }
 0x2c1   : > { %7196 = vmatprep.subr.bf16.mxu0 %v12162_v54  ;;  %15530 = vst [vmem:[#allocation78_spill] sm:$0xff] %v12174_v11  ;;  %15531 = vst [vmem:[#allocation79_spill] sm:$0xff] %v12180_v19  ;;  %v12186_v54 = vld [vmem:[%s14738_s1 + $0x1c8] sm:$0xff]  }
 0x2c2   : > { %15532 = vst [vmem:[#allocation100_spill] sm:$0xff] %v12186_v54 }
 0x2c3   : > { %7215 = vmatpush3.bf16.msra.mxu1 %v12168_v34  ;;  %v12192_v34 = vld [vmem:[%s14738_s1 + $0x218] sm:$0xff]  }
 0x2c4   : > { %7216 = vmatprep.subr.bf16.mxu1 %v12174_v11  ;;  %7197 = vmatpush3.bf16.msra.mxu0 %v12180_v19  ;;  %15533 = vst [vmem:[#allocation101_spill] sm:$0xff] %v12192_v34  ;;  %v12198_v11 = vld [vmem:[%s14738_s1 + $0x250] sm:$0xff]   ;;  %v12204_v19 = vld [vmem:[%s14738_s1 + $0x188] sm:$0xff]  }
 0x2c5   : > { %7198 = vmatprep.subr.bf16.mxu0 %v12186_v54  ;;  %15534 = vst [vmem:[#allocation82_spill] sm:$0xff] %v12198_v11  ;;  %15535 = vst [vmem:[#allocation83_spill] sm:$0xff] %v12204_v19  ;;  %v12210_v54 = vld [vmem:[%s14738_s1 + $0x1c0] sm:$0xff]  }
 0x2c6   : > { %15536 = vst [vmem:[#allocation104_spill] sm:$0xff] %v12210_v54 }
 0x2c7   : > { %7217 = vmatpush3.bf16.msra.mxu1 %v12192_v34  ;;  %v12216_v34 = vld [vmem:[%s14738_s1 + $0x210] sm:$0xff]  }
 0x2c8   : > { %7218 = vmatprep.subr.bf16.mxu1 %v12198_v11  ;;  %7199 = vmatpush3.bf16.msra.mxu0 %v12204_v19  ;;  %15537 = vst [vmem:[#allocation105_spill] sm:$0xff] %v12216_v34  ;;  %v12222_v11 = vld [vmem:[%s14738_s1 + $0x248] sm:$0xff]   ;;  %v12228_v19 = vld [vmem:[%s14738_s1 + $0x180] sm:$0xff]  }
 0x2c9   : > { %7200 = vmatprep.subr.bf16.mxu0 %v12210_v54  ;;  %15538 = vst [vmem:[#allocation86_spill] sm:$0xff] %v12222_v11  ;;  %15539 = vst [vmem:[#allocation87_spill] sm:$0xff] %v12228_v19  ;;  %v12234_v54 = vld [vmem:[%s14738_s1 + $0x2f8] sm:$0xff]  }
 0x2ca   : > { %15540 = vst [vmem:[#allocation108_spill] sm:$0xff] %v12234_v54 }
 0x2cb   : > { %7219 = vmatpush3.bf16.msra.mxu1 %v12216_v34  ;;  %v12240_v34 = vld [vmem:[%s14738_s1 + $0x208] sm:$0xff]  }
 0x2cc   : > { %7220 = vmatprep.subr.bf16.mxu1 %v12222_v11  ;;  %7201 = vmatpush3.bf16.msra.mxu0 %v12228_v19  ;;  %15541 = vst [vmem:[#allocation109_spill] sm:$0xff] %v12240_v34  ;;  %v12247_v19 = vld [vmem:[%s14738_s1 + $0x240] sm:$0xff]  }
 0x2cd   : > { %7230 = vmatprep.subr.bf16.mxu0 %v12234_v54  ;;  %15542 = vst [vmem:[#allocation90_spill] sm:$0xff] %v12247_v19  ;;  %v12253_v54 = vld [vmem:[%s14738_s1 + $0x2b8] sm:$0xff]  }
 0x2ce   : > { %15543 = vst [vmem:[#allocation91_spill] sm:$0xff] %v12253_v54 }
 0x2cf   : > { %7221 = vmatpush3.bf16.msra.mxu1 %v12240_v34  ;;  %v6951_v11 = vpop.f32.mrf.mxu0  ;;  %4022 = vmatmul.mubr.bf16.vlgmr.msra.gmra.mxu0 %v11381_v46  ;;  %v12259_v34 = vld [vmem:[%s14738_s1 + $0x2f0] sm:$0xff]  }
 0x2d0   : > { %7222 = vmatprep.subr.bf16.mxu1 %v12247_v19  ;;  %7231 = vmatpush3.bf16.msra.mxu0 %v12253_v54  ;;  %15544 = vst [vmem:[#allocation112_spill] sm:$0xff] %v12259_v34  ;;  %v12266_v19 = vld [vmem:[%s14738_s1 + $0x200] sm:$0xff]  }
 0x2d1   : > { %v6952_v6 = vpop.f32.mrf.mxu0  ;;  %7232 = vmatprep.subr.bf16.mxu0 %v12259_v34  ;;  %4101 = vmatprep.mubr.bf16.mxu0 %v11396_v43  ;;  %15545 = vst [vmem:[#allocation113_spill] sm:$0xff] %v12266_v19 }
 0x2d2   : > { %v6953_v46 = vadd.f32 %v6952_v6, %v6951_v11  ;;  %v12278_v11 = vld [vmem:[%s14738_s1 + $0x2b0] sm:$0xff]  }
 0x2d3   : > { %7223 = vmatpush3.bf16.msra.mxu1 %v12266_v19  ;;  %v6954_v2 = vpop.f32.mrf.mxu0  ;;  %15547 = vst [vmem:[#allocation95_spill] sm:$0xff] %v12278_v11 }
 0x2d4   : > { %v3538_v54 = vadd.f32 %v6953_v46, %v3498_v35  ;;  %7252 = vmatprep.subr.bf16.mxu1 %v12272_v23  ;;  %7233 = vmatpush3.bf16.msra.mxu0 %v12278_v11  ;;  %v12284_v2 = vld [vmem:[%s14738_s1 + $0x2e8] sm:$0xff]   ;;  %v6973_v35 = vpop.f32.mrf.mxu1  ;;  %v12291_v46 = vld [vmem:[%s14738_s1 + $0x338] sm:$0xff]   ;;  %v12298_v23 = vld [vmem:[%s14738_s1 + $0x370] sm:$0xff]  }
 0x2d5   : > { %v6955_v6 = vpop.f32.mrf.mxu0  ;;  %15548 = vst [vmem:[#allocation116_spill] sm:$0xff] %v12284_v2  ;;  %7234 = vmatprep.subr.bf16.mxu0 %v12284_v2  ;;  %15549 = vst [vmem:[#allocation117_spill] sm:$0xff] %v12291_v46 }
 0x2d6   : > { %4062 = vmatmul.mubr.bf16.vlgmr.msra.gmra.mxu1 %v11486_v52  ;;  %v6974_v6 = vpop.f32.mrf.mxu1  ;;  %15550 = vst [vmem:[#allocation98_spill] sm:$0xff] %v12298_v23  ;;  %v12304_v52 = vld [vmem:[%s14738_s1 + $0x2a8] sm:$0xff]  }
 0x2d7   : > { %7253 = vmatpush3.bf16.msra.mxu1 %v12291_v46  ;;  %4141 = vmatprep.mubr.bf16.mxu1 %v11494_v0  ;;  %15551 = vst [vmem:[#allocation99_spill] sm:$0xff] %v12304_v52  ;;  %v6975_v19 = vadd.f32 %v6974_v6, %v6973_v35  ;;  %v12310_v46 = vld [vmem:[%s14738_s1 + $0x2e0] sm:$0xff]   ;;  %v12324_v35 = vld [vmem:[%s14738_s1 + $0x368] sm:$0xff]  }
 0x2d8   : > { %7254 = vmatprep.subr.bf16.mxu1 %v12298_v23  ;;  %7235 = vmatpush3.bf16.msra.mxu0 %v12304_v52  ;;  %15552 = vst [vmem:[#allocation120_spill] sm:$0xff] %v12310_v46  ;;  %v6976_v2 = vpop.f32.mrf.mxu1  ;;  %v12318_v23 = vld [vmem:[%s14738_s1 + $0x330] sm:$0xff]   ;;  %15554 = vst [vmem:[#allocation102_spill] sm:$0xff] %v12324_v35  ;;  %v12342_v6 = vld [vmem:[%s14738_s1 + $0x328] sm:$0xff]  }
 0x2d9   : > { %7236 = vmatprep.subr.bf16.mxu0 %v12310_v46  ;;  %v12313_v11 = vadd.f32 %v6975_v19, %v3538_v54  ;;  %15553 = vst [vmem:[#allocation121_spill] sm:$0xff] %v12318_v23  ;;  %v12330_v2 = vld [vmem:[%s14738_s1 + $0x2a0] sm:$0xff]   ;;  %v12336_v19 = vld [vmem:[%s14738_s1 + $0x2d8] sm:$0xff]   ;;  %15557 = vst [vmem:[#allocation125_spill] sm:$0xff] %v12342_v6 }
 0x2da   : > { %15555 = vst [vmem:[#allocation103_spill] sm:$0xff] %v12330_v2  ;;  %v6977_v54 = vpop.f32.mrf.mxu1  ;;  %15556 = vst [vmem:[#allocation124_spill] sm:$0xff] %v12336_v19  ;;  %v12425_v46 = vld [vmem:[%s14738_s1 + $0x348] sm:$0xff]  }
 0x2db   : > { %7255 = vmatpush3.bf16.msra.mxu1 %v12318_v23  ;;  %v12354_v54 = vld [vmem:[%s14738_s1 + $0x298] sm:$0xff]   ;;  %v12360_v23 = vld [vmem:[%s14738_s1 + $0x2d0] sm:$0xff]   ;;  %15570 = vst [vmem:[#allocation122_spill] sm:$0xff] %v12425_v46 }
 0x2dc   : > { %7256 = vmatprep.subr.bf16.mxu1 %v12324_v35  ;;  %7237 = vmatpush3.bf16.msra.mxu0 %v12330_v2  ;;  %v12348_v35 = vld [vmem:[%s14738_s1 + $0x360] sm:$0xff]   ;;  %15559 = vst [vmem:[#allocation107_spill] sm:$0xff] %v12354_v54  ;;  %15560 = vst [vmem:[#allocation128_spill] sm:$0xff] %v12360_v23  ;;  %v12419_v2 = vld [vmem:[%s14738_s1 + $0x310] sm:$0xff]  }
 0x2dd   : > { %7238 = vmatprep.subr.bf16.mxu0 %v12336_v19  ;;  %15558 = vst [vmem:[#allocation106_spill] sm:$0xff] %v12348_v35  ;;  %15569 = vst [vmem:[#allocation119_spill] sm:$0xff] %v12419_v2 }
 0x2df   : > { %7257 = vmatpush3.bf16.msra.mxu1 %v12342_v6  ;;  %v12366_v6 = vld [vmem:[%s14738_s1 + $0x320] sm:$0xff]  }
 0x2e0   : > { %7258 = vmatprep.subr.bf16.mxu1 %v12348_v35  ;;  %7239 = vmatpush3.bf16.msra.mxu0 %v12354_v54  ;;  %15561 = vst [vmem:[#allocation129_spill] sm:$0xff] %v12366_v6  ;;  %v12372_v35 = vld [vmem:[%s14738_s1 + $0x358] sm:$0xff]   ;;  %v12378_v54 = vld [vmem:[%s14738_s1 + $0x290] sm:$0xff]  }
 0x2e1   : > { %7240 = vmatprep.subr.bf16.mxu0 %v12360_v23  ;;  %15562 = vst [vmem:[#allocation110_spill] sm:$0xff] %v12372_v35  ;;  %15563 = vst [vmem:[#allocation111_spill] sm:$0xff] %v12378_v54  ;;  %v12382_v23 = vld [vmem:[%s9354_s25 + $0xb0] sm:$0xf] }
 0x2e2   : > { %v6060_v19 = vcombine.low %v12382_v23, %v12382_v23 }
 0x2e3   : > { %7259 = vmatpush3.bf16.msra.mxu1 %v12366_v6  ;;  %v12387_v6 = vld [vmem:[%s14738_s1 + $0x2c8] sm:$0xff]  }
 0x2e4   : > { %7260 = vmatprep.subr.bf16.mxu1 %v12372_v35  ;;  %7241 = vmatpush3.bf16.msra.mxu0 %v12378_v54  ;;  %15564 = vst [vmem:[#allocation132_spill] sm:$0xff] %v12387_v6  ;;  %v12393_v35 = vld [vmem:[%s14738_s1 + $0x318] sm:$0xff]   ;;  %v12401_v54 = vld [vmem:[%s14738_s1 + $0x350] sm:$0xff]   ;;  %v462_v52 = vshrl.u32 %v6060_v19, 16 }
 0x2e5   : > { %7242 = vmatprep.subr.bf16.mxu0 %v12387_v6  ;;  %15565 = vst [vmem:[#allocation133_spill] sm:$0xff] %v12393_v35  ;;  %15566 = vst [vmem:[#allocation114_spill] sm:$0xff] %v12401_v54  ;;  %v12407_v6 = vld [vmem:[%s14738_s1 + $0x288] sm:$0xff]  }
 0x2e6   : > { %15567 = vst [vmem:[#allocation115_spill] sm:$0xff] %v12407_v6 }
 0x2e7   : > { %7261 = vmatpush3.bf16.msra.mxu1 %v12393_v35  ;;  %v12413_v35 = vld [vmem:[%s14738_s1 + $0x2c0] sm:$0xff]  }
 0x2e8   : > { %7262 = vmatprep.subr.bf16.mxu1 %v12401_v54  ;;  %7243 = vmatpush3.bf16.msra.mxu0 %v12407_v6  ;;  %15568 = vst [vmem:[#allocation118_spill] sm:$0xff] %v12413_v35  ;;  %v464_v54 = vshll.u32 %v6060_v19, 16  ;;  %v12431_v6 = vld [vmem:[%s14738_s1 + $0x280] sm:$0xff]   ;;  %v12462_v19 = vld [vmem:[%s14738_s1 + $0x3f0] sm:$0xff]  }
 0x2e9   : > { %7244 = vmatprep.subr.bf16.mxu0 %v12413_v35  ;;  %15571 = vst [vmem:[#allocation123_spill] sm:$0xff] %v12431_v6  ;;  %v12437_v35 = vld [vmem:[%s14738_s1 + $0x3f8] sm:$0xff]  }
 0x2ea   : > { %15572 = vst [vmem:[#allocation126_spill] sm:$0xff] %v12437_v35  ;;  %v466_v34 = vrot.slane %v464_v54, 1 }
 0x2eb   : > { %7263 = vmatpush3.bf16.msra.mxu1 %v12419_v2  ;;  %v12443_v2 = vld [vmem:[%s14738_s1 + $0x308] sm:$0xff]  }
 0x2ec   : > { %7264 = vmatprep.subr.bf16.mxu1 %v12425_v46  ;;  %7245 = vmatpush3.bf16.msra.mxu0 %v12431_v6  ;;  %15573 = vst [vmem:[#allocation127_spill] sm:$0xff] %v12443_v2  ;;  %v12450_v6 = vld [vmem:[%s14738_s1 + $0x340] sm:$0xff]  }
 0x2ed   : > { %7274 = vmatprep.subr.bf16.mxu0 %v12437_v35  ;;  %15574 = vst [vmem:[#allocation130_spill] sm:$0xff] %v12450_v6  ;;  %v12456_v35 = vld [vmem:[%s14738_s1 + $0x3b8] sm:$0xff]  }
 0x2ee   : > { %15575 = vst [vmem:[#allocation131_spill] sm:$0xff] %v12456_v35 }
 0x2ef   : > { %7265 = vmatpush3.bf16.msra.mxu1 %v12443_v2  ;;  %v6995_v46 = vpop.f32.mrf.mxu0  ;;  %4102 = vmatmul.mubr.bf16.vlgmr.msra.gmra.mxu0 %v11595_v58 }
 0x2f0   : > { %7266 = vmatprep.subr.bf16.mxu1 %v12450_v6  ;;  %7275 = vmatpush3.bf16.msra.mxu0 %v12456_v35  ;;  %v12469_v6 = vld [vmem:[%s14738_s1 + $0x300] sm:$0xff]   ;;  %v12472_v35 = vor.u32 %v466_v34, %v462_v52 }
 0x2f1   : > { %v6996_v2 = vpop.f32.mrf.mxu0  ;;  %7276 = vmatprep.subr.bf16.mxu0 %v12462_v19  ;;  %4181 = vmatprep.mubr.bf16.mxu0 %v12382_v23  ;;  %15576 = vst [vmem:[#allocation134_spill] sm:$0xff] %v12469_v6 }
 0x2f2   : > { %v6997_v54 = vadd.f32 %v6996_v2, %v6995_v46  ;;  %v12484_v46 = vld [vmem:[%s14738_s1 + $0x3b0] sm:$0xff]  }
 0x2f3   : > { %7267 = vmatpush3.bf16.msra.mxu1 %v12469_v6  ;;  %v6998_v18 = vpop.f32.mrf.mxu0 }
 0x2f4   : > { %v3618_v8 = vadd.f32 %v6997_v54, %v12313_v11  ;;  %7296 = vmatprep.subr.bf16.mxu1 %v12478_v53  ;;  %7277 = vmatpush3.bf16.msra.mxu0 %v12484_v46  ;;  %v12490_v18 = vld [vmem:[%s14738_s1 + $0x3e8] sm:$0xff]   ;;  %v7017_v34 = vpop.f32.mrf.mxu1  ;;  %v12497_v11 = vld [vmem:[%s14738_s1 + $0x438] sm:$0xff]   ;;  %v12511_v53 = vld [vmem:[%s14738_s1 + $0x3e0] sm:$0xff]  }
 0x2f5   : > { %v6999_v2 = vpop.f32.mrf.mxu0  ;;  %7278 = vmatprep.subr.bf16.mxu0 %v12490_v18  ;;  %15578 = vst [vmem:[#allocation136_spill] sm:$0xff] %v12497_v11  ;;  %v12505_v54 = vld [vmem:[%s14738_s1 + $0x3a8] sm:$0xff]  }
 0x2f6   : > { %4142 = vmatmul.mubr.bf16.vlgmr.msra.gmra.mxu1 %v11689_v16  ;;  %v7018_v52 = vpop.f32.mrf.mxu1 }
 0x2f7   : > { %7297 = vmatpush3.bf16.msra.mxu1 %v12497_v11  ;;  %4221 = vmatprep.mubr.bf16.mxu1 %v12472_v35  ;;  %v7019_v2 = vadd.f32 %v7018_v52, %v7017_v34  ;;  %v12527_v52 = vld [vmem:[%s14738_s1 + $0x3d8] sm:$0xff]  }
 0x2f8   : > { %7298 = vmatprep.subr.bf16.mxu1 %v11311_v22  ;;  %7279 = vmatpush3.bf16.msra.mxu0 %v12505_v54  ;;  %v7020_v11 = vpop.f32.mrf.mxu1  ;;  %v12521_v22 = vld [vmem:[%s14738_s1 + $0x3a0] sm:$0xff]  }
 0x2f9   : > { %7280 = vmatprep.subr.bf16.mxu0 %v12511_v53  ;;  %v12514_v6 = vadd.f32 %v7019_v2, %v3618_v8  ;;  %v208_v8 = vld [vmem:[%s9354_s25 + $0xb4] sm:$0x1] }
 0x2fa   : > { %v7021_v34 = vpop.f32.mrf.mxu1  ;;  %v6074_v11 = vcombine.low %v12382_v23, %v208_v8 }
 0x2fb   : > { %7299 = vmatpush3.bf16.msra.mxu1 %v11322_v37  ;;  %v12535_v37 = vld [vmem:[%s14738_s1 + $0x398] sm:$0xff]  }
 0x2fc   : > { %7300 = vmatprep.subr.bf16.mxu1 %v11328_v15  ;;  %7281 = vmatpush3.bf16.msra.mxu0 %v12521_v22  ;;  %v12541_v15 = vld [vmem:[%s14738_s1 + $0x3d0] sm:$0xff]   ;;  %v12588_v2 = vrot.slane %v6074_v11, 1 }
 0x2fd   : > { %7282 = vmatprep.subr.bf16.mxu0 %v12527_v52  ;;  %v12618_v11 = vld [vmem:[%s14738_s1 + $0x4b0] sm:$0xff]  }
 0x2ff   : > { %7301 = vmatpush3.bf16.msra.mxu1 %v11342_v61  ;;  %v12549_v61 = vld [vmem:[%s14738_s1 + $0x390] sm:$0xff]  }
 0x300   : > { %7302 = vmatprep.subr.bf16.mxu1 %v11348_v27  ;;  %7283 = vmatpush3.bf16.msra.mxu0 %v12535_v37  ;;  %v12555_v27 = vld [vmem:[%s14738_s1 + $0x3c8] sm:$0xff]  }
 0x301   : > { %7284 = vmatprep.subr.bf16.mxu0 %v12541_v15 }
 0x303   : > { %7303 = vmatpush3.bf16.msra.mxu1 %v11356_v24  ;;  %v12564_v24 = vld [vmem:[%s14738_s1 + $0x388] sm:$0xff]  }
 0x304   : > { %7304 = vmatprep.subr.bf16.mxu1 %v11362_v36  ;;  %7285 = vmatpush3.bf16.msra.mxu0 %v12549_v61  ;;  %v12570_v36 = vld [vmem:[%s14738_s1 + $0x3c0] sm:$0xff]  }
 0x305   : > { %7286 = vmatprep.subr.bf16.mxu0 %v12555_v27 }
 0x307   : > { %7305 = vmatpush3.bf16.msra.mxu1 %v11370_v13  ;;  %v12579_v13 = vld [vmem:[%s14738_s1 + $0x380] sm:$0xff]  }
 0x308   : > { %7306 = vmatprep.subr.bf16.mxu1 %v11376_v38  ;;  %7287 = vmatpush3.bf16.msra.mxu0 %v12564_v24  ;;  %v12585_v38 = vld [vmem:[%s14738_s1 + $0x4f8] sm:$0xff]  }
 0x309   : > { %7288 = vmatprep.subr.bf16.mxu0 %v12570_v36  ;;  %15579 = vst [vmem:[#allocation137_spill] sm:$0xff] %v12585_v38 }
 0x30b   : > { %7307 = vmatpush3.bf16.msra.mxu1 %v11392_v3 }
 0x30c   : > { %7308 = vmatprep.subr.bf16.mxu1 %v11401_v32  ;;  %7289 = vmatpush3.bf16.msra.mxu0 %v12579_v13  ;;  %v12598_v32 = vld [vmem:[%s14738_s1 + $0x4b8] sm:$0xff]  }
 0x30d   : > { %7318 = vmatprep.subr.bf16.mxu0 %v12585_v38  ;;  %15580 = vst [vmem:[#allocation138_spill] sm:$0xff] %v12598_v32 }
 0x30f   : > { %7309 = vmatpush3.bf16.msra.mxu1 %v11423_v7  ;;  %v12591_v3 = vpop.f32.mrf.mxu0  ;;  %4182 = vmatmul.mubr.bf16.vlgmr.msra.gmra.mxu0 %v11819_v33  ;;  %v12606_v7 = vld [vmem:[%s14738_s1 + $0x4f0] sm:$0xff]  }
 0x310   : > { %7310 = vmatprep.subr.bf16.mxu1 %v11429_v51  ;;  %7319 = vmatpush3.bf16.msra.mxu0 %v12598_v32  ;;  %15581 = vst [vmem:[#allocation139_spill] sm:$0xff] %v12606_v7  ;;  %v12612_v51 = vld [vmem:[%s9354_s25 + $0xf8] sm:$0xf]  ;;  %v12622_v32 = vld [vmem:[%s9354_s25 + $0x70] sm:$0xf] }
 0x311   : > { %v12601_v34 = vpop.f32.mrf.mxu0  ;;  %7320 = vmatprep.subr.bf16.mxu0 %v12606_v7  ;;  %4261 = vmatprep.mubr.bf16.mxu0 %v12588_v2  ;;  %v12627_v7 = vld [vmem:[%s14738_s1 + $0x4e8] sm:$0xff]  }
 0x312   : > { %15582 = vst [vmem:[#allocation140_spill] sm:$0xff] %v12627_v7 }
 0x313   : > { %7311 = vmatpush3.bf16.msra.mxu1 %v11447_v41  ;;  %v7042_v8 = vpop.f32.mrf.mxu0 }
 0x314   : > { %7340 = vmatprep.subr.bf16.mxu1 %v11453_v44  ;;  %7321 = vmatpush3.bf16.msra.mxu0 %v12618_v11  ;;  %v12630_v41 = vpop.f32.mrf.mxu1  ;;  %v12647_v8 = vld [vmem:[%s14738_s1 + $0x4e0] sm:$0xff]  }
 0x315   : > { %v7043_v38 = vpop.f32.mrf.mxu0  ;;  %7322 = vmatprep.subr.bf16.mxu0 %v12627_v7  ;;  %v6067_v7 = vcombine.low %v12612_v51, %v12612_v51 }
 0x316   : > { %4222 = vmatmul.mubr.bf16.vlgmr.msra.gmra.mxu1 %v12612_v51  ;;  %v12635_v44 = vpop.f32.mrf.mxu1  ;;  %v12641_v38 = vld [vmem:[%s14738_s1 + $0x4a8] sm:$0xff]  }
 0x317   : > { %7341 = vmatpush3.bf16.msra.mxu1 %v11474_v48  ;;  %4301 = vmatprep.mubr.bf16.mxu1 %v12622_v32  ;;  %15583 = vst [vmem:[#allocation141_spill] sm:$0xff] %v12641_v38 }
 0x318   : > { %7342 = vmatprep.subr.bf16.mxu1 %v11482_v56  ;;  %7323 = vmatpush3.bf16.msra.mxu0 %v12641_v38  ;;  %v7064_v48 = vpop.f32.mrf.mxu1  ;;  %v12655_v56 = vld [vmem:[%s14738_s1 + $0x4a0] sm:$0xff]  }
 0x319   : > { %7324 = vmatprep.subr.bf16.mxu0 %v12647_v8 }
 0x31a   : > { %v7065_v38 = vpop.f32.mrf.mxu1 }
 0x31b   : > { %7343 = vmatpush3.bf16.msra.mxu1 %v11505_v62  ;;  %v6047_v62 = vcombine.low %v12622_v32, %v12622_v32 }
 0x31c   : > { %7344 = vmatprep.subr.bf16.mxu1 %v11511_v25  ;;  %7325 = vmatpush3.bf16.msra.mxu0 %v12655_v56  ;;  %v541_v25 = vshll.u32 %v6067_v7, 16 }
 0x31d   : > { %7326 = vmatprep.subr.bf16.mxu0 %v11386_v14  ;;  %v359_v14 = vshll.u32 %v6047_v62, 16 }
 0x31e   : > { %v543_v38 = vrot.slane %v541_v25, 1  ;;  %v15591_v25 = vld [vmem:[#allocation6_spill] sm:$0xff] }
 0x31f   : > { %7345 = vmatpush3.bf16.msra.mxu1 %v11531_v63  ;;  %v539_v63 = vshrl.u32 %v6067_v7, 16  ;;  %v15590_v7 = vld [vmem:[#allocation16_spill] sm:$0xff] }
 0x320   : > { %7346 = vmatprep.subr.bf16.mxu1 %v11537_v39  ;;  %7327 = vmatpush3.bf16.msra.mxu0 %v11409_v12  ;;  %v357_v12 = vshrl.u32 %v6047_v62, 16 }
 0x321   : > { %7328 = vmatprep.subr.bf16.mxu0 %v11417_v57  ;;  %v361_v57 = vrot.slane %v359_v14, 1  ;;  %v12676_v39 = vor.u32 %v543_v38, %v539_v63  ;;  %v15592_v14 = vld [vmem:[#allocation7_spill] sm:$0xff]  ;;  %v15593_v38 = vld [vmem:[#allocation18_spill] sm:$0xff] }
 0x323   : > { %7347 = vmatpush3.bf16.msra.mxu1 %v11555_v49  ;;  %v15586_v49 = vld [vmem:[#allocation15_spill] sm:$0xff] }
 0x324   : > { %7348 = vmatprep.subr.bf16.mxu1 %v11561_v21  ;;  %7329 = vmatpush3.bf16.msra.mxu0 %v11435_v20  ;;  %v15584_v20 = vld [vmem:[#allocation3_spill] sm:$0xff]  ;;  %v15587_v21 = vld [vmem:[#allocation4_spill] sm:$0xff] }
 0x325   : > { %7330 = vmatprep.subr.bf16.mxu0 %v11441_v9  ;;  %v12681_v9 = vor.u32 %v361_v57, %v357_v12  ;;  %v15594_v57 = vld [vmem:[#allocation8_spill] sm:$0xff] }
 0x327   : > { %7349 = vmatpush3.bf16.msra.mxu1 %v11579_v4  ;;  %v15588_v4 = vld [vmem:[#allocation12_spill] sm:$0xff] }
 0x328   : > { %7350 = vmatprep.subr.bf16.mxu1 %v11585_v47  ;;  %7331 = vmatpush3.bf16.msra.mxu0 %v11459_v28 }
 0x329   : > { %7332 = vmatprep.subr.bf16.mxu0 %v11468_v45  ;;  %v15585_v45 = vld [vmem:[#allocation10_spill] sm:$0xff] }
 0x32b   : > { %7351 = vmatpush3.bf16.msra.mxu1 %v11608_v42 }
 0x32c   : > { %7352 = vmatprep.subr.bf16.mxu1 %v11614_v31  ;;  %7333 = vmatpush3.bf16.msra.mxu0 %v11491_v59  ;;  %v12691_v59 = vld [vmem:[%s9354_s25 + $0x28] sm:$0xf] }
 0x32d   : > { %7362 = vmatprep.subr.bf16.mxu0 %v15584_v20  ;;  %v7041_v20 = vadd.f32 %v12601_v34, %v12591_v3  ;;  %v15598_v3 = vld [vmem:[#allocation24_spill] sm:$0xff] }
 0x32f   : > { %7353 = vmatpush3.bf16.msra.mxu1 %v11637_v1  ;;  %v7083_v28 = vpop.f32.mrf.mxu0  ;;  %4262 = vmatmul.mubr.bf16.vlgmr.msra.gmra.mxu0 %v12676_v39  ;;  %v15589_v1 = vld [vmem:[#allocation5_spill] sm:$0xff] }
 0x330   : > { %7354 = vmatprep.subr.bf16.mxu1 %v15585_v45  ;;  %7363 = vmatpush3.bf16.msra.mxu0 %v15586_v49  ;;  %v15595_v45 = vld [vmem:[#allocation9_spill] sm:$0xff] }
 0x331   : > { %v7084_v42 = vpop.f32.mrf.mxu0  ;;  %7364 = vmatprep.subr.bf16.mxu0 %v15587_v21  ;;  %4341 = vmatprep.mubr.bf16.mxu0 %v12681_v9  ;;  %v3698_v21 = vadd.f32 %v7041_v20, %v12514_v6  ;;  %v15600_v6 = vld [vmem:[#allocation27_spill] sm:$0xff]  ;;  %v15606_v20 = vld [vmem:[#allocation46_spill] sm:$0xff] }
 0x332   : > { %v7085_v34 = vadd.f32 %v7084_v42, %v7083_v28  ;;  %v15601_v28 = vld [vmem:[#allocation14_spill] sm:$0xff] }
 0x333   : > { %7355 = vmatpush3.bf16.msra.mxu1 %v15588_v4  ;;  %v7086_v47 = vpop.f32.mrf.mxu0  ;;  %v15597_v4 = vld [vmem:[#allocation11_spill] sm:$0xff] }
 0x334   : > { %8272 = vmatprep.subr.bf16.mxu1 %v15178_v40  ;;  %7365 = vmatpush3.bf16.msra.mxu0 %v15589_v1  ;;  %v7105_v48 = vpop.f32.mrf.mxu1 }
 0x335   : > { %v7087_v31 = vpop.f32.mrf.mxu0  ;;  %7366 = vmatprep.subr.bf16.mxu0 %v15590_v7 }
 0x336   : > { %4302 = vmatmul.mubr.bf16.vlgmr.msra.gmra.mxu1 %v12691_v59  ;;  %v7106_v62 = vpop.f32.mrf.mxu1 }
 0x337   : > { %8273 = vmatpush3.bf16.msra.mxu1 %v11683_v26  ;;  %8288 = vmatprep.mubr.msk.bf16.mxu1 %vm9228_vm0, %v15178_v40  ;;  %v6040_v26 = vcombine.low %v12691_v59, %v12691_v59 }
 0x338   : > { %8274 = vmatprep.subr.bf16.mxu1 %v15178_v40  ;;  %7367 = vmatpush3.bf16.msra.mxu0 %v15591_v25  ;;  %v7108_v63 = vpop.f32.mrf.mxu1  ;;  %v183_v25 = vld [vmem:[%s9354_s25 + $0x2c] sm:$0x1] }
 0x339   : > { %7368 = vmatprep.subr.bf16.mxu0 %v15592_v14  ;;  %v282_v49 = vshll.u32 %v6040_v26, 16  ;;  %v280_v47 = vshrl.u32 %v6040_v26, 16  ;;  %v6054_v14 = vcombine.low %v12691_v59, %v183_v25  ;;  %v15603_v63 = vld [vmem:[#allocation26_spill] sm:$0xff]  ;;  %v15614_v25 = vld [vmem:[#allocation35_spill] sm:$0xff] }
 0x33a   : > { %v7109_v12 = vpop.f32.mrf.mxu1 }
 0x33b   : > { %8275 = vmatpush3.bf16.msra.mxu1 %v11706_v60  ;;  %v15596_v60 = vld [vmem:[#allocation21_spill] sm:$0xff]  ;;  %v284_v1 = vrot.slane %v282_v49, 1  ;;  %v15605_v12 = vld [vmem:[#allocation19_spill] sm:$0xff]  ;;  %v12740_v26 = vrot.slane %v6054_v14, 1  ;;  %v15617_v14 = vld [vmem:[#allocation40_spill] sm:$0xff] }
 0x33c   : > { %8276 = vmatprep.subr.bf16.mxu1 %v15178_v40  ;;  %7369 = vmatpush3.bf16.msra.mxu0 %v15593_v38 }
 0x33d   : > { %7370 = vmatprep.subr.bf16.mxu0 %v15594_v57  ;;  %v12727_v7 = vor.u32 %v284_v1, %v280_v47  ;;  %v15611_v1 = vld [vmem:[#allocation50_spill] sm:$0xff] }
 0x33f   : > { %8277 = vmatpush3.bf16.msra.mxu1 %v11727_v30  ;;  %v7063_v30 = vadd.f32 %v12635_v44, %v12630_v41  ;;  %v7107_v44 = vadd.f32 %v7106_v62, %v7105_v48  ;;  %v15604_v48 = vld [vmem:[#allocation30_spill] sm:$0xff] }
 0x340   : > { %8278 = vmatprep.subr.bf16.mxu1 %v15178_v40  ;;  %7371 = vmatpush3.bf16.msra.mxu0 %v15595_v45  ;;  %v6289_v45 = vld [vmem:[%s11135_s24 + $0x8] sm:$0xf] }
 0x341   : > { %7372 = vmatprep.subr.bf16.mxu0 %v15596_v60  ;;  %v3738_v31 = vadd.f32 %v7063_v30, %v3698_v21  ;;  %v15607_v21 = vld [vmem:[#allocation47_spill] sm:$0xff]  ;;  %v15608_v30 = vld [vmem:[#allocation20_spill] sm:$0xff] }
 0x343   : > { %8279 = vmatpush3.bf16.msra.mxu1 %v11747_v50  ;;  %v15599_v50 = vld [vmem:[#allocation13_spill] sm:$0xff]  ;;  %v3778_v41 = vadd.f32 %v7085_v34, %v3738_v31  ;;  %v15612_v31 = vld [vmem:[#allocation36_spill] sm:$0xff]  ;;  %v13405_v34 = vld [vmem:[%s14738_s1 + $0x608] sm:$0xff]  }
 0x344   : > { %8280 = vmatprep.subr.bf16.mxu1 %v15178_v40  ;;  %7373 = vmatpush3.bf16.msra.mxu0 %v15597_v4  ;;  %15753 = vst [vmem:[#allocation35_spill] sm:$0xff] %v13405_v34 }
 0x345   : > { %7374 = vmatprep.subr.bf16.mxu0 %v15598_v3  ;;  %v3818_v42 = vadd.f32 %v7107_v44, %v3778_v41  ;;  %v15609_v3 = vld [vmem:[#allocation33_spill] sm:$0xff] }
 0x347   : > { %8281 = vmatpush3.bf16.msra.mxu1 %v11769_v5  ;;  %v15602_v5 = vld [vmem:[#allocation17_spill] sm:$0xff] }
 0x348   : > { %8282 = vmatprep.subr.bf16.mxu1 %v15178_v40  ;;  %7375 = vmatpush3.bf16.msra.mxu0 %v15599_v50 }
 0x349   : > { %7376 = vmatprep.subr.bf16.mxu0 %v15600_v6  ;;  %v15613_v6 = vld [vmem:[#allocation22_spill] sm:$0xff] }
 0x34b   : > { %8283 = vmatpush3.bf16.msra.mxu1 %v11788_v55 }
 0x34c   : > { %8284 = vmatprep.subr.bf16.mxu1 %v15178_v40  ;;  %7377 = vmatpush3.bf16.msra.mxu0 %v15601_v28  ;;  %v15615_v28 = vld [vmem:[#allocation54_spill] sm:$0xff] }
 0x34d   : > { %7393 = vmatprep.subr.bf16.mxu0 %v15602_v5  ;;  %v15616_v5 = vld [vmem:[#allocation23_spill] sm:$0xff] }
 0x34f   : > { %8285 = vmatpush3.bf16.msra.mxu1 %v15603_v63  ;;  %v3857_v38 = vpop.f32.mrf.mxu0  ;;  %4342 = vmatmul.mubr.bf16.vlgmr.msra.gmra.mxu0 %v12727_v7  ;;  %v15620_v63 = vld [vmem:[#allocation25_spill] sm:$0xff] }
 0x350   : > { %8286 = vmatprep.subr.bf16.mxu1 %v15178_v40  ;;  %v3858_v55 = vadd.f32 %v3857_v38, %v3818_v42  ;;  %7394 = vmatpush3.bf16.msra.mxu0 %v15604_v48  ;;  %v15621_v38 = vld [vmem:[#allocation43_spill] sm:$0xff]  ;;  %v15623_v48 = vld [vmem:[#allocation28_spill] sm:$0xff] }
 0x351   : > { %v8270_v62 = vpop.f32.mrf.mxu0  ;;  %7395 = vmatprep.subr.bf16.mxu0 %v15605_v12  ;;  %4427 = vmatprep.mubr.bf16.mxu0 %v11396_v43  ;;  %v15625_v12 = vld [vmem:[#allocation45_spill] sm:$0xff] }
 0x352   : > { %v3863_v57 = vmax.f32 %v3858_v55, 0.0  ;;  %v15622_v55 = vld [vmem:[#allocation62_spill] sm:$0xff]  ;;  %v15624_v62 = vld [vmem:[#allocation29_spill] sm:$0xff] }
 0x353   : > { %8287 = vmatpush3.bf16.msra.mxu1 %v15606_v20  ;;  %v3860_v60 = vpop.f32.mrf.mxu0  ;;  %v15627_v20 = vld [vmem:[#allocation31_spill] sm:$0xff] }
 0x354   : > { %v3864_v49 = vpack.c.bf16 %v3863_v57, %v3863_v57  ;;  %7415 = vmatprep.subr.bf16.mxu1 %v15607_v21  ;;  %7396 = vmatpush3.bf16.msra.mxu0 %v15608_v30  ;;  %v7136_v43 = vpop.f32.mrf.mxu1  ;;  %v15626_v57 = vld [vmem:[#allocation38_spill] sm:$0xff]  ;;  %v15630_v60 = vld [vmem:[#allocation49_spill] sm:$0xff]  ;;  %v15633_v30 = vld [vmem:[#allocation72_spill] sm:$0xff] }
 0x355   : > { %v8271_v4 = vpop.f32.mrf.mxu0  ;;  %7397 = vmatprep.subr.bf16.mxu0 %v15609_v3  ;;  %v15632_v21 = vld [vmem:[#allocation34_spill] sm:$0xff]  ;;  %v15634_v3 = vld [vmem:[#allocation73_spill] sm:$0xff] }
 0x356   : > { %v3867_v47 = vsel %vm11143_vm3, %v3864_v49, %v6289_v45  ;;  %8289 = vmatmul.mubr.bf16.vlgmr.msra.gmra.mxu1 %v12740_v26  ;;  %v7137_v50 = vpop.f32.mrf.mxu1  ;;  %v15629_v45 = vld [vmem:[#allocation48_spill] sm:$0xff]  ;;  %v15631_v49 = vld [vmem:[#allocation51_spill] sm:$0xff] }
 0x357   : > { %6290 = vst [vmem:[%s11135_s24 + $0x8] sm:$0xf] %v3867_v47  ;;  %7416 = vmatpush3.bf16.msra.mxu1 %v15611_v1  ;;  %4467 = vmatprep.mubr.bf16.mxu1 %v11494_v0  ;;  %v7138_v41 = vadd.f32 %v7137_v50, %v7136_v43  ;;  %v15618_v0 = vld [vmem:[#allocation58_spill] sm:$0xff]  ;;  %v15635_v47 = vld [vmem:[#allocation37_spill] sm:$0xff]  ;;  %v15636_v1 = vld [vmem:[#allocation39_spill] sm:$0xff] }
 0x358   : > { %7417 = vmatprep.subr.bf16.mxu1 %v11861_v29  ;;  %7398 = vmatpush3.bf16.msra.mxu0 %v15612_v31  ;;  %v7139_v44 = vpop.f32.mrf.mxu1  ;;  %v15619_v29 = vld [vmem:[#allocation41_spill] sm:$0xff]  ;;  %v15637_v31 = vld [vmem:[#allocation55_spill] sm:$0xff] }
 0x359   : > { %7399 = vmatprep.subr.bf16.mxu0 %v15613_v6  ;;  %v3904_v50 = vadd.f32 %v15637_v31, %v7138_v41  ;;  %v15638_v44 = vld [vmem:[#allocation76_spill] sm:$0xff]  ;;  %v15643_v41 = vld [vmem:[#allocation63_spill] sm:$0xff] }
 0x35a   : > { %v7140_v42 = vpop.f32.mrf.mxu1  ;;  %v15662_v31 = vld [vmem:[#allocation100_spill] sm:$0xff] }
 0x35b   : > { %7418 = vmatpush3.bf16.msra.mxu1 %v15614_v25  ;;  %v15640_v42 = vld [vmem:[#allocation59_spill] sm:$0xff] }
 0x35c   : > { %7419 = vmatprep.subr.bf16.mxu1 %v15615_v28  ;;  %7400 = vmatpush3.bf16.msra.mxu0 %v15616_v5  ;;  %v15639_v5 = vld [vmem:[#allocation77_spill] sm:$0xff] }
 0x35d   : > { %7401 = vmatprep.subr.bf16.mxu0 %v15617_v14  ;;  %v15641_v14 = vld [vmem:[#allocation42_spill] sm:$0xff] }
 0x35f   : > { %7420 = vmatpush3.bf16.msra.mxu1 %v11912_v17  ;;  %v15628_v17 = vld [vmem:[#allocation32_spill] sm:$0xff] }
 0x360   : > { %7421 = vmatprep.subr.bf16.mxu1 %v15618_v0  ;;  %7402 = vmatpush3.bf16.msra.mxu0 %v15619_v29  ;;  %v15642_v29 = vld [vmem:[#allocation80_spill] sm:$0xff] }
 0x361   : > { %7403 = vmatprep.subr.bf16.mxu0 %v15620_v63 }
 0x363   : > { %7422 = vmatpush3.bf16.msra.mxu1 %v15621_v38  ;;  %v15644_v38 = vld [vmem:[#allocation44_spill] sm:$0xff] }
 0x364   : > { %7423 = vmatprep.subr.bf16.mxu1 %v15622_v55  ;;  %7404 = vmatpush3.bf16.msra.mxu0 %v15623_v48 }
 0x365   : > { %7405 = vmatprep.subr.bf16.mxu0 %v15624_v62  ;;  %v15645_v62 = vld [vmem:[#allocation65_spill] sm:$0xff] }
 0x367   : > { %7424 = vmatpush3.bf16.msra.mxu1 %v15625_v12  ;;  %v15646_v12 = vld [vmem:[#allocation84_spill] sm:$0xff] }
 0x368   : > { %7425 = vmatprep.subr.bf16.mxu1 %v15626_v57  ;;  %7406 = vmatpush3.bf16.msra.mxu0 %v15627_v20  ;;  %v15647_v57 = vld [vmem:[#allocation66_spill] sm:$0xff]  ;;  %v15648_v20 = vld [vmem:[#allocation67_spill] sm:$0xff] }
 0x369   : > { %7407 = vmatprep.subr.bf16.mxu0 %v15628_v17  ;;  %v15650_v17 = vld [vmem:[#allocation88_spill] sm:$0xff] }
 0x36b   : > { %7426 = vmatpush3.bf16.msra.mxu1 %v15629_v45  ;;  %v15652_v45 = vld [vmem:[#allocation53_spill] sm:$0xff] }
 0x36c   : > { %7427 = vmatprep.subr.bf16.mxu1 %v15630_v60  ;;  %7408 = vmatpush3.bf16.msra.mxu0 %v15631_v49  ;;  %v15653_v60 = vld [vmem:[#allocation71_spill] sm:$0xff]  ;;  %v15654_v49 = vld [vmem:[#allocation92_spill] sm:$0xff] }
 0x36d   : > { %7437 = vmatprep.subr.bf16.mxu0 %v15632_v21  ;;  %v15655_v21 = vld [vmem:[#allocation56_spill] sm:$0xff] }
 0x36f   : > { %7428 = vmatpush3.bf16.msra.mxu1 %v15633_v30  ;;  %v7158_v4 = vpop.f32.mrf.mxu0  ;;  %4428 = vmatmul.mubr.bf16.vlgmr.msra.gmra.mxu0 %v11595_v58  ;;  %v15656_v30 = vld [vmem:[#allocation57_spill] sm:$0xff] }
 0x370   : > { %7429 = vmatprep.subr.bf16.mxu1 %v15634_v3  ;;  %7438 = vmatpush3.bf16.msra.mxu0 %v15635_v47  ;;  %v15658_v3 = vld [vmem:[#allocation96_spill] sm:$0xff] }
 0x371   : > { %v7159_v43 = vpop.f32.mrf.mxu0  ;;  %7439 = vmatprep.subr.bf16.mxu0 %v15636_v1  ;;  %4507 = vmatprep.mubr.bf16.mxu0 %v12382_v23  ;;  %v15659_v47 = vld [vmem:[#allocation60_spill] sm:$0xff]  ;;  %v15661_v1 = vld [vmem:[#allocation79_spill] sm:$0xff] }
 0x372   : > { %v7160_v6 = vadd.f32 %v7159_v43, %v7158_v4  ;;  %v15657_v4 = vld [vmem:[#allocation75_spill] sm:$0xff]  ;;  %v15660_v43 = vld [vmem:[#allocation61_spill] sm:$0xff] }
 0x373   : > { %7430 = vmatpush3.bf16.msra.mxu1 %v15638_v44  ;;  %v7161_v25 = vpop.f32.mrf.mxu0  ;;  %v15665_v44 = vld [vmem:[#allocation83_spill] sm:$0xff] }
 0x374   : > { %v3944_v28 = vadd.f32 %v7160_v6, %v3904_v50  ;;  %7459 = vmatprep.subr.bf16.mxu1 %v15639_v5  ;;  %7440 = vmatpush3.bf16.msra.mxu0 %v15640_v42  ;;  %v15663_v50 = vld [vmem:[#allocation81_spill] sm:$0xff]  ;;  %v15664_v6 = vld [vmem:[#allocation64_spill] sm:$0xff] }
 0x375   : > { %v7162_v58 = vpop.f32.mrf.mxu0  ;;  %7441 = vmatprep.subr.bf16.mxu0 %v15641_v14  ;;  %v15667_v5 = vld [vmem:[#allocation85_spill] sm:$0xff] }
 0x376   : > { %v7180_v0 = vpop.f32.mrf.mxu1  ;;  %4468 = vmatmul.mubr.bf16.vlgmr.msra.gmra.mxu1 %v11689_v16  ;;  %v15668_v58 = vld [vmem:[#allocation68_spill] sm:$0xff] }
 0x377   : > { %7460 = vmatpush3.bf16.msra.mxu1 %v15642_v29  ;;  %4547 = vmatprep.mubr.bf16.mxu1 %v12472_v35  ;;  %v15649_v35 = vld [vmem:[#allocation69_spill] sm:$0xff] }
 0x378   : > { %v7181_v23 = vpop.f32.mrf.mxu1  ;;  %7461 = vmatprep.subr.bf16.mxu1 %v12063_v10  ;;  %7442 = vmatpush3.bf16.msra.mxu0 %v15643_v41  ;;  %v15651_v10 = vld [vmem:[#allocation52_spill] sm:$0xff] }
 0x379   : > { %v7182_v63 = vadd.f32 %v7181_v23, %v7180_v0  ;;  %7443 = vmatprep.subr.bf16.mxu0 %v15644_v38  ;;  %v15669_v0 = vld [vmem:[#allocation87_spill] sm:$0xff]  ;;  %v15670_v41 = vld [vmem:[#allocation108_spill] sm:$0xff] }
 0x37a   : > { %v7183_v55 = vpop.f32.mrf.mxu1 }
 0x37b   : > { %v3984_v48 = vadd.f32 %v7182_v63, %v3944_v28  ;;  %7462 = vmatpush3.bf16.msra.mxu1 %v15645_v62  ;;  %v15666_v28 = vld [vmem:[#allocation104_spill] sm:$0xff]  ;;  %v15671_v63 = vld [vmem:[#allocation89_spill] sm:$0xff]  ;;  %v15673_v62 = vld [vmem:[#allocation91_spill] sm:$0xff] }
 0x37c   : > { %7463 = vmatprep.subr.bf16.mxu1 %v15646_v12  ;;  %7444 = vmatpush3.bf16.msra.mxu0 %v15647_v57  ;;  %v7184_v16 = vpop.f32.mrf.mxu1  ;;  %v15674_v12 = vld [vmem:[#allocation112_spill] sm:$0xff]  ;;  %v15675_v57 = vld [vmem:[#allocation93_spill] sm:$0xff] }
 0x37d   : > { %7445 = vmatprep.subr.bf16.mxu0 %v15648_v20  ;;  %v15676_v16 = vld [vmem:[#allocation74_spill] sm:$0xff] }
 0x37f   : > { %7464 = vmatpush3.bf16.msra.mxu1 %v15649_v35 }
 0x380   : > { %7465 = vmatprep.subr.bf16.mxu1 %v15650_v17  ;;  %7446 = vmatpush3.bf16.msra.mxu0 %v15651_v10  ;;  %v15677_v17 = vld [vmem:[#allocation95_spill] sm:$0xff]  ;;  %v15678_v10 = vld [vmem:[#allocation116_spill] sm:$0xff] }
 0x381   : > { %7447 = vmatprep.subr.bf16.mxu0 %v15652_v45  ;;  %v15679_v45 = vld [vmem:[#allocation97_spill] sm:$0xff] }
 0x383   : > { %7466 = vmatpush3.bf16.msra.mxu1 %v15653_v60  ;;  %v15680_v60 = vld [vmem:[#allocation78_spill] sm:$0xff] }
 0x384   : > { %7467 = vmatprep.subr.bf16.mxu1 %v15654_v49  ;;  %7448 = vmatpush3.bf16.msra.mxu0 %v15655_v21  ;;  %v15681_v49 = vld [vmem:[#allocation99_spill] sm:$0xff]  ;;  %v15682_v21 = vld [vmem:[#allocation120_spill] sm:$0xff] }
 0x385   : > { %7449 = vmatprep.subr.bf16.mxu0 %v15656_v30  ;;  %v15683_v30 = vld [vmem:[#allocation101_spill] sm:$0xff] }
 0x387   : > { %7468 = vmatpush3.bf16.msra.mxu1 %v15657_v4  ;;  %v15684_v4 = vld [vmem:[#allocation82_spill] sm:$0xff] }
 0x388   : > { %7469 = vmatprep.subr.bf16.mxu1 %v15658_v3  ;;  %7450 = vmatpush3.bf16.msra.mxu0 %v15659_v47  ;;  %v15685_v3 = vld [vmem:[#allocation103_spill] sm:$0xff]  ;;  %v15686_v47 = vld [vmem:[#allocation124_spill] sm:$0xff] }
 0x389   : > { %7451 = vmatprep.subr.bf16.mxu0 %v15660_v43  ;;  %v15687_v43 = vld [vmem:[#allocation105_spill] sm:$0xff] }
 0x38b   : > { %7470 = vmatpush3.bf16.msra.mxu1 %v15661_v1  ;;  %v15688_v1 = vld [vmem:[#allocation86_spill] sm:$0xff] }
 0x38c   : > { %7471 = vmatprep.subr.bf16.mxu1 %v15662_v31  ;;  %7452 = vmatpush3.bf16.msra.mxu0 %v15663_v50  ;;  %v15689_v31 = vld [vmem:[#allocation107_spill] sm:$0xff]  ;;  %v15690_v50 = vld [vmem:[#allocation128_spill] sm:$0xff] }
 0x38d   : > { %7481 = vmatprep.subr.bf16.mxu0 %v15664_v6  ;;  %v15691_v6 = vld [vmem:[#allocation109_spill] sm:$0xff] }
 0x38f   : > { %7472 = vmatpush3.bf16.msra.mxu1 %v15665_v44  ;;  %v7202_v25 = vpop.f32.mrf.mxu0  ;;  %4508 = vmatmul.mubr.bf16.vlgmr.msra.gmra.mxu0 %v11819_v33  ;;  %v15672_v33 = vld [vmem:[#allocation70_spill] sm:$0xff] }
 0x390   : > { %7473 = vmatprep.subr.bf16.mxu1 %v15666_v28  ;;  %7482 = vmatpush3.bf16.msra.mxu0 %v15667_v5  ;;  %v15692_v44 = vld [vmem:[#allocation90_spill] sm:$0xff]  ;;  %v15694_v28 = vld [vmem:[#allocation132_spill] sm:$0xff]  ;;  %v15695_v5 = vld [vmem:[#allocation113_spill] sm:$0xff] }
 0x391   : > { %v7203_v42 = vpop.f32.mrf.mxu0  ;;  %7483 = vmatprep.subr.bf16.mxu0 %v15668_v58  ;;  %4587 = vmatprep.mubr.bf16.mxu0 %v12588_v2  ;;  %v15697_v58 = vld [vmem:[#allocation115_spill] sm:$0xff] }
 0x392   : > { %v7204_v14 = vadd.f32 %v7203_v42, %v7202_v25  ;;  %v15693_v25 = vld [vmem:[#allocation111_spill] sm:$0xff]  ;;  %v15696_v42 = vld [vmem:[#allocation94_spill] sm:$0xff] }
 0x393   : > { %7474 = vmatpush3.bf16.msra.mxu1 %v15669_v0  ;;  %v7205_v29 = vpop.f32.mrf.mxu0  ;;  %v15698_v0 = vld [vmem:[#allocation118_spill] sm:$0xff] }
 0x394   : > { %v4024_v23 = vadd.f32 %v7204_v14, %v3984_v48  ;;  %7503 = vmatprep.subr.bf16.mxu1 %v15670_v41  ;;  %7484 = vmatpush3.bf16.msra.mxu0 %v15671_v63  ;;  %v15699_v29 = vld [vmem:[#allocation117_spill] sm:$0xff]  ;;  %v15700_v41 = vld [vmem:[#allocation98_spill] sm:$0xff] }
 0x395   : > { %v7206_v38 = vpop.f32.mrf.mxu0  ;;  %7485 = vmatprep.subr.bf16.mxu0 %v15672_v33 }
 0x396   : > { %v7224_v55 = vpop.f32.mrf.mxu1  ;;  %4548 = vmatmul.mubr.bf16.vlgmr.msra.gmra.mxu1 %v12612_v51  ;;  %v15701_v38 = vld [vmem:[#allocation123_spill] sm:$0xff] }
 0x397   : > { %7504 = vmatpush3.bf16.msra.mxu1 %v15673_v62  ;;  %4627 = vmatprep.mubr.bf16.mxu1 %v12622_v32  ;;  %v15702_v62 = vld [vmem:[#allocation126_spill] sm:$0xff] }
 0x398   : > { %v7225_v2 = vpop.f32.mrf.mxu1  ;;  %7505 = vmatprep.subr.bf16.mxu1 %v15674_v12  ;;  %7486 = vmatpush3.bf16.msra.mxu0 %v15675_v57  ;;  %v12859_v12 = vld [vmem:[%s9354_s25 + $0xb8] sm:$0xf]  ;;  %v15704_v57 = vld [vmem:[#allocation102_spill] sm:$0xff] }
 0x399   : > { %v7226_v48 = vadd.f32 %v7225_v2, %v7224_v55  ;;  %7487 = vmatprep.subr.bf16.mxu0 %v15676_v16  ;;  %v15703_v2 = vld [vmem:[#allocation121_spill] sm:$0xff]  ;;  %v15705_v16 = vld [vmem:[#allocation131_spill] sm:$0xff] }
 0x39a   : > { %v7227_v20 = vpop.f32.mrf.mxu1 }
 0x39b   : > { %v4064_v35 = vadd.f32 %v7226_v48, %v4024_v23  ;;  %7506 = vmatpush3.bf16.msra.mxu1 %v15677_v17 }
 0x39c   : > { %7507 = vmatprep.subr.bf16.mxu1 %v15678_v10  ;;  %7488 = vmatpush3.bf16.msra.mxu0 %v15679_v45  ;;  %v7228_v51 = vpop.f32.mrf.mxu1  ;;  %v15707_v10 = vld [vmem:[#allocation106_spill] sm:$0xff] }
 0x39d   : > { %7489 = vmatprep.subr.bf16.mxu0 %v15680_v60  ;;  %v15708_v60 = vld [vmem:[#allocation129_spill] sm:$0xff] }
 0x39f   : > { %7508 = vmatpush3.bf16.msra.mxu1 %v15681_v49 }
 0x3a0   : > { %7509 = vmatprep.subr.bf16.mxu1 %v15682_v21  ;;  %7490 = vmatpush3.bf16.msra.mxu0 %v15683_v30  ;;  %v15709_v21 = vld [vmem:[#allocation110_spill] sm:$0xff] }
 0x3a1   : > { %7491 = vmatprep.subr.bf16.mxu0 %v15684_v4  ;;  %v15711_v30 = vld [vmem:[#allocation114_spill] sm:$0xff]  ;;  %v6061_v4 = vcombine.low %v12859_v12, %v12859_v12 }
 0x3a3   : > { %7510 = vmatpush3.bf16.msra.mxu1 %v15685_v3  ;;  %v471_v3 = vshll.u32 %v6061_v4, 16 }
 0x3a4   : > { %7511 = vmatprep.subr.bf16.mxu1 %v15686_v47  ;;  %7492 = vmatpush3.bf16.msra.mxu0 %v15687_v43  ;;  %v469_v47 = vshrl.u32 %v6061_v4, 16 }
 0x3a5   : > { %7493 = vmatprep.subr.bf16.mxu0 %v15688_v1  ;;  %v473_v43 = vrot.slane %v471_v3, 1  ;;  %v15717_v1 = vld [vmem:[#allocation135_spill] sm:$0xff] }
 0x3a7   : > { %7512 = vmatpush3.bf16.msra.mxu1 %v15689_v31  ;;  %v12893_v31 = vor.u32 %v473_v43, %v469_v47  ;;  %v13070_v47 = vld [vmem:[%s14738_s1 + $0x538] sm:$0xff]  }
 0x3a8   : > { %7513 = vmatprep.subr.bf16.mxu1 %v15690_v50  ;;  %7494 = vmatpush3.bf16.msra.mxu0 %v15691_v6  ;;  %v12907_v50 = vld [vmem:[%s14738_s1 + $0x470] sm:$0xff]  }
 0x3a9   : > { %7495 = vmatprep.subr.bf16.mxu0 %v15692_v44  ;;  %v15719_v44 = vld [vmem:[#allocation137_spill] sm:$0xff] }
 0x3ab   : > { %7514 = vmatpush3.bf16.msra.mxu1 %v15693_v25 }
 0x3ac   : > { %7515 = vmatprep.subr.bf16.mxu1 %v15694_v28  ;;  %7496 = vmatpush3.bf16.msra.mxu0 %v15695_v5  ;;  %v12924_v28 = vld [vmem:[%s14738_s1 + $0x468] sm:$0xff]   ;;  %v15720_v5 = vld [vmem:[#allocation138_spill] sm:$0xff] }
 0x3ad   : > { %7525 = vmatprep.subr.bf16.mxu0 %v15696_v42 }
 0x3af   : > { %7516 = vmatpush3.bf16.msra.mxu1 %v15697_v58  ;;  %v7246_v14 = vpop.f32.mrf.mxu0  ;;  %4588 = vmatmul.mubr.bf16.vlgmr.msra.gmra.mxu0 %v12676_v39  ;;  %v15721_v58 = vld [vmem:[#allocation139_spill] sm:$0xff] }
 0x3b0   : > { %7517 = vmatprep.subr.bf16.mxu1 %v15698_v0  ;;  %7526 = vmatpush3.bf16.msra.mxu0 %v15699_v29  ;;  %v12944_v0 = vld [vmem:[%s14738_s1 + $0x460] sm:$0xff]  }
 0x3b1   : > { %v7247_v23 = vpop.f32.mrf.mxu0  ;;  %7527 = vmatprep.subr.bf16.mxu0 %v15700_v41  ;;  %4667 = vmatprep.mubr.bf16.mxu0 %v12681_v9  ;;  %v12952_v41 = vld [vmem:[%s14738_s1 + $0x420] sm:$0xff]  }
 0x3b2   : > { %v7248_v63 = vadd.f32 %v7247_v23, %v7246_v14  ;;  %v12938_v14 = vld [vmem:[%s14738_s1 + $0x428] sm:$0xff]   ;;  %v15722_v23 = vld [vmem:[#allocation140_spill] sm:$0xff] }
 0x3b3   : > { %7518 = vmatpush3.bf16.msra.mxu1 %v15701_v38  ;;  %v7249_v33 = vpop.f32.mrf.mxu0  ;;  %v12958_v38 = vld [vmem:[%s14738_s1 + $0x458] sm:$0xff]  }
 0x3b4   : > { %v4104_v55 = vadd.f32 %v7248_v63, %v4064_v35  ;;  %7547 = vmatprep.subr.bf16.mxu1 %v15702_v62  ;;  %7528 = vmatpush3.bf16.msra.mxu0 %v15703_v2  ;;  %v15706_v35 = vld [vmem:[#allocation125_spill] sm:$0xff]  ;;  %v12977_v62 = vld [vmem:[%s9354_s25 + $0x100] sm:$0xf]  ;;  %v12988_v2 = vld [vmem:[%s14738_s1 + $0x410] sm:$0xff]  }
 0x3b5   : > { %v7250_v39 = vpop.f32.mrf.mxu0  ;;  %7529 = vmatprep.subr.bf16.mxu0 %v15704_v57  ;;  %v15723_v33 = vld [vmem:[#allocation141_spill] sm:$0xff]  ;;  %v6068_v57 = vcombine.low %v12977_v62, %v12977_v62 }
 0x3b6   : > { %v7268_v48 = vpop.f32.mrf.mxu1  ;;  %4628 = vmatmul.mubr.bf16.vlgmr.msra.gmra.mxu1 %v12691_v59  ;;  %v12992_v39 = vld [vmem:[%s9354_s25 + $0x78] sm:$0xf] }
 0x3b7   : > { %7548 = vmatpush3.bf16.msra.mxu1 %v15705_v16  ;;  %4707 = vmatprep.mubr.bf16.mxu1 %v12859_v12  ;;  %v6048_v16 = vcombine.low %v12992_v39, %v12992_v39 }
 0x3b8   : > { %v7269_v20 = vpop.f32.mrf.mxu1  ;;  %7549 = vmatprep.subr.bf16.mxu1 %v12462_v19  ;;  %7530 = vmatpush3.bf16.msra.mxu0 %v15706_v35  ;;  %v15710_v19 = vld [vmem:[#allocation133_spill] sm:$0xff]  ;;  %v13019_v35 = vld [vmem:[%s14738_s1 + $0x408] sm:$0xff]  }
 0x3b9   : > { %v7270_v17 = vadd.f32 %v7269_v20, %v7268_v48  ;;  %7531 = vmatprep.subr.bf16.mxu0 %v15707_v10  ;;  %v13005_v48 = vld [vmem:[%s14738_s1 + $0x498] sm:$0xff]   ;;  %v13013_v20 = vld [vmem:[%s14738_s1 + $0x4d0] sm:$0xff]   ;;  %v548_v10 = vshll.u32 %v6068_v57, 16  ;;  %v364_v3 = vshrl.u32 %v6048_v16, 16 }
 0x3ba   : > { %v7271_v45 = vpop.f32.mrf.mxu1 }
 0x3bb   : > { %v12868_v51 = vadd.f32 %v7270_v17, %v4104_v55  ;;  %7550 = vmatpush3.bf16.msra.mxu1 %v12484_v46  ;;  %v15712_v46 = vld [vmem:[#allocation119_spill] sm:$0xff]  ;;  %v12972_v55 = vld [vmem:[%s14738_s1 + $0x450] sm:$0xff]   ;;  %v13025_v17 = vld [vmem:[%s14738_s1 + $0x440] sm:$0xff]   ;;  %v550_v4 = vrot.slane %v548_v10, 1 }
 0x3bc   : > { %7551 = vmatprep.subr.bf16.mxu1 %v12490_v18  ;;  %7532 = vmatpush3.bf16.msra.mxu0 %v15708_v60  ;;  %v7272_v49 = vpop.f32.mrf.mxu1  ;;  %v15713_v18 = vld [vmem:[#allocation122_spill] sm:$0xff]  ;;  %v13031_v45 = vld [vmem:[%s14738_s1 + $0x490] sm:$0xff]   ;;  %v366_v60 = vshll.u32 %v6048_v16, 16 }
 0x3bd   : > { %7533 = vmatprep.subr.bf16.mxu0 %v15709_v21  ;;  %v13037_v49 = vld [vmem:[%s14738_s1 + $0x4c8] sm:$0xff]   ;;  %v13043_v21 = vld [vmem:[%s14738_s1 + $0x400] sm:$0xff]   ;;  %v13139_v10 = vld [vmem:[%s14738_s1 + $0x5b0] sm:$0xff]  }
 0x3be   : > { %15727 = vst [vmem:[#allocation4_spill] sm:$0xff] %v13139_v10 }
 0x3bf   : > { %7552 = vmatpush3.bf16.msra.mxu1 %v12505_v54  ;;  %v15715_v54 = vld [vmem:[#allocation130_spill] sm:$0xff] }
 0x3c0   : > { %7553 = vmatprep.subr.bf16.mxu1 %v12511_v53  ;;  %7534 = vmatpush3.bf16.msra.mxu0 %v15710_v19  ;;  %v15714_v53 = vld [vmem:[#allocation127_spill] sm:$0xff]  ;;  %v13049_v19 = vld [vmem:[%s14738_s1 + $0x578] sm:$0xff]  }
 0x3c1   : > { %7535 = vmatprep.subr.bf16.mxu0 %v15711_v30  ;;  %v546_v30 = vshrl.u32 %v6068_v57, 16  ;;  %v13133_v57 = vld [vmem:[%s14738_s1 + $0x560] sm:$0xff]  }
 0x3c3   : > { %7554 = vmatpush3.bf16.msra.mxu1 %v12521_v22  ;;  %v15716_v22 = vld [vmem:[#allocation134_spill] sm:$0xff] }
 0x3c4   : > { %7555 = vmatprep.subr.bf16.mxu1 %v12527_v52  ;;  %7536 = vmatpush3.bf16.msra.mxu0 %v15712_v46  ;;  %v210_v52 = vld [vmem:[%s9354_s25 + $0xbc] sm:$0x1]  ;;  %v13055_v46 = vld [vmem:[%s14738_s1 + $0x488] sm:$0xff]  }
 0x3c5   : > { %7537 = vmatprep.subr.bf16.mxu0 %v15713_v18 }
 0x3c7   : > { %7556 = vmatpush3.bf16.msra.mxu1 %v12535_v37 }
 0x3c8   : > { %7557 = vmatprep.subr.bf16.mxu1 %v12541_v15  ;;  %7538 = vmatpush3.bf16.msra.mxu0 %v15714_v53  ;;  %v6075_v15 = vcombine.low %v12859_v12, %v210_v52  ;;  %v368_v53 = vrot.slane %v366_v60, 1  ;;  %v13082_v52 = vor.u32 %v550_v4, %v546_v30  ;;  %v13145_v60 = vld [vmem:[%s14738_s1 + $0x5e8] sm:$0xff]   ;;  %v13151_v30 = vld [vmem:[%s14738_s1 + $0x520] sm:$0xff]  }
 0x3c9   : > { %7539 = vmatprep.subr.bf16.mxu0 %v15715_v54  ;;  %v13064_v54 = vld [vmem:[%s14738_s1 + $0x4c0] sm:$0xff]   ;;  %15728 = vst [vmem:[#allocation12_spill] sm:$0xff] %v13145_v60 }
 0x3ca   : > { %v12912_v6 = vrot.slane %v6075_v15, 1 }
 0x3cb   : > { %7558 = vmatpush3.bf16.msra.mxu1 %v12549_v61  ;;  %v15718_v61 = vld [vmem:[#allocation136_spill] sm:$0xff] }
 0x3cc   : > { %7559 = vmatprep.subr.bf16.mxu1 %v12555_v27  ;;  %7540 = vmatpush3.bf16.msra.mxu0 %v15716_v22  ;;  %v13078_v22 = vld [vmem:[%s14738_s1 + $0x570] sm:$0xff]  }
 0x3cd   : > { %7569 = vmatprep.subr.bf16.mxu0 %v15717_v1  ;;  %v13087_v1 = vld [vmem:[%s14738_s1 + $0x480] sm:$0xff]  }
 0x3cf   : > { %7560 = vmatpush3.bf16.msra.mxu1 %v12564_v24  ;;  %v12896_v37 = vpop.f32.mrf.mxu0  ;;  %4668 = vmatmul.mubr.bf16.vlgmr.msra.gmra.mxu0 %v12727_v7 }
 0x3d0   : > { %7561 = vmatprep.subr.bf16.mxu1 %v12570_v36  ;;  %7570 = vmatpush3.bf16.msra.mxu0 %v15718_v61  ;;  %v12918_v36 = vld [vmem:[%s14738_s1 + $0x430] sm:$0xff]   ;;  %v13090_v61 = vor.u32 %v368_v53, %v364_v3  ;;  %v13157_v3 = vld [vmem:[%s14738_s1 + $0x558] sm:$0xff]   ;;  %v13163_v53 = vld [vmem:[%s14738_s1 + $0x5a8] sm:$0xff]  }
 0x3d1   : > { %v12902_v27 = vpop.f32.mrf.mxu0  ;;  %7571 = vmatprep.subr.bf16.mxu0 %v12907_v50  ;;  %4747 = vmatprep.mubr.bf16.mxu0 %v12893_v31  ;;  %15729 = vst [vmem:[#allocation5_spill] sm:$0xff] %v13163_v53 }
 0x3d3   : > { %7562 = vmatpush3.bf16.msra.mxu1 %v12579_v13  ;;  %v7293_v24 = vpop.f32.mrf.mxu0 }
 0x3d4   : > { %7591 = vmatprep.subr.bf16.mxu1 %v15719_v44  ;;  %7572 = vmatpush3.bf16.msra.mxu0 %v12918_v36  ;;  %v13095_v24 = vld [vmem:[%s14738_s1 + $0x5f8] sm:$0xff]   ;;  %v13101_v44 = vld [vmem:[%s14738_s1 + $0x530] sm:$0xff]  }
 0x3d5   : > { %v7294_v25 = vpop.f32.mrf.mxu0  ;;  %7573 = vmatprep.subr.bf16.mxu0 %v12924_v28  ;;  %15724 = vst [vmem:[#allocation3_spill] sm:$0xff] %v13095_v24 }
 0x3d6   : > { %v12927_v13 = vpop.f32.mrf.mxu1  ;;  %4708 = vmatmul.mubr.bf16.vlgmr.msra.gmra.mxu1 %v12740_v26 }
 0x3d7   : > { %7592 = vmatpush3.bf16.msra.mxu1 %v15720_v5  ;;  %4787 = vmatprep.mubr.bf16.mxu1 %v12912_v6  ;;  %v13107_v5 = vld [vmem:[%s14738_s1 + $0x568] sm:$0xff]  }
 0x3d8   : > { %v12932_v42 = vpop.f32.mrf.mxu1  ;;  %7593 = vmatprep.subr.bf16.mxu1 %v15721_v58  ;;  %7574 = vmatpush3.bf16.msra.mxu0 %v12938_v14 }
 0x3d9   : > { %7575 = vmatprep.subr.bf16.mxu0 %v12944_v0 }
 0x3da   : > { %v7315_v29 = vpop.f32.mrf.mxu1 }
 0x3db   : > { %7594 = vmatpush3.bf16.msra.mxu1 %v12618_v11  ;;  %v12966_v11 = vld [vmem:[%s14738_s1 + $0x418] sm:$0xff]  }
 0x3dc   : > { %7595 = vmatprep.subr.bf16.mxu1 %v15722_v23  ;;  %7576 = vmatpush3.bf16.msra.mxu0 %v12952_v41  ;;  %v7316_v63 = vpop.f32.mrf.mxu1  ;;  %v13114_v29 = vld [vmem:[%s14738_s1 + $0x5b8] sm:$0xff]  }
 0x3dd   : > { %7577 = vmatprep.subr.bf16.mxu0 %v12958_v38  ;;  %15725 = vst [vmem:[#allocation10_spill] sm:$0xff] %v13114_v29  ;;  %v13121_v63 = vld [vmem:[%s14738_s1 + $0x5f0] sm:$0xff]  }
 0x3de   : > { %15726 = vst [vmem:[#allocation15_spill] sm:$0xff] %v13121_v63 }
 0x3df   : > { %7596 = vmatpush3.bf16.msra.mxu1 %v15723_v33  ;;  %v13127_v33 = vld [vmem:[%s14738_s1 + $0x528] sm:$0xff]  }
 0x3e0   : > { %7597 = vmatprep.subr.bf16.mxu1 %v12647_v8  ;;  %7578 = vmatpush3.bf16.msra.mxu0 %v12966_v11  ;;  %v12982_v8 = vld [vmem:[%s14738_s1 + $0x4d8] sm:$0xff]  }
 0x3e1   : > { %7579 = vmatprep.subr.bf16.mxu0 %v12972_v55 }
 0x3e3   : > { %7598 = vmatpush3.bf16.msra.mxu1 %v12655_v56  ;;  %v12997_v56 = vld [vmem:[%s14738_s1 + $0x448] sm:$0xff]  }
 0x3e4   : > { %7599 = vmatprep.subr.bf16.mxu1 %v12982_v8  ;;  %7580 = vmatpush3.bf16.msra.mxu0 %v12988_v2 }
 0x3e5   : > { %7581 = vmatprep.subr.bf16.mxu0 %v12997_v56 }
 0x3e7   : > { %7600 = vmatpush3.bf16.msra.mxu1 %v13005_v48 }
 0x3e8   : > { %7601 = vmatprep.subr.bf16.mxu1 %v13013_v20  ;;  %7582 = vmatpush3.bf16.msra.mxu0 %v13019_v35 }
 0x3e9   : > { %7583 = vmatprep.subr.bf16.mxu0 %v13025_v17 }
 0x3eb   : > { %7602 = vmatpush3.bf16.msra.mxu1 %v13031_v45 }
 0x3ec   : > { %7603 = vmatprep.subr.bf16.mxu1 %v13037_v49  ;;  %7584 = vmatpush3.bf16.msra.mxu0 %v13043_v21 }
 0x3ed   : > { %7613 = vmatprep.subr.bf16.mxu0 %v13049_v19 }
 0x3ef   : > { %7604 = vmatpush3.bf16.msra.mxu1 %v13055_v46  ;;  %v13058_v18 = vpop.f32.mrf.mxu0  ;;  %4748 = vmatmul.mubr.bf16.vlgmr.msra.gmra.mxu0 %v12977_v62 }
 0x3f0   : > { %7605 = vmatprep.subr.bf16.mxu1 %v13064_v54  ;;  %7614 = vmatpush3.bf16.msra.mxu0 %v13070_v47 }
 0x3f1   : > { %v13073_v43 = vpop.f32.mrf.mxu0  ;;  %7615 = vmatprep.subr.bf16.mxu0 %v13078_v22  ;;  %4827 = vmatprep.mubr.bf16.mxu0 %v12992_v39 }
 0x3f3   : > { %7606 = vmatpush3.bf16.msra.mxu1 %v13087_v1  ;;  %v7337_v15 = vpop.f32.mrf.mxu0 }
 0x3f4   : > { %7635 = vmatprep.subr.bf16.mxu1 %v13095_v24  ;;  %7616 = vmatpush3.bf16.msra.mxu0 %v13101_v44  ;;  %v13169_v15 = vld [vmem:[%s14738_s1 + $0x5e0] sm:$0xff]   ;;  %v13233_v24 = vld [vmem:[%s14738_s1 + $0x508] sm:$0xff]  }
 0x3f5   : > { %v7338_v25 = vpop.f32.mrf.mxu0  ;;  %7617 = vmatprep.subr.bf16.mxu0 %v13107_v5  ;;  %15730 = vst [vmem:[#allocation16_spill] sm:$0xff] %v13169_v15 }
 0x3f6   : > { %v7356_v58 = vpop.f32.mrf.mxu1  ;;  %4788 = vmatmul.mubr.bf16.vlgmr.msra.gmra.mxu1 %v13082_v52  ;;  %v13175_v25 = vld [vmem:[%s14738_s1 + $0x518] sm:$0xff]  }
 0x3f7   : > { %7636 = vmatpush3.bf16.msra.mxu1 %v13114_v29  ;;  %4867 = vmatprep.mubr.bf16.mxu1 %v13090_v61  ;;  %v13227_v29 = vld [vmem:[%s14738_s1 + $0x5d0] sm:$0xff]  }
 0x3f8   : > { %v7357_v23 = vpop.f32.mrf.mxu1  ;;  %7637 = vmatprep.subr.bf16.mxu1 %v13121_v63  ;;  %7618 = vmatpush3.bf16.msra.mxu0 %v13127_v33  ;;  %v7314_v63 = vadd.f32 %v12932_v42, %v12927_v13  ;;  %15734 = vst [vmem:[#allocation8_spill] sm:$0xff] %v13227_v29  ;;  %v7336_v13 = vadd.f32 %v13073_v43, %v13058_v18  ;;  %v13259_v18 = vld [vmem:[%s14738_s1 + $0x500] sm:$0xff]  }
 0x3f9   : > { %7619 = vmatprep.subr.bf16.mxu0 %v13133_v57  ;;  %15738 = vst [vmem:[#allocation24_spill] sm:$0xff] %v13259_v18 }
 0x3fa   : > { %v7359_v16 = vpop.f32.mrf.mxu1 }
 0x3fb   : > { %7638 = vmatpush3.bf16.msra.mxu1 %v13139_v10  ;;  %v13181_v16 = vld [vmem:[%s14738_s1 + $0x550] sm:$0xff]  }
 0x3fc   : > { %7639 = vmatprep.subr.bf16.mxu1 %v13145_v60  ;;  %7620 = vmatpush3.bf16.msra.mxu0 %v13151_v30  ;;  %v7360_v4 = vpop.f32.mrf.mxu1  ;;  %v13198_v60 = vld [vmem:[%s14738_s1 + $0x5d8] sm:$0xff]   ;;  %v13204_v10 = vld [vmem:[%s14738_s1 + $0x510] sm:$0xff]  }
 0x3fd   : > { %7621 = vmatprep.subr.bf16.mxu0 %v13157_v3  ;;  %v13187_v4 = vld [vmem:[%s14738_s1 + $0x5a0] sm:$0xff]   ;;  %15732 = vst [vmem:[#allocation7_spill] sm:$0xff] %v13198_v60 }
 0x3fe   : > { %15731 = vst [vmem:[#allocation6_spill] sm:$0xff] %v13187_v4 }
 0x3ff   : > { %7640 = vmatpush3.bf16.msra.mxu1 %v13163_v53  ;;  %v7292_v53 = vadd.f32 %v12902_v27, %v12896_v37  ;;  %v13218_v27 = vld [vmem:[%s14738_s1 + $0x598] sm:$0xff]  }
 0x400   : > { %7641 = vmatprep.subr.bf16.mxu1 %v13169_v15  ;;  %7622 = vmatpush3.bf16.msra.mxu0 %v13175_v25  ;;  %v13191_v15 = vld [vmem:[%s9354_s25 + $0x30] sm:$0xf]  ;;  %15733 = vst [vmem:[#allocation18_spill] sm:$0xff] %v13218_v27 }
 0x401   : > { %7623 = vmatprep.subr.bf16.mxu0 %v13181_v16  ;;  %v6041_v37 = vcombine.low %v13191_v15, %v13191_v15 }
 0x403   : > { %7642 = vmatpush3.bf16.msra.mxu1 %v13187_v4  ;;  %v13210_v4 = vld [vmem:[%s14738_s1 + $0x548] sm:$0xff]   ;;  %v289_v42 = vshll.u32 %v6041_v37, 16 }
 0x404   : > { %7643 = vmatprep.subr.bf16.mxu1 %v13198_v60  ;;  %7624 = vmatpush3.bf16.msra.mxu0 %v13204_v10  ;;  %v4184_v60 = vadd.f32 %v7292_v53, %v12868_v51  ;;  %v13239_v51 = vld [vmem:[%s14738_s1 + $0x540] sm:$0xff]   ;;  %v13247_v53 = vld [vmem:[%s14738_s1 + $0x590] sm:$0xff]  }
 0x405   : > { %7625 = vmatprep.subr.bf16.mxu0 %v13210_v4  ;;  %15735 = vst [vmem:[#allocation9_spill] sm:$0xff] %v13239_v51  ;;  %15736 = vst [vmem:[#allocation21_spill] sm:$0xff] %v13247_v53 }
 0x407   : > { %7644 = vmatpush3.bf16.msra.mxu1 %v13218_v27  ;;  %v13253_v27 = vld [vmem:[%s14738_s1 + $0x5c8] sm:$0xff]  }
 0x408   : > { %7645 = vmatprep.subr.bf16.mxu1 %v13227_v29  ;;  %7626 = vmatpush3.bf16.msra.mxu0 %v13233_v24  ;;  %v4224_v29 = vadd.f32 %v7314_v63, %v4184_v60  ;;  %15737 = vst [vmem:[#allocation11_spill] sm:$0xff] %v13253_v27  ;;  %v291_v63 = vrot.slane %v289_v42, 1  ;;  %v13266_v60 = vld [vmem:[%s14738_s1 + $0x588] sm:$0xff]   ;;  %v13290_v42 = vld [vmem:[%s14738_s1 + $0x580] sm:$0xff]  }
 0x409   : > { %7627 = vmatprep.subr.bf16.mxu0 %v13239_v51  ;;  %v7358_v51 = vadd.f32 %v7357_v23, %v7356_v58  ;;  %15739 = vst [vmem:[#allocation13_spill] sm:$0xff] %v13266_v60  ;;  %v13279_v58 = vld [vmem:[%s14738_s1 + $0x638] sm:$0xff]   ;;  %15741 = vst [vmem:[#allocation14_spill] sm:$0xff] %v13290_v42 }
 0x40a   : > { %v4264_v43 = vadd.f32 %v7336_v13, %v4224_v29 }
 0x40b   : > { %7646 = vmatpush3.bf16.msra.mxu1 %v13247_v53  ;;  %v287_v53 = vshrl.u32 %v6041_v37, 16 }
 0x40c   : > { %7647 = vmatprep.subr.bf16.mxu1 %v13253_v27  ;;  %7628 = vmatpush3.bf16.msra.mxu0 %v13259_v18  ;;  %v13273_v18 = vld [vmem:[%s14738_s1 + $0x5c0] sm:$0xff]   ;;  %v4304_v23 = vadd.f32 %v7358_v51, %v4264_v43  ;;  %v13310_v43 = vld [vmem:[%s14738_s1 + $0x38] sm:$0xff]  }
 0x40d   : > { %8292 = vmatprep.subr.bf16.mxu0 %v15178_v40  ;;  %15740 = vst [vmem:[#allocation27_spill] sm:$0xff] %v13273_v18  ;;  %v13285_v13 = vor.u32 %v291_v63, %v287_v53  ;;  %15743 = vst [vmem:[#allocation26_spill] sm:$0xff] %v13310_v43 }
 0x40f   : > { %7648 = vmatpush3.bf16.msra.mxu1 %v13266_v60  ;;  %v7378_v27 = vpop.f32.mrf.mxu0  ;;  %4828 = vmatmul.mubr.bf16.vlgmr.msra.gmra.mxu0 %v13191_v15  ;;  %v13296_v60 = vld [vmem:[%s14738_s1 + $0x78] sm:$0xff]  }
 0x410   : > { %7649 = vmatprep.subr.bf16.mxu1 %v13273_v18  ;;  %8293 = vmatpush3.bf16.msra.mxu0 %v13279_v58  ;;  %15742 = vst [vmem:[#allocation17_spill] sm:$0xff] %v13296_v60 }
 0x411   : > { %v7379_v29 = vpop.f32.mrf.mxu0  ;;  %8294 = vmatprep.subr.bf16.mxu0 %v15178_v40  ;;  %8308 = vmatprep.mubr.msk.bf16.mxu0 %vm9228_vm0, %v15178_v40 }
 0x412   : > { %v7380_v37 = vadd.f32 %v7379_v29, %v7378_v27  ;;  %v13302_v27 = vld [vmem:[%s14738_s1 + $0x630] sm:$0xff]  }
 0x413   : > { %7650 = vmatpush3.bf16.msra.mxu1 %v13290_v42  ;;  %v7381_v18 = vpop.f32.mrf.mxu0  ;;  %v13317_v29 = vld [vmem:[%s14738_s1 + $0x70] sm:$0xff]  }
 0x414   : > { %7666 = vmatprep.subr.bf16.mxu1 %v13296_v60  ;;  %8295 = vmatpush3.bf16.msra.mxu0 %v13302_v27  ;;  %v4344_v51 = vadd.f32 %v7380_v37, %v4304_v23  ;;  %15744 = vst [vmem:[#allocation30_spill] sm:$0xff] %v13317_v29  ;;  %v13323_v23 = vld [vmem:[%s14738_s1 + $0x628] sm:$0xff]  }
 0x415   : > { %v7382_v53 = vpop.f32.mrf.mxu0  ;;  %8296 = vmatprep.subr.bf16.mxu0 %v15178_v40 }
 0x416   : > { %4868 = vmatmul.mubr.bf16.vlgmr.msra.gmra.mxu1 %v13285_v13  ;;  %v4383_v18 = vpop.f32.mrf.mxu1 }
 0x417   : > { %7667 = vmatpush3.bf16.msra.mxu1 %v13310_v43  ;;  %v4384_v63 = vadd.f32 %v4383_v18, %v4344_v51  ;;  %4953 = vmatprep.mubr.bf16.mxu1 %v12622_v32  ;;  %v6291_v32 = vld [vmem:[%s11135_s24 + $0xc] sm:$0xf]  ;;  %v13331_v43 = vld [vmem:[%s14738_s1 + $0x30] sm:$0xff]  }
 0x418   : > { %7668 = vmatprep.subr.bf16.mxu1 %v13317_v29  ;;  %8297 = vmatpush3.bf16.msra.mxu0 %v13323_v23  ;;  %v8290_v37 = vpop.f32.mrf.mxu1  ;;  %15745 = vst [vmem:[#allocation19_spill] sm:$0xff] %v13331_v43  ;;  %v13337_v29 = vld [vmem:[%s14738_s1 + $0x68] sm:$0xff]  }
 0x419   : > { %v4389_v53 = vmax.f32 %v4384_v63, 0.0  ;;  %8298 = vmatprep.subr.bf16.mxu0 %v15178_v40  ;;  %15746 = vst [vmem:[#allocation46_spill] sm:$0xff] %v13337_v29  ;;  %v13343_v63 = vld [vmem:[%s14738_s1 + $0x620] sm:$0xff]  }
 0x41a   : > { %v4386_v51 = vpop.f32.mrf.mxu1 }
 0x41b   : > { %v4390_v18 = vpack.c.bf16 %v4389_v53, %v4389_v53  ;;  %7669 = vmatpush3.bf16.msra.mxu1 %v13331_v43  ;;  %v13353_v51 = vld [vmem:[%s14738_s1 + $0x28] sm:$0xff]   ;;  %v13426_v43 = vld [vmem:[%s14738_s1 + $0x600] sm:$0xff]  }
 0x41c   : > { %7670 = vmatprep.subr.bf16.mxu1 %v13337_v29  ;;  %8299 = vmatpush3.bf16.msra.mxu0 %v13343_v63  ;;  %v8291_v37 = vpop.f32.mrf.mxu1  ;;  %15747 = vst [vmem:[#allocation47_spill] sm:$0xff] %v13353_v51  ;;  %v13359_v29 = vld [vmem:[%s14738_s1 + $0x60] sm:$0xff]   ;;  %15756 = vst [vmem:[#allocation40_spill] sm:$0xff] %v13426_v43 }
 0x41d   : > { %v4393_v53 = vsel %vm11143_vm3, %v4390_v18, %v6291_v32  ;;  %8300 = vmatprep.subr.bf16.mxu0 %v15178_v40  ;;  %15748 = vst [vmem:[#allocation20_spill] sm:$0xff] %v13359_v29  ;;  %v13365_v32 = vld [vmem:[%s14738_s1 + $0x618] sm:$0xff]   ;;  %v13372_v18 = vld [vmem:[%s14738_s1 + $0x20] sm:$0xff]   ;;  %v185_v37 = vld [vmem:[%s9354_s25 + $0x34] sm:$0x1] }
 0x41e   : > { %6292 = vst [vmem:[%s11135_s24 + $0xc] sm:$0xf] %v4393_v53  ;;  %15749 = vst [vmem:[#allocation33_spill] sm:$0xff] %v13372_v18  ;;  %v13379_v53 = vld [vmem:[%s14738_s1 + $0x58] sm:$0xff]  }
 0x41f   : > { %7671 = vmatpush3.bf16.msra.mxu1 %v13353_v51  ;;  %15750 = vst [vmem:[#allocation50_spill] sm:$0xff] %v13379_v53  ;;  %v6055_v51 = vcombine.low %v13191_v15, %v185_v37  ;;  %v13412_v37 = vld [vmem:[%s14738_s1 + $0x10] sm:$0xff]  }
 0x420   : > { %7672 = vmatprep.subr.bf16.mxu1 %v13359_v29  ;;  %8301 = vmatpush3.bf16.msra.mxu0 %v13365_v32  ;;  %v13385_v29 = vld [vmem:[%s14738_s1 + $0x610] sm:$0xff]   ;;  %15754 = vst [vmem:[#allocation54_spill] sm:$0xff] %v13412_v37 }
 0x421   : > { %8302 = vmatprep.subr.bf16.mxu0 %v15178_v40 }
 0x423   : > { %7673 = vmatpush3.bf16.msra.mxu1 %v13372_v18  ;;  %v13393_v18 = vld [vmem:[%s14738_s1 + $0x18] sm:$0xff]  }
 0x424   : > { %7674 = vmatprep.subr.bf16.mxu1 %v13379_v53  ;;  %8303 = vmatpush3.bf16.msra.mxu0 %v13385_v29  ;;  %15751 = vst [vmem:[#allocation36_spill] sm:$0xff] %v13393_v18  ;;  %v13399_v53 = vld [vmem:[%s14738_s1 + $0x50] sm:$0xff]  }
 0x425   : > { %8304 = vmatprep.subr.bf16.mxu0 %v15178_v40  ;;  %15752 = vst [vmem:[#allocation22_spill] sm:$0xff] %v13399_v53 }
 0x427   : > { %7675 = vmatpush3.bf16.msra.mxu1 %v13393_v18  ;;  %v13415_v18 = vrot.slane %v6055_v51, 1  ;;  %v13438_v51 = vld [vmem:[%s14738_s1 + $0x8] sm:$0xff]  }
 0x428   : > { %7676 = vmatprep.subr.bf16.mxu1 %v13399_v53  ;;  %8305 = vmatpush3.bf16.msra.mxu0 %v13405_v34  ;;  %v13420_v53 = vld [vmem:[%s14738_s1 + $0x48] sm:$0xff]   ;;  %15758 = vst [vmem:[#allocation41_spill] sm:$0xff] %v13438_v51 }
 0x429   : > { %8306 = vmatprep.subr.bf16.mxu0 %v15178_v40  ;;  %15755 = vst [vmem:[#allocation23_spill] sm:$0xff] %v13420_v53 }
 0x42b   : > { %7677 = vmatpush3.bf16.msra.mxu1 %v13412_v37  ;;  %v13432_v37 = vld [vmem:[%s14738_s1 + $0xf8] sm:$0xff]  }
 0x42c   : > { %7678 = vmatprep.subr.bf16.mxu1 %v13420_v53  ;;  %8307 = vmatpush3.bf16.msra.mxu0 %v13426_v43  ;;  %15757 = vst [vmem:[#allocation58_spill] sm:$0xff] %v13432_v37  ;;  %v13445_v43 = vld [vmem:[%s14738_s1 + $0x40] sm:$0xff]  }
 0x42d   : > { %7688 = vmatprep.subr.bf16.mxu0 %v13432_v37  ;;  %15759 = vst [vmem:[#allocation25_spill] sm:$0xff] %v13445_v43  ;;  %v13451_v37 = vld [vmem:[%s14738_s1 + $0xb8] sm:$0xff]  }
 0x42e   : > { %15760 = vst [vmem:[#allocation43_spill] sm:$0xff] %v13451_v37 }
 0x42f   : > { %7679 = vmatpush3.bf16.msra.mxu1 %v13438_v51  ;;  %v7409_v53 = vpop.f32.mrf.mxu0  ;;  %8309 = vmatmul.mubr.bf16.vlgmr.msra.gmra.mxu0 %v13415_v18  ;;  %v13457_v51 = vld [vmem:[%s14738_s1 + $0xf0] sm:$0xff]  }
 0x430   : > { %7680 = vmatprep.subr.bf16.mxu1 %v13445_v43  ;;  %7689 = vmatpush3.bf16.msra.mxu0 %v13451_v37  ;;  %v13464_v43 = vld [vmem:[%s14738_s1] sm:$0xff]   ;;  %v13470_v37 = vld [vmem:[%s14738_s1 + $0x178] sm:$0xff]  }
 0x431   : > { %v7410_v34 = vpop.f32.mrf.mxu0  ;;  %7690 = vmatprep.subr.bf16.mxu0 %v13457_v51  ;;  %4993 = vmatprep.mubr.bf16.mxu0 %v12681_v9  ;;  %15761 = vst [vmem:[#allocation62_spill] sm:$0xff] %v13464_v43  ;;  %15762 = vst [vmem:[#allocation28_spill] sm:$0xff] %v13470_v37  ;;  %v13476_v9 = vld [vmem:[%s14738_s1 + $0xb0] sm:$0xff]  }
 0x432   : > { %v7411_v60 = vadd.f32 %v7410_v34, %v7409_v53  ;;  %15763 = vst [vmem:[#allocation29_spill] sm:$0xff] %v13476_v9  ;;  %v13482_v53 = vld [vmem:[%s14738_s1 + $0xe8] sm:$0xff]  }
 0x433   : > { %7681 = vmatpush3.bf16.msra.mxu1 %v13464_v43  ;;  %v7412_v42 = vpop.f32.mrf.mxu0  ;;  %15764 = vst [vmem:[#allocation45_spill] sm:$0xff] %v13482_v53 }
 0x434   : > { %7710 = vmatprep.subr.bf16.mxu1 %v13470_v37  ;;  %7691 = vmatpush3.bf16.msra.mxu0 %v13476_v9  ;;  %v13489_v37 = vld [vmem:[%s14739_s2] ss:$0 sm:$0xff] }
 0x435   : > { %v7413_v34 = vpop.f32.mrf.mxu0  ;;  %7692 = vmatprep.subr.bf16.mxu0 %v13482_v53  ;;  %15765 = vst [vmem:[#allocation38_spill] sm:$0xff] %v13489_v37  ;;  %v4430_v43 = vadd.f32 %v13489_v37, %v7411_v60  ;;  %v13508_v60 = vld [vmem:[%s14738_s1 + $0xa8] sm:$0xff]  }
 0x436   : > { %v7431_v42 = vpop.f32.mrf.mxu1  ;;  %4954 = vmatmul.mubr.bf16.vlgmr.msra.gmra.mxu1 %v12691_v59  ;;  %v13495_v34 = vld [vmem:[%s14738_s1 + $0x138] sm:$0xff]   ;;  %v13502_v59 = vld [vmem:[%s14738_s1 + $0x170] sm:$0xff]  }
 0x437   : > { %15766 = vst [vmem:[#allocation31_spill] sm:$0xff] %v13495_v34  ;;  %7711 = vmatpush3.bf16.msra.mxu1 %v13495_v34  ;;  %5033 = vmatprep.mubr.bf16.mxu1 %v12859_v12  ;;  %15767 = vst [vmem:[#allocation32_spill] sm:$0xff] %v13502_v59  ;;  %v13514_v12 = vld [vmem:[%s14738_s1 + $0xe0] sm:$0xff]  }
 0x438   : > { %v7432_v53 = vpop.f32.mrf.mxu1  ;;  %7712 = vmatprep.subr.bf16.mxu1 %v13502_v59  ;;  %7693 = vmatpush3.bf16.msra.mxu0 %v13508_v60  ;;  %15768 = vst [vmem:[#allocation48_spill] sm:$0xff] %v13514_v12  ;;  %v13520_v59 = vld [vmem:[%s14738_s1 + $0x130] sm:$0xff]  }
 0x439   : > { %v7433_v37 = vadd.f32 %v7432_v53, %v7431_v42  ;;  %7694 = vmatprep.subr.bf16.mxu0 %v13514_v12  ;;  %15769 = vst [vmem:[#allocation49_spill] sm:$0xff] %v13520_v59  ;;  %v13526_v53 = vld [vmem:[%s14738_s1 + $0x168] sm:$0xff]   ;;  %v13532_v42 = vld [vmem:[%s14738_s1 + $0xa0] sm:$0xff]   ;;  %v13672_v12 = vld [vmem:[%s14738_s1 + $0x278] sm:$0xff]  }
 0x43a   : > { %v7434_v34 = vpop.f32.mrf.mxu1  ;;  %15770 = vst [vmem:[#allocation51_spill] sm:$0xff] %v13526_v53  ;;  %15771 = vst [vmem:[#allocation34_spill] sm:$0xff] %v13532_v42 }
 0x43b   : > { %v4470_v9 = vadd.f32 %v7433_v37, %v4430_v43  ;;  %7713 = vmatpush3.bf16.msra.mxu1 %v13520_v59  ;;  %v13538_v37 = vld [vmem:[%s14738_s1 + $0xd8] sm:$0xff]   ;;  %v13544_v34 = vld [vmem:[%s14738_s1 + $0x128] sm:$0xff]   ;;  %v13562_v59 = vld [vmem:[%s14738_s1 + $0xd0] sm:$0xff]   ;;  %15793 = vst [vmem:[#allocation92_spill] sm:$0xff] %v13672_v12 }
 0x43c   : > { %7714 = vmatprep.subr.bf16.mxu1 %v13526_v53  ;;  %7695 = vmatpush3.bf16.msra.mxu0 %v13532_v42  ;;  %v7435_v43 = vpop.f32.mrf.mxu1  ;;  %15772 = vst [vmem:[#allocation72_spill] sm:$0xff] %v13538_v37  ;;  %15773 = vst [vmem:[#allocation73_spill] sm:$0xff] %v13544_v34  ;;  %v13550_v53 = vld [vmem:[%s14738_s1 + $0x160] sm:$0xff]  }
 0x43d   : > { %7696 = vmatprep.subr.bf16.mxu0 %v13538_v37  ;;  %15774 = vst [vmem:[#allocation37_spill] sm:$0xff] %v13550_v53  ;;  %v13556_v43 = vld [vmem:[%s14738_s1 + $0x98] sm:$0xff]   ;;  %15776 = vst [vmem:[#allocation55_spill] sm:$0xff] %v13562_v59 }
 0x43e   : > { %15775 = vst [vmem:[#allocation39_spill] sm:$0xff] %v13556_v43 }
 0x43f   : > { %7715 = vmatpush3.bf16.msra.mxu1 %v13544_v34  ;;  %v13568_v34 = vld [vmem:[%s14738_s1 + $0x120] sm:$0xff]  }
 0x440   : > { %7716 = vmatprep.subr.bf16.mxu1 %v13550_v53  ;;  %7697 = vmatpush3.bf16.msra.mxu0 %v13556_v43  ;;  %15777 = vst [vmem:[#allocation76_spill] sm:$0xff] %v13568_v34  ;;  %v13574_v53 = vld [vmem:[%s14738_s1 + $0x158] sm:$0xff]   ;;  %v13580_v43 = vld [vmem:[%s14738_s1 + $0x90] sm:$0xff]  }
 0x441   : > { %7698 = vmatprep.subr.bf16.mxu0 %v13562_v59  ;;  %15778 = vst [vmem:[#allocation77_spill] sm:$0xff] %v13574_v53  ;;  %15779 = vst [vmem:[#allocation59_spill] sm:$0xff] %v13580_v43  ;;  %v13586_v59 = vld [vmem:[%s14738_s1 + $0xc8] sm:$0xff]  }
 0x442   : > { %15780 = vst [vmem:[#allocation42_spill] sm:$0xff] %v13586_v59 }
 0x443   : > { %7717 = vmatpush3.bf16.msra.mxu1 %v13568_v34  ;;  %v13592_v34 = vld [vmem:[%s14738_s1 + $0x118] sm:$0xff]  }
 0x444   : > { %7718 = vmatprep.subr.bf16.mxu1 %v13574_v53  ;;  %7699 = vmatpush3.bf16.msra.mxu0 %v13580_v43  ;;  %15781 = vst [vmem:[#allocation80_spill] sm:$0xff] %v13592_v34  ;;  %v13598_v53 = vld [vmem:[%s14738_s1 + $0x150] sm:$0xff]   ;;  %v13604_v43 = vld [vmem:[%s14738_s1 + $0x88] sm:$0xff]  }
 0x445   : > { %7700 = vmatprep.subr.bf16.mxu0 %v13586_v59  ;;  %15782 = vst [vmem:[#allocation63_spill] sm:$0xff] %v13598_v53  ;;  %15783 = vst [vmem:[#allocation44_spill] sm:$0xff] %v13604_v43  ;;  %v13610_v59 = vld [vmem:[%s14738_s1 + $0xc0] sm:$0xff]  }
 0x446   : > { %15784 = vst [vmem:[#allocation65_spill] sm:$0xff] %v13610_v59 }
 0x447   : > { %7719 = vmatpush3.bf16.msra.mxu1 %v13592_v34  ;;  %v13616_v34 = vld [vmem:[%s14738_s1 + $0x110] sm:$0xff]  }
 0x448   : > { %7720 = vmatprep.subr.bf16.mxu1 %v13598_v53  ;;  %7701 = vmatpush3.bf16.msra.mxu0 %v13604_v43  ;;  %15785 = vst [vmem:[#allocation84_spill] sm:$0xff] %v13616_v34  ;;  %v13622_v53 = vld [vmem:[%s14738_s1 + $0x148] sm:$0xff]   ;;  %v13628_v43 = vld [vmem:[%s14738_s1 + $0x80] sm:$0xff]  }
 0x449   : > { %7702 = vmatprep.subr.bf16.mxu0 %v13610_v59  ;;  %15786 = vst [vmem:[#allocation66_spill] sm:$0xff] %v13622_v53  ;;  %15787 = vst [vmem:[#allocation67_spill] sm:$0xff] %v13628_v43  ;;  %v13634_v59 = vld [vmem:[%s14738_s1 + $0x1f8] sm:$0xff]  }
 0x44a   : > { %15788 = vst [vmem:[#allocation69_spill] sm:$0xff] %v13634_v59 }
 0x44b   : > { %7721 = vmatpush3.bf16.msra.mxu1 %v13616_v34  ;;  %v13640_v34 = vld [vmem:[%s14738_s1 + $0x108] sm:$0xff]  }
 0x44c   : > { %7722 = vmatprep.subr.bf16.mxu1 %v13622_v53  ;;  %7703 = vmatpush3.bf16.msra.mxu0 %v13628_v43  ;;  %15789 = vst [vmem:[#allocation88_spill] sm:$0xff] %v13640_v34  ;;  %v13647_v43 = vld [vmem:[%s14738_s1 + $0x140] sm:$0xff]  }
 0x44d   : > { %7732 = vmatprep.subr.bf16.mxu0 %v13634_v59  ;;  %15790 = vst [vmem:[#allocation52_spill] sm:$0xff] %v13647_v43  ;;  %v13653_v59 = vld [vmem:[%s14738_s1 + $0x1b8] sm:$0xff]  }
 0x44e   : > { %15791 = vst [vmem:[#allocation53_spill] sm:$0xff] %v13653_v59 }
 0x44f   : > { %7723 = vmatpush3.bf16.msra.mxu1 %v13640_v34  ;;  %v7453_v53 = vpop.f32.mrf.mxu0  ;;  %4994 = vmatmul.mubr.bf16.vlgmr.msra.gmra.mxu0 %v12727_v7  ;;  %v13659_v34 = vld [vmem:[%s14738_s1 + $0x1f0] sm:$0xff]  }
 0x450   : > { %7724 = vmatprep.subr.bf16.mxu1 %v13647_v43  ;;  %7733 = vmatpush3.bf16.msra.mxu0 %v13653_v59  ;;  %v13666_v43 = vld [vmem:[%s14738_s1 + $0x100] sm:$0xff]  }
 0x451   : > { %v7454_v37 = vpop.f32.mrf.mxu0  ;;  %7734 = vmatprep.subr.bf16.mxu0 %v13659_v34  ;;  %5073 = vmatprep.mubr.bf16.mxu0 %v12893_v31  ;;  %15792 = vst [vmem:[#allocation71_spill] sm:$0xff] %v13666_v43  ;;  %v13678_v31 = vld [vmem:[%s14738_s1 + $0x1b0] sm:$0xff]  }
 0x452   : > { %v7455_v7 = vadd.f32 %v7454_v37, %v7453_v53  ;;  %15794 = vst [vmem:[#allocation56_spill] sm:$0xff] %v13678_v31  ;;  %v13691_v37 = vld [vmem:[%s14738_s1 + $0x238] sm:$0xff]  }
 0x453   : > { %7725 = vmatpush3.bf16.msra.mxu1 %v13666_v43  ;;  %v7456_v42 = vpop.f32.mrf.mxu0  ;;  %15796 = vst [vmem:[#allocation75_spill] sm:$0xff] %v13691_v37 }
 0x454   : > { %v4510_v59 = vadd.f32 %v7455_v7, %v4470_v9  ;;  %7754 = vmatprep.subr.bf16.mxu1 %v13672_v12  ;;  %7735 = vmatpush3.bf16.msra.mxu0 %v13678_v31  ;;  %v13684_v42 = vld [vmem:[%s14738_s1 + $0x1e8] sm:$0xff]   ;;  %v14074_v31 = vld [vmem:[%s14738_s1 + $0x478] sm:$0xff]  }
 0x455   : > { %v7457_v53 = vpop.f32.mrf.mxu0  ;;  %15795 = vst [vmem:[#allocation57_spill] sm:$0xff] %v13684_v42  ;;  %7736 = vmatprep.subr.bf16.mxu0 %v13684_v42  ;;  %15856 = vst [vmem:[#allocation135_spill] sm:$0xff] %v14074_v31 }
 0x456   : > { %v7475_v9 = vpop.f32.mrf.mxu1  ;;  %5034 = vmatmul.mubr.bf16.vlgmr.msra.gmra.mxu1 %v12740_v26  ;;  %v13698_v53 = vld [vmem:[%s14738_s1 + $0x270] sm:$0xff]   ;;  %v13704_v26 = vld [vmem:[%s14738_s1 + $0x1a8] sm:$0xff]  }
 0x457   : > { %7755 = vmatpush3.bf16.msra.mxu1 %v13691_v37  ;;  %5113 = vmatprep.mubr.bf16.mxu1 %v12912_v6  ;;  %15797 = vst [vmem:[#allocation96_spill] sm:$0xff] %v13698_v53  ;;  %15798 = vst [vmem:[#allocation60_spill] sm:$0xff] %v13704_v26  ;;  %v13710_v6 = vld [vmem:[%s14738_s1 + $0x1e0] sm:$0xff]  }
 0x458   : > { %v7476_v7 = vpop.f32.mrf.mxu1  ;;  %7756 = vmatprep.subr.bf16.mxu1 %v13698_v53  ;;  %7737 = vmatpush3.bf16.msra.mxu0 %v13704_v26  ;;  %15799 = vst [vmem:[#allocation61_spill] sm:$0xff] %v13710_v6  ;;  %v13716_v53 = vld [vmem:[%s14738_s1 + $0x230] sm:$0xff]  }
 0x459   : > { %v7477_v12 = vadd.f32 %v7476_v7, %v7475_v9  ;;  %7738 = vmatprep.subr.bf16.mxu0 %v13710_v6  ;;  %15800 = vst [vmem:[#allocation79_spill] sm:$0xff] %v13716_v53  ;;  %v13722_v9 = vld [vmem:[%s14738_s1 + $0x268] sm:$0xff]   ;;  %v13728_v7 = vld [vmem:[%s14738_s1 + $0x1a0] sm:$0xff]   ;;  %v13868_v6 = vld [vmem:[%s14738_s1 + $0x378] sm:$0xff]  }
 0x45a   : > { %v7478_v37 = vpop.f32.mrf.mxu1  ;;  %15801 = vst [vmem:[#allocation100_spill] sm:$0xff] %v13722_v9  ;;  %15802 = vst [vmem:[#allocation81_spill] sm:$0xff] %v13728_v7 }
 0x45b   : > { %v4550_v43 = vadd.f32 %v7477_v12, %v4510_v59  ;;  %7757 = vmatpush3.bf16.msra.mxu1 %v13716_v53  ;;  %v13734_v12 = vld [vmem:[%s14738_s1 + $0x1d8] sm:$0xff]   ;;  %v13740_v37 = vld [vmem:[%s14738_s1 + $0x228] sm:$0xff]   ;;  %v13758_v53 = vld [vmem:[%s14738_s1 + $0x1d0] sm:$0xff]   ;;  %15825 = vst [vmem:[#allocation124_spill] sm:$0xff] %v13868_v6 }
 0x45c   : > { %7758 = vmatprep.subr.bf16.mxu1 %v13722_v9  ;;  %7739 = vmatpush3.bf16.msra.mxu0 %v13728_v7  ;;  %v7479_v59 = vpop.f32.mrf.mxu1  ;;  %15803 = vst [vmem:[#allocation64_spill] sm:$0xff] %v13734_v12  ;;  %15804 = vst [vmem:[#allocation83_spill] sm:$0xff] %v13740_v37  ;;  %v13746_v9 = vld [vmem:[%s14738_s1 + $0x260] sm:$0xff]  }
 0x45d   : > { %7740 = vmatprep.subr.bf16.mxu0 %v13734_v12  ;;  %15805 = vst [vmem:[#allocation104_spill] sm:$0xff] %v13746_v9  ;;  %v13752_v59 = vld [vmem:[%s14738_s1 + $0x198] sm:$0xff]   ;;  %15807 = vst [vmem:[#allocation68_spill] sm:$0xff] %v13758_v53 }
 0x45e   : > { %15806 = vst [vmem:[#allocation85_spill] sm:$0xff] %v13752_v59 }
 0x45f   : > { %7759 = vmatpush3.bf16.msra.mxu1 %v13740_v37  ;;  %v13764_v37 = vld [vmem:[%s14738_s1 + $0x220] sm:$0xff]  }
 0x460   : > { %7760 = vmatprep.subr.bf16.mxu1 %v13746_v9  ;;  %7741 = vmatpush3.bf16.msra.mxu0 %v13752_v59  ;;  %15808 = vst [vmem:[#allocation87_spill] sm:$0xff] %v13764_v37  ;;  %v13770_v9 = vld [vmem:[%s14738_s1 + $0x258] sm:$0xff]   ;;  %v13776_v59 = vld [vmem:[%s14738_s1 + $0x190] sm:$0xff]  }
 0x461   : > { %7742 = vmatprep.subr.bf16.mxu0 %v13758_v53  ;;  %15809 = vst [vmem:[#allocation108_spill] sm:$0xff] %v13770_v9  ;;  %15810 = vst [vmem:[#allocation89_spill] sm:$0xff] %v13776_v59  ;;  %v13782_v53 = vld [vmem:[%s14738_s1 + $0x1c8] sm:$0xff]  }
 0x462   : > { %15811 = vst [vmem:[#allocation70_spill] sm:$0xff] %v13782_v53 }
 0x463   : > { %7761 = vmatpush3.bf16.msra.mxu1 %v13764_v37  ;;  %v13788_v37 = vld [vmem:[%s14738_s1 + $0x218] sm:$0xff]  }
 0x464   : > { %7762 = vmatprep.subr.bf16.mxu1 %v13770_v9  ;;  %7743 = vmatpush3.bf16.msra.mxu0 %v13776_v59  ;;  %15812 = vst [vmem:[#allocation91_spill] sm:$0xff] %v13788_v37  ;;  %v13794_v9 = vld [vmem:[%s14738_s1 + $0x250] sm:$0xff]   ;;  %v13800_v59 = vld [vmem:[%s14738_s1 + $0x188] sm:$0xff]  }
 0x465   : > { %7744 = vmatprep.subr.bf16.mxu0 %v13782_v53  ;;  %15813 = vst [vmem:[#allocation112_spill] sm:$0xff] %v13794_v9  ;;  %15814 = vst [vmem:[#allocation93_spill] sm:$0xff] %v13800_v59  ;;  %v13806_v53 = vld [vmem:[%s14738_s1 + $0x1c0] sm:$0xff]  }
 0x466   : > { %15815 = vst [vmem:[#allocation74_spill] sm:$0xff] %v13806_v53 }
 0x467   : > { %7763 = vmatpush3.bf16.msra.mxu1 %v13788_v37  ;;  %v13812_v37 = vld [vmem:[%s14738_s1 + $0x210] sm:$0xff]  }
 0x468   : > { %7764 = vmatprep.subr.bf16.mxu1 %v13794_v9  ;;  %7745 = vmatpush3.bf16.msra.mxu0 %v13800_v59  ;;  %15816 = vst [vmem:[#allocation95_spill] sm:$0xff] %v13812_v37  ;;  %v13818_v9 = vld [vmem:[%s14738_s1 + $0x248] sm:$0xff]   ;;  %v13824_v59 = vld [vmem:[%s14738_s1 + $0x180] sm:$0xff]  }
 0x469   : > { %7746 = vmatprep.subr.bf16.mxu0 %v13806_v53  ;;  %15817 = vst [vmem:[#allocation116_spill] sm:$0xff] %v13818_v9  ;;  %15818 = vst [vmem:[#allocation97_spill] sm:$0xff] %v13824_v59  ;;  %v13830_v53 = vld [vmem:[%s14738_s1 + $0x2f8] sm:$0xff]  }
 0x46a   : > { %15819 = vst [vmem:[#allocation78_spill] sm:$0xff] %v13830_v53 }
 0x46b   : > { %7765 = vmatpush3.bf16.msra.mxu1 %v13812_v37  ;;  %v13836_v37 = vld [vmem:[%s14738_s1 + $0x208] sm:$0xff]  }
 0x46c   : > { %7766 = vmatprep.subr.bf16.mxu1 %v13818_v9  ;;  %7747 = vmatpush3.bf16.msra.mxu0 %v13824_v59  ;;  %15820 = vst [vmem:[#allocation99_spill] sm:$0xff] %v13836_v37  ;;  %v13843_v59 = vld [vmem:[%s14738_s1 + $0x240] sm:$0xff]  }
 0x46d   : > { %7776 = vmatprep.subr.bf16.mxu0 %v13830_v53  ;;  %15821 = vst [vmem:[#allocation120_spill] sm:$0xff] %v13843_v59  ;;  %v13849_v53 = vld [vmem:[%s14738_s1 + $0x2b8] sm:$0xff]  }
 0x46e   : > { %15822 = vst [vmem:[#allocation101_spill] sm:$0xff] %v13849_v53 }
 0x46f   : > { %7767 = vmatpush3.bf16.msra.mxu1 %v13836_v37  ;;  %v7497_v9 = vpop.f32.mrf.mxu0  ;;  %5074 = vmatmul.mubr.bf16.vlgmr.msra.gmra.mxu0 %v12977_v62  ;;  %v13855_v37 = vld [vmem:[%s14738_s1 + $0x2f0] sm:$0xff]  }
 0x470   : > { %7768 = vmatprep.subr.bf16.mxu1 %v13843_v59  ;;  %7777 = vmatpush3.bf16.msra.mxu0 %v13849_v53  ;;  %15823 = vst [vmem:[#allocation82_spill] sm:$0xff] %v13855_v37  ;;  %v13862_v59 = vld [vmem:[%s14738_s1 + $0x200] sm:$0xff]  }
 0x471   : > { %v7498_v12 = vpop.f32.mrf.mxu0  ;;  %7778 = vmatprep.subr.bf16.mxu0 %v13855_v37  ;;  %5153 = vmatprep.mubr.bf16.mxu0 %v12992_v39  ;;  %15824 = vst [vmem:[#allocation103_spill] sm:$0xff] %v13862_v59 }
 0x472   : > { %v7499_v62 = vadd.f32 %v7498_v12, %v7497_v9  ;;  %v13874_v9 = vld [vmem:[%s14738_s1 + $0x2b0] sm:$0xff]  }
 0x473   : > { %7769 = vmatpush3.bf16.msra.mxu1 %v13862_v59  ;;  %v7500_v7 = vpop.f32.mrf.mxu0  ;;  %15826 = vst [vmem:[#allocation105_spill] sm:$0xff] %v13874_v9 }
 0x474   : > { %v4590_v53 = vadd.f32 %v7499_v62, %v4550_v43  ;;  %7798 = vmatprep.subr.bf16.mxu1 %v13868_v6  ;;  %7779 = vmatpush3.bf16.msra.mxu0 %v13874_v9  ;;  %v13880_v7 = vld [vmem:[%s14738_s1 + $0x2e8] sm:$0xff]   ;;  %v13887_v62 = vld [vmem:[%s14738_s1 + $0x338] sm:$0xff]   ;;  %v13894_v6 = vld [vmem:[%s14738_s1 + $0x370] sm:$0xff]  }
 0x475   : > { %v7501_v12 = vpop.f32.mrf.mxu0  ;;  %15827 = vst [vmem:[#allocation86_spill] sm:$0xff] %v13880_v7  ;;  %7780 = vmatprep.subr.bf16.mxu0 %v13880_v7  ;;  %15828 = vst [vmem:[#allocation107_spill] sm:$0xff] %v13887_v62 }
 0x476   : > { %v7519_v43 = vpop.f32.mrf.mxu1  ;;  %5114 = vmatmul.mubr.bf16.vlgmr.msra.gmra.mxu1 %v13082_v52  ;;  %15829 = vst [vmem:[#allocation128_spill] sm:$0xff] %v13894_v6  ;;  %v13900_v52 = vld [vmem:[%s14738_s1 + $0x2a8] sm:$0xff]  }
 0x477   : > { %7799 = vmatpush3.bf16.msra.mxu1 %v13887_v62  ;;  %5193 = vmatprep.mubr.bf16.mxu1 %v13090_v61  ;;  %15830 = vst [vmem:[#allocation109_spill] sm:$0xff] %v13900_v52  ;;  %v13906_v62 = vld [vmem:[%s14738_s1 + $0x2e0] sm:$0xff]  }
 0x478   : > { %v7520_v12 = vpop.f32.mrf.mxu1  ;;  %7800 = vmatprep.subr.bf16.mxu1 %v13894_v6  ;;  %7781 = vmatpush3.bf16.msra.mxu0 %v13900_v52  ;;  %15831 = vst [vmem:[#allocation90_spill] sm:$0xff] %v13906_v62  ;;  %v13914_v6 = vld [vmem:[%s14738_s1 + $0x330] sm:$0xff]  }
 0x479   : > { %v7521_v59 = vadd.f32 %v7520_v12, %v7519_v43  ;;  %7782 = vmatprep.subr.bf16.mxu0 %v13906_v62  ;;  %15832 = vst [vmem:[#allocation111_spill] sm:$0xff] %v13914_v6  ;;  %v13920_v43 = vld [vmem:[%s14738_s1 + $0x368] sm:$0xff]  }
 0x47a   : > { %v7522_v7 = vpop.f32.mrf.mxu1  ;;  %15833 = vst [vmem:[#allocation132_spill] sm:$0xff] %v13920_v43  ;;  %v13938_v12 = vld [vmem:[%s14738_s1 + $0x328] sm:$0xff]  }
 0x47b   : > { %v13909_v9 = vadd.f32 %v7521_v59, %v4590_v53  ;;  %7801 = vmatpush3.bf16.msra.mxu1 %v13914_v6  ;;  %v13926_v7 = vld [vmem:[%s14738_s1 + $0x2a0] sm:$0xff]   ;;  %v13932_v59 = vld [vmem:[%s14738_s1 + $0x2d8] sm:$0xff]   ;;  %15836 = vst [vmem:[#allocation115_spill] sm:$0xff] %v13938_v12  ;;  %v13956_v6 = vld [vmem:[%s14738_s1 + $0x2d0] sm:$0xff]  }
 0x47c   : > { %7802 = vmatprep.subr.bf16.mxu1 %v13920_v43  ;;  %15834 = vst [vmem:[#allocation113_spill] sm:$0xff] %v13926_v7  ;;  %7783 = vmatpush3.bf16.msra.mxu0 %v13926_v7  ;;  %v7523_v53 = vpop.f32.mrf.mxu1  ;;  %15835 = vst [vmem:[#allocation94_spill] sm:$0xff] %v13932_v59  ;;  %v13944_v43 = vld [vmem:[%s14738_s1 + $0x360] sm:$0xff]   ;;  %v14015_v7 = vld [vmem:[%s14738_s1 + $0x310] sm:$0xff]  }
 0x47d   : > { %7784 = vmatprep.subr.bf16.mxu0 %v13932_v59  ;;  %15837 = vst [vmem:[#allocation118_spill] sm:$0xff] %v13944_v43  ;;  %v13950_v53 = vld [vmem:[%s14738_s1 + $0x298] sm:$0xff]   ;;  %15839 = vst [vmem:[#allocation98_spill] sm:$0xff] %v13956_v6  ;;  %v14021_v62 = vld [vmem:[%s14738_s1 + $0x348] sm:$0xff]  }
 0x47e   : > { %15838 = vst [vmem:[#allocation117_spill] sm:$0xff] %v13950_v53  ;;  %15848 = vst [vmem:[#allocation110_spill] sm:$0xff] %v14015_v7 }
 0x47f   : > { %7803 = vmatpush3.bf16.msra.mxu1 %v13938_v12  ;;  %v13962_v12 = vld [vmem:[%s14738_s1 + $0x320] sm:$0xff]   ;;  %15849 = vst [vmem:[#allocation133_spill] sm:$0xff] %v14021_v62 }
 0x480   : > { %7804 = vmatprep.subr.bf16.mxu1 %v13944_v43  ;;  %7785 = vmatpush3.bf16.msra.mxu0 %v13950_v53  ;;  %15840 = vst [vmem:[#allocation123_spill] sm:$0xff] %v13962_v12  ;;  %v13968_v43 = vld [vmem:[%s14738_s1 + $0x358] sm:$0xff]   ;;  %v13974_v53 = vld [vmem:[%s14738_s1 + $0x290] sm:$0xff]  }
 0x481   : > { %7786 = vmatprep.subr.bf16.mxu0 %v13956_v6  ;;  %15841 = vst [vmem:[#allocation126_spill] sm:$0xff] %v13968_v43  ;;  %15842 = vst [vmem:[#allocation121_spill] sm:$0xff] %v13974_v53  ;;  %v13978_v6 = vld [vmem:[%s9354_s25 + $0xc0] sm:$0xf] }
 0x482   : > { %v6062_v59 = vcombine.low %v13978_v6, %v13978_v6 }
 0x483   : > { %7805 = vmatpush3.bf16.msra.mxu1 %v13962_v12  ;;  %v13983_v12 = vld [vmem:[%s14738_s1 + $0x2c8] sm:$0xff]  }
 0x484   : > { %7806 = vmatprep.subr.bf16.mxu1 %v13968_v43  ;;  %7787 = vmatpush3.bf16.msra.mxu0 %v13974_v53  ;;  %15843 = vst [vmem:[#allocation102_spill] sm:$0xff] %v13983_v12  ;;  %v13989_v43 = vld [vmem:[%s14738_s1 + $0x318] sm:$0xff]   ;;  %v13997_v53 = vld [vmem:[%s14738_s1 + $0x350] sm:$0xff]   ;;  %v476_v52 = vshrl.u32 %v6062_v59, 16 }
 0x485   : > { %7788 = vmatprep.subr.bf16.mxu0 %v13983_v12  ;;  %15844 = vst [vmem:[#allocation131_spill] sm:$0xff] %v13989_v43  ;;  %15845 = vst [vmem:[#allocation125_spill] sm:$0xff] %v13997_v53  ;;  %v14003_v12 = vld [vmem:[%s14738_s1 + $0x288] sm:$0xff]  }
 0x486   : > { %15846 = vst [vmem:[#allocation106_spill] sm:$0xff] %v14003_v12 }
 0x487   : > { %7807 = vmatpush3.bf16.msra.mxu1 %v13989_v43  ;;  %v14009_v43 = vld [vmem:[%s14738_s1 + $0x2c0] sm:$0xff]  }
 0x488   : > { %7808 = vmatprep.subr.bf16.mxu1 %v13997_v53  ;;  %7789 = vmatpush3.bf16.msra.mxu0 %v14003_v12  ;;  %15847 = vst [vmem:[#allocation129_spill] sm:$0xff] %v14009_v43  ;;  %v478_v53 = vshll.u32 %v6062_v59, 16  ;;  %v14027_v12 = vld [vmem:[%s14738_s1 + $0x280] sm:$0xff]   ;;  %v14058_v59 = vld [vmem:[%s14738_s1 + $0x3f0] sm:$0xff]  }
 0x489   : > { %7790 = vmatprep.subr.bf16.mxu0 %v14009_v43  ;;  %15850 = vst [vmem:[#allocation114_spill] sm:$0xff] %v14027_v12  ;;  %v14033_v43 = vld [vmem:[%s14738_s1 + $0x3f8] sm:$0xff]  }
 0x48a   : > { %15851 = vst [vmem:[#allocation119_spill] sm:$0xff] %v14033_v43  ;;  %v480_v37 = vrot.slane %v478_v53, 1 }
 0x48b   : > { %7809 = vmatpush3.bf16.msra.mxu1 %v14015_v7  ;;  %v14039_v7 = vld [vmem:[%s14738_s1 + $0x308] sm:$0xff]  }
 0x48c   : > { %7810 = vmatprep.subr.bf16.mxu1 %v14021_v62  ;;  %7791 = vmatpush3.bf16.msra.mxu0 %v14027_v12  ;;  %15852 = vst [vmem:[#allocation122_spill] sm:$0xff] %v14039_v7  ;;  %v14046_v12 = vld [vmem:[%s14738_s1 + $0x340] sm:$0xff]  }
 0x48d   : > { %7820 = vmatprep.subr.bf16.mxu0 %v14033_v43  ;;  %15853 = vst [vmem:[#allocation127_spill] sm:$0xff] %v14046_v12  ;;  %v14052_v43 = vld [vmem:[%s14738_s1 + $0x3b8] sm:$0xff]  }
 0x48e   : > { %15854 = vst [vmem:[#allocation130_spill] sm:$0xff] %v14052_v43 }
 0x48f   : > { %7811 = vmatpush3.bf16.msra.mxu1 %v14039_v7  ;;  %v7541_v62 = vpop.f32.mrf.mxu0  ;;  %5154 = vmatmul.mubr.bf16.vlgmr.msra.gmra.mxu0 %v13191_v15 }
 0x490   : > { %7812 = vmatprep.subr.bf16.mxu1 %v14046_v12  ;;  %7821 = vmatpush3.bf16.msra.mxu0 %v14052_v43  ;;  %v14065_v12 = vld [vmem:[%s14738_s1 + $0x300] sm:$0xff]   ;;  %v14068_v43 = vor.u32 %v480_v37, %v476_v52 }
 0x491   : > { %v7542_v7 = vpop.f32.mrf.mxu0  ;;  %7822 = vmatprep.subr.bf16.mxu0 %v14058_v59  ;;  %5233 = vmatprep.mubr.bf16.mxu0 %v13978_v6  ;;  %15855 = vst [vmem:[#allocation134_spill] sm:$0xff] %v14065_v12 }
 0x492   : > { %v7543_v53 = vadd.f32 %v7542_v7, %v7541_v62  ;;  %v14080_v62 = vld [vmem:[%s14738_s1 + $0x3b0] sm:$0xff]  }
 0x493   : > { %7813 = vmatpush3.bf16.msra.mxu1 %v14065_v12  ;;  %v7544_v26 = vpop.f32.mrf.mxu0 }
 0x494   : > { %v4670_v42 = vadd.f32 %v7543_v53, %v13909_v9  ;;  %7842 = vmatprep.subr.bf16.mxu1 %v14074_v31  ;;  %7823 = vmatpush3.bf16.msra.mxu0 %v14080_v62  ;;  %v14086_v26 = vld [vmem:[%s14738_s1 + $0x3e8] sm:$0xff]   ;;  %v14093_v9 = vld [vmem:[%s14738_s1 + $0x438] sm:$0xff]   ;;  %v14107_v31 = vld [vmem:[%s14738_s1 + $0x3e0] sm:$0xff]  }
 0x495   : > { %v7545_v7 = vpop.f32.mrf.mxu0  ;;  %7824 = vmatprep.subr.bf16.mxu0 %v14086_v26  ;;  %15857 = vst [vmem:[#allocation136_spill] sm:$0xff] %v14093_v9  ;;  %v14101_v53 = vld [vmem:[%s14738_s1 + $0x3a8] sm:$0xff]  }
 0x496   : > { %v7563_v37 = vpop.f32.mrf.mxu1  ;;  %5194 = vmatmul.mubr.bf16.vlgmr.msra.gmra.mxu1 %v13285_v13 }
 0x497   : > { %7843 = vmatpush3.bf16.msra.mxu1 %v14093_v9  ;;  %5273 = vmatprep.mubr.bf16.mxu1 %v14068_v43 }
 0x498   : > { %v7564_v52 = vpop.f32.mrf.mxu1  ;;  %7844 = vmatprep.subr.bf16.mxu1 %v12907_v50  ;;  %7825 = vmatpush3.bf16.msra.mxu0 %v14101_v53  ;;  %v14117_v50 = vld [vmem:[%s14738_s1 + $0x3a0] sm:$0xff]  }
 0x499   : > { %v7565_v7 = vadd.f32 %v7564_v52, %v7563_v37  ;;  %7826 = vmatprep.subr.bf16.mxu0 %v14107_v31  ;;  %v14123_v52 = vld [vmem:[%s14738_s1 + $0x3d8] sm:$0xff]  }
 0x49a   : > { %v7566_v9 = vpop.f32.mrf.mxu1 }
 0x49b   : > { %v14110_v12 = vadd.f32 %v7565_v7, %v4670_v42  ;;  %7845 = vmatpush3.bf16.msra.mxu1 %v12918_v36  ;;  %v14131_v36 = vld [vmem:[%s14738_s1 + $0x398] sm:$0xff]   ;;  %v212_v42 = vld [vmem:[%s9354_s25 + $0xc4] sm:$0x1] }
 0x49c   : > { %7846 = vmatprep.subr.bf16.mxu1 %v12924_v28  ;;  %7827 = vmatpush3.bf16.msra.mxu0 %v14117_v50  ;;  %v7567_v37 = vpop.f32.mrf.mxu1  ;;  %v14137_v28 = vld [vmem:[%s14738_s1 + $0x3d0] sm:$0xff]   ;;  %v6076_v9 = vcombine.low %v13978_v6, %v212_v42 }
 0x49d   : > { %7828 = vmatprep.subr.bf16.mxu0 %v14123_v52 }
 0x49e   : > { %v14184_v7 = vrot.slane %v6076_v9, 1  ;;  %v14214_v9 = vld [vmem:[%s14738_s1 + $0x4b0] sm:$0xff]  }
 0x49f   : > { %7847 = vmatpush3.bf16.msra.mxu1 %v12938_v14  ;;  %v14145_v14 = vld [vmem:[%s14738_s1 + $0x390] sm:$0xff]  }
 0x4a0   : > { %7848 = vmatprep.subr.bf16.mxu1 %v12944_v0  ;;  %7829 = vmatpush3.bf16.msra.mxu0 %v14131_v36  ;;  %v14151_v0 = vld [vmem:[%s14738_s1 + $0x3c8] sm:$0xff]  }
 0x4a1   : > { %7830 = vmatprep.subr.bf16.mxu0 %v14137_v28 }
 0x4a3   : > { %7849 = vmatpush3.bf16.msra.mxu1 %v12952_v41  ;;  %v14160_v41 = vld [vmem:[%s14738_s1 + $0x388] sm:$0xff]  }
 0x4a4   : > { %7850 = vmatprep.subr.bf16.mxu1 %v12958_v38  ;;  %7831 = vmatpush3.bf16.msra.mxu0 %v14145_v14  ;;  %v14166_v38 = vld [vmem:[%s14738_s1 + $0x3c0] sm:$0xff]  }
 0x4a5   : > { %7832 = vmatprep.subr.bf16.mxu0 %v14151_v0 }
 0x4a7   : > { %7851 = vmatpush3.bf16.msra.mxu1 %v12966_v11  ;;  %v14175_v11 = vld [vmem:[%s14738_s1 + $0x380] sm:$0xff]  }
 0x4a8   : > { %7852 = vmatprep.subr.bf16.mxu1 %v12972_v55  ;;  %7833 = vmatpush3.bf16.msra.mxu0 %v14160_v41  ;;  %v14181_v55 = vld [vmem:[%s14738_s1 + $0x4f8] sm:$0xff]  }
 0x4a9   : > { %7834 = vmatprep.subr.bf16.mxu0 %v14166_v38  ;;  %15858 = vst [vmem:[#allocation137_spill] sm:$0xff] %v14181_v55 }
 0x4ab   : > { %7853 = vmatpush3.bf16.msra.mxu1 %v12988_v2 }
 0x4ac   : > { %7854 = vmatprep.subr.bf16.mxu1 %v12997_v56  ;;  %7835 = vmatpush3.bf16.msra.mxu0 %v14175_v11  ;;  %v14194_v56 = vld [vmem:[%s14738_s1 + $0x4b8] sm:$0xff]  }
 0x4ad   : > { %7864 = vmatprep.subr.bf16.mxu0 %v14181_v55  ;;  %15859 = vst [vmem:[#allocation138_spill] sm:$0xff] %v14194_v56 }
 0x4af   : > { %7855 = vmatpush3.bf16.msra.mxu1 %v13019_v35  ;;  %v14187_v2 = vpop.f32.mrf.mxu0  ;;  %5234 = vmatmul.mubr.bf16.vlgmr.msra.gmra.mxu0 %v13415_v18  ;;  %v14202_v35 = vld [vmem:[%s14738_s1 + $0x4f0] sm:$0xff]  }
 0x4b0   : > { %7856 = vmatprep.subr.bf16.mxu1 %v13025_v17  ;;  %7865 = vmatpush3.bf16.msra.mxu0 %v14194_v56  ;;  %15860 = vst [vmem:[#allocation139_spill] sm:$0xff] %v14202_v35  ;;  %v14208_v17 = vld [vmem:[%s9354_s25 + $0x108] sm:$0xf]  ;;  %v14218_v56 = vld [vmem:[%s9354_s25 + $0x80] sm:$0xf] }
 0x4b1   : > { %v14197_v37 = vpop.f32.mrf.mxu0  ;;  %7866 = vmatprep.subr.bf16.mxu0 %v14202_v35  ;;  %5313 = vmatprep.mubr.bf16.mxu0 %v14184_v7  ;;  %v14223_v35 = vld [vmem:[%s14738_s1 + $0x4e8] sm:$0xff]  }
 0x4b2   : > { %15861 = vst [vmem:[#allocation140_spill] sm:$0xff] %v14223_v35 }
 0x4b3   : > { %7857 = vmatpush3.bf16.msra.mxu1 %v13043_v21  ;;  %v7588_v42 = vpop.f32.mrf.mxu0 }
 0x4b4   : > { %7886 = vmatprep.subr.bf16.mxu1 %v13049_v19  ;;  %7867 = vmatpush3.bf16.msra.mxu0 %v14214_v9  ;;  %v14243_v42 = vld [vmem:[%s14738_s1 + $0x4e0] sm:$0xff]  }
 0x4b5   : > { %v7589_v55 = vpop.f32.mrf.mxu0  ;;  %7868 = vmatprep.subr.bf16.mxu0 %v14223_v35  ;;  %v6069_v35 = vcombine.low %v14208_v17, %v14208_v17 }
 0x4b6   : > { %v14226_v21 = vpop.f32.mrf.mxu1  ;;  %5274 = vmatmul.mubr.bf16.vlgmr.msra.gmra.mxu1 %v14208_v17  ;;  %v14237_v55 = vld [vmem:[%s14738_s1 + $0x4a8] sm:$0xff]  }
 0x4b7   : > { %7887 = vmatpush3.bf16.msra.mxu1 %v13070_v47  ;;  %5353 = vmatprep.mubr.bf16.mxu1 %v14218_v56  ;;  %15862 = vst [vmem:[#allocation141_spill] sm:$0xff] %v14237_v55 }
 0x4b8   : > { %v14231_v19 = vpop.f32.mrf.mxu1  ;;  %7888 = vmatprep.subr.bf16.mxu1 %v13078_v22  ;;  %7869 = vmatpush3.bf16.msra.mxu0 %v14237_v55  ;;  %v14251_v22 = vld [vmem:[%s14738_s1 + $0x4a0] sm:$0xff]  }
 0x4b9   : > { %7870 = vmatprep.subr.bf16.mxu0 %v14243_v42 }
 0x4ba   : > { %v7610_v47 = vpop.f32.mrf.mxu1 }
 0x4bb   : > { %7889 = vmatpush3.bf16.msra.mxu1 %v13101_v44  ;;  %v6078_v44 = vcombine.low %v14218_v56, %v14218_v56 }
 0x4bc   : > { %7890 = vmatprep.subr.bf16.mxu1 %v13107_v5  ;;  %7871 = vmatpush3.bf16.msra.mxu0 %v14251_v22  ;;  %v7611_v55 = vpop.f32.mrf.mxu1  ;;  %v555_v5 = vshll.u32 %v6069_v35, 16 }
 0x4bd   : > { %7872 = vmatprep.subr.bf16.mxu0 %v12982_v8  ;;  %v618_v8 = vshll.u32 %v6078_v44, 16 }
 0x4be   : > { %v557_v55 = vrot.slane %v555_v5, 1  ;;  %v15870_v5 = vld [vmem:[#allocation5_spill] sm:$0xff] }
 0x4bf   : > { %7891 = vmatpush3.bf16.msra.mxu1 %v13127_v33  ;;  %v553_v33 = vshrl.u32 %v6069_v35, 16  ;;  %v15869_v35 = vld [vmem:[#allocation12_spill] sm:$0xff] }
 0x4c0   : > { %7892 = vmatprep.subr.bf16.mxu1 %v13133_v57  ;;  %7873 = vmatpush3.bf16.msra.mxu0 %v13005_v48  ;;  %v616_v48 = vshrl.u32 %v6078_v44, 16 }
 0x4c1   : > { %7874 = vmatprep.subr.bf16.mxu0 %v13013_v20  ;;  %v620_v20 = vrot.slane %v618_v8, 1  ;;  %v14272_v57 = vor.u32 %v557_v55, %v553_v33  ;;  %v15871_v8 = vld [vmem:[#allocation16_spill] sm:$0xff]  ;;  %v15872_v55 = vld [vmem:[#allocation6_spill] sm:$0xff] }
 0x4c3   : > { %7893 = vmatpush3.bf16.msra.mxu1 %v13151_v30  ;;  %v15865_v30 = vld [vmem:[#allocation10_spill] sm:$0xff] }
 0x4c4   : > { %7894 = vmatprep.subr.bf16.mxu1 %v13157_v3  ;;  %7875 = vmatpush3.bf16.msra.mxu0 %v13031_v45  ;;  %v15863_v45 = vld [vmem:[#allocation3_spill] sm:$0xff] }
 0x4c5   : > { %7876 = vmatprep.subr.bf16.mxu0 %v13037_v49  ;;  %v14277_v49 = vor.u32 %v620_v20, %v616_v48  ;;  %v15866_v3 = vld [vmem:[#allocation15_spill] sm:$0xff] }
 0x4c6   : > { %v15873_v20 = vld [vmem:[#allocation7_spill] sm:$0xff] }
 0x4c7   : > { %7895 = vmatpush3.bf16.msra.mxu1 %v13175_v25  ;;  %v15867_v25 = vld [vmem:[#allocation24_spill] sm:$0xff] }
 0x4c8   : > { %7896 = vmatprep.subr.bf16.mxu1 %v13181_v16  ;;  %7877 = vmatpush3.bf16.msra.mxu0 %v13055_v46 }
 0x4c9   : > { %7878 = vmatprep.subr.bf16.mxu0 %v13064_v54  ;;  %v15864_v54 = vld [vmem:[#allocation9_spill] sm:$0xff] }
 0x4cb   : > { %7897 = vmatpush3.bf16.msra.mxu1 %v13204_v10 }
 0x4cc   : > { %7898 = vmatprep.subr.bf16.mxu1 %v13210_v4  ;;  %7879 = vmatpush3.bf16.msra.mxu0 %v13087_v1  ;;  %v14287_v1 = vld [vmem:[%s9354_s25 + $0x38] sm:$0xf] }
 0x4cd   : > { %7908 = vmatprep.subr.bf16.mxu0 %v15863_v45  ;;  %v7587_v45 = vadd.f32 %v14197_v37, %v14187_v2  ;;  %v15877_v2 = vld [vmem:[#allocation11_spill] sm:$0xff] }
 0x4cf   : > { %7899 = vmatpush3.bf16.msra.mxu1 %v13233_v24  ;;  %v7629_v46 = vpop.f32.mrf.mxu0  ;;  %5314 = vmatmul.mubr.bf16.vlgmr.msra.gmra.mxu0 %v14272_v57  ;;  %v15868_v24 = vld [vmem:[#allocation4_spill] sm:$0xff] }
 0x4d0   : > { %7900 = vmatprep.subr.bf16.mxu1 %v15864_v54  ;;  %7909 = vmatpush3.bf16.msra.mxu0 %v15865_v30  ;;  %v15874_v54 = vld [vmem:[#allocation18_spill] sm:$0xff] }
 0x4d1   : > { %v7630_v10 = vpop.f32.mrf.mxu0  ;;  %7910 = vmatprep.subr.bf16.mxu0 %v15866_v3  ;;  %5393 = vmatprep.mubr.bf16.mxu0 %v14277_v49  ;;  %v4750_v3 = vadd.f32 %v7587_v45, %v14110_v12  ;;  %v15879_v12 = vld [vmem:[#allocation27_spill] sm:$0xff]  ;;  %v15885_v45 = vld [vmem:[#allocation40_spill] sm:$0xff] }
 0x4d2   : > { %v7631_v37 = vadd.f32 %v7630_v10, %v7629_v46  ;;  %v15880_v46 = vld [vmem:[#allocation14_spill] sm:$0xff]  ;;  %v15881_v10 = vld [vmem:[#allocation17_spill] sm:$0xff] }
 0x4d3   : > { %7901 = vmatpush3.bf16.msra.mxu1 %v15867_v25  ;;  %v7632_v16 = vpop.f32.mrf.mxu0  ;;  %v7609_v25 = vadd.f32 %v14231_v19, %v14226_v21  ;;  %v187_v19 = vld [vmem:[%s9354_s25 + $0x3c] sm:$0x1] }
 0x4d4   : > { %8312 = vmatprep.subr.bf16.mxu1 %v15178_v40  ;;  %7911 = vmatpush3.bf16.msra.mxu0 %v15868_v24 }
 0x4d5   : > { %v7633_v4 = vpop.f32.mrf.mxu0  ;;  %7912 = vmatprep.subr.bf16.mxu0 %v15869_v35 }
 0x4d6   : > { %v7651_v47 = vpop.f32.mrf.mxu1  ;;  %5354 = vmatmul.mubr.bf16.vlgmr.msra.gmra.mxu1 %v14287_v1  ;;  %v4790_v4 = vadd.f32 %v7609_v25, %v4750_v3  ;;  %v15886_v3 = vld [vmem:[#allocation58_spill] sm:$0xff]  ;;  %v15887_v25 = vld [vmem:[#allocation19_spill] sm:$0xff] }
 0x4d7   : > { %8313 = vmatpush3.bf16.msra.mxu1 %v13279_v58  ;;  %8328 = vmatprep.mubr.msk.bf16.mxu1 %vm9228_vm0, %v15178_v40  ;;  %v6077_v58 = vcombine.low %v14287_v1, %v14287_v1 }
 0x4d8   : > { %v7652_v44 = vpop.f32.mrf.mxu1  ;;  %8314 = vmatprep.subr.bf16.mxu1 %v15178_v40  ;;  %7913 = vmatpush3.bf16.msra.mxu0 %v15870_v5  ;;  %v4830_v35 = vadd.f32 %v7631_v37, %v4790_v4  ;;  %v15891_v4 = vld [vmem:[#allocation47_spill] sm:$0xff] }
 0x4d9   : > { %7914 = vmatprep.subr.bf16.mxu0 %v15871_v8  ;;  %v607_v30 = vshll.u32 %v6077_v58, 16  ;;  %v605_v16 = vshrl.u32 %v6077_v58, 16  ;;  %v7653_v21 = vadd.f32 %v7652_v44, %v7651_v47  ;;  %v15883_v47 = vld [vmem:[#allocation26_spill] sm:$0xff] }
 0x4da   : > { %v7654_v33 = vpop.f32.mrf.mxu1 }
 0x4db   : > { %8315 = vmatpush3.bf16.msra.mxu1 %v13302_v27  ;;  %v15875_v27 = vld [vmem:[#allocation8_spill] sm:$0xff]  ;;  %v609_v24 = vrot.slane %v607_v30, 1  ;;  %v4870_v8 = vadd.f32 %v7653_v21, %v4830_v35  ;;  %v15882_v33 = vld [vmem:[#allocation35_spill] sm:$0xff] }
 0x4dc   : > { %8316 = vmatprep.subr.bf16.mxu1 %v15178_v40  ;;  %7915 = vmatpush3.bf16.msra.mxu0 %v15872_v55  ;;  %v7655_v48 = vpop.f32.mrf.mxu1 }
 0x4dd   : > { %7916 = vmatprep.subr.bf16.mxu0 %v15873_v20  ;;  %v14324_v5 = vor.u32 %v609_v24, %v605_v16  ;;  %v15884_v48 = vld [vmem:[#allocation30_spill] sm:$0xff]  ;;  %v15890_v24 = vld [vmem:[#allocation43_spill] sm:$0xff] }
 0x4df   : > { %8317 = vmatpush3.bf16.msra.mxu1 %v13323_v23  ;;  %v15876_v23 = vld [vmem:[#allocation21_spill] sm:$0xff] }
 0x4e0   : > { %8318 = vmatprep.subr.bf16.mxu1 %v15178_v40  ;;  %7917 = vmatpush3.bf16.msra.mxu0 %v15874_v54  ;;  %v6293_v54 = vld [vmem:[%s11135_s24 + $0x10] sm:$0xf] }
 0x4e1   : > { %7918 = vmatprep.subr.bf16.mxu0 %v15875_v27 }
 0x4e3   : > { %8319 = vmatpush3.bf16.msra.mxu1 %v13343_v63  ;;  %v15878_v63 = vld [vmem:[#allocation13_spill] sm:$0xff] }
 0x4e4   : > { %8320 = vmatprep.subr.bf16.mxu1 %v15178_v40  ;;  %7919 = vmatpush3.bf16.msra.mxu0 %v15876_v23 }
 0x4e5   : > { %7920 = vmatprep.subr.bf16.mxu0 %v15877_v2  ;;  %v15888_v2 = vld [vmem:[#allocation46_spill] sm:$0xff] }
 0x4e7   : > { %8321 = vmatpush3.bf16.msra.mxu1 %v13365_v32  ;;  %v6079_v32 = vcombine.low %v14287_v1, %v187_v19  ;;  %v15893_v19 = vld [vmem:[#allocation29_spill] sm:$0xff] }
 0x4e8   : > { %8322 = vmatprep.subr.bf16.mxu1 %v15178_v40  ;;  %7921 = vmatpush3.bf16.msra.mxu0 %v15878_v63 }
 0x4e9   : > { %7922 = vmatprep.subr.bf16.mxu0 %v15879_v12  ;;  %v14336_v20 = vrot.slane %v6079_v32, 1  ;;  %v15892_v12 = vld [vmem:[#allocation20_spill] sm:$0xff] }
 0x4eb   : > { %8323 = vmatpush3.bf16.msra.mxu1 %v13385_v29 }
 0x4ec   : > { %8324 = vmatprep.subr.bf16.mxu1 %v15178_v40  ;;  %7923 = vmatpush3.bf16.msra.mxu0 %v15880_v46  ;;  %v15894_v46 = vld [vmem:[#allocation45_spill] sm:$0xff] }
 0x4ed   : > { %7939 = vmatprep.subr.bf16.mxu0 %v15881_v10  ;;  %v15895_v10 = vld [vmem:[#allocation33_spill] sm:$0xff] }
 0x4ef   : > { %8325 = vmatpush3.bf16.msra.mxu1 %v15882_v33  ;;  %v4909_v55 = vpop.f32.mrf.mxu0  ;;  %5394 = vmatmul.mubr.bf16.vlgmr.msra.gmra.mxu0 %v14324_v5  ;;  %v15899_v33 = vld [vmem:[#allocation22_spill] sm:$0xff] }
 0x4f0   : > { %8326 = vmatprep.subr.bf16.mxu1 %v15178_v40  ;;  %v4910_v29 = vadd.f32 %v4909_v55, %v4870_v8  ;;  %7940 = vmatpush3.bf16.msra.mxu0 %v15883_v47  ;;  %v15896_v8 = vld [vmem:[#allocation50_spill] sm:$0xff] }
 0x4f1   : > { %v8310_v44 = vpop.f32.mrf.mxu0  ;;  %7941 = vmatprep.subr.bf16.mxu0 %v15884_v48  ;;  %5479 = vmatprep.mubr.bf16.mxu0 %v12992_v39  ;;  %v15900_v55 = vld [vmem:[#allocation34_spill] sm:$0xff]  ;;  %v15904_v48 = vld [vmem:[#allocation39_spill] sm:$0xff] }
 0x4f2   : > { %v4915_v58 = vmax.f32 %v4910_v29, 0.0  ;;  %v15901_v29 = vld [vmem:[#allocation72_spill] sm:$0xff]  ;;  %v15902_v47 = vld [vmem:[#allocation54_spill] sm:$0xff]  ;;  %v15903_v44 = vld [vmem:[#allocation23_spill] sm:$0xff] }
 0x4f3   : > { %8327 = vmatpush3.bf16.msra.mxu1 %v15885_v45  ;;  %v4912_v27 = vpop.f32.mrf.mxu0  ;;  %v15906_v45 = vld [vmem:[#allocation41_spill] sm:$0xff] }
 0x4f4   : > { %v4916_v30 = vpack.c.bf16 %v4915_v58, %v4915_v58  ;;  %7961 = vmatprep.subr.bf16.mxu1 %v15886_v3  ;;  %7942 = vmatpush3.bf16.msra.mxu0 %v15887_v25  ;;  %v15905_v58 = vld [vmem:[#allocation55_spill] sm:$0xff]  ;;  %v15909_v27 = vld [vmem:[#allocation42_spill] sm:$0xff]  ;;  %v15911_v3 = vld [vmem:[#allocation28_spill] sm:$0xff] }
 0x4f5   : > { %v8311_v23 = vpop.f32.mrf.mxu0  ;;  %7943 = vmatprep.subr.bf16.mxu0 %v15888_v2  ;;  %v15912_v25 = vld [vmem:[#allocation44_spill] sm:$0xff]  ;;  %v15913_v2 = vld [vmem:[#allocation65_spill] sm:$0xff] }
 0x4f6   : > { %v4919_v16 = vsel %vm11143_vm3, %v4916_v30, %v6293_v54  ;;  %8329 = vmatmul.mubr.bf16.vlgmr.msra.gmra.mxu1 %v14336_v20  ;;  %v7682_v39 = vpop.f32.mrf.mxu1  ;;  %v15908_v54 = vld [vmem:[#allocation59_spill] sm:$0xff]  ;;  %v15910_v30 = vld [vmem:[#allocation62_spill] sm:$0xff] }
 0x4f7   : > { %6294 = vst [vmem:[%s11135_s24 + $0x10] sm:$0xf] %v4919_v16  ;;  %7962 = vmatpush3.bf16.msra.mxu1 %v15890_v24  ;;  %5519 = vmatprep.mubr.bf16.mxu1 %v13090_v61  ;;  %v15897_v61 = vld [vmem:[#allocation48_spill] sm:$0xff]  ;;  %v15914_v16 = vld [vmem:[#allocation31_spill] sm:$0xff] }
 0x4f8   : > { %7963 = vmatprep.subr.bf16.mxu1 %v13457_v51  ;;  %7944 = vmatpush3.bf16.msra.mxu0 %v15891_v4  ;;  %v7683_v63 = vpop.f32.mrf.mxu1  ;;  %v15898_v51 = vld [vmem:[#allocation36_spill] sm:$0xff]  ;;  %v15916_v4 = vld [vmem:[#allocation38_spill] sm:$0xff] }
 0x4f9   : > { %7945 = vmatprep.subr.bf16.mxu0 %v15892_v12  ;;  %v7684_v35 = vadd.f32 %v7683_v63, %v7682_v39  ;;  %v15915_v24 = vld [vmem:[#allocation32_spill] sm:$0xff] }
 0x4fa   : > { %v7685_v21 = vpop.f32.mrf.mxu1 }
 0x4fb   : > { %7964 = vmatpush3.bf16.msra.mxu1 %v15893_v19  ;;  %v4956_v63 = vadd.f32 %v15916_v4, %v7684_v35  ;;  %v15917_v21 = vld [vmem:[#allocation67_spill] sm:$0xff]  ;;  %v15922_v35 = vld [vmem:[#allocation73_spill] sm:$0xff]  ;;  %v15941_v4 = vld [vmem:[#allocation70_spill] sm:$0xff] }
 0x4fc   : > { %7965 = vmatprep.subr.bf16.mxu1 %v15894_v46  ;;  %7946 = vmatpush3.bf16.msra.mxu0 %v15895_v10  ;;  %v7686_v32 = vpop.f32.mrf.mxu1  ;;  %v15918_v10 = vld [vmem:[#allocation69_spill] sm:$0xff] }
 0x4fd   : > { %7947 = vmatprep.subr.bf16.mxu0 %v15896_v8  ;;  %v15919_v32 = vld [vmem:[#allocation49_spill] sm:$0xff]  ;;  %v15920_v8 = vld [vmem:[#allocation51_spill] sm:$0xff] }
 0x4ff   : > { %7966 = vmatpush3.bf16.msra.mxu1 %v13508_v60  ;;  %v15907_v60 = vld [vmem:[#allocation25_spill] sm:$0xff] }
 0x500   : > { %7967 = vmatprep.subr.bf16.mxu1 %v15897_v61  ;;  %7948 = vmatpush3.bf16.msra.mxu0 %v15898_v51  ;;  %v15921_v51 = vld [vmem:[#allocation53_spill] sm:$0xff] }
 0x501   : > { %7949 = vmatprep.subr.bf16.mxu0 %v15899_v33 }
 0x503   : > { %7968 = vmatpush3.bf16.msra.mxu1 %v15900_v55  ;;  %v15923_v55 = vld [vmem:[#allocation37_spill] sm:$0xff] }
 0x504   : > { %7969 = vmatprep.subr.bf16.mxu1 %v15901_v29  ;;  %7950 = vmatpush3.bf16.msra.mxu0 %v15902_v47 }
 0x505   : > { %7951 = vmatprep.subr.bf16.mxu0 %v15903_v44  ;;  %v15924_v44 = vld [vmem:[#allocation56_spill] sm:$0xff] }
 0x507   : > { %7970 = vmatpush3.bf16.msra.mxu1 %v15904_v48  ;;  %v15925_v48 = vld [vmem:[#allocation57_spill] sm:$0xff] }
 0x508   : > { %7971 = vmatprep.subr.bf16.mxu1 %v15905_v58  ;;  %7952 = vmatpush3.bf16.msra.mxu0 %v15906_v45  ;;  %v15926_v58 = vld [vmem:[#allocation76_spill] sm:$0xff]  ;;  %v15927_v45 = vld [vmem:[#allocation77_spill] sm:$0xff] }
 0x509   : > { %7953 = vmatprep.subr.bf16.mxu0 %v15907_v60  ;;  %v15929_v60 = vld [vmem:[#allocation61_spill] sm:$0xff] }
 0x50b   : > { %7972 = vmatpush3.bf16.msra.mxu1 %v15908_v54  ;;  %v15931_v54 = vld [vmem:[#allocation63_spill] sm:$0xff] }
 0x50c   : > { %7973 = vmatprep.subr.bf16.mxu1 %v15909_v27  ;;  %7954 = vmatpush3.bf16.msra.mxu0 %v15910_v30  ;;  %v15932_v27 = vld [vmem:[#allocation81_spill] sm:$0xff]  ;;  %v15933_v30 = vld [vmem:[#allocation64_spill] sm:$0xff] }
 0x50d   : > { %7983 = vmatprep.subr.bf16.mxu0 %v15911_v3  ;;  %v15934_v3 = vld [vmem:[#allocation84_spill] sm:$0xff] }
 0x50f   : > { %7974 = vmatpush3.bf16.msra.mxu1 %v15912_v25  ;;  %v7704_v23 = vpop.f32.mrf.mxu0  ;;  %5480 = vmatmul.mubr.bf16.vlgmr.msra.gmra.mxu0 %v13191_v15  ;;  %v15935_v25 = vld [vmem:[#allocation66_spill] sm:$0xff] }
 0x510   : > { %7975 = vmatprep.subr.bf16.mxu1 %v15913_v2  ;;  %7984 = vmatpush3.bf16.msra.mxu0 %v15914_v16  ;;  %v15937_v2 = vld [vmem:[#allocation68_spill] sm:$0xff] }
 0x511   : > { %v7705_v39 = vpop.f32.mrf.mxu0  ;;  %7985 = vmatprep.subr.bf16.mxu0 %v15915_v24  ;;  %5559 = vmatprep.mubr.bf16.mxu0 %v13978_v6  ;;  %v15938_v16 = vld [vmem:[#allocation88_spill] sm:$0xff]  ;;  %v15940_v24 = vld [vmem:[#allocation89_spill] sm:$0xff] }
 0x512   : > { %v7706_v12 = vadd.f32 %v7705_v39, %v7704_v23  ;;  %v15936_v23 = vld [vmem:[#allocation85_spill] sm:$0xff]  ;;  %v15939_v39 = vld [vmem:[#allocation52_spill] sm:$0xff] }
 0x513   : > { %7976 = vmatpush3.bf16.msra.mxu1 %v15917_v21  ;;  %v7707_v19 = vpop.f32.mrf.mxu0  ;;  %v15944_v21 = vld [vmem:[#allocation93_spill] sm:$0xff] }
 0x514   : > { %v4996_v46 = vadd.f32 %v7706_v12, %v4956_v63  ;;  %8005 = vmatprep.subr.bf16.mxu1 %v15918_v10  ;;  %7986 = vmatpush3.bf16.msra.mxu0 %v15919_v32  ;;  %v15942_v63 = vld [vmem:[#allocation71_spill] sm:$0xff]  ;;  %v15943_v12 = vld [vmem:[#allocation92_spill] sm:$0xff] }
 0x515   : > { %v7708_v15 = vpop.f32.mrf.mxu0  ;;  %7987 = vmatprep.subr.bf16.mxu0 %v15920_v8  ;;  %v15946_v10 = vld [vmem:[#allocation75_spill] sm:$0xff] }
 0x516   : > { %v7726_v61 = vpop.f32.mrf.mxu1  ;;  %5520 = vmatmul.mubr.bf16.vlgmr.msra.gmra.mxu1 %v13285_v13  ;;  %v15947_v15 = vld [vmem:[#allocation96_spill] sm:$0xff] }
 0x517   : > { %8006 = vmatpush3.bf16.msra.mxu1 %v15921_v51  ;;  %5599 = vmatprep.mubr.bf16.mxu1 %v14068_v43  ;;  %v15928_v43 = vld [vmem:[#allocation60_spill] sm:$0xff] }
 0x518   : > { %v7727_v6 = vpop.f32.mrf.mxu1  ;;  %8007 = vmatprep.subr.bf16.mxu1 %v13659_v34  ;;  %7988 = vmatpush3.bf16.msra.mxu0 %v15922_v35  ;;  %v15930_v34 = vld [vmem:[#allocation80_spill] sm:$0xff]  ;;  %v15949_v35 = vld [vmem:[#allocation78_spill] sm:$0xff] }
 0x519   : > { %v7728_v33 = vadd.f32 %v7727_v6, %v7726_v61  ;;  %7989 = vmatprep.subr.bf16.mxu0 %v15923_v55  ;;  %v15948_v61 = vld [vmem:[#allocation97_spill] sm:$0xff] }
 0x51a   : > { %v7729_v29 = vpop.f32.mrf.mxu1 }
 0x51b   : > { %v5036_v47 = vadd.f32 %v7728_v33, %v4996_v46  ;;  %8008 = vmatpush3.bf16.msra.mxu1 %v15924_v44  ;;  %v15945_v46 = vld [vmem:[#allocation74_spill] sm:$0xff]  ;;  %v15950_v33 = vld [vmem:[#allocation79_spill] sm:$0xff]  ;;  %v15952_v44 = vld [vmem:[#allocation101_spill] sm:$0xff] }
 0x51c   : > { %8009 = vmatprep.subr.bf16.mxu1 %v15925_v48  ;;  %7990 = vmatpush3.bf16.msra.mxu0 %v15926_v58  ;;  %v7730_v13 = vpop.f32.mrf.mxu1  ;;  %v15953_v48 = vld [vmem:[#allocation82_spill] sm:$0xff]  ;;  %v15954_v58 = vld [vmem:[#allocation83_spill] sm:$0xff] }
 0x51d   : > { %7991 = vmatprep.subr.bf16.mxu0 %v15927_v45  ;;  %v15955_v13 = vld [vmem:[#allocation104_spill] sm:$0xff] }
 0x51f   : > { %8010 = vmatpush3.bf16.msra.mxu1 %v15928_v43 }
 0x520   : > { %8011 = vmatprep.subr.bf16.mxu1 %v15929_v60  ;;  %7992 = vmatpush3.bf16.msra.mxu0 %v15930_v34  ;;  %v15956_v60 = vld [vmem:[#allocation105_spill] sm:$0xff]  ;;  %v15957_v34 = vld [vmem:[#allocation86_spill] sm:$0xff] }
 0x521   : > { %7993 = vmatprep.subr.bf16.mxu0 %v15931_v54  ;;  %v15958_v54 = vld [vmem:[#allocation87_spill] sm:$0xff] }
 0x523   : > { %8012 = vmatpush3.bf16.msra.mxu1 %v15932_v27  ;;  %v15959_v27 = vld [vmem:[#allocation108_spill] sm:$0xff] }
 0x524   : > { %8013 = vmatprep.subr.bf16.mxu1 %v15933_v30  ;;  %7994 = vmatpush3.bf16.msra.mxu0 %v15934_v3  ;;  %v15961_v30 = vld [vmem:[#allocation90_spill] sm:$0xff]  ;;  %v15962_v3 = vld [vmem:[#allocation91_spill] sm:$0xff] }
 0x525   : > { %7995 = vmatprep.subr.bf16.mxu0 %v15935_v25  ;;  %v15963_v25 = vld [vmem:[#allocation112_spill] sm:$0xff] }
 0x527   : > { %8014 = vmatpush3.bf16.msra.mxu1 %v15936_v23  ;;  %v15964_v23 = vld [vmem:[#allocation113_spill] sm:$0xff] }
 0x528   : > { %8015 = vmatprep.subr.bf16.mxu1 %v15937_v2  ;;  %7996 = vmatpush3.bf16.msra.mxu0 %v15938_v16  ;;  %v15965_v2 = vld [vmem:[#allocation94_spill] sm:$0xff]  ;;  %v15966_v16 = vld [vmem:[#allocation95_spill] sm:$0xff] }
 0x529   : > { %7997 = vmatprep.subr.bf16.mxu0 %v15939_v39  ;;  %v15967_v39 = vld [vmem:[#allocation116_spill] sm:$0xff] }
 0x52b   : > { %8016 = vmatpush3.bf16.msra.mxu1 %v15940_v24  ;;  %v15968_v24 = vld [vmem:[#allocation117_spill] sm:$0xff] }
 0x52c   : > { %8017 = vmatprep.subr.bf16.mxu1 %v15941_v4  ;;  %7998 = vmatpush3.bf16.msra.mxu0 %v15942_v63  ;;  %v15969_v4 = vld [vmem:[#allocation98_spill] sm:$0xff]  ;;  %v15970_v63 = vld [vmem:[#allocation99_spill] sm:$0xff] }
 0x52d   : > { %8027 = vmatprep.subr.bf16.mxu0 %v15943_v12  ;;  %v15971_v12 = vld [vmem:[#allocation120_spill] sm:$0xff] }
 0x52f   : > { %8018 = vmatpush3.bf16.msra.mxu1 %v15944_v21  ;;  %v7748_v19 = vpop.f32.mrf.mxu0  ;;  %5560 = vmatmul.mubr.bf16.vlgmr.msra.gmra.mxu0 %v13415_v18  ;;  %v15951_v18 = vld [vmem:[#allocation100_spill] sm:$0xff]  ;;  %v15972_v21 = vld [vmem:[#allocation121_spill] sm:$0xff] }
 0x530   : > { %8019 = vmatprep.subr.bf16.mxu1 %v15945_v46  ;;  %8028 = vmatpush3.bf16.msra.mxu0 %v15946_v10  ;;  %v15974_v46 = vld [vmem:[#allocation103_spill] sm:$0xff]  ;;  %v15975_v10 = vld [vmem:[#allocation124_spill] sm:$0xff] }
 0x531   : > { %v7749_v32 = vpop.f32.mrf.mxu0  ;;  %8029 = vmatprep.subr.bf16.mxu0 %v15947_v15  ;;  %5639 = vmatprep.mubr.bf16.mxu0 %v14184_v7 }
 0x532   : > { %v7750_v8 = vadd.f32 %v7749_v32, %v7748_v19  ;;  %v15973_v19 = vld [vmem:[#allocation102_spill] sm:$0xff] }
 0x533   : > { %8020 = vmatpush3.bf16.msra.mxu1 %v15948_v61  ;;  %v7751_v51 = vpop.f32.mrf.mxu0  ;;  %v15976_v32 = vld [vmem:[#allocation106_spill] sm:$0xff]  ;;  %v15978_v61 = vld [vmem:[#allocation107_spill] sm:$0xff] }
 0x534   : > { %v5076_v6 = vadd.f32 %v7750_v8, %v5036_v47  ;;  %8049 = vmatprep.subr.bf16.mxu1 %v15949_v35  ;;  %8030 = vmatpush3.bf16.msra.mxu0 %v15950_v33  ;;  %v15977_v8 = vld [vmem:[#allocation129_spill] sm:$0xff]  ;;  %v15980_v33 = vld [vmem:[#allocation114_spill] sm:$0xff] }
 0x535   : > { %v7752_v55 = vpop.f32.mrf.mxu0  ;;  %8031 = vmatprep.subr.bf16.mxu0 %v15951_v18 }
 0x536   : > { %v7770_v29 = vpop.f32.mrf.mxu1  ;;  %5600 = vmatmul.mubr.bf16.vlgmr.msra.gmra.mxu1 %v14208_v17 }
 0x537   : > { %8050 = vmatpush3.bf16.msra.mxu1 %v15952_v44  ;;  %5679 = vmatprep.mubr.bf16.mxu1 %v14218_v56  ;;  %v15960_v56 = vld [vmem:[#allocation109_spill] sm:$0xff]  ;;  %v15982_v44 = vld [vmem:[#allocation111_spill] sm:$0xff] }
 0x538   : > { %v7771_v7 = vpop.f32.mrf.mxu1  ;;  %8051 = vmatprep.subr.bf16.mxu1 %v15953_v48  ;;  %8032 = vmatpush3.bf16.msra.mxu0 %v15954_v58  ;;  %v15983_v48 = vld [vmem:[#allocation132_spill] sm:$0xff] }
 0x539   : > { %v7772_v47 = vadd.f32 %v7771_v7, %v7770_v29  ;;  %8033 = vmatprep.subr.bf16.mxu0 %v15955_v13  ;;  %v15981_v29 = vld [vmem:[#allocation119_spill] sm:$0xff] }
 0x53a   : > { %v7773_v45 = vpop.f32.mrf.mxu1  ;;  %v213_v7 = vld [vmem:[%s9354_s25 + $0xc8] sm:$0xf] }
 0x53b   : > { %v5116_v43 = vadd.f32 %v7772_v47, %v5076_v6  ;;  %8052 = vmatpush3.bf16.msra.mxu1 %v15956_v60  ;;  %v15979_v6 = vld [vmem:[#allocation128_spill] sm:$0xff]  ;;  %v15984_v47 = vld [vmem:[#allocation130_spill] sm:$0xff]  ;;  %v15985_v13 = vld [vmem:[#allocation115_spill] sm:$0xff] }
 0x53c   : > { %8053 = vmatprep.subr.bf16.mxu1 %v15957_v34  ;;  %8034 = vmatpush3.bf16.msra.mxu0 %v15958_v54  ;;  %v7774_v17 = vpop.f32.mrf.mxu1  ;;  %v15987_v54 = vld [vmem:[#allocation123_spill] sm:$0xff] }
 0x53d   : > { %8035 = vmatprep.subr.bf16.mxu0 %v15959_v27  ;;  %v15988_v17 = vld [vmem:[#allocation126_spill] sm:$0xff]  ;;  %v15990_v27 = vld [vmem:[#allocation125_spill] sm:$0xff] }
 0x53f   : > { %8054 = vmatpush3.bf16.msra.mxu1 %v15960_v56  ;;  %v6080_v56 = vcombine.low %v213_v7, %v213_v7 }
 0x540   : > { %8055 = vmatprep.subr.bf16.mxu1 %v15961_v30  ;;  %8036 = vmatpush3.bf16.msra.mxu0 %v15962_v3 }
 0x541   : > { %8037 = vmatprep.subr.bf16.mxu0 %v15963_v25  ;;  %v634_v30 = vshll.u32 %v6080_v56, 16  ;;  %v632_v3 = vshrl.u32 %v6080_v56, 16  ;;  %v9178_v56 = vld [vmem:[%s14738_s1 + $0x538] sm:$0xff]  }
 0x543   : > { %8056 = vmatpush3.bf16.msra.mxu1 %v15964_v23  ;;  %v636_v25 = vrot.slane %v634_v30, 1  ;;  %v15996_v23 = vld [vmem:[#allocation135_spill] sm:$0xff] }
 0x544   : > { %8057 = vmatprep.subr.bf16.mxu1 %v15965_v2  ;;  %8038 = vmatpush3.bf16.msra.mxu0 %v15966_v16  ;;  %v15997_v16 = vld [vmem:[#allocation136_spill] sm:$0xff] }
 0x545   : > { %8039 = vmatprep.subr.bf16.mxu0 %v15967_v39  ;;  %v637_v2 = vor.u32 %v636_v25, %v632_v3  ;;  %v9181_v25 = vld [vmem:[%s14738_s1 + $0x5f8] sm:$0xff]  }
 0x547   : > { %8058 = vmatpush3.bf16.msra.mxu1 %v15968_v24  ;;  %v15998_v24 = vld [vmem:[#allocation137_spill] sm:$0xff] }
 0x548   : > { %8059 = vmatprep.subr.bf16.mxu1 %v15969_v4  ;;  %8040 = vmatpush3.bf16.msra.mxu0 %v15970_v63  ;;  %v9158_v4 = vld [vmem:[%s14738_s1 + $0x468] sm:$0xff]  }
 0x549   : > { %8041 = vmatprep.subr.bf16.mxu0 %v15971_v12 }
 0x54b   : > { %8060 = vmatpush3.bf16.msra.mxu1 %v15972_v21  ;;  %v16000_v21 = vld [vmem:[#allocation139_spill] sm:$0xff] }
 0x54c   : > { %8061 = vmatprep.subr.bf16.mxu1 %v15973_v19  ;;  %8042 = vmatpush3.bf16.msra.mxu0 %v15974_v46  ;;  %v9159_v19 = vld [vmem:[%s14738_s1 + $0x428] sm:$0xff]   ;;  %v9160_v46 = vld [vmem:[%s14738_s1 + $0x460] sm:$0xff]  }
 0x54d   : > { %8071 = vmatprep.subr.bf16.mxu0 %v15975_v10 }
 0x54f   : > { %8062 = vmatpush3.bf16.msra.mxu1 %v15976_v32  ;;  %v7792_v15 = vpop.f32.mrf.mxu0  ;;  %5640 = vmatmul.mubr.bf16.vlgmr.msra.gmra.mxu0 %v14272_v57  ;;  %v9161_v32 = vld [vmem:[%s14738_s1 + $0x420] sm:$0xff]  }
 0x550   : > { %8063 = vmatprep.subr.bf16.mxu1 %v15977_v8  ;;  %8072 = vmatpush3.bf16.msra.mxu0 %v15978_v61  ;;  %v9162_v8 = vld [vmem:[%s14738_s1 + $0x458] sm:$0xff]  }
 0x551   : > { %v7793_v51 = vpop.f32.mrf.mxu0  ;;  %8073 = vmatprep.subr.bf16.mxu0 %v15979_v6  ;;  %5719 = vmatprep.mubr.bf16.mxu0 %v14277_v49  ;;  %v16002_v61 = vld [vmem:[#allocation141_spill] sm:$0xff]  ;;  %v222_v6 = vld [vmem:[%s9354_s25 + $0x110] sm:$0xf] }
 0x552   : > { %v7794_v35 = vadd.f32 %v7793_v51, %v7792_v15  ;;  %v9164_v51 = vld [vmem:[%s14738_s1 + $0x450] sm:$0xff]  }
 0x553   : > { %8064 = vmatpush3.bf16.msra.mxu1 %v15980_v33  ;;  %v7795_v55 = vpop.f32.mrf.mxu0  ;;  %v198_v33 = vld [vmem:[%s9354_s25 + $0x88] sm:$0xf] }
 0x554   : > { %v5156_v18 = vadd.f32 %v7794_v35, %v5116_v43  ;;  %8093 = vmatprep.subr.bf16.mxu1 %v15981_v29  ;;  %8074 = vmatpush3.bf16.msra.mxu0 %v15982_v44  ;;  %v15986_v43 = vld [vmem:[#allocation118_spill] sm:$0xff]  ;;  %v9165_v35 = vld [vmem:[%s14738_s1 + $0x4d8] sm:$0xff]   ;;  %v9167_v55 = vld [vmem:[%s14738_s1 + $0x448] sm:$0xff]   ;;  %v6084_v29 = vcombine.low %v198_v33, %v198_v33 }
 0x555   : > { %v7796_v57 = vpop.f32.mrf.mxu0  ;;  %8075 = vmatprep.subr.bf16.mxu0 %v15983_v48  ;;  %v9169_v44 = vld [vmem:[%s14738_s1 + $0x4d0] sm:$0xff]  }
 0x556   : > { %v7814_v58 = vpop.f32.mrf.mxu1  ;;  %5680 = vmatmul.mubr.bf16.vlgmr.msra.gmra.mxu1 %v14287_v1  ;;  %v9171_v57 = vld [vmem:[%s14738_s1 + $0x440] sm:$0xff]  }
 0x557   : > { %8094 = vmatpush3.bf16.msra.mxu1 %v15984_v47  ;;  %5759 = vmatprep.mubr.bf16.mxu1 %v213_v7  ;;  %v672_v47 = vshll.u32 %v6084_v29, 16 }
 0x558   : > { %v7815_v49 = vpop.f32.mrf.mxu1  ;;  %8095 = vmatprep.subr.bf16.mxu1 %v14058_v59  ;;  %8076 = vmatpush3.bf16.msra.mxu0 %v15985_v13  ;;  %v15989_v59 = vld [vmem:[#allocation131_spill] sm:$0xff]  ;;  %v9174_v13 = vld [vmem:[%s14738_s1 + $0x400] sm:$0xff]  }
 0x559   : > { %v7816_v45 = vadd.f32 %v7815_v49, %v7814_v58  ;;  %8077 = vmatprep.subr.bf16.mxu0 %v15986_v43  ;;  %v9172_v58 = vld [vmem:[%s14738_s1 + $0x490] sm:$0xff]   ;;  %v9173_v49 = vld [vmem:[%s14738_s1 + $0x4c8] sm:$0xff]  }
 0x55a   : > { %v7817_v60 = vpop.f32.mrf.mxu1 }
 0x55b   : > { %v14461_v34 = vadd.f32 %v7816_v45, %v5156_v18  ;;  %8096 = vmatpush3.bf16.msra.mxu1 %v14080_v62  ;;  %v15991_v62 = vld [vmem:[#allocation110_spill] sm:$0xff]  ;;  %v6081_v18 = vcombine.low %v222_v6, %v222_v6  ;;  %v9175_v45 = vld [vmem:[%s14738_s1 + $0x578] sm:$0xff]  }
 0x55c   : > { %8097 = vmatprep.subr.bf16.mxu1 %v14086_v26  ;;  %8078 = vmatpush3.bf16.msra.mxu0 %v15987_v54  ;;  %v7818_v1 = vpop.f32.mrf.mxu1  ;;  %v15992_v26 = vld [vmem:[#allocation133_spill] sm:$0xff]  ;;  %v9176_v54 = vld [vmem:[%s14738_s1 + $0x488] sm:$0xff]  }
 0x55d   : > { %8079 = vmatprep.subr.bf16.mxu0 %v15988_v17  ;;  %v645_v48 = vshll.u32 %v6081_v18, 16  ;;  %v643_v43 = vshrl.u32 %v6081_v18, 16  ;;  %v670_v17 = vshrl.u32 %v6084_v29, 16  ;;  %v9206_v29 = vld [vmem:[%s14738_s1 + $0x500] sm:$0xff]  }
 0x55f   : > { %8098 = vmatpush3.bf16.msra.mxu1 %v14101_v53  ;;  %v15994_v53 = vld [vmem:[#allocation127_spill] sm:$0xff]  ;;  %v647_v60 = vrot.slane %v645_v48, 1 }
 0x560   : > { %8099 = vmatprep.subr.bf16.mxu1 %v14107_v31  ;;  %8080 = vmatpush3.bf16.msra.mxu0 %v15989_v59  ;;  %v15993_v31 = vld [vmem:[#allocation122_spill] sm:$0xff]  ;;  %v674_v59 = vrot.slane %v672_v47, 1 }
 0x561   : > { %8081 = vmatprep.subr.bf16.mxu0 %v15990_v27  ;;  %v9177_v27 = vld [vmem:[%s14738_s1 + $0x4c0] sm:$0xff]   ;;  %v648_v30 = vor.u32 %v647_v60, %v643_v43 }
 0x562   : > { %v675_v3 = vor.u32 %v674_v59, %v670_v17  ;;  %v9211_v59 = vld [vmem:[%s14738_s1 + $0x630] sm:$0xff]  }
 0x563   : > { %8100 = vmatpush3.bf16.msra.mxu1 %v14117_v50  ;;  %v15995_v50 = vld [vmem:[#allocation134_spill] sm:$0xff] }
 0x564   : > { %8101 = vmatprep.subr.bf16.mxu1 %v14123_v52  ;;  %8082 = vmatpush3.bf16.msra.mxu0 %v15991_v62  ;;  %v214_v52 = vld [vmem:[%s9354_s25 + $0xcc] sm:$0x1] }
 0x565   : > { %8083 = vmatprep.subr.bf16.mxu0 %v15992_v26  ;;  %v9179_v26 = vld [vmem:[%s14738_s1 + $0x570] sm:$0xff]  }
 0x567   : > { %8102 = vmatpush3.bf16.msra.mxu1 %v14131_v36 }
 0x568   : > { %8103 = vmatprep.subr.bf16.mxu1 %v14137_v28  ;;  %8084 = vmatpush3.bf16.msra.mxu0 %v15993_v31  ;;  %v6082_v28 = vcombine.low %v213_v7, %v214_v52  ;;  %v9170_v7 = vld [vmem:[%s14738_s1 + $0x408] sm:$0xff]   ;;  %v9180_v31 = vld [vmem:[%s14738_s1 + $0x480] sm:$0xff]  }
 0x569   : > { %8085 = vmatprep.subr.bf16.mxu0 %v15994_v53 }
 0x56a   : > { %v653_v39 = vrot.slane %v6082_v28, 1  ;;  %v9184_v28 = vld [vmem:[%s14738_s1 + $0x5b8] sm:$0xff]  }
 0x56b   : > { %8104 = vmatpush3.bf16.msra.mxu1 %v14145_v14 }
 0x56c   : > { %8105 = vmatprep.subr.bf16.mxu1 %v14151_v0  ;;  %8086 = vmatpush3.bf16.msra.mxu0 %v15995_v50  ;;  %v9156_v0 = vld [vmem:[%s14738_s1 + $0x470] sm:$0xff]  }
 0x56d   : > { %8115 = vmatprep.subr.bf16.mxu0 %v15996_v23  ;;  %v9182_v50 = vld [vmem:[%s14738_s1 + $0x530] sm:$0xff]   ;;  %v9183_v23 = vld [vmem:[%s14738_s1 + $0x568] sm:$0xff]  }
 0x56f   : > { %8106 = vmatpush3.bf16.msra.mxu1 %v14160_v41  ;;  %v14485_v36 = vpop.f32.mrf.mxu0  ;;  %5720 = vmatmul.mubr.bf16.vlgmr.msra.gmra.mxu0 %v14324_v5 }
 0x570   : > { %8107 = vmatprep.subr.bf16.mxu1 %v14166_v38  ;;  %8116 = vmatpush3.bf16.msra.mxu0 %v15997_v16  ;;  %v9157_v38 = vld [vmem:[%s14738_s1 + $0x430] sm:$0xff]  }
 0x571   : > { %v14490_v14 = vpop.f32.mrf.mxu0  ;;  %8117 = vmatprep.subr.bf16.mxu0 %v9156_v0  ;;  %5799 = vmatprep.mubr.bf16.mxu0 %v637_v2  ;;  %v9185_v0 = vld [vmem:[%s14738_s1 + $0x5f0] sm:$0xff]  }
 0x573   : > { %8108 = vmatpush3.bf16.msra.mxu1 %v14175_v11  ;;  %v7839_v41 = vpop.f32.mrf.mxu0  ;;  %v15999_v11 = vld [vmem:[#allocation138_spill] sm:$0xff] }
 0x574   : > { %8137 = vmatprep.subr.bf16.mxu1 %v15998_v24  ;;  %8118 = vmatpush3.bf16.msra.mxu0 %v9157_v38  ;;  %v9186_v41 = vld [vmem:[%s14738_s1 + $0x528] sm:$0xff]   ;;  %v9188_v38 = vld [vmem:[%s14738_s1 + $0x5b0] sm:$0xff]  }
 0x575   : > { %v7840_v5 = vpop.f32.mrf.mxu0  ;;  %8119 = vmatprep.subr.bf16.mxu0 %v9158_v4  ;;  %v9190_v4 = vld [vmem:[%s14738_s1 + $0x520] sm:$0xff]  }
 0x576   : > { %v14503_v63 = vpop.f32.mrf.mxu1  ;;  %5760 = vmatmul.mubr.bf16.vlgmr.msra.gmra.mxu1 %v14336_v20  ;;  %v16001_v20 = vld [vmem:[#allocation140_spill] sm:$0xff]  ;;  %v9189_v5 = vld [vmem:[%s14738_s1 + $0x5e8] sm:$0xff]  }
 0x577   : > { %8138 = vmatpush3.bf16.msra.mxu1 %v15999_v11  ;;  %5839 = vmatprep.mubr.bf16.mxu1 %v653_v39  ;;  %v9187_v39 = vld [vmem:[%s14738_s1 + $0x560] sm:$0xff]  }
 0x578   : > { %v14507_v12 = vpop.f32.mrf.mxu1  ;;  %8139 = vmatprep.subr.bf16.mxu1 %v16000_v21  ;;  %8120 = vmatpush3.bf16.msra.mxu0 %v9159_v19  ;;  %v9191_v21 = vld [vmem:[%s14738_s1 + $0x558] sm:$0xff]   ;;  %v9192_v19 = vld [vmem:[%s14738_s1 + $0x5a8] sm:$0xff]  }
 0x579   : > { %8121 = vmatprep.subr.bf16.mxu0 %v9160_v46  ;;  %v9193_v46 = vld [vmem:[%s14738_s1 + $0x5e0] sm:$0xff]  }
 0x57a   : > { %v7861_v10 = vpop.f32.mrf.mxu1 }
 0x57b   : > { %8140 = vmatpush3.bf16.msra.mxu1 %v14214_v9  ;;  %v9163_v9 = vld [vmem:[%s14738_s1 + $0x418] sm:$0xff]  }
 0x57c   : > { %8141 = vmatprep.subr.bf16.mxu1 %v16001_v20  ;;  %8122 = vmatpush3.bf16.msra.mxu0 %v9161_v32  ;;  %v7862_v15 = vpop.f32.mrf.mxu1  ;;  %v9194_v10 = vld [vmem:[%s14738_s1 + $0x518] sm:$0xff]   ;;  %v9195_v20 = vld [vmem:[%s14738_s1 + $0x550] sm:$0xff]   ;;  %v9196_v32 = vld [vmem:[%s14738_s1 + $0x5a0] sm:$0xff]  }
 0x57d   : > { %8123 = vmatprep.subr.bf16.mxu0 %v9162_v8  ;;  %v14636_v15 = vld [vmem:[%s9354_s25 + $0x40] sm:$0xf]  ;;  %v7838_v8 = vadd.f32 %v14490_v14, %v14485_v36  ;;  %v9200_v36 = vld [vmem:[%s14738_s1 + $0x598] sm:$0xff]  }
 0x57f   : > { %8142 = vmatpush3.bf16.msra.mxu1 %v16002_v61  ;;  %v9197_v61 = vld [vmem:[%s14738_s1 + $0x5d8] sm:$0xff]   ;;  %v5236_v14 = vadd.f32 %v7838_v8, %v14461_v34 }
 0x580   : > { %8143 = vmatprep.subr.bf16.mxu1 %v14243_v42  ;;  %8124 = vmatpush3.bf16.msra.mxu0 %v9163_v9  ;;  %v9166_v42 = vld [vmem:[%s14738_s1 + $0x410] sm:$0xff]  }
 0x581   : > { %8125 = vmatprep.subr.bf16.mxu0 %v9164_v51  ;;  %v9198_v9 = vld [vmem:[%s14738_s1 + $0x510] sm:$0xff]   ;;  %v9199_v51 = vld [vmem:[%s14738_s1 + $0x548] sm:$0xff]  }
 0x583   : > { %8144 = vmatpush3.bf16.msra.mxu1 %v14251_v22  ;;  %v9168_v22 = vld [vmem:[%s14738_s1 + $0x498] sm:$0xff]  }
 0x584   : > { %8145 = vmatprep.subr.bf16.mxu1 %v9165_v35  ;;  %8126 = vmatpush3.bf16.msra.mxu0 %v9166_v42  ;;  %v7860_v35 = vadd.f32 %v14507_v12, %v14503_v63  ;;  %v9201_v42 = vld [vmem:[%s14738_s1 + $0x5d0] sm:$0xff]  }
 0x585   : > { %8127 = vmatprep.subr.bf16.mxu0 %v9167_v55  ;;  %v9203_v55 = vld [vmem:[%s14738_s1 + $0x540] sm:$0xff]   ;;  %v9204_v63 = vld [vmem:[%s14738_s1 + $0x590] sm:$0xff]  }
 0x586   : > { %v5276_v12 = vadd.f32 %v7860_v35, %v5236_v14 }
 0x587   : > { %8146 = vmatpush3.bf16.msra.mxu1 %v9168_v22  ;;  %v9205_v22 = vld [vmem:[%s14738_s1 + $0x5c8] sm:$0xff]  }
 0x588   : > { %8147 = vmatprep.subr.bf16.mxu1 %v9169_v44  ;;  %8128 = vmatpush3.bf16.msra.mxu0 %v9170_v7 }
 0x589   : > { %8129 = vmatprep.subr.bf16.mxu0 %v9171_v57 }
 0x58b   : > { %8148 = vmatpush3.bf16.msra.mxu1 %v9172_v58  ;;  %v9207_v58 = vld [vmem:[%s14738_s1 + $0x588] sm:$0xff]  }
 0x58c   : > { %8149 = vmatprep.subr.bf16.mxu1 %v9173_v49  ;;  %8130 = vmatpush3.bf16.msra.mxu0 %v9174_v13  ;;  %v9208_v49 = vld [vmem:[%s14738_s1 + $0x5c0] sm:$0xff]   ;;  %v9209_v13 = vld [vmem:[%s14738_s1 + $0x638] sm:$0xff]  }
 0x58d   : > { %8159 = vmatprep.subr.bf16.mxu0 %v9175_v45 }
 0x58f   : > { %8150 = vmatpush3.bf16.msra.mxu1 %v9176_v54  ;;  %v14571_v1 = vpop.f32.mrf.mxu0  ;;  %5800 = vmatmul.mubr.bf16.vlgmr.msra.gmra.mxu0 %v222_v6  ;;  %v6083_v6 = vcombine.low %v14636_v15, %v14636_v15 }
 0x590   : > { %8151 = vmatprep.subr.bf16.mxu1 %v9177_v27  ;;  %8160 = vmatpush3.bf16.msra.mxu0 %v9178_v56 }
 0x591   : > { %v14579_v62 = vpop.f32.mrf.mxu0  ;;  %8161 = vmatprep.subr.bf16.mxu0 %v9179_v26  ;;  %5879 = vmatprep.mubr.bf16.mxu0 %v198_v33  ;;  %v9202_v33 = vld [vmem:[%s14738_s1 + $0x508] sm:$0xff]   ;;  %v661_v18 = vshll.u32 %v6083_v6, 16  ;;  %v659_v57 = vshrl.u32 %v6083_v6, 16 }
 0x592   : > { %v7882_v34 = vadd.f32 %v14579_v62, %v14571_v1  ;;  %v9210_v1 = vld [vmem:[%s14738_s1 + $0x580] sm:$0xff]  }
 0x593   : > { %8152 = vmatpush3.bf16.msra.mxu1 %v9180_v31  ;;  %v7883_v53 = vpop.f32.mrf.mxu0  ;;  %v663_v48 = vrot.slane %v661_v18, 1 }
 0x594   : > { %8181 = vmatprep.subr.bf16.mxu1 %v9181_v25  ;;  %8162 = vmatpush3.bf16.msra.mxu0 %v9182_v50  ;;  %v5316_v44 = vadd.f32 %v7882_v34, %v5276_v12 }
 0x595   : > { %v7884_v52 = vpop.f32.mrf.mxu0  ;;  %8163 = vmatprep.subr.bf16.mxu0 %v9183_v23  ;;  %v664_v54 = vor.u32 %v663_v48, %v659_v57 }
 0x596   : > { %v7902_v2 = vpop.f32.mrf.mxu1  ;;  %5840 = vmatmul.mubr.bf16.vlgmr.msra.gmra.mxu1 %v648_v30  ;;  %v9212_v30 = vld [vmem:[%s14738_s1 + $0x628] sm:$0xff]   ;;  %v9213_v52 = vld [vmem:[%s14738_s1 + $0x620] sm:$0xff]  }
 0x597   : > { %8182 = vmatpush3.bf16.msra.mxu1 %v9184_v28  ;;  %5919 = vmatprep.mubr.bf16.mxu1 %v675_v3  ;;  %v6295_v3 = vld [vmem:[%s11135_s24 + $0x14] sm:$0xf]  ;;  %v9214_v28 = vld [vmem:[%s14738_s1 + $0x618] sm:$0xff]  }
 0x598   : > { %v7903_v16 = vpop.f32.mrf.mxu1  ;;  %8183 = vmatprep.subr.bf16.mxu1 %v9185_v0  ;;  %8164 = vmatpush3.bf16.msra.mxu0 %v9186_v41  ;;  %v9215_v0 = vld [vmem:[%s14738_s1 + $0x610] sm:$0xff]  }
 0x599   : > { %8165 = vmatprep.subr.bf16.mxu0 %v9187_v39  ;;  %v7904_v7 = vadd.f32 %v7903_v16, %v7902_v2  ;;  %v189_v16 = vld [vmem:[%s9354_s25 + $0x44] sm:$0x1]  ;;  %v9216_v39 = vld [vmem:[%s14738_s1 + $0x608] sm:$0xff]  }
 0x59a   : > { %v7905_v24 = vpop.f32.mrf.mxu1  ;;  %v6085_v41 = vcombine.low %v14636_v15, %v189_v16 }
 0x59b   : > { %8184 = vmatpush3.bf16.msra.mxu1 %v9188_v38  ;;  %v5356_v43 = vadd.f32 %v7904_v7, %v5316_v44  ;;  %v9217_v38 = vld [vmem:[%s14738_s1 + $0x600] sm:$0xff]  }
 0x59c   : > { %8185 = vmatprep.subr.bf16.mxu1 %v9189_v5  ;;  %8166 = vmatpush3.bf16.msra.mxu0 %v9190_v4  ;;  %v7906_v11 = vpop.f32.mrf.mxu1  ;;  %v680_v24 = vrot.slane %v6085_v41, 1 }
 0x59d   : > { %8167 = vmatprep.subr.bf16.mxu0 %v9191_v21 }
 0x59f   : > { %8186 = vmatpush3.bf16.msra.mxu1 %v9192_v19 }
 0x5a0   : > { %8187 = vmatprep.subr.bf16.mxu1 %v9193_v46  ;;  %8168 = vmatpush3.bf16.msra.mxu0 %v9194_v10  ;;  %v9218_v10 = vld [vmem:[%s14739_s2] ss:$0 sm:$0xff] }
 0x5a1   : > { %8169 = vmatprep.subr.bf16.mxu0 %v9195_v20 }
 0x5a3   : > { %8188 = vmatpush3.bf16.msra.mxu1 %v9196_v32 }
 0x5a4   : > { %8189 = vmatprep.subr.bf16.mxu1 %v9197_v61  ;;  %8170 = vmatpush3.bf16.msra.mxu0 %v9198_v9 }
 0x5a5   : > { %8171 = vmatprep.subr.bf16.mxu0 %v9199_v51 }
 0x5a7   : > { %8190 = vmatpush3.bf16.msra.mxu1 %v9200_v36 }
 0x5a8   : > { %8191 = vmatprep.subr.bf16.mxu1 %v9201_v42  ;;  %8172 = vmatpush3.bf16.msra.mxu0 %v9202_v33 }
 0x5a9   : > { %8173 = vmatprep.subr.bf16.mxu0 %v9203_v55 }
 0x5ab   : > { %8192 = vmatpush3.bf16.msra.mxu1 %v9204_v63 }
 0x5ac   : > { %8193 = vmatprep.subr.bf16.mxu1 %v9205_v22  ;;  %8174 = vmatpush3.bf16.msra.mxu0 %v9206_v29 }
 0x5ad   : > { %8332 = vmatprep.subr.bf16.mxu0 %v15178_v40 }
 0x5af   : > { %8194 = vmatpush3.bf16.msra.mxu1 %v9207_v58  ;;  %v7924_v47 = vpop.f32.mrf.mxu0  ;;  %5880 = vmatmul.mubr.bf16.vlgmr.msra.gmra.mxu0 %v14636_v15 }
 0x5b0   : > { %8195 = vmatprep.subr.bf16.mxu1 %v9208_v49  ;;  %8333 = vmatpush3.bf16.msra.mxu0 %v9209_v13 }
 0x5b1   : > { %v7925_v45 = vpop.f32.mrf.mxu0  ;;  %8334 = vmatprep.subr.bf16.mxu0 %v15178_v40  ;;  %8348 = vmatprep.mubr.msk.bf16.mxu0 %vm9228_vm0, %v15178_v40 }
 0x5b2   : > { %v7926_v60 = vadd.f32 %v7925_v45, %v7924_v47 }
 0x5b3   : > { %8196 = vmatpush3.bf16.msra.mxu1 %v9210_v1  ;;  %v7927_v17 = vpop.f32.mrf.mxu0 }
 0x5b4   : > { %8335 = vmatpush3.bf16.msra.mxu0 %v9211_v59  ;;  %v5396_v27 = vadd.f32 %v7926_v60, %v5356_v43 }
 0x5b5   : > { %v7928_v56 = vpop.f32.mrf.mxu0  ;;  %8336 = vmatprep.subr.bf16.mxu0 %v15178_v40 }
 0x5b6   : > { %5920 = vmatmul.mubr.bf16.vlgmr.msra.gmra.mxu1 %v664_v54  ;;  %v5435_v62 = vpop.f32.mrf.mxu1 }
 0x5b7   : > { %v5436_v26 = vadd.f32 %v5435_v62, %v5396_v27 }
 0x5b8   : > { %8337 = vmatpush3.bf16.msra.mxu0 %v9212_v30  ;;  %v8330_v31 = vpop.f32.mrf.mxu1 }
 0x5b9   : > { %v5441_v53 = vmax.f32 %v5436_v26, 0.0  ;;  %8338 = vmatprep.subr.bf16.mxu0 %v15178_v40 }
 0x5ba   : > { %v5438_v25 = vpop.f32.mrf.mxu1 }
 0x5bb   : > { %v5442_v50 = vpack.c.bf16 %v5441_v53, %v5441_v53 }
 0x5bc   : > { %8339 = vmatpush3.bf16.msra.mxu0 %v9213_v52  ;;  %v8331_v23 = vpop.f32.mrf.mxu1 }
 0x5bd   : > { %v5445_v2 = vsel %vm11143_vm3, %v5442_v50, %v6295_v3  ;;  %8340 = vmatprep.subr.bf16.mxu0 %v15178_v40 }
 0x5be   : > { %6296 = vst [vmem:[%s11135_s24 + $0x14] sm:$0xf] %v5445_v2 }
 0x5c0   : > { %8341 = vmatpush3.bf16.msra.mxu0 %v9214_v28 }
 0x5c1   : > { %8342 = vmatprep.subr.bf16.mxu0 %v15178_v40 }
 0x5c4   : > { %8343 = vmatpush3.bf16.msra.mxu0 %v9215_v0 }
 0x5c5   : > { %8344 = vmatprep.subr.bf16.mxu0 %v15178_v40 }
 0x5c8   : > { %8345 = vmatpush3.bf16.msra.mxu0 %v9216_v39 }
 0x5c9   : > { %8346 = vmatprep.subr.bf16.mxu0 %v15178_v40 }
 0x5cc   : > { %8347 = vmatpush3.bf16.msra.mxu0 %v9217_v38 }
 0x5cf   : > { %v7955_v5 = vpop.f32.mrf.mxu0  ;;  %8349 = vmatmul.mubr.bf16.vlgmr.msra.gmra.mxu0 %v680_v24 }
 0x5d1   : > { %v7956_v4 = vpop.f32.mrf.mxu0 }
 0x5d2   : > { %v7957_v11 = vadd.f32 %v7956_v4, %v7955_v5 }
 0x5d3   : > { %v7958_v21 = vpop.f32.mrf.mxu0 }
 0x5d4   : > { %v5482_v20 = vadd.f32 %v9218_v10, %v7957_v11 }
 0x5d5   : > { %v7959_v19 = vpop.f32.mrf.mxu0 }
 0x5d6   : > { %v7977_v46 = vpop.f32.mrf.mxu1 }
 0x5d8   : > { %v7978_v32 = vpop.f32.mrf.mxu1 }
 0x5d9   : > { %v7979_v40 = vadd.f32 %v7978_v32, %v7977_v46 }
 0x5da   : > { %v7980_v15 = vpop.f32.mrf.mxu1 }
 0x5db   : > { %v5522_v8 = vadd.f32 %v7979_v40, %v5482_v20 }
 0x5dc   : > { %v7981_v61 = vpop.f32.mrf.mxu1 }
 0x5ef   : > { %v7999_v9 = vpop.f32.mrf.mxu0 }
 0x5f1   : > { %v8000_v51 = vpop.f32.mrf.mxu0 }
 0x5f2   : > { %v8001_v6 = vadd.f32 %v8000_v51, %v7999_v9  ;;  %v6297_v51 = vld [vmem:[%s11135_s24 + $0x18] sm:$0xf] }
 0x5f3   : > { %v8002_v36 = vpop.f32.mrf.mxu0 }
 0x5f4   : > { %v5562_v14 = vadd.f32 %v8001_v6, %v5522_v8 }
 0x5f5   : > { %v8003_v35 = vpop.f32.mrf.mxu0 }
 0x5f6   : > { %v8021_v42 = vpop.f32.mrf.mxu1 }
 0x5f8   : > { %v8022_v33 = vpop.f32.mrf.mxu1 }
 0x5f9   : > { %v8023_v55 = vadd.f32 %v8022_v33, %v8021_v42 }
 0x5fa   : > { %v8024_v34 = vpop.f32.mrf.mxu1 }
 0x5fb   : > { %v5602_v18 = vadd.f32 %v8023_v55, %v5562_v14 }
 0x5fc   : > { %v8025_v63 = vpop.f32.mrf.mxu1 }
 0x60f   : > { %v8043_v12 = vpop.f32.mrf.mxu0 }
 0x611   : > { %v8044_v22 = vpop.f32.mrf.mxu0 }
 0x612   : > { %v8045_v29 = vadd.f32 %v8044_v22, %v8043_v12 }
 0x613   : > { %v8046_v44 = vpop.f32.mrf.mxu0 }
 0x614   : > { %v5642_v7 = vadd.f32 %v8045_v29, %v5602_v18 }
 0x615   : > { %v8047_v57 = vpop.f32.mrf.mxu0 }
 0x616   : > { %v8065_v48 = vpop.f32.mrf.mxu1 }
 0x618   : > { %v8066_v58 = vpop.f32.mrf.mxu1 }
 0x619   : > { %v8067_v47 = vadd.f32 %v8066_v58, %v8065_v48 }
 0x61a   : > { %v8068_v49 = vpop.f32.mrf.mxu1 }
 0x61b   : > { %v5682_v13 = vadd.f32 %v8067_v47, %v5642_v7 }
 0x61c   : > { %v8069_v45 = vpop.f32.mrf.mxu1 }
 0x62f   : > { %v8087_v43 = vpop.f32.mrf.mxu0 }
 0x631   : > { %v8088_v60 = vpop.f32.mrf.mxu0 }
 0x632   : > { %v8089_v54 = vadd.f32 %v8088_v60, %v8087_v43 }
 0x633   : > { %v8090_v1 = vpop.f32.mrf.mxu0 }
 0x634   : > { %v5722_v17 = vadd.f32 %v8089_v54, %v5682_v13 }
 0x635   : > { %v8091_v59 = vpop.f32.mrf.mxu0 }
 0x636   : > { %v8109_v27 = vpop.f32.mrf.mxu1 }
 0x638   : > { %v8110_v56 = vpop.f32.mrf.mxu1 }
 0x639   : > { %v8111_v62 = vadd.f32 %v8110_v56, %v8109_v27 }
 0x63a   : > { %v8112_v26 = vpop.f32.mrf.mxu1 }
 0x63b   : > { %v5762_v30 = vadd.f32 %v8111_v62, %v5722_v17 }
 0x63c   : > { %v8113_v31 = vpop.f32.mrf.mxu1 }
 0x64f   : > { %v8131_v53 = vpop.f32.mrf.mxu0 }
 0x651   : > { %v8132_v3 = vpop.f32.mrf.mxu0 }
 0x652   : > { %v8133_v11 = vadd.f32 %v8132_v3, %v8131_v53 }
 0x653   : > { %v8134_v25 = vpop.f32.mrf.mxu0 }
 0x654   : > { %v5802_v21 = vadd.f32 %v8133_v11, %v5762_v30 }
 0x655   : > { %v8135_v50 = vpop.f32.mrf.mxu0 }
 0x656   : > { %v8153_v52 = vpop.f32.mrf.mxu1 }
 0x658   : > { %v8154_v23 = vpop.f32.mrf.mxu1 }
 0x659   : > { %v8155_v19 = vadd.f32 %v8154_v23, %v8153_v52 }
 0x65a   : > { %v8156_v2 = vpop.f32.mrf.mxu1 }
 0x65b   : > { %v5842_v10 = vadd.f32 %v8155_v19, %v5802_v21 }
 0x65c   : > { %v8157_v28 = vpop.f32.mrf.mxu1 }
 0x66f   : > { %v8175_v16 = vpop.f32.mrf.mxu0 }
 0x671   : > { %v8176_v0 = vpop.f32.mrf.mxu0 }
 0x672   : > { %v8177_v46 = vadd.f32 %v8176_v0, %v8175_v16 }
 0x673   : > { %v8178_v41 = vpop.f32.mrf.mxu0 }
 0x674   : > { %v5882_v20 = vadd.f32 %v8177_v46, %v5842_v10 }
 0x675   : > { %v8179_v39 = vpop.f32.mrf.mxu0 }
 0x676   : > { %v8197_v24 = vpop.f32.mrf.mxu1 }
 0x678   : > { %v8198_v38 = vpop.f32.mrf.mxu1 }
 0x679   : > { %v8199_v32 = vadd.f32 %v8198_v38, %v8197_v24 }
 0x67a   : > { %v8200_v5 = vpop.f32.mrf.mxu1 }
 0x67b   : > { %v5922_v40 = vadd.f32 %v8199_v32, %v5882_v20 }
 0x67c   : > { %v8201_v4 = vpop.f32.mrf.mxu1 }
 0x68f   : > { %v5961_v15 = vpop.f32.mrf.mxu0 }
 0x690   : > { %v5962_v8 = vadd.f32 %v5961_v15, %v5922_v40 }
 0x691   : > { %v8350_v61 = vpop.f32.mrf.mxu0 }
 0x692   : > { %v5967_v9 = vmax.f32 %v5962_v8, 0.0 }
 0x693   : > { %v5964_v6 = vpop.f32.mrf.mxu0 }
 0x694   : > { %v5968_v36 = vpack.c.bf16 %v5967_v9, %v5967_v9 }
 0x695   : > { %v8351_v14 = vpop.f32.mrf.mxu0 }
 0x696   : > { %v5971_v35 = vsel %vm11143_vm3, %v5968_v36, %v6297_v51 }
 0x697   : > { %6298 = vst [vmem:[%s11135_s24 + $0x18] sm:$0xf] %v5971_v35 }
 0x698 PF: > { %s13_s12 = sadd.s32 1, %s9225_s12  }
 0x699   : > { %p10_p4 = scmp.ge.s32.totalorder %s13_s12, 4  }
 0x69b   :  { %12 = sbr.rel (!%p10_p4) target bundleno = 1 (0x1), region = 68 }

</bundles_post_ra>
